<compile_context>
chip_gen: v5e
topology: v5e:2x2
jax: 0.10.0
libtpu: 0.0.40
codegen_flags: <defaults>
</compile_context>

<pallas_src>
import jax
import jax.numpy as jnp
from jax.experimental import pallas as pl
from jax.experimental.pallas import tpu as pltpu


GATE_PAD = 128  # per-gate lane width: one full vreg lane dimension


def autoencoder_kernel(x_ref,                                 # (S, F) time series
                       wih1e_ref, whh1e_ref, b1e_ref,          # enc rnn1
                       wih2e_ref, whh2e_ref, b2e_ref,          # enc rnn2
                       wih1d_ref, whh1d_ref, b1d_ref,          # dec rnn1
                       wih2d_ref, whh2d_ref, b2d_ref,          # dec rnn2
                       wout_ref, bout_ref,                     # (GP,F) (1,F)
                       out_ref):                               # (S, F)
    S = x_ref.shape[0]
    GP = whh1e_ref.shape[0]          # padded per-gate width (== GATE_PAD)

    def sigmoid(z):
        # exact, single EUP tanh per call (no approx reciprocal on the chain)
        return 0.5 * jnp.tanh(0.5 * z) + 0.5

    def lstm_cell(h, c, pre_t, whh_bf16):
        # one (1,GP) x (GP,4GP) bf16 MXU matmul on the serial path per step;
        # accumulate in f32, gate math stays f32 (VPU/EUP).
        g = jnp.dot(h.astype(jnp.bfloat16), whh_bf16,
                    preferred_element_type=jnp.float32) + pre_t
        i_f = sigmoid(g[:, 0 * GP:2 * GP])        # i,f gates (2 full vregs)
        g_g = jnp.tanh(g[:, 2 * GP:3 * GP])       # g gate   (1 full vreg)
        o_g = sigmoid(g[:, 3 * GP:4 * GP])        # o gate   (1 full vreg)
        c_new = i_f[:, GP:2 * GP] * c + i_f[:, 0:GP] * g_g
        h_new = o_g * jnp.tanh(c_new)
        return h_new, c_new

    zeros = jnp.zeros((1, GP), jnp.float32)

    def run_lstm_pre(pre_rows, whh_bf16):
        """Serial LSTM; per-step input term pre_rows[t] already available."""
        h, c = zeros, zeros
        hs = []
        for t in range(S):                        # fully unrolled, one BB
            h, c = lstm_cell(h, c, pre_rows[t], whh_bf16)
            hs.append(h)
        return hs, h

    def run_lstm_fused(h_in, wih_bf16, whh_bf16, b):
        """Serial LSTM whose input projection is fused per step: step t depends
        only on the previous layer's step t, so this layer's matmul chain can
        overlap the producing layer's chain (registers only, no VMEM trip)."""
        h, c = zeros, zeros
        hs = []
        for t in range(S):
            pre_t = jnp.dot(h_in[t].astype(jnp.bfloat16), wih_bf16,
                            preferred_element_type=jnp.float32) + b
            h, c = lstm_cell(h, c, pre_t, whh_bf16)
            hs.append(h)
        return hs, h

    # ------------------------- Encoder -------------------------
    # rnn1 (n_features -> 2E): input term for ALL timesteps in one shot.
    if x_ref.shape[1] == 1:
        # n_features == 1: (S,1)x(1,4GP) is an outer product -> exact f32 VPU.
        pre1 = x_ref[...] * wih1e_ref[...]
    else:
        pre1 = jnp.dot(x_ref[...].astype(jnp.bfloat16),
                       wih1e_ref[...].astype(jnp.bfloat16),
                       preferred_element_type=jnp.float32)
    pre1 = pre1 + b1e_ref[...]                                  # (S, 4*GP)
    pre1_rows = [pre1[t:t + 1, :] for t in range(S)]
    h1e, _ = run_lstm_pre(pre1_rows, whh1e_ref[...])

    # rnn2 (2E -> E): only the final hidden (the latent) is needed, but the
    # per-step fused projection lets its chain overlap rnn1's chain.
    _, latent = run_lstm_fused(h1e, wih2e_ref[...], whh2e_ref[...], b2e_ref[...])

    # ------------------------- Decoder -------------------------
    # rnn1 (E -> E): input is the SAME repeated latent every step, so its
    # projection is a single time-invariant (1, 4*GP) row.
    pre_d1 = (jnp.dot(latent.astype(jnp.bfloat16), wih1d_ref[...],
                      preferred_element_type=jnp.float32) + b1d_ref[...])
    h1d, _ = run_lstm_pre([pre_d1] * S, whh1d_ref[...])

    # rnn2 (E -> 2E), fused per-step projection (overlaps decoder rnn1).
    h2d, _ = run_lstm_fused(h1d, wih2d_ref[...], whh2d_ref[...], b2d_ref[...])

    # output Linear (2E -> n_features) over the whole sequence at once.
    # (F=1 -> masked partial store; negligible, make lane-dense if F grows.)
    h2d_seq = jnp.concatenate(h2d, axis=0)                      # (S, GP)
    out_ref[...] = (jnp.dot(h2d_seq, wout_ref[...],
                            preferred_element_type=jnp.float32) + bout_ref[...])


# -------------------------- host-side parameter prep --------------------------

def _pad_gate_weight(w, hid, in_dim, in_pad, gp):
    """PyTorch (4*hid, in_dim) gate-major (i,f,g,o) -> kernel (in_pad, 4*gp)
    with each gate block zero-padded to a full gp-lane slot."""
    w4 = jnp.pad(w.reshape(4, hid, in_dim),
                 ((0, 0), (0, gp - hid), (0, in_pad - in_dim)))
    return jnp.transpose(w4, (2, 0, 1)).reshape(in_pad, 4 * gp)


def _pad_gate_bias(b, hid, gp):
    return jnp.pad(b.reshape(4, hid), ((0, 0), (0, gp - hid))).reshape(1, 4 * gp)


def make_params(key, seq_len, n_features, embedding_dim):
    """PyTorch-style uniform(-1/sqrt(hidden), 1/sqrt(hidden)) init."""
    E = embedding_dim
    HE = 2 * E           # encoder rnn1 hidden / decoder rnn2 hidden
    D = E                # decoder rnn1 hidden
    H = 2 * D
    F = n_features
    ks = jax.random.split(key, 18)

    def u(k, shape, fan):
        lim = 1.0 / jnp.sqrt(jnp.float32(fan))
        return jax.random.uniform(k, shape, jnp.float32, -lim, lim)

    return {
        # Encoder rnn1: LSTM(n_features -> 2E), PyTorch gate order (i, f, g, o)
        "e1_w_ih": u(ks[0], (4 * HE, F), HE),
        "e1_w_hh": u(ks[1], (4 * HE, HE), HE),
        "e1_b_ih": u(ks[2], (4 * HE,), HE),
        "e1_b_hh": u(ks[3], (4 * HE,), HE),
        # Encoder rnn2: LSTM(2E -> E)
        "e2_w_ih": u(ks[4], (4 * E, HE), E),
        "e2_w_hh": u(ks[5], (4 * E, E), E),
        "e2_b_ih": u(ks[6], (4 * E,), E),
        "e2_b_hh": u(ks[7], (4 * E,), E),
        # Decoder rnn1: LSTM(E -> E)
        "d1_w_ih": u(ks[8], (4 * D, D), D),
        "d1_w_hh": u(ks[9], (4 * D, D), D),
        "d1_b_ih": u(ks[10], (4 * D,), D),
        "d1_b_hh": u(ks[11], (4 * D,), D),
        # Decoder rnn2: LSTM(E -> 2E)
        "d2_w_ih": u(ks[12], (4 * H, D), H),
        "d2_w_hh": u(ks[13], (4 * H, H), H),
        "d2_b_ih": u(ks[14], (4 * H,), H),
        "d2_b_hh": u(ks[15], (4 * H,), H),
        # output Linear(2E -> n_features)
        "w_out": u(ks[16], (F, H), H),
        "b_out": u(ks[17], (F,), H),
    }


def recurrent_autoencoder_forward(x, params, seq_len, n_features, embedding_dim):
    E = embedding_dim
    HE = 2 * E
    D = E
    H = 2 * D
    F = n_features
    GP = GATE_PAD
    assert max(HE, E, D, H) <= GP, "hidden sizes must fit one padded gate vreg"

    x_in = x.reshape(seq_len, n_features).astype(jnp.float32)

    def prep(wi, wh, bi, bh, hid, in_dim, in_pad, wih_dtype):
        # Pad each gate block to a full 128-lane slot, pre-transpose so the
        # kernel right-multiplies (row @ W), fold the two biases, and cast the
        # matmul operands to bf16 once here (f32 accumulate stays in-kernel).
        wih = _pad_gate_weight(wi, hid, in_dim, in_pad, GP).astype(wih_dtype)
        whh = _pad_gate_weight(wh, hid, hid, GP, GP).astype(jnp.bfloat16)
        b = _pad_gate_bias(bi + bh, hid, GP)            # f32, added post-matmul
        return wih, whh, b

    # encoder rnn1 keeps its (F, 4*GP) input weights in f32: with F==1 the
    # input term is an exact VPU outer product, not an MXU matmul.
    wih1e, whh1e, b1e = prep(params["e1_w_ih"], params["e1_w_hh"],
                             params["e1_b_ih"], params["e1_b_hh"],
                             HE, F, F, jnp.float32)
    wih2e, whh2e, b2e = prep(params["e2_w_ih"], params["e2_w_hh"],
                             params["e2_b_ih"], params["e2_b_hh"],
                             E, HE, GP, jnp.bfloat16)
    wih1d, whh1d, b1d = prep(params["d1_w_ih"], params["d1_w_hh"],
                             params["d1_b_ih"], params["d1_b_hh"],
                             D, D, GP, jnp.bfloat16)
    wih2d, whh2d, b2d = prep(params["d2_w_ih"], params["d2_w_hh"],
                             params["d2_b_ih"], params["d2_b_hh"],
                             H, D, GP, jnp.bfloat16)
    # output Linear: keep f32 (single matmul off the recurrent chain).
    wout = jnp.pad(params["w_out"].T.astype(jnp.float32), ((0, GP - H), (0, 0)))
    bout = params["b_out"].reshape(1, F).astype(jnp.float32)

    vmem = pl.BlockSpec(memory_space=pltpu.MemorySpace.VMEM)
    out = pl.pallas_call(
        autoencoder_kernel,
        out_shape=jax.ShapeDtypeStruct((seq_len, F), jnp.float32),
        in_specs=[vmem] * 15,
        out_specs=vmem,
    )(x_in, wih1e, whh1e, b1e, wih2e, whh2e, b2e,
      wih1d, whh1d, b1d, wih2d, whh2d, b2d, wout, bout)
    return out


def recurrent_autoencoder_reference(x, params, seq_len, n_features, embedding_dim):
    """Pure-JAX (f32) mirror of the PyTorch RecurrentAutoencoder forward."""
    E = embedding_dim
    HE = 2 * E
    D = E
    H = 2 * D

    def lstm(xs, w_ih, w_hh, b_ih, b_hh, hid):
        h = jnp.zeros((hid,), jnp.float32)
        c = jnp.zeros((hid,), jnp.float32)
        outs = []
        for t in range(xs.shape[0]):
            g = xs[t] @ w_ih.T + b_ih + h @ w_hh.T + b_hh
            i = jax.nn.sigmoid(g[0 * hid:1 * hid])
            f = jax.nn.sigmoid(g[1 * hid:2 * hid])
            gg = jnp.tanh(g[2 * hid:3 * hid])
            o = jax.nn.sigmoid(g[3 * hid:4 * hid])
            c = f * c + i * gg
            h = o * jnp.tanh(c)
            outs.append(h)
        return jnp.stack(outs, axis=0), h

    # Encoder
    xs = x.reshape(seq_len, n_features)
    y1, _ = lstm(xs, params["e1_w_ih"], params["e1_w_hh"],
                 params["e1_b_ih"], params["e1_b_hh"], HE)
    _, h_n = lstm(y1, params["e2_w_ih"], params["e2_w_hh"],
                  params["e2_b_ih"], params["e2_b_hh"], E)
    latent = h_n.reshape(n_features, E)

    # Decoder (x.repeat(seq_len, n_features).reshape(n_features, seq_len, D))
    xd = jnp.tile(latent, (seq_len, n_features)).reshape(n_features, seq_len, D)[0]
    z1, _ = lstm(xd, params["d1_w_ih"], params["d1_w_hh"],
                 params["d1_b_ih"], params["d1_b_hh"], D)
    z2, _ = lstm(z1, params["d2_w_ih"], params["d2_w_hh"],
                 params["d2_b_ih"], params["d2_b_hh"], H)
    return z2 @ params["w_out"].T + params["b_out"]


if __name__ == "__main__":
    seq_len, n_features, embedding_dim = 8, 1, 32

    key = jax.random.PRNGKey(0)
    k_param, k_x = jax.random.split(key)
    params = make_params(k_param, seq_len, n_features, embedding_dim)

    # Time-series input consumed by RecurrentAutoencoder.forward.
    x = jax.random.normal(k_x, (seq_len, n_features), jnp.float32)

    out = recurrent_autoencoder_forward(x, params, seq_len, n_features, embedding_dim)
    out = jax.block_until_ready(out)

    ref = recurrent_autoencoder_reference(x, params, seq_len, n_features, embedding_dim)
    assert out.shape == (seq_len, n_features)
    # bf16 MXU operands on the recurrent / input-projection matmuls introduce
    # ~1e-3-level rounding that compounds through 8 steps x 4 layers; the gate
    # math itself is exact f32 (tanh-based sigmoid, no approx reciprocal).
    assert jnp.allclose(out, ref, atol=1e-2, rtol=1e-2), (out, ref)

    print("KERNEL_OK")
</pallas_src>

<mosaic_0001>
module attributes {stable_mosaic.version = 11 : i64} {
  func.func @autoencoder_kernel(%arg0: memref<8x1xf32, #tpu.memory_space<vmem>>, %arg1: memref<1x512xf32, #tpu.memory_space<vmem>>, %arg2: memref<128x512xbf16, #tpu.memory_space<vmem>>, %arg3: memref<1x512xf32, #tpu.memory_space<vmem>>, %arg4: memref<128x512xbf16, #tpu.memory_space<vmem>>, %arg5: memref<128x512xbf16, #tpu.memory_space<vmem>>, %arg6: memref<1x512xf32, #tpu.memory_space<vmem>>, %arg7: memref<128x512xbf16, #tpu.memory_space<vmem>>, %arg8: memref<128x512xbf16, #tpu.memory_space<vmem>>, %arg9: memref<1x512xf32, #tpu.memory_space<vmem>>, %arg10: memref<128x512xbf16, #tpu.memory_space<vmem>>, %arg11: memref<128x512xbf16, #tpu.memory_space<vmem>>, %arg12: memref<1x512xf32, #tpu.memory_space<vmem>>, %arg13: memref<128x1xf32, #tpu.memory_space<vmem>>, %arg14: memref<1x1xf32, #tpu.memory_space<vmem>>, %arg15: memref<8x1xf32, #tpu.memory_space<vmem>>) attributes {dimension_semantics = [], scalar_prefetch = 0 : i64, scratch_operands = 0 : i64, tpu.core_type = #tpu.core_type<tc>} {
    %cst = arith.constant 0.000000e+00 : f32
    %0 = vector.broadcast %cst : f32 to vector<1x128xf32>
    %c0 = arith.constant 0 : index
    %c0_0 = arith.constant 0 : index
    %1 = vector.load %arg0[%c0, %c0_0] : memref<8x1xf32, #tpu.memory_space<vmem>>, vector<8x1xf32>
    %c0_1 = arith.constant 0 : index
    %c0_2 = arith.constant 0 : index
    %2 = vector.load %arg1[%c0_1, %c0_2] : memref<1x512xf32, #tpu.memory_space<vmem>>, vector<1x512xf32>
    %3 = vector.broadcast %1 : vector<8x1xf32> to vector<8x512xf32>
    %4 = vector.broadcast %2 : vector<1x512xf32> to vector<8x512xf32>
    %5 = arith.mulf %3, %4 : vector<8x512xf32>
    %c0_3 = arith.constant 0 : index
    %c0_4 = arith.constant 0 : index
    %6 = vector.load %arg3[%c0_3, %c0_4] : memref<1x512xf32, #tpu.memory_space<vmem>>, vector<1x512xf32>
    %7 = vector.broadcast %6 : vector<1x512xf32> to vector<8x512xf32>
    %8 = arith.addf %5, %7 : vector<8x512xf32>
    %9 = vector.extract_strided_slice %8 {offsets = [0, 0], sizes = [1, 512], strides = [1, 1]} : vector<8x512xf32> to vector<1x512xf32>
    %10 = vector.extract_strided_slice %8 {offsets = [1, 0], sizes = [1, 512], strides = [1, 1]} : vector<8x512xf32> to vector<1x512xf32>
    %11 = vector.extract_strided_slice %8 {offsets = [2, 0], sizes = [1, 512], strides = [1, 1]} : vector<8x512xf32> to vector<1x512xf32>
    %12 = vector.extract_strided_slice %8 {offsets = [3, 0], sizes = [1, 512], strides = [1, 1]} : vector<8x512xf32> to vector<1x512xf32>
    %13 = vector.extract_strided_slice %8 {offsets = [4, 0], sizes = [1, 512], strides = [1, 1]} : vector<8x512xf32> to vector<1x512xf32>
    %14 = vector.extract_strided_slice %8 {offsets = [5, 0], sizes = [1, 512], strides = [1, 1]} : vector<8x512xf32> to vector<1x512xf32>
    %15 = vector.extract_strided_slice %8 {offsets = [6, 0], sizes = [1, 512], strides = [1, 1]} : vector<8x512xf32> to vector<1x512xf32>
    %16 = vector.extract_strided_slice %8 {offsets = [7, 0], sizes = [1, 512], strides = [1, 1]} : vector<8x512xf32> to vector<1x512xf32>
    %c0_5 = arith.constant 0 : index
    %c0_6 = arith.constant 0 : index
    %17 = vector.load %arg2[%c0_5, %c0_6] : memref<128x512xbf16, #tpu.memory_space<vmem>>, vector<128x512xbf16>
    %18 = arith.truncf %0 : vector<1x128xf32> to vector<1x128xbf16>
    %cst_7 = arith.constant dense<0.000000e+00> : vector<1x512xf32>
    %19 = tpu.matmul %18, %17, %cst_7 {dimension_numbers = #tpu.dot_dimension_numbers<[1], [0], [0], [1], [0, 0, 1, 1], [], []>} : vector<1x128xbf16>, vector<128x512xbf16>, vector<1x512xf32> -> vector<1x512xf32>
    %20 = arith.addf %19, %9 : vector<1x512xf32>
    %21 = vector.extract_strided_slice %20 {offsets = [0, 0], sizes = [1, 256], strides = [1, 1]} : vector<1x512xf32> to vector<1x256xf32>
    %cst_8 = arith.constant 5.000000e-01 : f32
    %22 = vector.broadcast %cst_8 : f32 to vector<1x256xf32>
    %23 = arith.mulf %22, %21 : vector<1x256xf32>
    %24 = math.tanh %23 : vector<1x256xf32>
    %cst_9 = arith.constant 5.000000e-01 : f32
    %25 = vector.broadcast %cst_9 : f32 to vector<1x256xf32>
    %26 = arith.mulf %25, %24 : vector<1x256xf32>
    %cst_10 = arith.constant 5.000000e-01 : f32
    %27 = vector.broadcast %cst_10 : f32 to vector<1x256xf32>
    %28 = arith.addf %26, %27 : vector<1x256xf32>
    %29 = vector.extract_strided_slice %20 {offsets = [0, 256], sizes = [1, 128], strides = [1, 1]} : vector<1x512xf32> to vector<1x128xf32>
    %30 = math.tanh %29 : vector<1x128xf32>
    %31 = vector.extract_strided_slice %20 {offsets = [0, 384], sizes = [1, 128], strides = [1, 1]} : vector<1x512xf32> to vector<1x128xf32>
    %cst_11 = arith.constant 5.000000e-01 : f32
    %32 = vector.broadcast %cst_11 : f32 to vector<1x128xf32>
    %33 = arith.mulf %32, %31 : vector<1x128xf32>
    %34 = math.tanh %33 : vector<1x128xf32>
    %cst_12 = arith.constant 5.000000e-01 : f32
    %35 = vector.broadcast %cst_12 : f32 to vector<1x128xf32>
    %36 = arith.mulf %35, %34 : vector<1x128xf32>
    %cst_13 = arith.constant 5.000000e-01 : f32
    %37 = vector.broadcast %cst_13 : f32 to vector<1x128xf32>
    %38 = arith.addf %36, %37 : vector<1x128xf32>
    %39 = vector.extract_strided_slice %28 {offsets = [0, 128], sizes = [1, 128], strides = [1, 1]} : vector<1x256xf32> to vector<1x128xf32>
    %40 = arith.mulf %39, %0 : vector<1x128xf32>
    %41 = vector.extract_strided_slice %28 {offsets = [0, 0], sizes = [1, 128], strides = [1, 1]} : vector<1x256xf32> to vector<1x128xf32>
    %42 = arith.mulf %41, %30 : vector<1x128xf32>
    %43 = arith.addf %40, %42 : vector<1x128xf32>
    %44 = math.tanh %43 : vector<1x128xf32>
    %45 = arith.mulf %38, %44 : vector<1x128xf32>
    %46 = arith.truncf %45 : vector<1x128xf32> to vector<1x128xbf16>
    %cst_14 = arith.constant dense<0.000000e+00> : vector<1x512xf32>
    %47 = tpu.matmul %46, %17, %cst_14 {dimension_numbers = #tpu.dot_dimension_numbers<[1], [0], [0], [1], [0, 0, 1, 1], [], []>} : vector<1x128xbf16>, vector<128x512xbf16>, vector<1x512xf32> -> vector<1x512xf32>
    %48 = arith.addf %47, %10 : vector<1x512xf32>
    %49 = vector.extract_strided_slice %48 {offsets = [0, 0], sizes = [1, 256], strides = [1, 1]} : vector<1x512xf32> to vector<1x256xf32>
    %cst_15 = arith.constant 5.000000e-01 : f32
    %50 = vector.broadcast %cst_15 : f32 to vector<1x256xf32>
    %51 = arith.mulf %50, %49 : vector<1x256xf32>
    %52 = math.tanh %51 : vector<1x256xf32>
    %cst_16 = arith.constant 5.000000e-01 : f32
    %53 = vector.broadcast %cst_16 : f32 to vector<1x256xf32>
    %54 = arith.mulf %53, %52 : vector<1x256xf32>
    %cst_17 = arith.constant 5.000000e-01 : f32
    %55 = vector.broadcast %cst_17 : f32 to vector<1x256xf32>
    %56 = arith.addf %54, %55 : vector<1x256xf32>
    %57 = vector.extract_strided_slice %48 {offsets = [0, 256], sizes = [1, 128], strides = [1, 1]} : vector<1x512xf32> to vector<1x128xf32>
    %58 = math.tanh %57 : vector<1x128xf32>
    %59 = vector.extract_strided_slice %48 {offsets = [0, 384], sizes = [1, 128], strides = [1, 1]} : vector<1x512xf32> to vector<1x128xf32>
    %cst_18 = arith.constant 5.000000e-01 : f32
    %60 = vector.broadcast %cst_18 : f32 to vector<1x128xf32>
    %61 = arith.mulf %60, %59 : vector<1x128xf32>
    %62 = math.tanh %61 : vector<1x128xf32>
    %cst_19 = arith.constant 5.000000e-01 : f32
    %63 = vector.broadcast %cst_19 : f32 to vector<1x128xf32>
    %64 = arith.mulf %63, %62 : vector<1x128xf32>
    %cst_20 = arith.constant 5.000000e-01 : f32
    %65 = vector.broadcast %cst_20 : f32 to vector<1x128xf32>
    %66 = arith.addf %64, %65 : vector<1x128xf32>
    %67 = vector.extract_strided_slice %56 {offsets = [0, 128], sizes = [1, 128], strides = [1, 1]} : vector<1x256xf32> to vector<1x128xf32>
    %68 = arith.mulf %67, %43 : vector<1x128xf32>
    %69 = vector.extract_strided_slice %56 {offsets = [0, 0], sizes = [1, 128], strides = [1, 1]} : vector<1x256xf32> to vector<1x128xf32>
    %70 = arith.mulf %69, %58 : vector<1x128xf32>
    %71 = arith.addf %68, %70 : vector<1x128xf32>
    %72 = math.tanh %71 : vector<1x128xf32>
    %73 = arith.mulf %66, %72 : vector<1x128xf32>
    %74 = arith.truncf %73 : vector<1x128xf32> to vector<1x128xbf16>
    %cst_21 = arith.constant dense<0.000000e+00> : vector<1x512xf32>
    %75 = tpu.matmul %74, %17, %cst_21 {dimension_numbers = #tpu.dot_dimension_numbers<[1], [0], [0], [1], [0, 0, 1, 1], [], []>} : vector<1x128xbf16>, vector<128x512xbf16>, vector<1x512xf32> -> vector<1x512xf32>
    %76 = arith.addf %75, %11 : vector<1x512xf32>
    %77 = vector.extract_strided_slice %76 {offsets = [0, 0], sizes = [1, 256], strides = [1, 1]} : vector<1x512xf32> to vector<1x256xf32>
    %cst_22 = arith.constant 5.000000e-01 : f32
    %78 = vector.broadcast %cst_22 : f32 to vector<1x256xf32>
    %79 = arith.mulf %78, %77 : vector<1x256xf32>
    %80 = math.tanh %79 : vector<1x256xf32>
    %cst_23 = arith.constant 5.000000e-01 : f32
    %81 = vector.broadcast %cst_23 : f32 to vector<1x256xf32>
    %82 = arith.mulf %81, %80 : vector<1x256xf32>
    %cst_24 = arith.constant 5.000000e-01 : f32
    %83 = vector.broadcast %cst_24 : f32 to vector<1x256xf32>
    %84 = arith.addf %82, %83 : vector<1x256xf32>
    %85 = vector.extract_strided_slice %76 {offsets = [0, 256], sizes = [1, 128], strides = [1, 1]} : vector<1x512xf32> to vector<1x128xf32>
    %86 = math.tanh %85 : vector<1x128xf32>
    %87 = vector.extract_strided_slice %76 {offsets = [0, 384], sizes = [1, 128], strides = [1, 1]} : vector<1x512xf32> to vector<1x128xf32>
    %cst_25 = arith.constant 5.000000e-01 : f32
    %88 = vector.broadcast %cst_25 : f32 to vector<1x128xf32>
    %89 = arith.mulf %88, %87 : vector<1x128xf32>
    %90 = math.tanh %89 : vector<1x128xf32>
    %cst_26 = arith.constant 5.000000e-01 : f32
    %91 = vector.broadcast %cst_26 : f32 to vector<1x128xf32>
    %92 = arith.mulf %91, %90 : vector<1x128xf32>
    %cst_27 = arith.constant 5.000000e-01 : f32
    %93 = vector.broadcast %cst_27 : f32 to vector<1x128xf32>
    %94 = arith.addf %92, %93 : vector<1x128xf32>
    %95 = vector.extract_strided_slice %84 {offsets = [0, 128], sizes = [1, 128], strides = [1, 1]} : vector<1x256xf32> to vector<1x128xf32>
    %96 = arith.mulf %95, %71 : vector<1x128xf32>
    %97 = vector.extract_strided_slice %84 {offsets = [0, 0], sizes = [1, 128], strides = [1, 1]} : vector<1x256xf32> to vector<1x128xf32>
    %98 = arith.mulf %97, %86 : vector<1x128xf32>
    %99 = arith.addf %96, %98 : vector<1x128xf32>
    %100 = math.tanh %99 : vector<1x128xf32>
    %101 = arith.mulf %94, %100 : vector<1x128xf32>
    %102 = arith.truncf %101 : vector<1x128xf32> to vector<1x128xbf16>
    %cst_28 = arith.constant dense<0.000000e+00> : vector<1x512xf32>
    %103 = tpu.matmul %102, %17, %cst_28 {dimension_numbers = #tpu.dot_dimension_numbers<[1], [0], [0], [1], [0, 0, 1, 1], [], []>} : vector<1x128xbf16>, vector<128x512xbf16>, vector<1x512xf32> -> vector<1x512xf32>
    %104 = arith.addf %103, %12 : vector<1x512xf32>
    %105 = vector.extract_strided_slice %104 {offsets = [0, 0], sizes = [1, 256], strides = [1, 1]} : vector<1x512xf32> to vector<1x256xf32>
    %cst_29 = arith.constant 5.000000e-01 : f32
    %106 = vector.broadcast %cst_29 : f32 to vector<1x256xf32>
    %107 = arith.mulf %106, %105 : vector<1x256xf32>
    %108 = math.tanh %107 : vector<1x256xf32>
    %cst_30 = arith.constant 5.000000e-01 : f32
    %109 = vector.broadcast %cst_30 : f32 to vector<1x256xf32>
    %110 = arith.mulf %109, %108 : vector<1x256xf32>
    %cst_31 = arith.constant 5.000000e-01 : f32
    %111 = vector.broadcast %cst_31 : f32 to vector<1x256xf32>
    %112 = arith.addf %110, %111 : vector<1x256xf32>
    %113 = vector.extract_strided_slice %104 {offsets = [0, 256], sizes = [1, 128], strides = [1, 1]} : vector<1x512xf32> to vector<1x128xf32>
    %114 = math.tanh %113 : vector<1x128xf32>
    %115 = vector.extract_strided_slice %104 {offsets = [0, 384], sizes = [1, 128], strides = [1, 1]} : vector<1x512xf32> to vector<1x128xf32>
    %cst_32 = arith.constant 5.000000e-01 : f32
    %116 = vector.broadcast %cst_32 : f32 to vector<1x128xf32>
    %117 = arith.mulf %116, %115 : vector<1x128xf32>
    %118 = math.tanh %117 : vector<1x128xf32>
    %cst_33 = arith.constant 5.000000e-01 : f32
    %119 = vector.broadcast %cst_33 : f32 to vector<1x128xf32>
    %120 = arith.mulf %119, %118 : vector<1x128xf32>
    %cst_34 = arith.constant 5.000000e-01 : f32
    %121 = vector.broadcast %cst_34 : f32 to vector<1x128xf32>
    %122 = arith.addf %120, %121 : vector<1x128xf32>
    %123 = vector.extract_strided_slice %112 {offsets = [0, 128], sizes = [1, 128], strides = [1, 1]} : vector<1x256xf32> to vector<1x128xf32>
    %124 = arith.mulf %123, %99 : vector<1x128xf32>
    %125 = vector.extract_strided_slice %112 {offsets = [0, 0], sizes = [1, 128], strides = [1, 1]} : vector<1x256xf32> to vector<1x128xf32>
    %126 = arith.mulf %125, %114 : vector<1x128xf32>
    %127 = arith.addf %124, %126 : vector<1x128xf32>
    %128 = math.tanh %127 : vector<1x128xf32>
    %129 = arith.mulf %122, %128 : vector<1x128xf32>
    %130 = arith.truncf %129 : vector<1x128xf32> to vector<1x128xbf16>
    %cst_35 = arith.constant dense<0.000000e+00> : vector<1x512xf32>
    %131 = tpu.matmul %130, %17, %cst_35 {dimension_numbers = #tpu.dot_dimension_numbers<[1], [0], [0], [1], [0, 0, 1, 1], [], []>} : vector<1x128xbf16>, vector<128x512xbf16>, vector<1x512xf32> -> vector<1x512xf32>
    %132 = arith.addf %131, %13 : vector<1x512xf32>
    %133 = vector.extract_strided_slice %132 {offsets = [0, 0], sizes = [1, 256], strides = [1, 1]} : vector<1x512xf32> to vector<1x256xf32>
    %cst_36 = arith.constant 5.000000e-01 : f32
    %134 = vector.broadcast %cst_36 : f32 to vector<1x256xf32>
    %135 = arith.mulf %134, %133 : vector<1x256xf32>
    %136 = math.tanh %135 : vector<1x256xf32>
    %cst_37 = arith.constant 5.000000e-01 : f32
    %137 = vector.broadcast %cst_37 : f32 to vector<1x256xf32>
    %138 = arith.mulf %137, %136 : vector<1x256xf32>
    %cst_38 = arith.constant 5.000000e-01 : f32
    %139 = vector.broadcast %cst_38 : f32 to vector<1x256xf32>
    %140 = arith.addf %138, %139 : vector<1x256xf32>
    %141 = vector.extract_strided_slice %132 {offsets = [0, 256], sizes = [1, 128], strides = [1, 1]} : vector<1x512xf32> to vector<1x128xf32>
    %142 = math.tanh %141 : vector<1x128xf32>
    %143 = vector.extract_strided_slice %132 {offsets = [0, 384], sizes = [1, 128], strides = [1, 1]} : vector<1x512xf32> to vector<1x128xf32>
    %cst_39 = arith.constant 5.000000e-01 : f32
    %144 = vector.broadcast %cst_39 : f32 to vector<1x128xf32>
    %145 = arith.mulf %144, %143 : vector<1x128xf32>
    %146 = math.tanh %145 : vector<1x128xf32>
    %cst_40 = arith.constant 5.000000e-01 : f32
    %147 = vector.broadcast %cst_40 : f32 to vector<1x128xf32>
    %148 = arith.mulf %147, %146 : vector<1x128xf32>
    %cst_41 = arith.constant 5.000000e-01 : f32
    %149 = vector.broadcast %cst_41 : f32 to vector<1x128xf32>
    %150 = arith.addf %148, %149 : vector<1x128xf32>
    %151 = vector.extract_strided_slice %140 {offsets = [0, 128], sizes = [1, 128], strides = [1, 1]} : vector<1x256xf32> to vector<1x128xf32>
    %152 = arith.mulf %151, %127 : vector<1x128xf32>
    %153 = vector.extract_strided_slice %140 {offsets = [0, 0], sizes = [1, 128], strides = [1, 1]} : vector<1x256xf32> to vector<1x128xf32>
    %154 = arith.mulf %153, %142 : vector<1x128xf32>
    %155 = arith.addf %152, %154 : vector<1x128xf32>
    %156 = math.tanh %155 : vector<1x128xf32>
    %157 = arith.mulf %150, %156 : vector<1x128xf32>
    %158 = arith.truncf %157 : vector<1x128xf32> to vector<1x128xbf16>
    %cst_42 = arith.constant dense<0.000000e+00> : vector<1x512xf32>
    %159 = tpu.matmul %158, %17, %cst_42 {dimension_numbers = #tpu.dot_dimension_numbers<[1], [0], [0], [1], [0, 0, 1, 1], [], []>} : vector<1x128xbf16>, vector<128x512xbf16>, vector<1x512xf32> -> vector<1x512xf32>
    %160 = arith.addf %159, %14 : vector<1x512xf32>
    %161 = vector.extract_strided_slice %160 {offsets = [0, 0], sizes = [1, 256], strides = [1, 1]} : vector<1x512xf32> to vector<1x256xf32>
    %cst_43 = arith.constant 5.000000e-01 : f32
    %162 = vector.broadcast %cst_43 : f32 to vector<1x256xf32>
    %163 = arith.mulf %162, %161 : vector<1x256xf32>
    %164 = math.tanh %163 : vector<1x256xf32>
    %cst_44 = arith.constant 5.000000e-01 : f32
    %165 = vector.broadcast %cst_44 : f32 to vector<1x256xf32>
    %166 = arith.mulf %165, %164 : vector<1x256xf32>
    %cst_45 = arith.constant 5.000000e-01 : f32
    %167 = vector.broadcast %cst_45 : f32 to vector<1x256xf32>
    %168 = arith.addf %166, %167 : vector<1x256xf32>
    %169 = vector.extract_strided_slice %160 {offsets = [0, 256], sizes = [1, 128], strides = [1, 1]} : vector<1x512xf32> to vector<1x128xf32>
    %170 = math.tanh %169 : vector<1x128xf32>
    %171 = vector.extract_strided_slice %160 {offsets = [0, 384], sizes = [1, 128], strides = [1, 1]} : vector<1x512xf32> to vector<1x128xf32>
    %cst_46 = arith.constant 5.000000e-01 : f32
    %172 = vector.broadcast %cst_46 : f32 to vector<1x128xf32>
    %173 = arith.mulf %172, %171 : vector<1x128xf32>
    %174 = math.tanh %173 : vector<1x128xf32>
    %cst_47 = arith.constant 5.000000e-01 : f32
    %175 = vector.broadcast %cst_47 : f32 to vector<1x128xf32>
    %176 = arith.mulf %175, %174 : vector<1x128xf32>
    %cst_48 = arith.constant 5.000000e-01 : f32
    %177 = vector.broadcast %cst_48 : f32 to vector<1x128xf32>
    %178 = arith.addf %176, %177 : vector<1x128xf32>
    %179 = vector.extract_strided_slice %168 {offsets = [0, 128], sizes = [1, 128], strides = [1, 1]} : vector<1x256xf32> to vector<1x128xf32>
    %180 = arith.mulf %179, %155 : vector<1x128xf32>
    %181 = vector.extract_strided_slice %168 {offsets = [0, 0], sizes = [1, 128], strides = [1, 1]} : vector<1x256xf32> to vector<1x128xf32>
    %182 = arith.mulf %181, %170 : vector<1x128xf32>
    %183 = arith.addf %180, %182 : vector<1x128xf32>
    %184 = math.tanh %183 : vector<1x128xf32>
    %185 = arith.mulf %178, %184 : vector<1x128xf32>
    %186 = arith.truncf %185 : vector<1x128xf32> to vector<1x128xbf16>
    %cst_49 = arith.constant dense<0.000000e+00> : vector<1x512xf32>
    %187 = tpu.matmul %186, %17, %cst_49 {dimension_numbers = #tpu.dot_dimension_numbers<[1], [0], [0], [1], [0, 0, 1, 1], [], []>} : vector<1x128xbf16>, vector<128x512xbf16>, vector<1x512xf32> -> vector<1x512xf32>
    %188 = arith.addf %187, %15 : vector<1x512xf32>
    %189 = vector.extract_strided_slice %188 {offsets = [0, 0], sizes = [1, 256], strides = [1, 1]} : vector<1x512xf32> to vector<1x256xf32>
    %cst_50 = arith.constant 5.000000e-01 : f32
    %190 = vector.broadcast %cst_50 : f32 to vector<1x256xf32>
    %191 = arith.mulf %190, %189 : vector<1x256xf32>
    %192 = math.tanh %191 : vector<1x256xf32>
    %cst_51 = arith.constant 5.000000e-01 : f32
    %193 = vector.broadcast %cst_51 : f32 to vector<1x256xf32>
    %194 = arith.mulf %193, %192 : vector<1x256xf32>
    %cst_52 = arith.constant 5.000000e-01 : f32
    %195 = vector.broadcast %cst_52 : f32 to vector<1x256xf32>
    %196 = arith.addf %194, %195 : vector<1x256xf32>
    %197 = vector.extract_strided_slice %188 {offsets = [0, 256], sizes = [1, 128], strides = [1, 1]} : vector<1x512xf32> to vector<1x128xf32>
    %198 = math.tanh %197 : vector<1x128xf32>
    %199 = vector.extract_strided_slice %188 {offsets = [0, 384], sizes = [1, 128], strides = [1, 1]} : vector<1x512xf32> to vector<1x128xf32>
    %cst_53 = arith.constant 5.000000e-01 : f32
    %200 = vector.broadcast %cst_53 : f32 to vector<1x128xf32>
    %201 = arith.mulf %200, %199 : vector<1x128xf32>
    %202 = math.tanh %201 : vector<1x128xf32>
    %cst_54 = arith.constant 5.000000e-01 : f32
    %203 = vector.broadcast %cst_54 : f32 to vector<1x128xf32>
    %204 = arith.mulf %203, %202 : vector<1x128xf32>
    %cst_55 = arith.constant 5.000000e-01 : f32
    %205 = vector.broadcast %cst_55 : f32 to vector<1x128xf32>
    %206 = arith.addf %204, %205 : vector<1x128xf32>
    %207 = vector.extract_strided_slice %196 {offsets = [0, 128], sizes = [1, 128], strides = [1, 1]} : vector<1x256xf32> to vector<1x128xf32>
    %208 = arith.mulf %207, %183 : vector<1x128xf32>
    %209 = vector.extract_strided_slice %196 {offsets = [0, 0], sizes = [1, 128], strides = [1, 1]} : vector<1x256xf32> to vector<1x128xf32>
    %210 = arith.mulf %209, %198 : vector<1x128xf32>
    %211 = arith.addf %208, %210 : vector<1x128xf32>
    %212 = math.tanh %211 : vector<1x128xf32>
    %213 = arith.mulf %206, %212 : vector<1x128xf32>
    %214 = arith.truncf %213 : vector<1x128xf32> to vector<1x128xbf16>
    %cst_56 = arith.constant dense<0.000000e+00> : vector<1x512xf32>
    %215 = tpu.matmul %214, %17, %cst_56 {dimension_numbers = #tpu.dot_dimension_numbers<[1], [0], [0], [1], [0, 0, 1, 1], [], []>} : vector<1x128xbf16>, vector<128x512xbf16>, vector<1x512xf32> -> vector<1x512xf32>
    %216 = arith.addf %215, %16 : vector<1x512xf32>
    %217 = vector.extract_strided_slice %216 {offsets = [0, 0], sizes = [1, 256], strides = [1, 1]} : vector<1x512xf32> to vector<1x256xf32>
    %cst_57 = arith.constant 5.000000e-01 : f32
    %218 = vector.broadcast %cst_57 : f32 to vector<1x256xf32>
    %219 = arith.mulf %218, %217 : vector<1x256xf32>
    %220 = math.tanh %219 : vector<1x256xf32>
    %cst_58 = arith.constant 5.000000e-01 : f32
    %221 = vector.broadcast %cst_58 : f32 to vector<1x256xf32>
    %222 = arith.mulf %221, %220 : vector<1x256xf32>
    %cst_59 = arith.constant 5.000000e-01 : f32
    %223 = vector.broadcast %cst_59 : f32 to vector<1x256xf32>
    %224 = arith.addf %222, %223 : vector<1x256xf32>
    %225 = vector.extract_strided_slice %216 {offsets = [0, 256], sizes = [1, 128], strides = [1, 1]} : vector<1x512xf32> to vector<1x128xf32>
    %226 = math.tanh %225 : vector<1x128xf32>
    %227 = vector.extract_strided_slice %216 {offsets = [0, 384], sizes = [1, 128], strides = [1, 1]} : vector<1x512xf32> to vector<1x128xf32>
    %cst_60 = arith.constant 5.000000e-01 : f32
    %228 = vector.broadcast %cst_60 : f32 to vector<1x128xf32>
    %229 = arith.mulf %228, %227 : vector<1x128xf32>
    %230 = math.tanh %229 : vector<1x128xf32>
    %cst_61 = arith.constant 5.000000e-01 : f32
    %231 = vector.broadcast %cst_61 : f32 to vector<1x128xf32>
    %232 = arith.mulf %231, %230 : vector<1x128xf32>
    %cst_62 = arith.constant 5.000000e-01 : f32
    %233 = vector.broadcast %cst_62 : f32 to vector<1x128xf32>
    %234 = arith.addf %232, %233 : vector<1x128xf32>
    %235 = vector.extract_strided_slice %224 {offsets = [0, 128], sizes = [1, 128], strides = [1, 1]} : vector<1x256xf32> to vector<1x128xf32>
    %236 = arith.mulf %235, %211 : vector<1x128xf32>
    %237 = vector.extract_strided_slice %224 {offsets = [0, 0], sizes = [1, 128], strides = [1, 1]} : vector<1x256xf32> to vector<1x128xf32>
    %238 = arith.mulf %237, %226 : vector<1x128xf32>
    %239 = arith.addf %236, %238 : vector<1x128xf32>
    %240 = math.tanh %239 : vector<1x128xf32>
    %241 = arith.mulf %234, %240 : vector<1x128xf32>
    %c0_63 = arith.constant 0 : index
    %c0_64 = arith.constant 0 : index
    %242 = vector.load %arg4[%c0_63, %c0_64] : memref<128x512xbf16, #tpu.memory_space<vmem>>, vector<128x512xbf16>
    %c0_65 = arith.constant 0 : index
    %c0_66 = arith.constant 0 : index
    %243 = vector.load %arg5[%c0_65, %c0_66] : memref<128x512xbf16, #tpu.memory_space<vmem>>, vector<128x512xbf16>
    %c0_67 = arith.constant 0 : index
    %c0_68 = arith.constant 0 : index
    %244 = vector.load %arg6[%c0_67, %c0_68] : memref<1x512xf32, #tpu.memory_space<vmem>>, vector<1x512xf32>
    %245 = arith.truncf %45 : vector<1x128xf32> to vector<1x128xbf16>
    %cst_69 = arith.constant dense<0.000000e+00> : vector<1x512xf32>
    %246 = tpu.matmul %245, %242, %cst_69 {dimension_numbers = #tpu.dot_dimension_numbers<[1], [0], [0], [1], [0, 0, 1, 1], [], []>} : vector<1x128xbf16>, vector<128x512xbf16>, vector<1x512xf32> -> vector<1x512xf32>
    %247 = arith.addf %246, %244 : vector<1x512xf32>
    %248 = arith.truncf %0 : vector<1x128xf32> to vector<1x128xbf16>
    %cst_70 = arith.constant dense<0.000000e+00> : vector<1x512xf32>
    %249 = tpu.matmul %248, %243, %cst_70 {dimension_numbers = #tpu.dot_dimension_numbers<[1], [0], [0], [1], [0, 0, 1, 1], [], []>} : vector<1x128xbf16>, vector<128x512xbf16>, vector<1x512xf32> -> vector<1x512xf32>
    %250 = arith.addf %249, %247 : vector<1x512xf32>
    %251 = vector.extract_strided_slice %250 {offsets = [0, 0], sizes = [1, 256], strides = [1, 1]} : vector<1x512xf32> to vector<1x256xf32>
    %cst_71 = arith.constant 5.000000e-01 : f32
    %252 = vector.broadcast %cst_71 : f32 to vector<1x256xf32>
    %253 = arith.mulf %252, %251 : vector<1x256xf32>
    %254 = math.tanh %253 : vector<1x256xf32>
    %cst_72 = arith.constant 5.000000e-01 : f32
    %255 = vector.broadcast %cst_72 : f32 to vector<1x256xf32>
    %256 = arith.mulf %255, %254 : vector<1x256xf32>
    %cst_73 = arith.constant 5.000000e-01 : f32
    %257 = vector.broadcast %cst_73 : f32 to vector<1x256xf32>
    %258 = arith.addf %256, %257 : vector<1x256xf32>
    %259 = vector.extract_strided_slice %250 {offsets = [0, 256], sizes = [1, 128], strides = [1, 1]} : vector<1x512xf32> to vector<1x128xf32>
    %260 = math.tanh %259 : vector<1x128xf32>
    %261 = vector.extract_strided_slice %250 {offsets = [0, 384], sizes = [1, 128], strides = [1, 1]} : vector<1x512xf32> to vector<1x128xf32>
    %cst_74 = arith.constant 5.000000e-01 : f32
    %262 = vector.broadcast %cst_74 : f32 to vector<1x128xf32>
    %263 = arith.mulf %262, %261 : vector<1x128xf32>
    %264 = math.tanh %263 : vector<1x128xf32>
    %cst_75 = arith.constant 5.000000e-01 : f32
    %265 = vector.broadcast %cst_75 : f32 to vector<1x128xf32>
    %266 = arith.mulf %265, %264 : vector<1x128xf32>
    %cst_76 = arith.constant 5.000000e-01 : f32
    %267 = vector.broadcast %cst_76 : f32 to vector<1x128xf32>
    %268 = arith.addf %266, %267 : vector<1x128xf32>
    %269 = vector.extract_strided_slice %258 {offsets = [0, 128], sizes = [1, 128], strides = [1, 1]} : vector<1x256xf32> to vector<1x128xf32>
    %270 = arith.mulf %269, %0 : vector<1x128xf32>
    %271 = vector.extract_strided_slice %258 {offsets = [0, 0], sizes = [1, 128], strides = [1, 1]} : vector<1x256xf32> to vector<1x128xf32>
    %272 = arith.mulf %271, %260 : vector<1x128xf32>
    %273 = arith.addf %270, %272 : vector<1x128xf32>
    %274 = math.tanh %273 : vector<1x128xf32>
    %275 = arith.mulf %268, %274 : vector<1x128xf32>
    %276 = arith.truncf %73 : vector<1x128xf32> to vector<1x128xbf16>
    %cst_77 = arith.constant dense<0.000000e+00> : vector<1x512xf32>
    %277 = tpu.matmul %276, %242, %cst_77 {dimension_numbers = #tpu.dot_dimension_numbers<[1], [0], [0], [1], [0, 0, 1, 1], [], []>} : vector<1x128xbf16>, vector<128x512xbf16>, vector<1x512xf32> -> vector<1x512xf32>
    %278 = arith.addf %277, %244 : vector<1x512xf32>
    %279 = arith.truncf %275 : vector<1x128xf32> to vector<1x128xbf16>
    %cst_78 = arith.constant dense<0.000000e+00> : vector<1x512xf32>
    %280 = tpu.matmul %279, %243, %cst_78 {dimension_numbers = #tpu.dot_dimension_numbers<[1], [0], [0], [1], [0, 0, 1, 1], [], []>} : vector<1x128xbf16>, vector<128x512xbf16>, vector<1x512xf32> -> vector<1x512xf32>
    %281 = arith.addf %280, %278 : vector<1x512xf32>
    %282 = vector.extract_strided_slice %281 {offsets = [0, 0], sizes = [1, 256], strides = [1, 1]} : vector<1x512xf32> to vector<1x256xf32>
    %cst_79 = arith.constant 5.000000e-01 : f32
    %283 = vector.broadcast %cst_79 : f32 to vector<1x256xf32>
    %284 = arith.mulf %283, %282 : vector<1x256xf32>
    %285 = math.tanh %284 : vector<1x256xf32>
    %cst_80 = arith.constant 5.000000e-01 : f32
    %286 = vector.broadcast %cst_80 : f32 to vector<1x256xf32>
    %287 = arith.mulf %286, %285 : vector<1x256xf32>
    %cst_81 = arith.constant 5.000000e-01 : f32
    %288 = vector.broadcast %cst_81 : f32 to vector<1x256xf32>
    %289 = arith.addf %287, %288 : vector<1x256xf32>
    %290 = vector.extract_strided_slice %281 {offsets = [0, 256], sizes = [1, 128], strides = [1, 1]} : vector<1x512xf32> to vector<1x128xf32>
    %291 = math.tanh %290 : vector<1x128xf32>
    %292 = vector.extract_strided_slice %281 {offsets = [0, 384], sizes = [1, 128], strides = [1, 1]} : vector<1x512xf32> to vector<1x128xf32>
    %cst_82 = arith.constant 5.000000e-01 : f32
    %293 = vector.broadcast %cst_82 : f32 to vector<1x128xf32>
    %294 = arith.mulf %293, %292 : vector<1x128xf32>
    %295 = math.tanh %294 : vector<1x128xf32>
    %cst_83 = arith.constant 5.000000e-01 : f32
    %296 = vector.broadcast %cst_83 : f32 to vector<1x128xf32>
    %297 = arith.mulf %296, %295 : vector<1x128xf32>
    %cst_84 = arith.constant 5.000000e-01 : f32
    %298 = vector.broadcast %cst_84 : f32 to vector<1x128xf32>
    %299 = arith.addf %297, %298 : vector<1x128xf32>
    %300 = vector.extract_strided_slice %289 {offsets = [0, 128], sizes = [1, 128], strides = [1, 1]} : vector<1x256xf32> to vector<1x128xf32>
    %301 = arith.mulf %300, %273 : vector<1x128xf32>
    %302 = vector.extract_strided_slice %289 {offsets = [0, 0], sizes = [1, 128], strides = [1, 1]} : vector<1x256xf32> to vector<1x128xf32>
    %303 = arith.mulf %302, %291 : vector<1x128xf32>
    %304 = arith.addf %301, %303 : vector<1x128xf32>
    %305 = math.tanh %304 : vector<1x128xf32>
    %306 = arith.mulf %299, %305 : vector<1x128xf32>
    %307 = arith.truncf %101 : vector<1x128xf32> to vector<1x128xbf16>
    %cst_85 = arith.constant dense<0.000000e+00> : vector<1x512xf32>
    %308 = tpu.matmul %307, %242, %cst_85 {dimension_numbers = #tpu.dot_dimension_numbers<[1], [0], [0], [1], [0, 0, 1, 1], [], []>} : vector<1x128xbf16>, vector<128x512xbf16>, vector<1x512xf32> -> vector<1x512xf32>
    %309 = arith.addf %308, %244 : vector<1x512xf32>
    %310 = arith.truncf %306 : vector<1x128xf32> to vector<1x128xbf16>
    %cst_86 = arith.constant dense<0.000000e+00> : vector<1x512xf32>
    %311 = tpu.matmul %310, %243, %cst_86 {dimension_numbers = #tpu.dot_dimension_numbers<[1], [0], [0], [1], [0, 0, 1, 1], [], []>} : vector<1x128xbf16>, vector<128x512xbf16>, vector<1x512xf32> -> vector<1x512xf32>
    %312 = arith.addf %311, %309 : vector<1x512xf32>
    %313 = vector.extract_strided_slice %312 {offsets = [0, 0], sizes = [1, 256], strides = [1, 1]} : vector<1x512xf32> to vector<1x256xf32>
    %cst_87 = arith.constant 5.000000e-01 : f32
    %314 = vector.broadcast %cst_87 : f32 to vector<1x256xf32>
    %315 = arith.mulf %314, %313 : vector<1x256xf32>
    %316 = math.tanh %315 : vector<1x256xf32>
    %cst_88 = arith.constant 5.000000e-01 : f32
    %317 = vector.broadcast %cst_88 : f32 to vector<1x256xf32>
    %318 = arith.mulf %317, %316 : vector<1x256xf32>
    %cst_89 = arith.constant 5.000000e-01 : f32
    %319 = vector.broadcast %cst_89 : f32 to vector<1x256xf32>
    %320 = arith.addf %318, %319 : vector<1x256xf32>
    %321 = vector.extract_strided_slice %312 {offsets = [0, 256], sizes = [1, 128], strides = [1, 1]} : vector<1x512xf32> to vector<1x128xf32>
    %322 = math.tanh %321 : vector<1x128xf32>
    %323 = vector.extract_strided_slice %312 {offsets = [0, 384], sizes = [1, 128], strides = [1, 1]} : vector<1x512xf32> to vector<1x128xf32>
    %cst_90 = arith.constant 5.000000e-01 : f32
    %324 = vector.broadcast %cst_90 : f32 to vector<1x128xf32>
    %325 = arith.mulf %324, %323 : vector<1x128xf32>
    %326 = math.tanh %325 : vector<1x128xf32>
    %cst_91 = arith.constant 5.000000e-01 : f32
    %327 = vector.broadcast %cst_91 : f32 to vector<1x128xf32>
    %328 = arith.mulf %327, %326 : vector<1x128xf32>
    %cst_92 = arith.constant 5.000000e-01 : f32
    %329 = vector.broadcast %cst_92 : f32 to vector<1x128xf32>
    %330 = arith.addf %328, %329 : vector<1x128xf32>
    %331 = vector.extract_strided_slice %320 {offsets = [0, 128], sizes = [1, 128], strides = [1, 1]} : vector<1x256xf32> to vector<1x128xf32>
    %332 = arith.mulf %331, %304 : vector<1x128xf32>
    %333 = vector.extract_strided_slice %320 {offsets = [0, 0], sizes = [1, 128], strides = [1, 1]} : vector<1x256xf32> to vector<1x128xf32>
    %334 = arith.mulf %333, %322 : vector<1x128xf32>
    %335 = arith.addf %332, %334 : vector<1x128xf32>
    %336 = math.tanh %335 : vector<1x128xf32>
    %337 = arith.mulf %330, %336 : vector<1x128xf32>
    %338 = arith.truncf %129 : vector<1x128xf32> to vector<1x128xbf16>
    %cst_93 = arith.constant dense<0.000000e+00> : vector<1x512xf32>
    %339 = tpu.matmul %338, %242, %cst_93 {dimension_numbers = #tpu.dot_dimension_numbers<[1], [0], [0], [1], [0, 0, 1, 1], [], []>} : vector<1x128xbf16>, vector<128x512xbf16>, vector<1x512xf32> -> vector<1x512xf32>
    %340 = arith.addf %339, %244 : vector<1x512xf32>
    %341 = arith.truncf %337 : vector<1x128xf32> to vector<1x128xbf16>
    %cst_94 = arith.constant dense<0.000000e+00> : vector<1x512xf32>
    %342 = tpu.matmul %341, %243, %cst_94 {dimension_numbers = #tpu.dot_dimension_numbers<[1], [0], [0], [1], [0, 0, 1, 1], [], []>} : vector<1x128xbf16>, vector<128x512xbf16>, vector<1x512xf32> -> vector<1x512xf32>
    %343 = arith.addf %342, %340 : vector<1x512xf32>
    %344 = vector.extract_strided_slice %343 {offsets = [0, 0], sizes = [1, 256], strides = [1, 1]} : vector<1x512xf32> to vector<1x256xf32>
    %cst_95 = arith.constant 5.000000e-01 : f32
    %345 = vector.broadcast %cst_95 : f32 to vector<1x256xf32>
    %346 = arith.mulf %345, %344 : vector<1x256xf32>
    %347 = math.tanh %346 : vector<1x256xf32>
    %cst_96 = arith.constant 5.000000e-01 : f32
    %348 = vector.broadcast %cst_96 : f32 to vector<1x256xf32>
    %349 = arith.mulf %348, %347 : vector<1x256xf32>
    %cst_97 = arith.constant 5.000000e-01 : f32
    %350 = vector.broadcast %cst_97 : f32 to vector<1x256xf32>
    %351 = arith.addf %349, %350 : vector<1x256xf32>
    %352 = vector.extract_strided_slice %343 {offsets = [0, 256], sizes = [1, 128], strides = [1, 1]} : vector<1x512xf32> to vector<1x128xf32>
    %353 = math.tanh %352 : vector<1x128xf32>
    %354 = vector.extract_strided_slice %343 {offsets = [0, 384], sizes = [1, 128], strides = [1, 1]} : vector<1x512xf32> to vector<1x128xf32>
    %cst_98 = arith.constant 5.000000e-01 : f32
    %355 = vector.broadcast %cst_98 : f32 to vector<1x128xf32>
    %356 = arith.mulf %355, %354 : vector<1x128xf32>
    %357 = math.tanh %356 : vector<1x128xf32>
    %cst_99 = arith.constant 5.000000e-01 : f32
    %358 = vector.broadcast %cst_99 : f32 to vector<1x128xf32>
    %359 = arith.mulf %358, %357 : vector<1x128xf32>
    %cst_100 = arith.constant 5.000000e-01 : f32
    %360 = vector.broadcast %cst_100 : f32 to vector<1x128xf32>
    %361 = arith.addf %359, %360 : vector<1x128xf32>
    %362 = vector.extract_strided_slice %351 {offsets = [0, 128], sizes = [1, 128], strides = [1, 1]} : vector<1x256xf32> to vector<1x128xf32>
    %363 = arith.mulf %362, %335 : vector<1x128xf32>
    %364 = vector.extract_strided_slice %351 {offsets = [0, 0], sizes = [1, 128], strides = [1, 1]} : vector<1x256xf32> to vector<1x128xf32>
    %365 = arith.mulf %364, %353 : vector<1x128xf32>
    %366 = arith.addf %363, %365 : vector<1x128xf32>
    %367 = math.tanh %366 : vector<1x128xf32>
    %368 = arith.mulf %361, %367 : vector<1x128xf32>
    %369 = arith.truncf %157 : vector<1x128xf32> to vector<1x128xbf16>
    %cst_101 = arith.constant dense<0.000000e+00> : vector<1x512xf32>
    %370 = tpu.matmul %369, %242, %cst_101 {dimension_numbers = #tpu.dot_dimension_numbers<[1], [0], [0], [1], [0, 0, 1, 1], [], []>} : vector<1x128xbf16>, vector<128x512xbf16>, vector<1x512xf32> -> vector<1x512xf32>
    %371 = arith.addf %370, %244 : vector<1x512xf32>
    %372 = arith.truncf %368 : vector<1x128xf32> to vector<1x128xbf16>
    %cst_102 = arith.constant dense<0.000000e+00> : vector<1x512xf32>
    %373 = tpu.matmul %372, %243, %cst_102 {dimension_numbers = #tpu.dot_dimension_numbers<[1], [0], [0], [1], [0, 0, 1, 1], [], []>} : vector<1x128xbf16>, vector<128x512xbf16>, vector<1x512xf32> -> vector<1x512xf32>
    %374 = arith.addf %373, %371 : vector<1x512xf32>
    %375 = vector.extract_strided_slice %374 {offsets = [0, 0], sizes = [1, 256], strides = [1, 1]} : vector<1x512xf32> to vector<1x256xf32>
    %cst_103 = arith.constant 5.000000e-01 : f32
    %376 = vector.broadcast %cst_103 : f32 to vector<1x256xf32>
    %377 = arith.mulf %376, %375 : vector<1x256xf32>
    %378 = math.tanh %377 : vector<1x256xf32>
    %cst_104 = arith.constant 5.000000e-01 : f32
    %379 = vector.broadcast %cst_104 : f32 to vector<1x256xf32>
    %380 = arith.mulf %379, %378 : vector<1x256xf32>
    %cst_105 = arith.constant 5.000000e-01 : f32
    %381 = vector.broadcast %cst_105 : f32 to vector<1x256xf32>
    %382 = arith.addf %380, %381 : vector<1x256xf32>
    %383 = vector.extract_strided_slice %374 {offsets = [0, 256], sizes = [1, 128], strides = [1, 1]} : vector<1x512xf32> to vector<1x128xf32>
    %384 = math.tanh %383 : vector<1x128xf32>
    %385 = vector.extract_strided_slice %374 {offsets = [0, 384], sizes = [1, 128], strides = [1, 1]} : vector<1x512xf32> to vector<1x128xf32>
    %cst_106 = arith.constant 5.000000e-01 : f32
    %386 = vector.broadcast %cst_106 : f32 to vector<1x128xf32>
    %387 = arith.mulf %386, %385 : vector<1x128xf32>
    %388 = math.tanh %387 : vector<1x128xf32>
    %cst_107 = arith.constant 5.000000e-01 : f32
    %389 = vector.broadcast %cst_107 : f32 to vector<1x128xf32>
    %390 = arith.mulf %389, %388 : vector<1x128xf32>
    %cst_108 = arith.constant 5.000000e-01 : f32
    %391 = vector.broadcast %cst_108 : f32 to vector<1x128xf32>
    %392 = arith.addf %390, %391 : vector<1x128xf32>
    %393 = vector.extract_strided_slice %382 {offsets = [0, 128], sizes = [1, 128], strides = [1, 1]} : vector<1x256xf32> to vector<1x128xf32>
    %394 = arith.mulf %393, %366 : vector<1x128xf32>
    %395 = vector.extract_strided_slice %382 {offsets = [0, 0], sizes = [1, 128], strides = [1, 1]} : vector<1x256xf32> to vector<1x128xf32>
    %396 = arith.mulf %395, %384 : vector<1x128xf32>
    %397 = arith.addf %394, %396 : vector<1x128xf32>
    %398 = math.tanh %397 : vector<1x128xf32>
    %399 = arith.mulf %392, %398 : vector<1x128xf32>
    %400 = arith.truncf %185 : vector<1x128xf32> to vector<1x128xbf16>
    %cst_109 = arith.constant dense<0.000000e+00> : vector<1x512xf32>
    %401 = tpu.matmul %400, %242, %cst_109 {dimension_numbers = #tpu.dot_dimension_numbers<[1], [0], [0], [1], [0, 0, 1, 1], [], []>} : vector<1x128xbf16>, vector<128x512xbf16>, vector<1x512xf32> -> vector<1x512xf32>
    %402 = arith.addf %401, %244 : vector<1x512xf32>
    %403 = arith.truncf %399 : vector<1x128xf32> to vector<1x128xbf16>
    %cst_110 = arith.constant dense<0.000000e+00> : vector<1x512xf32>
    %404 = tpu.matmul %403, %243, %cst_110 {dimension_numbers = #tpu.dot_dimension_numbers<[1], [0], [0], [1], [0, 0, 1, 1], [], []>} : vector<1x128xbf16>, vector<128x512xbf16>, vector<1x512xf32> -> vector<1x512xf32>
    %405 = arith.addf %404, %402 : vector<1x512xf32>
    %406 = vector.extract_strided_slice %405 {offsets = [0, 0], sizes = [1, 256], strides = [1, 1]} : vector<1x512xf32> to vector<1x256xf32>
    %cst_111 = arith.constant 5.000000e-01 : f32
    %407 = vector.broadcast %cst_111 : f32 to vector<1x256xf32>
    %408 = arith.mulf %407, %406 : vector<1x256xf32>
    %409 = math.tanh %408 : vector<1x256xf32>
    %cst_112 = arith.constant 5.000000e-01 : f32
    %410 = vector.broadcast %cst_112 : f32 to vector<1x256xf32>
    %411 = arith.mulf %410, %409 : vector<1x256xf32>
    %cst_113 = arith.constant 5.000000e-01 : f32
    %412 = vector.broadcast %cst_113 : f32 to vector<1x256xf32>
    %413 = arith.addf %411, %412 : vector<1x256xf32>
    %414 = vector.extract_strided_slice %405 {offsets = [0, 256], sizes = [1, 128], strides = [1, 1]} : vector<1x512xf32> to vector<1x128xf32>
    %415 = math.tanh %414 : vector<1x128xf32>
    %416 = vector.extract_strided_slice %405 {offsets = [0, 384], sizes = [1, 128], strides = [1, 1]} : vector<1x512xf32> to vector<1x128xf32>
    %cst_114 = arith.constant 5.000000e-01 : f32
    %417 = vector.broadcast %cst_114 : f32 to vector<1x128xf32>
    %418 = arith.mulf %417, %416 : vector<1x128xf32>
    %419 = math.tanh %418 : vector<1x128xf32>
    %cst_115 = arith.constant 5.000000e-01 : f32
    %420 = vector.broadcast %cst_115 : f32 to vector<1x128xf32>
    %421 = arith.mulf %420, %419 : vector<1x128xf32>
    %cst_116 = arith.constant 5.000000e-01 : f32
    %422 = vector.broadcast %cst_116 : f32 to vector<1x128xf32>
    %423 = arith.addf %421, %422 : vector<1x128xf32>
    %424 = vector.extract_strided_slice %413 {offsets = [0, 128], sizes = [1, 128], strides = [1, 1]} : vector<1x256xf32> to vector<1x128xf32>
    %425 = arith.mulf %424, %397 : vector<1x128xf32>
    %426 = vector.extract_strided_slice %413 {offsets = [0, 0], sizes = [1, 128], strides = [1, 1]} : vector<1x256xf32> to vector<1x128xf32>
    %427 = arith.mulf %426, %415 : vector<1x128xf32>
    %428 = arith.addf %425, %427 : vector<1x128xf32>
    %429 = math.tanh %428 : vector<1x128xf32>
    %430 = arith.mulf %423, %429 : vector<1x128xf32>
    %431 = arith.truncf %213 : vector<1x128xf32> to vector<1x128xbf16>
    %cst_117 = arith.constant dense<0.000000e+00> : vector<1x512xf32>
    %432 = tpu.matmul %431, %242, %cst_117 {dimension_numbers = #tpu.dot_dimension_numbers<[1], [0], [0], [1], [0, 0, 1, 1], [], []>} : vector<1x128xbf16>, vector<128x512xbf16>, vector<1x512xf32> -> vector<1x512xf32>
    %433 = arith.addf %432, %244 : vector<1x512xf32>
    %434 = arith.truncf %430 : vector<1x128xf32> to vector<1x128xbf16>
    %cst_118 = arith.constant dense<0.000000e+00> : vector<1x512xf32>
    %435 = tpu.matmul %434, %243, %cst_118 {dimension_numbers = #tpu.dot_dimension_numbers<[1], [0], [0], [1], [0, 0, 1, 1], [], []>} : vector<1x128xbf16>, vector<128x512xbf16>, vector<1x512xf32> -> vector<1x512xf32>
    %436 = arith.addf %435, %433 : vector<1x512xf32>
    %437 = vector.extract_strided_slice %436 {offsets = [0, 0], sizes = [1, 256], strides = [1, 1]} : vector<1x512xf32> to vector<1x256xf32>
    %cst_119 = arith.constant 5.000000e-01 : f32
    %438 = vector.broadcast %cst_119 : f32 to vector<1x256xf32>
    %439 = arith.mulf %438, %437 : vector<1x256xf32>
    %440 = math.tanh %439 : vector<1x256xf32>
    %cst_120 = arith.constant 5.000000e-01 : f32
    %441 = vector.broadcast %cst_120 : f32 to vector<1x256xf32>
    %442 = arith.mulf %441, %440 : vector<1x256xf32>
    %cst_121 = arith.constant 5.000000e-01 : f32
    %443 = vector.broadcast %cst_121 : f32 to vector<1x256xf32>
    %444 = arith.addf %442, %443 : vector<1x256xf32>
    %445 = vector.extract_strided_slice %436 {offsets = [0, 256], sizes = [1, 128], strides = [1, 1]} : vector<1x512xf32> to vector<1x128xf32>
    %446 = math.tanh %445 : vector<1x128xf32>
    %447 = vector.extract_strided_slice %436 {offsets = [0, 384], sizes = [1, 128], strides = [1, 1]} : vector<1x512xf32> to vector<1x128xf32>
    %cst_122 = arith.constant 5.000000e-01 : f32
    %448 = vector.broadcast %cst_122 : f32 to vector<1x128xf32>
    %449 = arith.mulf %448, %447 : vector<1x128xf32>
    %450 = math.tanh %449 : vector<1x128xf32>
    %cst_123 = arith.constant 5.000000e-01 : f32
    %451 = vector.broadcast %cst_123 : f32 to vector<1x128xf32>
    %452 = arith.mulf %451, %450 : vector<1x128xf32>
    %cst_124 = arith.constant 5.000000e-01 : f32
    %453 = vector.broadcast %cst_124 : f32 to vector<1x128xf32>
    %454 = arith.addf %452, %453 : vector<1x128xf32>
    %455 = vector.extract_strided_slice %444 {offsets = [0, 128], sizes = [1, 128], strides = [1, 1]} : vector<1x256xf32> to vector<1x128xf32>
    %456 = arith.mulf %455, %428 : vector<1x128xf32>
    %457 = vector.extract_strided_slice %444 {offsets = [0, 0], sizes = [1, 128], strides = [1, 1]} : vector<1x256xf32> to vector<1x128xf32>
    %458 = arith.mulf %457, %446 : vector<1x128xf32>
    %459 = arith.addf %456, %458 : vector<1x128xf32>
    %460 = math.tanh %459 : vector<1x128xf32>
    %461 = arith.mulf %454, %460 : vector<1x128xf32>
    %462 = arith.truncf %241 : vector<1x128xf32> to vector<1x128xbf16>
    %cst_125 = arith.constant dense<0.000000e+00> : vector<1x512xf32>
    %463 = tpu.matmul %462, %242, %cst_125 {dimension_numbers = #tpu.dot_dimension_numbers<[1], [0], [0], [1], [0, 0, 1, 1], [], []>} : vector<1x128xbf16>, vector<128x512xbf16>, vector<1x512xf32> -> vector<1x512xf32>
    %464 = arith.addf %463, %244 : vector<1x512xf32>
    %465 = arith.truncf %461 : vector<1x128xf32> to vector<1x128xbf16>
    %cst_126 = arith.constant dense<0.000000e+00> : vector<1x512xf32>
    %466 = tpu.matmul %465, %243, %cst_126 {dimension_numbers = #tpu.dot_dimension_numbers<[1], [0], [0], [1], [0, 0, 1, 1], [], []>} : vector<1x128xbf16>, vector<128x512xbf16>, vector<1x512xf32> -> vector<1x512xf32>
    %467 = arith.addf %466, %464 : vector<1x512xf32>
    %468 = vector.extract_strided_slice %467 {offsets = [0, 0], sizes = [1, 256], strides = [1, 1]} : vector<1x512xf32> to vector<1x256xf32>
    %cst_127 = arith.constant 5.000000e-01 : f32
    %469 = vector.broadcast %cst_127 : f32 to vector<1x256xf32>
    %470 = arith.mulf %469, %468 : vector<1x256xf32>
    %471 = math.tanh %470 : vector<1x256xf32>
    %cst_128 = arith.constant 5.000000e-01 : f32
    %472 = vector.broadcast %cst_128 : f32 to vector<1x256xf32>
    %473 = arith.mulf %472, %471 : vector<1x256xf32>
    %cst_129 = arith.constant 5.000000e-01 : f32
    %474 = vector.broadcast %cst_129 : f32 to vector<1x256xf32>
    %475 = arith.addf %473, %474 : vector<1x256xf32>
    %476 = vector.extract_strided_slice %467 {offsets = [0, 256], sizes = [1, 128], strides = [1, 1]} : vector<1x512xf32> to vector<1x128xf32>
    %477 = math.tanh %476 : vector<1x128xf32>
    %478 = vector.extract_strided_slice %467 {offsets = [0, 384], sizes = [1, 128], strides = [1, 1]} : vector<1x512xf32> to vector<1x128xf32>
    %cst_130 = arith.constant 5.000000e-01 : f32
    %479 = vector.broadcast %cst_130 : f32 to vector<1x128xf32>
    %480 = arith.mulf %479, %478 : vector<1x128xf32>
    %481 = math.tanh %480 : vector<1x128xf32>
    %cst_131 = arith.constant 5.000000e-01 : f32
    %482 = vector.broadcast %cst_131 : f32 to vector<1x128xf32>
    %483 = arith.mulf %482, %481 : vector<1x128xf32>
    %cst_132 = arith.constant 5.000000e-01 : f32
    %484 = vector.broadcast %cst_132 : f32 to vector<1x128xf32>
    %485 = arith.addf %483, %484 : vector<1x128xf32>
    %486 = vector.extract_strided_slice %475 {offsets = [0, 128], sizes = [1, 128], strides = [1, 1]} : vector<1x256xf32> to vector<1x128xf32>
    %487 = arith.mulf %486, %459 : vector<1x128xf32>
    %488 = vector.extract_strided_slice %475 {offsets = [0, 0], sizes = [1, 128], strides = [1, 1]} : vector<1x256xf32> to vector<1x128xf32>
    %489 = arith.mulf %488, %477 : vector<1x128xf32>
    %490 = arith.addf %487, %489 : vector<1x128xf32>
    %491 = math.tanh %490 : vector<1x128xf32>
    %492 = arith.mulf %485, %491 : vector<1x128xf32>
    %493 = arith.truncf %492 : vector<1x128xf32> to vector<1x128xbf16>
    %c0_133 = arith.constant 0 : index
    %c0_134 = arith.constant 0 : index
    %494 = vector.load %arg7[%c0_133, %c0_134] : memref<128x512xbf16, #tpu.memory_space<vmem>>, vector<128x512xbf16>
    %cst_135 = arith.constant dense<0.000000e+00> : vector<1x512xf32>
    %495 = tpu.matmul %493, %494, %cst_135 {dimension_numbers = #tpu.dot_dimension_numbers<[1], [0], [0], [1], [0, 0, 1, 1], [], []>} : vector<1x128xbf16>, vector<128x512xbf16>, vector<1x512xf32> -> vector<1x512xf32>
    %c0_136 = arith.constant 0 : index
    %c0_137 = arith.constant 0 : index
    %496 = vector.load %arg9[%c0_136, %c0_137] : memref<1x512xf32, #tpu.memory_space<vmem>>, vector<1x512xf32>
    %497 = arith.addf %495, %496 : vector<1x512xf32>
    %c0_138 = arith.constant 0 : index
    %c0_139 = arith.constant 0 : index
    %498 = vector.load %arg8[%c0_138, %c0_139] : memref<128x512xbf16, #tpu.memory_space<vmem>>, vector<128x512xbf16>
    %499 = arith.truncf %0 : vector<1x128xf32> to vector<1x128xbf16>
    %cst_140 = arith.constant dense<0.000000e+00> : vector<1x512xf32>
    %500 = tpu.matmul %499, %498, %cst_140 {dimension_numbers = #tpu.dot_dimension_numbers<[1], [0], [0], [1], [0, 0, 1, 1], [], []>} : vector<1x128xbf16>, vector<128x512xbf16>, vector<1x512xf32> -> vector<1x512xf32>
    %501 = arith.addf %500, %497 : vector<1x512xf32>
    %502 = vector.extract_strided_slice %501 {offsets = [0, 0], sizes = [1, 256], strides = [1, 1]} : vector<1x512xf32> to vector<1x256xf32>
    %cst_141 = arith.constant 5.000000e-01 : f32
    %503 = vector.broadcast %cst_141 : f32 to vector<1x256xf32>
    %504 = arith.mulf %503, %502 : vector<1x256xf32>
    %505 = math.tanh %504 : vector<1x256xf32>
    %cst_142 = arith.constant 5.000000e-01 : f32
    %506 = vector.broadcast %cst_142 : f32 to vector<1x256xf32>
    %507 = arith.mulf %506, %505 : vector<1x256xf32>
    %cst_143 = arith.constant 5.000000e-01 : f32
    %508 = vector.broadcast %cst_143 : f32 to vector<1x256xf32>
    %509 = arith.addf %507, %508 : vector<1x256xf32>
    %510 = vector.extract_strided_slice %501 {offsets = [0, 256], sizes = [1, 128], strides = [1, 1]} : vector<1x512xf32> to vector<1x128xf32>
    %511 = math.tanh %510 : vector<1x128xf32>
    %512 = vector.extract_strided_slice %501 {offsets = [0, 384], sizes = [1, 128], strides = [1, 1]} : vector<1x512xf32> to vector<1x128xf32>
    %cst_144 = arith.constant 5.000000e-01 : f32
    %513 = vector.broadcast %cst_144 : f32 to vector<1x128xf32>
    %514 = arith.mulf %513, %512 : vector<1x128xf32>
    %515 = math.tanh %514 : vector<1x128xf32>
    %cst_145 = arith.constant 5.000000e-01 : f32
    %516 = vector.broadcast %cst_145 : f32 to vector<1x128xf32>
    %517 = arith.mulf %516, %515 : vector<1x128xf32>
    %cst_146 = arith.constant 5.000000e-01 : f32
    %518 = vector.broadcast %cst_146 : f32 to vector<1x128xf32>
    %519 = arith.addf %517, %518 : vector<1x128xf32>
    %520 = vector.extract_strided_slice %509 {offsets = [0, 128], sizes = [1, 128], strides = [1, 1]} : vector<1x256xf32> to vector<1x128xf32>
    %521 = arith.mulf %520, %0 : vector<1x128xf32>
    %522 = vector.extract_strided_slice %509 {offsets = [0, 0], sizes = [1, 128], strides = [1, 1]} : vector<1x256xf32> to vector<1x128xf32>
    %523 = arith.mulf %522, %511 : vector<1x128xf32>
    %524 = arith.addf %521, %523 : vector<1x128xf32>
    %525 = math.tanh %524 : vector<1x128xf32>
    %526 = arith.mulf %519, %525 : vector<1x128xf32>
    %527 = arith.truncf %526 : vector<1x128xf32> to vector<1x128xbf16>
    %cst_147 = arith.constant dense<0.000000e+00> : vector<1x512xf32>
    %528 = tpu.matmul %527, %498, %cst_147 {dimension_numbers = #tpu.dot_dimension_numbers<[1], [0], [0], [1], [0, 0, 1, 1], [], []>} : vector<1x128xbf16>, vector<128x512xbf16>, vector<1x512xf32> -> vector<1x512xf32>
    %529 = arith.addf %528, %497 : vector<1x512xf32>
    %530 = vector.extract_strided_slice %529 {offsets = [0, 0], sizes = [1, 256], strides = [1, 1]} : vector<1x512xf32> to vector<1x256xf32>
    %cst_148 = arith.constant 5.000000e-01 : f32
    %531 = vector.broadcast %cst_148 : f32 to vector<1x256xf32>
    %532 = arith.mulf %531, %530 : vector<1x256xf32>
    %533 = math.tanh %532 : vector<1x256xf32>
    %cst_149 = arith.constant 5.000000e-01 : f32
    %534 = vector.broadcast %cst_149 : f32 to vector<1x256xf32>
    %535 = arith.mulf %534, %533 : vector<1x256xf32>
    %cst_150 = arith.constant 5.000000e-01 : f32
    %536 = vector.broadcast %cst_150 : f32 to vector<1x256xf32>
    %537 = arith.addf %535, %536 : vector<1x256xf32>
    %538 = vector.extract_strided_slice %529 {offsets = [0, 256], sizes = [1, 128], strides = [1, 1]} : vector<1x512xf32> to vector<1x128xf32>
    %539 = math.tanh %538 : vector<1x128xf32>
    %540 = vector.extract_strided_slice %529 {offsets = [0, 384], sizes = [1, 128], strides = [1, 1]} : vector<1x512xf32> to vector<1x128xf32>
    %cst_151 = arith.constant 5.000000e-01 : f32
    %541 = vector.broadcast %cst_151 : f32 to vector<1x128xf32>
    %542 = arith.mulf %541, %540 : vector<1x128xf32>
    %543 = math.tanh %542 : vector<1x128xf32>
    %cst_152 = arith.constant 5.000000e-01 : f32
    %544 = vector.broadcast %cst_152 : f32 to vector<1x128xf32>
    %545 = arith.mulf %544, %543 : vector<1x128xf32>
    %cst_153 = arith.constant 5.000000e-01 : f32
    %546 = vector.broadcast %cst_153 : f32 to vector<1x128xf32>
    %547 = arith.addf %545, %546 : vector<1x128xf32>
    %548 = vector.extract_strided_slice %537 {offsets = [0, 128], sizes = [1, 128], strides = [1, 1]} : vector<1x256xf32> to vector<1x128xf32>
    %549 = arith.mulf %548, %524 : vector<1x128xf32>
    %550 = vector.extract_strided_slice %537 {offsets = [0, 0], sizes = [1, 128], strides = [1, 1]} : vector<1x256xf32> to vector<1x128xf32>
    %551 = arith.mulf %550, %539 : vector<1x128xf32>
    %552 = arith.addf %549, %551 : vector<1x128xf32>
    %553 = math.tanh %552 : vector<1x128xf32>
    %554 = arith.mulf %547, %553 : vector<1x128xf32>
    %555 = arith.truncf %554 : vector<1x128xf32> to vector<1x128xbf16>
    %cst_154 = arith.constant dense<0.000000e+00> : vector<1x512xf32>
    %556 = tpu.matmul %555, %498, %cst_154 {dimension_numbers = #tpu.dot_dimension_numbers<[1], [0], [0], [1], [0, 0, 1, 1], [], []>} : vector<1x128xbf16>, vector<128x512xbf16>, vector<1x512xf32> -> vector<1x512xf32>
    %557 = arith.addf %556, %497 : vector<1x512xf32>
    %558 = vector.extract_strided_slice %557 {offsets = [0, 0], sizes = [1, 256], strides = [1, 1]} : vector<1x512xf32> to vector<1x256xf32>
    %cst_155 = arith.constant 5.000000e-01 : f32
    %559 = vector.broadcast %cst_155 : f32 to vector<1x256xf32>
    %560 = arith.mulf %559, %558 : vector<1x256xf32>
    %561 = math.tanh %560 : vector<1x256xf32>
    %cst_156 = arith.constant 5.000000e-01 : f32
    %562 = vector.broadcast %cst_156 : f32 to vector<1x256xf32>
    %563 = arith.mulf %562, %561 : vector<1x256xf32>
    %cst_157 = arith.constant 5.000000e-01 : f32
    %564 = vector.broadcast %cst_157 : f32 to vector<1x256xf32>
    %565 = arith.addf %563, %564 : vector<1x256xf32>
    %566 = vector.extract_strided_slice %557 {offsets = [0, 256], sizes = [1, 128], strides = [1, 1]} : vector<1x512xf32> to vector<1x128xf32>
    %567 = math.tanh %566 : vector<1x128xf32>
    %568 = vector.extract_strided_slice %557 {offsets = [0, 384], sizes = [1, 128], strides = [1, 1]} : vector<1x512xf32> to vector<1x128xf32>
    %cst_158 = arith.constant 5.000000e-01 : f32
    %569 = vector.broadcast %cst_158 : f32 to vector<1x128xf32>
    %570 = arith.mulf %569, %568 : vector<1x128xf32>
    %571 = math.tanh %570 : vector<1x128xf32>
    %cst_159 = arith.constant 5.000000e-01 : f32
    %572 = vector.broadcast %cst_159 : f32 to vector<1x128xf32>
    %573 = arith.mulf %572, %571 : vector<1x128xf32>
    %cst_160 = arith.constant 5.000000e-01 : f32
    %574 = vector.broadcast %cst_160 : f32 to vector<1x128xf32>
    %575 = arith.addf %573, %574 : vector<1x128xf32>
    %576 = vector.extract_strided_slice %565 {offsets = [0, 128], sizes = [1, 128], strides = [1, 1]} : vector<1x256xf32> to vector<1x128xf32>
    %577 = arith.mulf %576, %552 : vector<1x128xf32>
    %578 = vector.extract_strided_slice %565 {offsets = [0, 0], sizes = [1, 128], strides = [1, 1]} : vector<1x256xf32> to vector<1x128xf32>
    %579 = arith.mulf %578, %567 : vector<1x128xf32>
    %580 = arith.addf %577, %579 : vector<1x128xf32>
    %581 = math.tanh %580 : vector<1x128xf32>
    %582 = arith.mulf %575, %581 : vector<1x128xf32>
    %583 = arith.truncf %582 : vector<1x128xf32> to vector<1x128xbf16>
    %cst_161 = arith.constant dense<0.000000e+00> : vector<1x512xf32>
    %584 = tpu.matmul %583, %498, %cst_161 {dimension_numbers = #tpu.dot_dimension_numbers<[1], [0], [0], [1], [0, 0, 1, 1], [], []>} : vector<1x128xbf16>, vector<128x512xbf16>, vector<1x512xf32> -> vector<1x512xf32>
    %585 = arith.addf %584, %497 : vector<1x512xf32>
    %586 = vector.extract_strided_slice %585 {offsets = [0, 0], sizes = [1, 256], strides = [1, 1]} : vector<1x512xf32> to vector<1x256xf32>
    %cst_162 = arith.constant 5.000000e-01 : f32
    %587 = vector.broadcast %cst_162 : f32 to vector<1x256xf32>
    %588 = arith.mulf %587, %586 : vector<1x256xf32>
    %589 = math.tanh %588 : vector<1x256xf32>
    %cst_163 = arith.constant 5.000000e-01 : f32
    %590 = vector.broadcast %cst_163 : f32 to vector<1x256xf32>
    %591 = arith.mulf %590, %589 : vector<1x256xf32>
    %cst_164 = arith.constant 5.000000e-01 : f32
    %592 = vector.broadcast %cst_164 : f32 to vector<1x256xf32>
    %593 = arith.addf %591, %592 : vector<1x256xf32>
    %594 = vector.extract_strided_slice %585 {offsets = [0, 256], sizes = [1, 128], strides = [1, 1]} : vector<1x512xf32> to vector<1x128xf32>
    %595 = math.tanh %594 : vector<1x128xf32>
    %596 = vector.extract_strided_slice %585 {offsets = [0, 384], sizes = [1, 128], strides = [1, 1]} : vector<1x512xf32> to vector<1x128xf32>
    %cst_165 = arith.constant 5.000000e-01 : f32
    %597 = vector.broadcast %cst_165 : f32 to vector<1x128xf32>
    %598 = arith.mulf %597, %596 : vector<1x128xf32>
    %599 = math.tanh %598 : vector<1x128xf32>
    %cst_166 = arith.constant 5.000000e-01 : f32
    %600 = vector.broadcast %cst_166 : f32 to vector<1x128xf32>
    %601 = arith.mulf %600, %599 : vector<1x128xf32>
    %cst_167 = arith.constant 5.000000e-01 : f32
    %602 = vector.broadcast %cst_167 : f32 to vector<1x128xf32>
    %603 = arith.addf %601, %602 : vector<1x128xf32>
    %604 = vector.extract_strided_slice %593 {offsets = [0, 128], sizes = [1, 128], strides = [1, 1]} : vector<1x256xf32> to vector<1x128xf32>
    %605 = arith.mulf %604, %580 : vector<1x128xf32>
    %606 = vector.extract_strided_slice %593 {offsets = [0, 0], sizes = [1, 128], strides = [1, 1]} : vector<1x256xf32> to vector<1x128xf32>
    %607 = arith.mulf %606, %595 : vector<1x128xf32>
    %608 = arith.addf %605, %607 : vector<1x128xf32>
    %609 = math.tanh %608 : vector<1x128xf32>
    %610 = arith.mulf %603, %609 : vector<1x128xf32>
    %611 = arith.truncf %610 : vector<1x128xf32> to vector<1x128xbf16>
    %cst_168 = arith.constant dense<0.000000e+00> : vector<1x512xf32>
    %612 = tpu.matmul %611, %498, %cst_168 {dimension_numbers = #tpu.dot_dimension_numbers<[1], [0], [0], [1], [0, 0, 1, 1], [], []>} : vector<1x128xbf16>, vector<128x512xbf16>, vector<1x512xf32> -> vector<1x512xf32>
    %613 = arith.addf %612, %497 : vector<1x512xf32>
    %614 = vector.extract_strided_slice %613 {offsets = [0, 0], sizes = [1, 256], strides = [1, 1]} : vector<1x512xf32> to vector<1x256xf32>
    %cst_169 = arith.constant 5.000000e-01 : f32
    %615 = vector.broadcast %cst_169 : f32 to vector<1x256xf32>
    %616 = arith.mulf %615, %614 : vector<1x256xf32>
    %617 = math.tanh %616 : vector<1x256xf32>
    %cst_170 = arith.constant 5.000000e-01 : f32
    %618 = vector.broadcast %cst_170 : f32 to vector<1x256xf32>
    %619 = arith.mulf %618, %617 : vector<1x256xf32>
    %cst_171 = arith.constant 5.000000e-01 : f32
    %620 = vector.broadcast %cst_171 : f32 to vector<1x256xf32>
    %621 = arith.addf %619, %620 : vector<1x256xf32>
    %622 = vector.extract_strided_slice %613 {offsets = [0, 256], sizes = [1, 128], strides = [1, 1]} : vector<1x512xf32> to vector<1x128xf32>
    %623 = math.tanh %622 : vector<1x128xf32>
    %624 = vector.extract_strided_slice %613 {offsets = [0, 384], sizes = [1, 128], strides = [1, 1]} : vector<1x512xf32> to vector<1x128xf32>
    %cst_172 = arith.constant 5.000000e-01 : f32
    %625 = vector.broadcast %cst_172 : f32 to vector<1x128xf32>
    %626 = arith.mulf %625, %624 : vector<1x128xf32>
    %627 = math.tanh %626 : vector<1x128xf32>
    %cst_173 = arith.constant 5.000000e-01 : f32
    %628 = vector.broadcast %cst_173 : f32 to vector<1x128xf32>
    %629 = arith.mulf %628, %627 : vector<1x128xf32>
    %cst_174 = arith.constant 5.000000e-01 : f32
    %630 = vector.broadcast %cst_174 : f32 to vector<1x128xf32>
    %631 = arith.addf %629, %630 : vector<1x128xf32>
    %632 = vector.extract_strided_slice %621 {offsets = [0, 128], sizes = [1, 128], strides = [1, 1]} : vector<1x256xf32> to vector<1x128xf32>
    %633 = arith.mulf %632, %608 : vector<1x128xf32>
    %634 = vector.extract_strided_slice %621 {offsets = [0, 0], sizes = [1, 128], strides = [1, 1]} : vector<1x256xf32> to vector<1x128xf32>
    %635 = arith.mulf %634, %623 : vector<1x128xf32>
    %636 = arith.addf %633, %635 : vector<1x128xf32>
    %637 = math.tanh %636 : vector<1x128xf32>
    %638 = arith.mulf %631, %637 : vector<1x128xf32>
    %639 = arith.truncf %638 : vector<1x128xf32> to vector<1x128xbf16>
    %cst_175 = arith.constant dense<0.000000e+00> : vector<1x512xf32>
    %640 = tpu.matmul %639, %498, %cst_175 {dimension_numbers = #tpu.dot_dimension_numbers<[1], [0], [0], [1], [0, 0, 1, 1], [], []>} : vector<1x128xbf16>, vector<128x512xbf16>, vector<1x512xf32> -> vector<1x512xf32>
    %641 = arith.addf %640, %497 : vector<1x512xf32>
    %642 = vector.extract_strided_slice %641 {offsets = [0, 0], sizes = [1, 256], strides = [1, 1]} : vector<1x512xf32> to vector<1x256xf32>
    %cst_176 = arith.constant 5.000000e-01 : f32
    %643 = vector.broadcast %cst_176 : f32 to vector<1x256xf32>
    %644 = arith.mulf %643, %642 : vector<1x256xf32>
    %645 = math.tanh %644 : vector<1x256xf32>
    %cst_177 = arith.constant 5.000000e-01 : f32
    %646 = vector.broadcast %cst_177 : f32 to vector<1x256xf32>
    %647 = arith.mulf %646, %645 : vector<1x256xf32>
    %cst_178 = arith.constant 5.000000e-01 : f32
    %648 = vector.broadcast %cst_178 : f32 to vector<1x256xf32>
    %649 = arith.addf %647, %648 : vector<1x256xf32>
    %650 = vector.extract_strided_slice %641 {offsets = [0, 256], sizes = [1, 128], strides = [1, 1]} : vector<1x512xf32> to vector<1x128xf32>
    %651 = math.tanh %650 : vector<1x128xf32>
    %652 = vector.extract_strided_slice %641 {offsets = [0, 384], sizes = [1, 128], strides = [1, 1]} : vector<1x512xf32> to vector<1x128xf32>
    %cst_179 = arith.constant 5.000000e-01 : f32
    %653 = vector.broadcast %cst_179 : f32 to vector<1x128xf32>
    %654 = arith.mulf %653, %652 : vector<1x128xf32>
    %655 = math.tanh %654 : vector<1x128xf32>
    %cst_180 = arith.constant 5.000000e-01 : f32
    %656 = vector.broadcast %cst_180 : f32 to vector<1x128xf32>
    %657 = arith.mulf %656, %655 : vector<1x128xf32>
    %cst_181 = arith.constant 5.000000e-01 : f32
    %658 = vector.broadcast %cst_181 : f32 to vector<1x128xf32>
    %659 = arith.addf %657, %658 : vector<1x128xf32>
    %660 = vector.extract_strided_slice %649 {offsets = [0, 128], sizes = [1, 128], strides = [1, 1]} : vector<1x256xf32> to vector<1x128xf32>
    %661 = arith.mulf %660, %636 : vector<1x128xf32>
    %662 = vector.extract_strided_slice %649 {offsets = [0, 0], sizes = [1, 128], strides = [1, 1]} : vector<1x256xf32> to vector<1x128xf32>
    %663 = arith.mulf %662, %651 : vector<1x128xf32>
    %664 = arith.addf %661, %663 : vector<1x128xf32>
    %665 = math.tanh %664 : vector<1x128xf32>
    %666 = arith.mulf %659, %665 : vector<1x128xf32>
    %667 = arith.truncf %666 : vector<1x128xf32> to vector<1x128xbf16>
    %cst_182 = arith.constant dense<0.000000e+00> : vector<1x512xf32>
    %668 = tpu.matmul %667, %498, %cst_182 {dimension_numbers = #tpu.dot_dimension_numbers<[1], [0], [0], [1], [0, 0, 1, 1], [], []>} : vector<1x128xbf16>, vector<128x512xbf16>, vector<1x512xf32> -> vector<1x512xf32>
    %669 = arith.addf %668, %497 : vector<1x512xf32>
    %670 = vector.extract_strided_slice %669 {offsets = [0, 0], sizes = [1, 256], strides = [1, 1]} : vector<1x512xf32> to vector<1x256xf32>
    %cst_183 = arith.constant 5.000000e-01 : f32
    %671 = vector.broadcast %cst_183 : f32 to vector<1x256xf32>
    %672 = arith.mulf %671, %670 : vector<1x256xf32>
    %673 = math.tanh %672 : vector<1x256xf32>
    %cst_184 = arith.constant 5.000000e-01 : f32
    %674 = vector.broadcast %cst_184 : f32 to vector<1x256xf32>
    %675 = arith.mulf %674, %673 : vector<1x256xf32>
    %cst_185 = arith.constant 5.000000e-01 : f32
    %676 = vector.broadcast %cst_185 : f32 to vector<1x256xf32>
    %677 = arith.addf %675, %676 : vector<1x256xf32>
    %678 = vector.extract_strided_slice %669 {offsets = [0, 256], sizes = [1, 128], strides = [1, 1]} : vector<1x512xf32> to vector<1x128xf32>
    %679 = math.tanh %678 : vector<1x128xf32>
    %680 = vector.extract_strided_slice %669 {offsets = [0, 384], sizes = [1, 128], strides = [1, 1]} : vector<1x512xf32> to vector<1x128xf32>
    %cst_186 = arith.constant 5.000000e-01 : f32
    %681 = vector.broadcast %cst_186 : f32 to vector<1x128xf32>
    %682 = arith.mulf %681, %680 : vector<1x128xf32>
    %683 = math.tanh %682 : vector<1x128xf32>
    %cst_187 = arith.constant 5.000000e-01 : f32
    %684 = vector.broadcast %cst_187 : f32 to vector<1x128xf32>
    %685 = arith.mulf %684, %683 : vector<1x128xf32>
    %cst_188 = arith.constant 5.000000e-01 : f32
    %686 = vector.broadcast %cst_188 : f32 to vector<1x128xf32>
    %687 = arith.addf %685, %686 : vector<1x128xf32>
    %688 = vector.extract_strided_slice %677 {offsets = [0, 128], sizes = [1, 128], strides = [1, 1]} : vector<1x256xf32> to vector<1x128xf32>
    %689 = arith.mulf %688, %664 : vector<1x128xf32>
    %690 = vector.extract_strided_slice %677 {offsets = [0, 0], sizes = [1, 128], strides = [1, 1]} : vector<1x256xf32> to vector<1x128xf32>
    %691 = arith.mulf %690, %679 : vector<1x128xf32>
    %692 = arith.addf %689, %691 : vector<1x128xf32>
    %693 = math.tanh %692 : vector<1x128xf32>
    %694 = arith.mulf %687, %693 : vector<1x128xf32>
    %695 = arith.truncf %694 : vector<1x128xf32> to vector<1x128xbf16>
    %cst_189 = arith.constant dense<0.000000e+00> : vector<1x512xf32>
    %696 = tpu.matmul %695, %498, %cst_189 {dimension_numbers = #tpu.dot_dimension_numbers<[1], [0], [0], [1], [0, 0, 1, 1], [], []>} : vector<1x128xbf16>, vector<128x512xbf16>, vector<1x512xf32> -> vector<1x512xf32>
    %697 = arith.addf %696, %497 : vector<1x512xf32>
    %698 = vector.extract_strided_slice %697 {offsets = [0, 0], sizes = [1, 256], strides = [1, 1]} : vector<1x512xf32> to vector<1x256xf32>
    %cst_190 = arith.constant 5.000000e-01 : f32
    %699 = vector.broadcast %cst_190 : f32 to vector<1x256xf32>
    %700 = arith.mulf %699, %698 : vector<1x256xf32>
    %701 = math.tanh %700 : vector<1x256xf32>
    %cst_191 = arith.constant 5.000000e-01 : f32
    %702 = vector.broadcast %cst_191 : f32 to vector<1x256xf32>
    %703 = arith.mulf %702, %701 : vector<1x256xf32>
    %cst_192 = arith.constant 5.000000e-01 : f32
    %704 = vector.broadcast %cst_192 : f32 to vector<1x256xf32>
    %705 = arith.addf %703, %704 : vector<1x256xf32>
    %706 = vector.extract_strided_slice %697 {offsets = [0, 256], sizes = [1, 128], strides = [1, 1]} : vector<1x512xf32> to vector<1x128xf32>
    %707 = math.tanh %706 : vector<1x128xf32>
    %708 = vector.extract_strided_slice %697 {offsets = [0, 384], sizes = [1, 128], strides = [1, 1]} : vector<1x512xf32> to vector<1x128xf32>
    %cst_193 = arith.constant 5.000000e-01 : f32
    %709 = vector.broadcast %cst_193 : f32 to vector<1x128xf32>
    %710 = arith.mulf %709, %708 : vector<1x128xf32>
    %711 = math.tanh %710 : vector<1x128xf32>
    %cst_194 = arith.constant 5.000000e-01 : f32
    %712 = vector.broadcast %cst_194 : f32 to vector<1x128xf32>
    %713 = arith.mulf %712, %711 : vector<1x128xf32>
    %cst_195 = arith.constant 5.000000e-01 : f32
    %714 = vector.broadcast %cst_195 : f32 to vector<1x128xf32>
    %715 = arith.addf %713, %714 : vector<1x128xf32>
    %716 = vector.extract_strided_slice %705 {offsets = [0, 128], sizes = [1, 128], strides = [1, 1]} : vector<1x256xf32> to vector<1x128xf32>
    %717 = arith.mulf %716, %692 : vector<1x128xf32>
    %718 = vector.extract_strided_slice %705 {offsets = [0, 0], sizes = [1, 128], strides = [1, 1]} : vector<1x256xf32> to vector<1x128xf32>
    %719 = arith.mulf %718, %707 : vector<1x128xf32>
    %720 = arith.addf %717, %719 : vector<1x128xf32>
    %721 = math.tanh %720 : vector<1x128xf32>
    %722 = arith.mulf %715, %721 : vector<1x128xf32>
    %c0_196 = arith.constant 0 : index
    %c0_197 = arith.constant 0 : index
    %723 = vector.load %arg10[%c0_196, %c0_197] : memref<128x512xbf16, #tpu.memory_space<vmem>>, vector<128x512xbf16>
    %c0_198 = arith.constant 0 : index
    %c0_199 = arith.constant 0 : index
    %724 = vector.load %arg11[%c0_198, %c0_199] : memref<128x512xbf16, #tpu.memory_space<vmem>>, vector<128x512xbf16>
    %c0_200 = arith.constant 0 : index
    %c0_201 = arith.constant 0 : index
    %725 = vector.load %arg12[%c0_200, %c0_201] : memref<1x512xf32, #tpu.memory_space<vmem>>, vector<1x512xf32>
    %726 = arith.truncf %526 : vector<1x128xf32> to vector<1x128xbf16>
    %cst_202 = arith.constant dense<0.000000e+00> : vector<1x512xf32>
    %727 = tpu.matmul %726, %723, %cst_202 {dimension_numbers = #tpu.dot_dimension_numbers<[1], [0], [0], [1], [0, 0, 1, 1], [], []>} : vector<1x128xbf16>, vector<128x512xbf16>, vector<1x512xf32> -> vector<1x512xf32>
    %728 = arith.addf %727, %725 : vector<1x512xf32>
    %729 = arith.truncf %0 : vector<1x128xf32> to vector<1x128xbf16>
    %cst_203 = arith.constant dense<0.000000e+00> : vector<1x512xf32>
    %730 = tpu.matmul %729, %724, %cst_203 {dimension_numbers = #tpu.dot_dimension_numbers<[1], [0], [0], [1], [0, 0, 1, 1], [], []>} : vector<1x128xbf16>, vector<128x512xbf16>, vector<1x512xf32> -> vector<1x512xf32>
    %731 = arith.addf %730, %728 : vector<1x512xf32>
    %732 = vector.extract_strided_slice %731 {offsets = [0, 0], sizes = [1, 256], strides = [1, 1]} : vector<1x512xf32> to vector<1x256xf32>
    %cst_204 = arith.constant 5.000000e-01 : f32
    %733 = vector.broadcast %cst_204 : f32 to vector<1x256xf32>
    %734 = arith.mulf %733, %732 : vector<1x256xf32>
    %735 = math.tanh %734 : vector<1x256xf32>
    %cst_205 = arith.constant 5.000000e-01 : f32
    %736 = vector.broadcast %cst_205 : f32 to vector<1x256xf32>
    %737 = arith.mulf %736, %735 : vector<1x256xf32>
    %cst_206 = arith.constant 5.000000e-01 : f32
    %738 = vector.broadcast %cst_206 : f32 to vector<1x256xf32>
    %739 = arith.addf %737, %738 : vector<1x256xf32>
    %740 = vector.extract_strided_slice %731 {offsets = [0, 256], sizes = [1, 128], strides = [1, 1]} : vector<1x512xf32> to vector<1x128xf32>
    %741 = math.tanh %740 : vector<1x128xf32>
    %742 = vector.extract_strided_slice %731 {offsets = [0, 384], sizes = [1, 128], strides = [1, 1]} : vector<1x512xf32> to vector<1x128xf32>
    %cst_207 = arith.constant 5.000000e-01 : f32
    %743 = vector.broadcast %cst_207 : f32 to vector<1x128xf32>
    %744 = arith.mulf %743, %742 : vector<1x128xf32>
    %745 = math.tanh %744 : vector<1x128xf32>
    %cst_208 = arith.constant 5.000000e-01 : f32
    %746 = vector.broadcast %cst_208 : f32 to vector<1x128xf32>
    %747 = arith.mulf %746, %745 : vector<1x128xf32>
    %cst_209 = arith.constant 5.000000e-01 : f32
    %748 = vector.broadcast %cst_209 : f32 to vector<1x128xf32>
    %749 = arith.addf %747, %748 : vector<1x128xf32>
    %750 = vector.extract_strided_slice %739 {offsets = [0, 128], sizes = [1, 128], strides = [1, 1]} : vector<1x256xf32> to vector<1x128xf32>
    %751 = arith.mulf %750, %0 : vector<1x128xf32>
    %752 = vector.extract_strided_slice %739 {offsets = [0, 0], sizes = [1, 128], strides = [1, 1]} : vector<1x256xf32> to vector<1x128xf32>
    %753 = arith.mulf %752, %741 : vector<1x128xf32>
    %754 = arith.addf %751, %753 : vector<1x128xf32>
    %755 = math.tanh %754 : vector<1x128xf32>
    %756 = arith.mulf %749, %755 : vector<1x128xf32>
    %757 = arith.truncf %554 : vector<1x128xf32> to vector<1x128xbf16>
    %cst_210 = arith.constant dense<0.000000e+00> : vector<1x512xf32>
    %758 = tpu.matmul %757, %723, %cst_210 {dimension_numbers = #tpu.dot_dimension_numbers<[1], [0], [0], [1], [0, 0, 1, 1], [], []>} : vector<1x128xbf16>, vector<128x512xbf16>, vector<1x512xf32> -> vector<1x512xf32>
    %759 = arith.addf %758, %725 : vector<1x512xf32>
    %760 = arith.truncf %756 : vector<1x128xf32> to vector<1x128xbf16>
    %cst_211 = arith.constant dense<0.000000e+00> : vector<1x512xf32>
    %761 = tpu.matmul %760, %724, %cst_211 {dimension_numbers = #tpu.dot_dimension_numbers<[1], [0], [0], [1], [0, 0, 1, 1], [], []>} : vector<1x128xbf16>, vector<128x512xbf16>, vector<1x512xf32> -> vector<1x512xf32>
    %762 = arith.addf %761, %759 : vector<1x512xf32>
    %763 = vector.extract_strided_slice %762 {offsets = [0, 0], sizes = [1, 256], strides = [1, 1]} : vector<1x512xf32> to vector<1x256xf32>
    %cst_212 = arith.constant 5.000000e-01 : f32
    %764 = vector.broadcast %cst_212 : f32 to vector<1x256xf32>
    %765 = arith.mulf %764, %763 : vector<1x256xf32>
    %766 = math.tanh %765 : vector<1x256xf32>
    %cst_213 = arith.constant 5.000000e-01 : f32
    %767 = vector.broadcast %cst_213 : f32 to vector<1x256xf32>
    %768 = arith.mulf %767, %766 : vector<1x256xf32>
    %cst_214 = arith.constant 5.000000e-01 : f32
    %769 = vector.broadcast %cst_214 : f32 to vector<1x256xf32>
    %770 = arith.addf %768, %769 : vector<1x256xf32>
    %771 = vector.extract_strided_slice %762 {offsets = [0, 256], sizes = [1, 128], strides = [1, 1]} : vector<1x512xf32> to vector<1x128xf32>
    %772 = math.tanh %771 : vector<1x128xf32>
    %773 = vector.extract_strided_slice %762 {offsets = [0, 384], sizes = [1, 128], strides = [1, 1]} : vector<1x512xf32> to vector<1x128xf32>
    %cst_215 = arith.constant 5.000000e-01 : f32
    %774 = vector.broadcast %cst_215 : f32 to vector<1x128xf32>
    %775 = arith.mulf %774, %773 : vector<1x128xf32>
    %776 = math.tanh %775 : vector<1x128xf32>
    %cst_216 = arith.constant 5.000000e-01 : f32
    %777 = vector.broadcast %cst_216 : f32 to vector<1x128xf32>
    %778 = arith.mulf %777, %776 : vector<1x128xf32>
    %cst_217 = arith.constant 5.000000e-01 : f32
    %779 = vector.broadcast %cst_217 : f32 to vector<1x128xf32>
    %780 = arith.addf %778, %779 : vector<1x128xf32>
    %781 = vector.extract_strided_slice %770 {offsets = [0, 128], sizes = [1, 128], strides = [1, 1]} : vector<1x256xf32> to vector<1x128xf32>
    %782 = arith.mulf %781, %754 : vector<1x128xf32>
    %783 = vector.extract_strided_slice %770 {offsets = [0, 0], sizes = [1, 128], strides = [1, 1]} : vector<1x256xf32> to vector<1x128xf32>
    %784 = arith.mulf %783, %772 : vector<1x128xf32>
    %785 = arith.addf %782, %784 : vector<1x128xf32>
    %786 = math.tanh %785 : vector<1x128xf32>
    %787 = arith.mulf %780, %786 : vector<1x128xf32>
    %788 = arith.truncf %582 : vector<1x128xf32> to vector<1x128xbf16>
    %cst_218 = arith.constant dense<0.000000e+00> : vector<1x512xf32>
    %789 = tpu.matmul %788, %723, %cst_218 {dimension_numbers = #tpu.dot_dimension_numbers<[1], [0], [0], [1], [0, 0, 1, 1], [], []>} : vector<1x128xbf16>, vector<128x512xbf16>, vector<1x512xf32> -> vector<1x512xf32>
    %790 = arith.addf %789, %725 : vector<1x512xf32>
    %791 = arith.truncf %787 : vector<1x128xf32> to vector<1x128xbf16>
    %cst_219 = arith.constant dense<0.000000e+00> : vector<1x512xf32>
    %792 = tpu.matmul %791, %724, %cst_219 {dimension_numbers = #tpu.dot_dimension_numbers<[1], [0], [0], [1], [0, 0, 1, 1], [], []>} : vector<1x128xbf16>, vector<128x512xbf16>, vector<1x512xf32> -> vector<1x512xf32>
    %793 = arith.addf %792, %790 : vector<1x512xf32>
    %794 = vector.extract_strided_slice %793 {offsets = [0, 0], sizes = [1, 256], strides = [1, 1]} : vector<1x512xf32> to vector<1x256xf32>
    %cst_220 = arith.constant 5.000000e-01 : f32
    %795 = vector.broadcast %cst_220 : f32 to vector<1x256xf32>
    %796 = arith.mulf %795, %794 : vector<1x256xf32>
    %797 = math.tanh %796 : vector<1x256xf32>
    %cst_221 = arith.constant 5.000000e-01 : f32
    %798 = vector.broadcast %cst_221 : f32 to vector<1x256xf32>
    %799 = arith.mulf %798, %797 : vector<1x256xf32>
    %cst_222 = arith.constant 5.000000e-01 : f32
    %800 = vector.broadcast %cst_222 : f32 to vector<1x256xf32>
    %801 = arith.addf %799, %800 : vector<1x256xf32>
    %802 = vector.extract_strided_slice %793 {offsets = [0, 256], sizes = [1, 128], strides = [1, 1]} : vector<1x512xf32> to vector<1x128xf32>
    %803 = math.tanh %802 : vector<1x128xf32>
    %804 = vector.extract_strided_slice %793 {offsets = [0, 384], sizes = [1, 128], strides = [1, 1]} : vector<1x512xf32> to vector<1x128xf32>
    %cst_223 = arith.constant 5.000000e-01 : f32
    %805 = vector.broadcast %cst_223 : f32 to vector<1x128xf32>
    %806 = arith.mulf %805, %804 : vector<1x128xf32>
    %807 = math.tanh %806 : vector<1x128xf32>
    %cst_224 = arith.constant 5.000000e-01 : f32
    %808 = vector.broadcast %cst_224 : f32 to vector<1x128xf32>
    %809 = arith.mulf %808, %807 : vector<1x128xf32>
    %cst_225 = arith.constant 5.000000e-01 : f32
    %810 = vector.broadcast %cst_225 : f32 to vector<1x128xf32>
    %811 = arith.addf %809, %810 : vector<1x128xf32>
    %812 = vector.extract_strided_slice %801 {offsets = [0, 128], sizes = [1, 128], strides = [1, 1]} : vector<1x256xf32> to vector<1x128xf32>
    %813 = arith.mulf %812, %785 : vector<1x128xf32>
    %814 = vector.extract_strided_slice %801 {offsets = [0, 0], sizes = [1, 128], strides = [1, 1]} : vector<1x256xf32> to vector<1x128xf32>
    %815 = arith.mulf %814, %803 : vector<1x128xf32>
    %816 = arith.addf %813, %815 : vector<1x128xf32>
    %817 = math.tanh %816 : vector<1x128xf32>
    %818 = arith.mulf %811, %817 : vector<1x128xf32>
    %819 = arith.truncf %610 : vector<1x128xf32> to vector<1x128xbf16>
    %cst_226 = arith.constant dense<0.000000e+00> : vector<1x512xf32>
    %820 = tpu.matmul %819, %723, %cst_226 {dimension_numbers = #tpu.dot_dimension_numbers<[1], [0], [0], [1], [0, 0, 1, 1], [], []>} : vector<1x128xbf16>, vector<128x512xbf16>, vector<1x512xf32> -> vector<1x512xf32>
    %821 = arith.addf %820, %725 : vector<1x512xf32>
    %822 = arith.truncf %818 : vector<1x128xf32> to vector<1x128xbf16>
    %cst_227 = arith.constant dense<0.000000e+00> : vector<1x512xf32>
    %823 = tpu.matmul %822, %724, %cst_227 {dimension_numbers = #tpu.dot_dimension_numbers<[1], [0], [0], [1], [0, 0, 1, 1], [], []>} : vector<1x128xbf16>, vector<128x512xbf16>, vector<1x512xf32> -> vector<1x512xf32>
    %824 = arith.addf %823, %821 : vector<1x512xf32>
    %825 = vector.extract_strided_slice %824 {offsets = [0, 0], sizes = [1, 256], strides = [1, 1]} : vector<1x512xf32> to vector<1x256xf32>
    %cst_228 = arith.constant 5.000000e-01 : f32
    %826 = vector.broadcast %cst_228 : f32 to vector<1x256xf32>
    %827 = arith.mulf %826, %825 : vector<1x256xf32>
    %828 = math.tanh %827 : vector<1x256xf32>
    %cst_229 = arith.constant 5.000000e-01 : f32
    %829 = vector.broadcast %cst_229 : f32 to vector<1x256xf32>
    %830 = arith.mulf %829, %828 : vector<1x256xf32>
    %cst_230 = arith.constant 5.000000e-01 : f32
    %831 = vector.broadcast %cst_230 : f32 to vector<1x256xf32>
    %832 = arith.addf %830, %831 : vector<1x256xf32>
    %833 = vector.extract_strided_slice %824 {offsets = [0, 256], sizes = [1, 128], strides = [1, 1]} : vector<1x512xf32> to vector<1x128xf32>
    %834 = math.tanh %833 : vector<1x128xf32>
    %835 = vector.extract_strided_slice %824 {offsets = [0, 384], sizes = [1, 128], strides = [1, 1]} : vector<1x512xf32> to vector<1x128xf32>
    %cst_231 = arith.constant 5.000000e-01 : f32
    %836 = vector.broadcast %cst_231 : f32 to vector<1x128xf32>
    %837 = arith.mulf %836, %835 : vector<1x128xf32>
    %838 = math.tanh %837 : vector<1x128xf32>
    %cst_232 = arith.constant 5.000000e-01 : f32
    %839 = vector.broadcast %cst_232 : f32 to vector<1x128xf32>
    %840 = arith.mulf %839, %838 : vector<1x128xf32>
    %cst_233 = arith.constant 5.000000e-01 : f32
    %841 = vector.broadcast %cst_233 : f32 to vector<1x128xf32>
    %842 = arith.addf %840, %841 : vector<1x128xf32>
    %843 = vector.extract_strided_slice %832 {offsets = [0, 128], sizes = [1, 128], strides = [1, 1]} : vector<1x256xf32> to vector<1x128xf32>
    %844 = arith.mulf %843, %816 : vector<1x128xf32>
    %845 = vector.extract_strided_slice %832 {offsets = [0, 0], sizes = [1, 128], strides = [1, 1]} : vector<1x256xf32> to vector<1x128xf32>
    %846 = arith.mulf %845, %834 : vector<1x128xf32>
    %847 = arith.addf %844, %846 : vector<1x128xf32>
    %848 = math.tanh %847 : vector<1x128xf32>
    %849 = arith.mulf %842, %848 : vector<1x128xf32>
    %850 = arith.truncf %638 : vector<1x128xf32> to vector<1x128xbf16>
    %cst_234 = arith.constant dense<0.000000e+00> : vector<1x512xf32>
    %851 = tpu.matmul %850, %723, %cst_234 {dimension_numbers = #tpu.dot_dimension_numbers<[1], [0], [0], [1], [0, 0, 1, 1], [], []>} : vector<1x128xbf16>, vector<128x512xbf16>, vector<1x512xf32> -> vector<1x512xf32>
    %852 = arith.addf %851, %725 : vector<1x512xf32>
    %853 = arith.truncf %849 : vector<1x128xf32> to vector<1x128xbf16>
    %cst_235 = arith.constant dense<0.000000e+00> : vector<1x512xf32>
    %854 = tpu.matmul %853, %724, %cst_235 {dimension_numbers = #tpu.dot_dimension_numbers<[1], [0], [0], [1], [0, 0, 1, 1], [], []>} : vector<1x128xbf16>, vector<128x512xbf16>, vector<1x512xf32> -> vector<1x512xf32>
    %855 = arith.addf %854, %852 : vector<1x512xf32>
    %856 = vector.extract_strided_slice %855 {offsets = [0, 0], sizes = [1, 256], strides = [1, 1]} : vector<1x512xf32> to vector<1x256xf32>
    %cst_236 = arith.constant 5.000000e-01 : f32
    %857 = vector.broadcast %cst_236 : f32 to vector<1x256xf32>
    %858 = arith.mulf %857, %856 : vector<1x256xf32>
    %859 = math.tanh %858 : vector<1x256xf32>
    %cst_237 = arith.constant 5.000000e-01 : f32
    %860 = vector.broadcast %cst_237 : f32 to vector<1x256xf32>
    %861 = arith.mulf %860, %859 : vector<1x256xf32>
    %cst_238 = arith.constant 5.000000e-01 : f32
    %862 = vector.broadcast %cst_238 : f32 to vector<1x256xf32>
    %863 = arith.addf %861, %862 : vector<1x256xf32>
    %864 = vector.extract_strided_slice %855 {offsets = [0, 256], sizes = [1, 128], strides = [1, 1]} : vector<1x512xf32> to vector<1x128xf32>
    %865 = math.tanh %864 : vector<1x128xf32>
    %866 = vector.extract_strided_slice %855 {offsets = [0, 384], sizes = [1, 128], strides = [1, 1]} : vector<1x512xf32> to vector<1x128xf32>
    %cst_239 = arith.constant 5.000000e-01 : f32
    %867 = vector.broadcast %cst_239 : f32 to vector<1x128xf32>
    %868 = arith.mulf %867, %866 : vector<1x128xf32>
    %869 = math.tanh %868 : vector<1x128xf32>
    %cst_240 = arith.constant 5.000000e-01 : f32
    %870 = vector.broadcast %cst_240 : f32 to vector<1x128xf32>
    %871 = arith.mulf %870, %869 : vector<1x128xf32>
    %cst_241 = arith.constant 5.000000e-01 : f32
    %872 = vector.broadcast %cst_241 : f32 to vector<1x128xf32>
    %873 = arith.addf %871, %872 : vector<1x128xf32>
    %874 = vector.extract_strided_slice %863 {offsets = [0, 128], sizes = [1, 128], strides = [1, 1]} : vector<1x256xf32> to vector<1x128xf32>
    %875 = arith.mulf %874, %847 : vector<1x128xf32>
    %876 = vector.extract_strided_slice %863 {offsets = [0, 0], sizes = [1, 128], strides = [1, 1]} : vector<1x256xf32> to vector<1x128xf32>
    %877 = arith.mulf %876, %865 : vector<1x128xf32>
    %878 = arith.addf %875, %877 : vector<1x128xf32>
    %879 = math.tanh %878 : vector<1x128xf32>
    %880 = arith.mulf %873, %879 : vector<1x128xf32>
    %881 = arith.truncf %666 : vector<1x128xf32> to vector<1x128xbf16>
    %cst_242 = arith.constant dense<0.000000e+00> : vector<1x512xf32>
    %882 = tpu.matmul %881, %723, %cst_242 {dimension_numbers = #tpu.dot_dimension_numbers<[1], [0], [0], [1], [0, 0, 1, 1], [], []>} : vector<1x128xbf16>, vector<128x512xbf16>, vector<1x512xf32> -> vector<1x512xf32>
    %883 = arith.addf %882, %725 : vector<1x512xf32>
    %884 = arith.truncf %880 : vector<1x128xf32> to vector<1x128xbf16>
    %cst_243 = arith.constant dense<0.000000e+00> : vector<1x512xf32>
    %885 = tpu.matmul %884, %724, %cst_243 {dimension_numbers = #tpu.dot_dimension_numbers<[1], [0], [0], [1], [0, 0, 1, 1], [], []>} : vector<1x128xbf16>, vector<128x512xbf16>, vector<1x512xf32> -> vector<1x512xf32>
    %886 = arith.addf %885, %883 : vector<1x512xf32>
    %887 = vector.extract_strided_slice %886 {offsets = [0, 0], sizes = [1, 256], strides = [1, 1]} : vector<1x512xf32> to vector<1x256xf32>
    %cst_244 = arith.constant 5.000000e-01 : f32
    %888 = vector.broadcast %cst_244 : f32 to vector<1x256xf32>
    %889 = arith.mulf %888, %887 : vector<1x256xf32>
    %890 = math.tanh %889 : vector<1x256xf32>
    %cst_245 = arith.constant 5.000000e-01 : f32
    %891 = vector.broadcast %cst_245 : f32 to vector<1x256xf32>
    %892 = arith.mulf %891, %890 : vector<1x256xf32>
    %cst_246 = arith.constant 5.000000e-01 : f32
    %893 = vector.broadcast %cst_246 : f32 to vector<1x256xf32>
    %894 = arith.addf %892, %893 : vector<1x256xf32>
    %895 = vector.extract_strided_slice %886 {offsets = [0, 256], sizes = [1, 128], strides = [1, 1]} : vector<1x512xf32> to vector<1x128xf32>
    %896 = math.tanh %895 : vector<1x128xf32>
    %897 = vector.extract_strided_slice %886 {offsets = [0, 384], sizes = [1, 128], strides = [1, 1]} : vector<1x512xf32> to vector<1x128xf32>
    %cst_247 = arith.constant 5.000000e-01 : f32
    %898 = vector.broadcast %cst_247 : f32 to vector<1x128xf32>
    %899 = arith.mulf %898, %897 : vector<1x128xf32>
    %900 = math.tanh %899 : vector<1x128xf32>
    %cst_248 = arith.constant 5.000000e-01 : f32
    %901 = vector.broadcast %cst_248 : f32 to vector<1x128xf32>
    %902 = arith.mulf %901, %900 : vector<1x128xf32>
    %cst_249 = arith.constant 5.000000e-01 : f32
    %903 = vector.broadcast %cst_249 : f32 to vector<1x128xf32>
    %904 = arith.addf %902, %903 : vector<1x128xf32>
    %905 = vector.extract_strided_slice %894 {offsets = [0, 128], sizes = [1, 128], strides = [1, 1]} : vector<1x256xf32> to vector<1x128xf32>
    %906 = arith.mulf %905, %878 : vector<1x128xf32>
    %907 = vector.extract_strided_slice %894 {offsets = [0, 0], sizes = [1, 128], strides = [1, 1]} : vector<1x256xf32> to vector<1x128xf32>
    %908 = arith.mulf %907, %896 : vector<1x128xf32>
    %909 = arith.addf %906, %908 : vector<1x128xf32>
    %910 = math.tanh %909 : vector<1x128xf32>
    %911 = arith.mulf %904, %910 : vector<1x128xf32>
    %912 = arith.truncf %694 : vector<1x128xf32> to vector<1x128xbf16>
    %cst_250 = arith.constant dense<0.000000e+00> : vector<1x512xf32>
    %913 = tpu.matmul %912, %723, %cst_250 {dimension_numbers = #tpu.dot_dimension_numbers<[1], [0], [0], [1], [0, 0, 1, 1], [], []>} : vector<1x128xbf16>, vector<128x512xbf16>, vector<1x512xf32> -> vector<1x512xf32>
    %914 = arith.addf %913, %725 : vector<1x512xf32>
    %915 = arith.truncf %911 : vector<1x128xf32> to vector<1x128xbf16>
    %cst_251 = arith.constant dense<0.000000e+00> : vector<1x512xf32>
    %916 = tpu.matmul %915, %724, %cst_251 {dimension_numbers = #tpu.dot_dimension_numbers<[1], [0], [0], [1], [0, 0, 1, 1], [], []>} : vector<1x128xbf16>, vector<128x512xbf16>, vector<1x512xf32> -> vector<1x512xf32>
    %917 = arith.addf %916, %914 : vector<1x512xf32>
    %918 = vector.extract_strided_slice %917 {offsets = [0, 0], sizes = [1, 256], strides = [1, 1]} : vector<1x512xf32> to vector<1x256xf32>
    %cst_252 = arith.constant 5.000000e-01 : f32
    %919 = vector.broadcast %cst_252 : f32 to vector<1x256xf32>
    %920 = arith.mulf %919, %918 : vector<1x256xf32>
    %921 = math.tanh %920 : vector<1x256xf32>
    %cst_253 = arith.constant 5.000000e-01 : f32
    %922 = vector.broadcast %cst_253 : f32 to vector<1x256xf32>
    %923 = arith.mulf %922, %921 : vector<1x256xf32>
    %cst_254 = arith.constant 5.000000e-01 : f32
    %924 = vector.broadcast %cst_254 : f32 to vector<1x256xf32>
    %925 = arith.addf %923, %924 : vector<1x256xf32>
    %926 = vector.extract_strided_slice %917 {offsets = [0, 256], sizes = [1, 128], strides = [1, 1]} : vector<1x512xf32> to vector<1x128xf32>
    %927 = math.tanh %926 : vector<1x128xf32>
    %928 = vector.extract_strided_slice %917 {offsets = [0, 384], sizes = [1, 128], strides = [1, 1]} : vector<1x512xf32> to vector<1x128xf32>
    %cst_255 = arith.constant 5.000000e-01 : f32
    %929 = vector.broadcast %cst_255 : f32 to vector<1x128xf32>
    %930 = arith.mulf %929, %928 : vector<1x128xf32>
    %931 = math.tanh %930 : vector<1x128xf32>
    %cst_256 = arith.constant 5.000000e-01 : f32
    %932 = vector.broadcast %cst_256 : f32 to vector<1x128xf32>
    %933 = arith.mulf %932, %931 : vector<1x128xf32>
    %cst_257 = arith.constant 5.000000e-01 : f32
    %934 = vector.broadcast %cst_257 : f32 to vector<1x128xf32>
    %935 = arith.addf %933, %934 : vector<1x128xf32>
    %936 = vector.extract_strided_slice %925 {offsets = [0, 128], sizes = [1, 128], strides = [1, 1]} : vector<1x256xf32> to vector<1x128xf32>
    %937 = arith.mulf %936, %909 : vector<1x128xf32>
    %938 = vector.extract_strided_slice %925 {offsets = [0, 0], sizes = [1, 128], strides = [1, 1]} : vector<1x256xf32> to vector<1x128xf32>
    %939 = arith.mulf %938, %927 : vector<1x128xf32>
    %940 = arith.addf %937, %939 : vector<1x128xf32>
    %941 = math.tanh %940 : vector<1x128xf32>
    %942 = arith.mulf %935, %941 : vector<1x128xf32>
    %943 = arith.truncf %722 : vector<1x128xf32> to vector<1x128xbf16>
    %cst_258 = arith.constant dense<0.000000e+00> : vector<1x512xf32>
    %944 = tpu.matmul %943, %723, %cst_258 {dimension_numbers = #tpu.dot_dimension_numbers<[1], [0], [0], [1], [0, 0, 1, 1], [], []>} : vector<1x128xbf16>, vector<128x512xbf16>, vector<1x512xf32> -> vector<1x512xf32>
    %945 = arith.addf %944, %725 : vector<1x512xf32>
    %946 = arith.truncf %942 : vector<1x128xf32> to vector<1x128xbf16>
    %cst_259 = arith.constant dense<0.000000e+00> : vector<1x512xf32>
    %947 = tpu.matmul %946, %724, %cst_259 {dimension_numbers = #tpu.dot_dimension_numbers<[1], [0], [0], [1], [0, 0, 1, 1], [], []>} : vector<1x128xbf16>, vector<128x512xbf16>, vector<1x512xf32> -> vector<1x512xf32>
    %948 = arith.addf %947, %945 : vector<1x512xf32>
    %949 = vector.extract_strided_slice %948 {offsets = [0, 0], sizes = [1, 256], strides = [1, 1]} : vector<1x512xf32> to vector<1x256xf32>
    %cst_260 = arith.constant 5.000000e-01 : f32
    %950 = vector.broadcast %cst_260 : f32 to vector<1x256xf32>
    %951 = arith.mulf %950, %949 : vector<1x256xf32>
    %952 = math.tanh %951 : vector<1x256xf32>
    %cst_261 = arith.constant 5.000000e-01 : f32
    %953 = vector.broadcast %cst_261 : f32 to vector<1x256xf32>
    %954 = arith.mulf %953, %952 : vector<1x256xf32>
    %cst_262 = arith.constant 5.000000e-01 : f32
    %955 = vector.broadcast %cst_262 : f32 to vector<1x256xf32>
    %956 = arith.addf %954, %955 : vector<1x256xf32>
    %957 = vector.extract_strided_slice %948 {offsets = [0, 256], sizes = [1, 128], strides = [1, 1]} : vector<1x512xf32> to vector<1x128xf32>
    %958 = math.tanh %957 : vector<1x128xf32>
    %959 = vector.extract_strided_slice %948 {offsets = [0, 384], sizes = [1, 128], strides = [1, 1]} : vector<1x512xf32> to vector<1x128xf32>
    %cst_263 = arith.constant 5.000000e-01 : f32
    %960 = vector.broadcast %cst_263 : f32 to vector<1x128xf32>
    %961 = arith.mulf %960, %959 : vector<1x128xf32>
    %962 = math.tanh %961 : vector<1x128xf32>
    %cst_264 = arith.constant 5.000000e-01 : f32
    %963 = vector.broadcast %cst_264 : f32 to vector<1x128xf32>
    %964 = arith.mulf %963, %962 : vector<1x128xf32>
    %cst_265 = arith.constant 5.000000e-01 : f32
    %965 = vector.broadcast %cst_265 : f32 to vector<1x128xf32>
    %966 = arith.addf %964, %965 : vector<1x128xf32>
    %967 = vector.extract_strided_slice %956 {offsets = [0, 128], sizes = [1, 128], strides = [1, 1]} : vector<1x256xf32> to vector<1x128xf32>
    %968 = arith.mulf %967, %940 : vector<1x128xf32>
    %969 = vector.extract_strided_slice %956 {offsets = [0, 0], sizes = [1, 128], strides = [1, 1]} : vector<1x256xf32> to vector<1x128xf32>
    %970 = arith.mulf %969, %958 : vector<1x128xf32>
    %971 = arith.addf %968, %970 : vector<1x128xf32>
    %972 = math.tanh %971 : vector<1x128xf32>
    %973 = arith.mulf %966, %972 : vector<1x128xf32>
    %974 = tpu.concatenate %756, %787, %818, %849, %880, %911, %942, %973 in 0 : vector<1x128xf32>, vector<1x128xf32>, vector<1x128xf32>, vector<1x128xf32>, vector<1x128xf32>, vector<1x128xf32>, vector<1x128xf32>, vector<1x128xf32> -> vector<8x128xf32>
    %c0_266 = arith.constant 0 : index
    %c0_267 = arith.constant 0 : index
    %975 = vector.load %arg13[%c0_266, %c0_267] : memref<128x1xf32, #tpu.memory_space<vmem>>, vector<128x1xf32>
    %cst_268 = arith.constant dense<0.000000e+00> : vector<8x1xf32>
    %976 = tpu.matmul %974, %975, %cst_268 {dimension_numbers = #tpu.dot_dimension_numbers<[1], [0], [0], [1], [0, 0, 1, 1], [], []>} : vector<8x128xf32>, vector<128x1xf32>, vector<8x1xf32> -> vector<8x1xf32>
    %c0_269 = arith.constant 0 : index
    %c0_270 = arith.constant 0 : index
    %977 = vector.load %arg14[%c0_269, %c0_270] : memref<1x1xf32, #tpu.memory_space<vmem>>, vector<1x1xf32>
    %978 = vector.broadcast %977 : vector<1x1xf32> to vector<8x1xf32>
    %979 = arith.addf %976, %978 : vector<8x1xf32>
    %c0_271 = arith.constant 0 : index
    %c0_272 = arith.constant 0 : index
    %980 = vector.load %arg15[%c0_271, %c0_272] : memref<8x1xf32, #tpu.memory_space<vmem>>, vector<8x1xf32>
    tpu.vector_store %arg15[%c0_271, %c0_272], %979 {strides = array<i32>} : memref<8x1xf32, #tpu.memory_space<vmem>>, vector<8x1xf32>,
    return
  }
}

</mosaic_0001>

<bundles_post_ra>
// kernel: tpu_custom_call.1
= control target key start
LH: loop header
LB: loop body
LE: loop exit
PB: predicated region body
PF: predicated region fallthrough
CT: control target
= control target key end

     0   :  { %s9228_s0 = inlined_call_operand.vmem [shape: f32[8,1], index: 0, kind: input, shape index: {}]   ;;  %s9229_s1 = inlined_call_operand.vmem [shape: f32[1,512], index: 1, kind: input, shape index: {}]   ;;  %s9230_s2 = inlined_call_operand.hbm [shape: bf16[128,512], index: 2, kind: input, shape index: {}]   ;;  %s9231_s3 = inlined_call_operand.vmem [shape: f32[1,512], index: 3, kind: input, shape index: {}]   ;;  %s9232_s4 = inlined_call_operand.hbm [shape: bf16[128,512], index: 4, kind: input, shape index: {}]   ;;  %s9233_s5 = inlined_call_operand.hbm [shape: bf16[128,512], index: 5, kind: input, shape index: {}]   ;;  %s9234_s6 = inlined_call_operand.vmem [shape: f32[1,512], index: 6, kind: input, shape index: {}]   ;;  %s9235_s7 = inlined_call_operand.hbm [shape: bf16[128,512], index: 7, kind: input, shape index: {}]   ;;  %s9236_s8 = inlined_call_operand.hbm [shape: bf16[128,512], index: 8, kind: input, shape index: {}]   ;;  %s9237_s9 = inlined_call_operand.vmem [shape: f32[1,512], index: 9, kind: input, shape index: {}]   ;;  %s9238_s10 = inlined_call_operand.hbm [shape: bf16[128,512], index: 10, kind: input, shape index: {}]   ;;  %s9239_s11 = inlined_call_operand.hbm [shape: bf16[128,512], index: 11, kind: input, shape index: {}]   ;;  %s9240_s12 = inlined_call_operand.vmem [shape: f32[1,512], index: 12, kind: input, shape index: {}]   ;;  %s9241_s13 = inlined_call_operand.vmem [shape: f32[128,1], index: 13, kind: input, shape index: {}]   ;;  %s9242_s14 = inlined_call_operand.<no memory space> [shape: f32[1,1], index: 14, kind: input, shape index: {}]   ;;  %s9243_s15 = inlined_call_operand.vmem [shape: f32[8,1], index: 15, kind: output, shape index: {}]  }
   0x1   :  { %v20_v0 = vstv %s9242_s14 }
   0x2   :  { %21 = vst [vmem:[#allocation2] sm:$0x1] %v20_v0 }
   0x3   :  { %22 = vsyncpa [#allocation4], 0 }
   0x4   :  { %23 = vsyncpa [#allocation6], 0 }
   0x5   :  { %24 = vsyncpa [#allocation9], 0 }
   0x6   :  { %25 = vsyncpa [#allocation12], 0  ;;  %s49_s22 = sshll.u32 %s9232_s4, 4  ;;  %s6498_s23 = smov [#allocation5]   ;;  %s50_s22 = int_to_ptr.hbm [resolvable:$true] %s49_s22 }
   0x7   :  { %s51_s24 = sshll.u32 %s6498_s23, 4  ;;  %s77_s27 = sshll.u32 %s9235_s7, 4  ;;  %s52_s24 = int_to_ptr.vmem [resolvable:$true] %s51_s24  ;;  %s78_s27 = int_to_ptr.hbm [resolvable:$true] %s77_s27 }
   0x8   :  { %s6499_s28 = smov 256   ;;  %s6500_s29 = smov 16  }
   0x9   :  { %57 = dma.hbm_to_vmem [thread:$0]  %s50_s22, 4096, %s52_s24, [#allocation6], %s6499_s28, %s6499_s28, %s6500_s29  }
   0xa   :  { %s6501_s14 = smov [#allocation8]   ;;  %s105_s4 = sshll.u32 %s9238_s10, 4  ;;  %s106_s4 = int_to_ptr.hbm [resolvable:$true] %s105_s4 }
   0xb   :  { %s79_s30 = sshll.u32 %s6501_s14, 4  ;;  %s34_s19 = sshll.u32 %s9230_s2, 4  ;;  %s80_s30 = int_to_ptr.vmem [resolvable:$true] %s79_s30  ;;  %s35_s19 = int_to_ptr.hbm [resolvable:$true] %s34_s19 }
   0xc   :  { %85 = dma.hbm_to_vmem [thread:$0]  %s78_s27, 4096, %s80_s30, [#allocation9], %s6499_s28, %s6499_s28, %s6500_s29  }
   0xd   :  { %s6502_s20 = smov [#allocation11]   ;;  %s6503_s22 = smov [#allocation3]  }
   0xe   :  { %s107_s21 = sshll.u32 %s6502_s20, 4  ;;  %s36_s10 = sshll.u32 %s6503_s22, 4  ;;  %s108_s21 = int_to_ptr.vmem [resolvable:$true] %s107_s21  ;;  %s37_s10 = int_to_ptr.vmem [resolvable:$true] %s36_s10 }
   0xf   :  { %113 = dma.hbm_to_vmem [thread:$0]  %s106_s4, 4096, %s108_s21, [#allocation12], %s6499_s28, %s6499_s28, %s6500_s29  }
  0x10   :  { %s62_s25 = sshll.u32 %s9233_s5, 4  ;;  %s90_s27 = sshll.u32 %s9236_s8, 4  ;;  %s63_s25 = int_to_ptr.hbm [resolvable:$true] %s62_s25  ;;  %s91_s27 = int_to_ptr.hbm [resolvable:$true] %s90_s27 }
  0x11   :  { %42 = dma.hbm_to_vmem [thread:$0]  %s35_s19, 4096, %s37_s10, [#allocation4], %s6499_s28, %s6499_s28, %s6500_s29  }
  0x12   :  { %s6504_s14 = smov [#allocation7]   ;;  %s6505_s16 = smov [#allocation10]  }
  0x13   :  { %s64_s30 = sshll.u32 %s6504_s14, 4  ;;  %s92_s5 = sshll.u32 %s6505_s16, 4  ;;  %s65_s30 = int_to_ptr.vmem [resolvable:$true] %s64_s30  ;;  %s93_s5 = int_to_ptr.vmem [resolvable:$true] %s92_s5 }
  0x14   :  { %70 = dma.hbm_to_vmem [thread:$0]  %s63_s25, 4096, %s65_s30, [#allocation6], %s6499_s28, %s6499_s28, %s6500_s29  }
  0x15   :  { %s118_s7 = sshll.u32 %s9239_s11, 4  ;;  %s6506_s8 = smov [#allocation13]   ;;  %s119_s7 = int_to_ptr.hbm [resolvable:$true] %s118_s7 }
  0x16   :  { %98 = dma.hbm_to_vmem [thread:$0]  %s91_s27, 4096, %s93_s5, [#allocation9], %s6499_s28, %s6499_s28, %s6500_s29  }
  0x17   :  { %s120_s18 = sshll.u32 %s6506_s8, 4  ;;  %s121_s18 = int_to_ptr.vmem [resolvable:$true] %s120_s18 }
  0x18   :  { %126 = dma.hbm_to_vmem [thread:$0]  %s119_s7, 4096, %s121_s18, [#allocation12], %s6499_s28, %s6499_s28, %s6500_s29  }
  0x19   :  { %6490 = dma.done.wait [#allocation4], 4096  }
  0x1a   :  { %6491 = vsyncadd [#allocation4], 4294963200 }
  0x1b   :  { %6492 = dma.done.wait [#allocation6], 8192  }
  0x1c   :  { %6493 = vsyncadd [#allocation6], 4294959104 }
  0x1d   :  { %6494 = dma.done.wait [#allocation9], 8192  }
  0x1e   :  { %6495 = vsyncadd [#allocation9], 4294959104 }
  0x1f   :  { %6496 = dma.done.wait [#allocation12], 8192  }
  0x20   :  { %6497 = vsyncadd [#allocation12], 4294959104  ;;  %v4984_v1 = vld [vmem:[#allocation3 + $0xe0] sm:$0xf]  ;;  %v5796_v2 = vld [vmem:[#allocation3 + $0xec] sm:$0xf0] }
  0x21   :  { %v5794_v3 = vld [vmem:[#allocation3 + $0xe4] sm:$0xf]  ;;  %v6633_v4 = vor.u32 %v5796_v2, %v4984_v1  ;;  %v4986_v5 = vld [vmem:[#allocation3 + $0xf0] sm:$0xf0]  ;;  %v4992_v6 = vld [vmem:[#allocation3 + $0xe8] sm:$0xf] }
  0x22   :  { %v5797_v7 = vld [vmem:[#allocation3 + $0xf4] sm:$0xf0]  ;;  %v6635_v8 = vor.u32 %v5794_v3, %v4986_v5  ;;  %v5795_v10 = vld [vmem:[#allocation3 + $0xec] sm:$0xf]  ;;  %v4994_v11 = vld [vmem:[#allocation3 + $0xf8] sm:$0xf0] }
  0x23   :  { %v6637_v9 = vor.u32 %v5797_v7, %v4992_v6  ;;  %v4968_v12 = vld [vmem:[#allocation3 + $0xc0] sm:$0xf]  ;;  %388 = vmatpush.bf16.msra.mxu0 %v6633_v4  ;;  %v6640_v13 = vor.u32 %v5795_v10, %v4994_v11  ;;  %v5792_v14 = vld [vmem:[#allocation3 + $0xcc] sm:$0xf0]  ;;  %v5790_v15 = vld [vmem:[#allocation3 + $0xc4] sm:$0xf] }
  0x24   :  { %v4970_v16 = vld [vmem:[#allocation3 + $0xd0] sm:$0xf0]  ;;  %401 = vmatpush.bf16.msra.mxu1 %v6635_v8  ;;  %v6644_v17 = vor.u32 %v5792_v14, %v4968_v12  ;;  %v4976_v19 = vld [vmem:[#allocation3 + $0xc8] sm:$0xf]  ;;  %v5793_v20 = vld [vmem:[#allocation3 + $0xd4] sm:$0xf0] }
  0x25   :  { %414 = vmatpush.bf16.msra.mxu2 %v6637_v9  ;;  %v6646_v18 = vor.u32 %v5790_v15, %v4970_v16  ;;  %v5791_v21 = vld [vmem:[#allocation3 + $0xcc] sm:$0xf]  ;;  %427 = vmatpush.bf16.msra.mxu3 %v6640_v13  ;;  %v6649_v22 = vor.u32 %v5793_v20, %v4976_v19  ;;  %v4978_v23 = vld [vmem:[#allocation3 + $0xd8] sm:$0xf0]  ;;  %v4952_v24 = vld [vmem:[#allocation3 + $0xa0] sm:$0xf] }
  0x26   :  { %v5788_v25 = vld [vmem:[#allocation3 + $0xac] sm:$0xf0]  ;;  %v6651_v26 = vor.u32 %v5791_v21, %v4978_v23  ;;  %v5786_v27 = vld [vmem:[#allocation3 + $0xa4] sm:$0xf]  ;;  %v4954_v28 = vld [vmem:[#allocation3 + $0xb0] sm:$0xf0] }
  0x27   :  { %v4960_v29 = vld [vmem:[#allocation3 + $0xa8] sm:$0xf]  ;;  %389 = vmatpush.bf16.msra.mxu0 %v6644_v17  ;;  %v6654_v30 = vor.u32 %v5788_v25, %v4952_v24  ;;  %v5789_v31 = vld [vmem:[#allocation3 + $0xb4] sm:$0xf0]  ;;  %v5787_v32 = vld [vmem:[#allocation3 + $0xac] sm:$0xf]  ;;  %v6658_v34 = vor.u32 %v5786_v27, %v4954_v28 }
  0x28   :  { %v4962_v33 = vld [vmem:[#allocation3 + $0xb8] sm:$0xf0]  ;;  %402 = vmatpush.bf16.msra.mxu1 %v6646_v18  ;;  %v6660_v35 = vor.u32 %v5789_v31, %v4960_v29  ;;  %v4936_v36 = vld [vmem:[#allocation3 + $0x80] sm:$0xf]  ;;  %v5784_v37 = vld [vmem:[#allocation3 + $0x8c] sm:$0xf0] }
  0x29   :  { %415 = vmatpush.bf16.msra.mxu2 %v6649_v22  ;;  %v5782_v38 = vld [vmem:[#allocation3 + $0x84] sm:$0xf]  ;;  %428 = vmatpush.bf16.msra.mxu3 %v6651_v26  ;;  %v6663_v39 = vor.u32 %v5787_v32, %v4962_v33  ;;  %v4938_v40 = vld [vmem:[#allocation3 + $0x90] sm:$0xf0]  ;;  %v4944_v41 = vld [vmem:[#allocation3 + $0x88] sm:$0xf]  ;;  %v6666_v45 = vor.u32 %v5784_v37, %v4936_v36 }
  0x2a   :  { %v5785_v42 = vld [vmem:[#allocation3 + $0x94] sm:$0xf0]  ;;  %v5783_v43 = vld [vmem:[#allocation3 + $0x8c] sm:$0xf]  ;;  %v4946_v44 = vld [vmem:[#allocation3 + $0x98] sm:$0xf0]  ;;  %v6670_v46 = vor.u32 %v5782_v38, %v4938_v40 }
  0x2b   :  { %390 = vmatpush.bf16.msra.mxu0 %v6654_v30  ;;  %v6672_v47 = vor.u32 %v5785_v42, %v4944_v41  ;;  %v4920_v48 = vld [vmem:[#allocation3 + $0x60] sm:$0xf]  ;;  %v5780_v49 = vld [vmem:[#allocation3 + $0x6c] sm:$0xf0]  ;;  %v5778_v50 = vld [vmem:[#allocation3 + $0x64] sm:$0xf]  ;;  %v6675_v51 = vor.u32 %v5783_v43, %v4946_v44 }
  0x2c   :  { %403 = vmatpush.bf16.msra.mxu1 %v6658_v34  ;;  %v4922_v52 = vld [vmem:[#allocation3 + $0x70] sm:$0xf0]  ;;  %v4928_v53 = vld [vmem:[#allocation3 + $0x68] sm:$0xf]  ;;  %v5781_v54 = vld [vmem:[#allocation3 + $0x74] sm:$0xf0]  ;;  %v6678_v57 = vor.u32 %v5780_v49, %v4920_v48 }
  0x2d   :  { %416 = vmatpush.bf16.msra.mxu2 %v6660_v35  ;;  %429 = vmatpush.bf16.msra.mxu3 %v6663_v39  ;;  %v5779_v55 = vld [vmem:[#allocation3 + $0x6c] sm:$0xf]  ;;  %v4930_v56 = vld [vmem:[#allocation3 + $0x78] sm:$0xf0]  ;;  %v6682_v58 = vor.u32 %v5778_v50, %v4922_v52  ;;  %v6684_v59 = vor.u32 %v5781_v54, %v4928_v53  ;;  %v4904_v60 = vld [vmem:[#allocation3 + $0x40] sm:$0xf] }
  0x2e   :  { %v5776_v61 = vld [vmem:[#allocation3 + $0x4c] sm:$0xf0]  ;;  %v5774_v62 = vld [vmem:[#allocation3 + $0x44] sm:$0xf]  ;;  %v6687_v63 = vor.u32 %v5779_v55, %v4930_v56  ;;  %v4906_v0 = vld [vmem:[#allocation3 + $0x50] sm:$0xf0] }
  0x2f   :  { %391 = vmatpush.bf16.msra.mxu0 %v6666_v45  ;;  %v4912_v1 = vld [vmem:[#allocation3 + $0x48] sm:$0xf]  ;;  %v5777_v2 = vld [vmem:[#allocation3 + $0x54] sm:$0xf0]  ;;  %v5775_v3 = vld [vmem:[#allocation3 + $0x4c] sm:$0xf]  ;;  %v6690_v6 = vor.u32 %v5776_v61, %v4904_v60  ;;  %v6694_v10 = vor.u32 %v5774_v62, %v4906_v0 }
  0x30   :  { %404 = vmatpush.bf16.msra.mxu1 %v6670_v46  ;;  %v4914_v5 = vld [vmem:[#allocation3 + $0x58] sm:$0xf0]  ;;  %v4888_v7 = vld [vmem:[#allocation3 + $0x20] sm:$0xf]  ;;  %v6696_v11 = vor.u32 %v5777_v2, %v4912_v1  ;;  %v5772_v12 = vld [vmem:[#allocation3 + $0x2c] sm:$0xf0] }
  0x31   :  { %417 = vmatpush.bf16.msra.mxu2 %v6672_v47  ;;  %430 = vmatpush.bf16.msra.mxu3 %v6675_v51  ;;  %v5770_v14 = vld [vmem:[#allocation3 + $0x24] sm:$0xf]  ;;  %v4890_v15 = vld [vmem:[#allocation3 + $0x30] sm:$0xf0]  ;;  %v6699_v16 = vor.u32 %v5775_v3, %v4914_v5  ;;  %v4896_v19 = vld [vmem:[#allocation3 + $0x28] sm:$0xf]  ;;  %v6706_v27 = vor.u32 %v5772_v12, %v4888_v7 }
  0x32   :  { %v5773_v20 = vld [vmem:[#allocation3 + $0x34] sm:$0xf0]  ;;  %v162_v21 = vld [vmem:[%s9228_s0] sm:$0xff]  ;;  %v5771_v23 = vld [vmem:[#allocation3 + $0x2c] sm:$0xf]  ;;  %v9244_v25 = vmov 0   ;;  %v6710_v28 = vor.u32 %v5770_v14, %v4890_v15 }
  0x33   :  { %392 = vmatpush.bf16.msra.mxu0 %v6678_v57  ;;  %v4898_v24 = vld [vmem:[#allocation3 + $0x38] sm:$0xf0]  ;;  %6000 = vset.pattern.permute.xlu0 %v9244_v25  ;;  %v6712_v29 = vor.u32 %v5773_v20, %v4896_v19  ;;  %v4872_v31 = vld [vmem:[#allocation3] sm:$0xf]  ;;  %v5768_v32 = vld [vmem:[#allocation3 + $0xc] sm:$0xf0] }
  0x34   :  { %405 = vmatpush.bf16.msra.mxu1 %v6682_v58  ;;  %166 = vperm.xlu0 %6000, %v162_v21   ;;  %v5766_v33 = vld [vmem:[#allocation3 + $0x4] sm:$0xf]  ;;  %v6715_v36 = vor.u32 %v5771_v23, %v4898_v24  ;;  %v4874_v37 = vld [vmem:[#allocation3 + $0x10] sm:$0xf0]  ;;  %v4880_v38 = vld [vmem:[#allocation3 + $0x8] sm:$0xf]  ;;  %v6718_v43 = vor.u32 %v5768_v32, %v4872_v31 }
  0x35   :  { %418 = vmatpush.bf16.msra.mxu2 %v6684_v59  ;;  %431 = vmatpush.bf16.msra.mxu3 %v6687_v63  ;;  %v5769_v40 = vld [vmem:[#allocation3 + $0x14] sm:$0xf0]  ;;  %v5767_v41 = vld [vmem:[#allocation3 + $0xc] sm:$0xf]  ;;  %v4882_v42 = vld [vmem:[#allocation3 + $0x18] sm:$0xf0]  ;;  %v6722_v44 = vor.u32 %v5766_v33, %v4874_v37 }
  0x36   :  { %v6724_v48 = vor.u32 %v5769_v40, %v4880_v38  ;;  %v6727_v49 = vor.u32 %v5767_v41, %v4882_v42  ;;  %v163_v50 = vld [vmem:[%s9229_s1] sm:$0xf]  ;;  %vm4806_vm0 = vcmask 1040384   ;;  %vm4808_vm1 = vcmask 1041408  }
  0x37   :  { %393 = vmatpush.bf16.msra.mxu0 %v6690_v6  ;;  %v170_v52 = vperm.slane %v163_v50, 0  ;;  %v171_v53 = vperm.slane %v163_v50, 1  ;;  %v182_v54 = vld [vmem:[%s9231_s3] sm:$0xf]  ;;  %v172_v1 = vperm.slane %v163_v50, 2  ;;  %v173_v3 = vperm.slane %v163_v50, 3 }
  0x38   :  { %406 = vmatpush.bf16.msra.mxu1 %v6694_v10  ;;  %v184_v56 = vperm.slane %v182_v54, 0  ;;  %v185_v61 = vperm.slane %v182_v54, 1  ;;  %v186_v14 = vperm.slane %v182_v54, 2  ;;  %v187_v20 = vperm.slane %v182_v54, 3 }
  0x39   :  { %419 = vmatpush.bf16.msra.mxu2 %v6696_v11  ;;  %432 = vmatpush.bf16.msra.mxu3 %v6699_v16  ;;  %vm4810_vm2 = vcmask 1042432   ;;  %vm4812_vm3 = vcmask 1043456   ;;  %vm4814_vm4 = vcmask 1044480   ;;  %vm4816_vm5 = vcmask 1045504  }
  0x3a   :  { %vm4818_vm6 = vcmask 1046528   ;;  %vm4860_vm7 = vcmask 7168  }
  0x3b   :  { %394 = vmatpush.bf16.msra.mxu0 %v6706_v27 }
  0x3c   :  { %407 = vmatpush.bf16.msra.mxu1 %v6710_v28 }
  0x3d   :  { %420 = vmatpush.bf16.msra.mxu2 %v6712_v29  ;;  %433 = vmatpush.bf16.msra.mxu3 %v6715_v36 }
  0x3f   :  { %395 = vmatpush.bf16.msra.mxu0 %v6718_v43 }
  0x40   :  { %408 = vmatpush.bf16.msra.mxu1 %v6722_v44 }
  0x41   :  { %421 = vmatpush.bf16.msra.mxu2 %v6724_v48  ;;  %434 = vmatpush.bf16.msra.mxu3 %v6727_v49 }
  0x42   :  { %396 = vmatmul.bf16.vlgmr.msra.gmra.mxu0 %v9244_v25 }
  0x43   :  { %471 = vmatpush.bf16.msrb.mxu0 %v6633_v4  ;;  %409 = vmatmul.bf16.vlgmr.msra.gmra.mxu1 %v9244_v25 }
  0x44   :  { %484 = vmatpush.bf16.msrb.mxu1 %v6635_v8  ;;  %422 = vmatmul.bf16.vlgmr.msra.gmra.mxu2 %v9244_v25 }
  0x45   :  { %435 = vmatmul.bf16.vlgmr.msra.gmra.mxu3 %v9244_v25  ;;  %497 = vmatpush.bf16.msrb.mxu2 %v6637_v9 }
  0x46   :  { %510 = vmatpush.bf16.msrb.mxu3 %v6640_v13 }
  0x47   :  { %472 = vmatpush.bf16.msrb.mxu0 %v6644_v17 }
  0x48   :  { %485 = vmatpush.bf16.msrb.mxu1 %v6646_v18 }
  0x49   :  { %498 = vmatpush.bf16.msrb.mxu2 %v6649_v22 }
  0x4a   :  { %511 = vmatpush.bf16.msrb.mxu3 %v6651_v26 }
  0x4b   :  { %473 = vmatpush.bf16.msrb.mxu0 %v6654_v30 }
  0x4c   :  { %486 = vmatpush.bf16.msrb.mxu1 %v6658_v34 }
  0x4d   :  { %499 = vmatpush.bf16.msrb.mxu2 %v6660_v35 }
  0x4e   :  { %512 = vmatpush.bf16.msrb.mxu3 %v6663_v39 }
  0x4f   :  { %474 = vmatpush.bf16.msrb.mxu0 %v6666_v45 }
  0x50   :  { %487 = vmatpush.bf16.msrb.mxu1 %v6670_v46 }
  0x51   :  { %500 = vmatpush.bf16.msrb.mxu2 %v6672_v47 }
  0x52   :  { %513 = vmatpush.bf16.msrb.mxu3 %v6675_v51 }
  0x53   :  { %475 = vmatpush.bf16.msrb.mxu0 %v6678_v57 }
  0x54   :  { %488 = vmatpush.bf16.msrb.mxu1 %v6682_v58 }
  0x55   :  { %501 = vmatpush.bf16.msrb.mxu2 %v6684_v59 }
  0x56   :  { %514 = vmatpush.bf16.msrb.mxu3 %v6687_v63 }
  0x57   :  { %476 = vmatpush.bf16.msrb.mxu0 %v6690_v6 }
  0x58   :  { %489 = vmatpush.bf16.msrb.mxu1 %v6694_v10 }
  0x59   :  { %502 = vmatpush.bf16.msrb.mxu2 %v6696_v11 }
  0x5a   :  { %515 = vmatpush.bf16.msrb.mxu3 %v6699_v16 }
  0x5b   :  { %477 = vmatpush.bf16.msrb.mxu0 %v6706_v27 }
  0x5c   :  { %490 = vmatpush.bf16.msrb.mxu1 %v6710_v28 }
  0x5d   :  { %503 = vmatpush.bf16.msrb.mxu2 %v6712_v29 }
  0x5e   :  { %516 = vmatpush.bf16.msrb.mxu3 %v6715_v36 }
  0x5f   :  { %478 = vmatpush.bf16.msrb.mxu0 %v6718_v43 }
  0x60   :  { %491 = vmatpush.bf16.msrb.mxu1 %v6722_v44 }
  0x61   :  { %504 = vmatpush.bf16.msrb.mxu2 %v6724_v48 }
  0x62   :  { %517 = vmatpush.bf16.msrb.mxu3 %v6727_v49 }
  0x63   :  { %550 = vmatpush.bf16.msra.mxu0 %v6633_v4 }
  0x64   :  { %563 = vmatpush.bf16.msra.mxu1 %v6635_v8 }
  0x65   :  { %576 = vmatpush.bf16.msra.mxu2 %v6637_v9 }
  0x66   :  { %589 = vmatpush.bf16.msra.mxu3 %v6640_v13 }
  0x67   :  { %551 = vmatpush.bf16.msra.mxu0 %v6644_v17 }
  0x68   :  { %564 = vmatpush.bf16.msra.mxu1 %v6646_v18 }
  0x69   :  { %577 = vmatpush.bf16.msra.mxu2 %v6649_v22 }
  0x6a   :  { %590 = vmatpush.bf16.msra.mxu3 %v6651_v26 }
  0x6b   :  { %552 = vmatpush.bf16.msra.mxu0 %v6654_v30 }
  0x6c   :  { %565 = vmatpush.bf16.msra.mxu1 %v6658_v34 }
  0x6d   :  { %578 = vmatpush.bf16.msra.mxu2 %v6660_v35 }
  0x6e   :  { %591 = vmatpush.bf16.msra.mxu3 %v6663_v39 }
  0x6f   :  { %553 = vmatpush.bf16.msra.mxu0 %v6666_v45 }
  0x70   :  { %566 = vmatpush.bf16.msra.mxu1 %v6670_v46 }
  0x71   :  { %579 = vmatpush.bf16.msra.mxu2 %v6672_v47 }
  0x72   :  { %592 = vmatpush.bf16.msra.mxu3 %v6675_v51 }
  0x73   :  { %554 = vmatpush.bf16.msra.mxu0 %v6678_v57 }
  0x74   :  { %567 = vmatpush.bf16.msra.mxu1 %v6682_v58 }
  0x75   :  { %580 = vmatpush.bf16.msra.mxu2 %v6684_v59 }
  0x76   :  { %593 = vmatpush.bf16.msra.mxu3 %v6687_v63 }
  0x77   :  { %555 = vmatpush.bf16.msra.mxu0 %v6690_v6 }
  0x78   :  { %568 = vmatpush.bf16.msra.mxu1 %v6694_v10 }
  0x79   :  { %581 = vmatpush.bf16.msra.mxu2 %v6696_v11 }
  0x7a   :  { %594 = vmatpush.bf16.msra.mxu3 %v6699_v16 }
  0x7b   :  { %556 = vmatpush.bf16.msra.mxu0 %v6706_v27 }
  0x7c   :  { %569 = vmatpush.bf16.msra.mxu1 %v6710_v28 }
  0x7d   :  { %582 = vmatpush.bf16.msra.mxu2 %v6712_v29 }
  0x7e   :  { %595 = vmatpush.bf16.msra.mxu3 %v6715_v36 }
  0x7f   :  { %557 = vmatpush.bf16.msra.mxu0 %v6718_v43 }
  0x80   :  { %570 = vmatpush.bf16.msra.mxu1 %v6722_v44 }
  0x81   :  { %583 = vmatpush.bf16.msra.mxu2 %v6724_v48 }
  0x82   :  { %596 = vmatpush.bf16.msra.mxu3 %v6727_v49 }
  0xa6   :  { %v167_v55 = vpop.permute.xlu0 %166 }
  0xa7   :  { %v178_v60 = vmul.f32 %v170_v52, %v167_v55  ;;  %v179_v62 = vmul.f32 %v171_v53, %v167_v55  ;;  %v180_v15 = vmul.f32 %v172_v1, %v167_v55  ;;  %v181_v21 = vmul.f32 %v173_v3, %v167_v55 }
  0xa9   :  { %v6807_v0 = vadd.f32 %v184_v56, %v178_v60  ;;  %v6809_v2 = vadd.f32 %v185_v61, %v179_v62  ;;  %v6813_v31 = vadd.f32 %v186_v14, %v180_v15  ;;  %v6815_v32 = vadd.f32 %v187_v20, %v181_v21 }
  0xab   :  { %9438 = vst [vmem:[#allocation18_spill] sm:$0xff] %v6807_v0 }
  0xac   :  { %9439 = vst [vmem:[#allocation19_spill] sm:$0xff] %v6809_v2 }
  0xad   :  { %9440 = vst [vmem:[#allocation20_spill] sm:$0xff] %v6813_v31 }
  0xae   :  { %9441 = vst [vmem:[#allocation21_spill] sm:$0xff] %v6815_v32 }
  0xbf   :  { %v397_v5 = vpop.f32.mrf.mxu0 }
  0xc0   :  { %v398_v7 = vadd.f32 %v397_v5, %v6807_v0  ;;  %v410_v12 = vpop.f32.mrf.mxu1 }
  0xc1   :  { %v411_v19 = vadd.f32 %v410_v12, %v6809_v2 }
  0xc2   :  { %v440_v23 = vmul.f32 0.5, %v398_v7 }
  0xc3   :  { %v441_v24 = vmul.f32 0.5, %v411_v19 }
  0xc4   :  { %6002 = vtanh.f32 %v440_v23  ;;  %v463_v23 = vrot.slane %v6807_v0, 1 }
  0xc5   :  { %6004 = vtanh.f32 %v441_v24  ;;  %v464_v24 = vrot.slane %v6809_v2, 1 }
  0xc7   :  { %v423_v33 = vpop.f32.mrf.mxu2  ;;  %v399_v40 = vpop.f32.mrf.mxu0 }
  0xc8   :  { %v424_v37 = vadd.f32 %v423_v33, %v6813_v31  ;;  %v436_v38 = vpop.f32.mrf.mxu3  ;;  %v412_v42 = vpop.f32.mrf.mxu1 }
  0xc9   :  { %v437_v41 = vadd.f32 %v436_v38, %v6815_v32 }
  0xca   :  { %6006 = vtanh.f32 %v424_v37  ;;  %v6003_v50 = vpop.eup %6002 }
  0xcb   :  { %v449_v52 = vmul.f32 0.5, %v437_v41  ;;  %v6005_v53 = vpop.eup %6004  ;;  %v444_v54 = vmul.f32 0.5, %v6003_v50  ;;  %v465_v50 = vrot.slane %v6813_v31, 1 }
  0xcc   :  { %v445_v55 = vmul.f32 0.5, %v6005_v53 }
  0xcd   :  { %6008 = vtanh.f32 %v449_v52  ;;  %v446_v56 = vadd.f32 0.5, %v444_v54  ;;  %v466_v52 = vrot.slane %v6815_v32, 1 }
  0xce   :  { %v447_v60 = vadd.f32 0.5, %v445_v55 }
  0xcf   :  { %v425_v61 = vpop.f32.mrf.mxu2 }
  0xd0   :  { %v6007_v62 = vpop.eup %6006  ;;  %v438_v1 = vpop.f32.mrf.mxu3  ;;  %v453_v3 = vmul.f32 0.0, %v447_v60 }
  0xd1   :  { %v454_v5 = vmul.f32 %v6007_v62, %v446_v56 }
  0xd3   :  { %v6009_v7 = vpop.eup %6008  ;;  %v6819_v12 = vadd.f32 %v454_v5, %v453_v3 }
  0xd4   :  { %v451_v14 = vmul.f32 0.5, %v6009_v7 }
  0xd5   :  { %6010 = vtanh.f32 %v6819_v12 }
  0xd6   :  { %v452_v15 = vadd.f32 0.5, %v451_v14 }
  0xdb   :  { %v6011_v19 = vpop.eup %6010 }
  0xdc   :  { %v457_v20 = vmul.f32 %v6011_v19, %v452_v15 }
  0xde   :  { %v6822_v21 = vpack.c.bf16 %v457_v20, %v457_v20 }
  0xe0   :  { %479 = vmatmul.bf16.vlgmr.msrb.gmra.mxu0 %v6822_v21  ;;  %492 = vmatmul.bf16.vlgmr.msrb.gmra.mxu1 %v6822_v21 }
  0xe1   :  { %505 = vmatmul.bf16.vlgmr.msrb.gmra.mxu2 %v6822_v21  ;;  %518 = vmatmul.bf16.vlgmr.msrb.gmra.mxu3 %v6822_v21 }
  0xe2   :  { %629 = vmatpush.bf16.msrb.mxu0 %v6633_v4  ;;  %642 = vmatpush.bf16.msrb.mxu1 %v6635_v8 }
  0xe3   :  { %655 = vmatpush.bf16.msrb.mxu2 %v6637_v9  ;;  %668 = vmatpush.bf16.msrb.mxu3 %v6640_v13 }
  0xe6   :  { %630 = vmatpush.bf16.msrb.mxu0 %v6644_v17  ;;  %643 = vmatpush.bf16.msrb.mxu1 %v6646_v18 }
  0xe7   :  { %656 = vmatpush.bf16.msrb.mxu2 %v6649_v22  ;;  %669 = vmatpush.bf16.msrb.mxu3 %v6651_v26 }
  0xea   :  { %631 = vmatpush.bf16.msrb.mxu0 %v6654_v30  ;;  %644 = vmatpush.bf16.msrb.mxu1 %v6658_v34 }
  0xeb   :  { %657 = vmatpush.bf16.msrb.mxu2 %v6660_v35  ;;  %670 = vmatpush.bf16.msrb.mxu3 %v6663_v39 }
  0xee   :  { %632 = vmatpush.bf16.msrb.mxu0 %v6666_v45  ;;  %645 = vmatpush.bf16.msrb.mxu1 %v6670_v46 }
  0xef   :  { %658 = vmatpush.bf16.msrb.mxu2 %v6672_v47  ;;  %671 = vmatpush.bf16.msrb.mxu3 %v6675_v51 }
  0xf2   :  { %633 = vmatpush.bf16.msrb.mxu0 %v6678_v57  ;;  %646 = vmatpush.bf16.msrb.mxu1 %v6682_v58 }
  0xf3   :  { %659 = vmatpush.bf16.msrb.mxu2 %v6684_v59  ;;  %672 = vmatpush.bf16.msrb.mxu3 %v6687_v63 }
  0xf6   :  { %634 = vmatpush.bf16.msrb.mxu0 %v6690_v6  ;;  %647 = vmatpush.bf16.msrb.mxu1 %v6694_v10 }
  0xf7   :  { %660 = vmatpush.bf16.msrb.mxu2 %v6696_v11  ;;  %673 = vmatpush.bf16.msrb.mxu3 %v6699_v16 }
  0xfa   :  { %635 = vmatpush.bf16.msrb.mxu0 %v6706_v27  ;;  %648 = vmatpush.bf16.msrb.mxu1 %v6710_v28 }
  0xfb   :  { %661 = vmatpush.bf16.msrb.mxu2 %v6712_v29  ;;  %674 = vmatpush.bf16.msrb.mxu3 %v6715_v36 }
  0xfe   :  { %636 = vmatpush.bf16.msrb.mxu0 %v6718_v43  ;;  %649 = vmatpush.bf16.msrb.mxu1 %v6722_v44 }
  0xff   :  { %662 = vmatpush.bf16.msrb.mxu2 %v6724_v48  ;;  %675 = vmatpush.bf16.msrb.mxu3 %v6727_v49 }
 0x15d   :  { %v480_v33 = vpop.f32.mrf.mxu0  ;;  %v493_v37 = vpop.f32.mrf.mxu1 }
 0x15e   :  { %v481_v38 = vadd.f32 %v480_v33, %v463_v23  ;;  %v494_v40 = vadd.f32 %v493_v37, %v464_v24 }
 0x160   :  { %v523_v41 = vmul.f32 0.5, %v481_v38  ;;  %v524_v42 = vmul.f32 0.5, %v494_v40 }
 0x162   :  { %6012 = vtanh.f32 %v523_v41 }
 0x163   :  { %6014 = vtanh.f32 %v524_v42 }
 0x164   :  { %v506_v53 = vpop.f32.mrf.mxu2  ;;  %v519_v54 = vpop.f32.mrf.mxu3 }
 0x165   :  { %v507_v55 = vadd.f32 %v506_v53, %v465_v50  ;;  %v520_v56 = vadd.f32 %v519_v54, %v466_v52  ;;  %v482_v60 = vpop.f32.mrf.mxu0  ;;  %v495_v61 = vpop.f32.mrf.mxu1  ;;  %v543_v53 = vrot.slane %v6809_v2, 2 }
 0x167   :  { %6016 = vtanh.f32 %v507_v55  ;;  %v532_v62 = vmul.f32 0.5, %v520_v56 }
 0x168   :  { %v6013_v1 = vpop.eup %6012 }
 0x169   :  { %v6015_v3 = vpop.eup %6014  ;;  %v527_v5 = vmul.f32 0.5, %v6013_v1  ;;  %6018 = vtanh.f32 %v532_v62  ;;  %v544_v1 = vrot.slane %v6813_v31, 2 }
 0x16a   :  { %v528_v7 = vmul.f32 0.5, %v6015_v3  ;;  %v545_v3 = vrot.slane %v6815_v32, 2 }
 0x16b   :  { %v529_v14 = vadd.f32 0.5, %v527_v5 }
 0x16c   :  { %v530_v15 = vadd.f32 0.5, %v528_v7  ;;  %v508_v19 = vpop.f32.mrf.mxu2  ;;  %v521_v20 = vpop.f32.mrf.mxu3 }
 0x16d   :  { %v6017_v23 = vpop.eup %6016 }
 0x16e   :  { %v536_v24 = vmul.f32 %v530_v15, %v6819_v12  ;;  %v537_v33 = vmul.f32 %v6017_v23, %v529_v14  ;;  %v542_v12 = vrot.slane %v6807_v0, 2 }
 0x16f   :  { %v6019_v37 = vpop.eup %6018 }
 0x170   :  { %v6865_v38 = vadd.f32 %v537_v33, %v536_v24  ;;  %v534_v40 = vmul.f32 0.5, %v6019_v37 }
 0x172   :  { %6020 = vtanh.f32 %v6865_v38  ;;  %v535_v41 = vadd.f32 0.5, %v534_v40 }
 0x178   :  { %v6021_v42 = vpop.eup %6020 }
 0x179   :  { %v540_v50 = vmul.f32 %v6021_v42, %v535_v41 }
 0x17b   :  { %v6868_v52 = vpack.c.bf16 %v540_v50, %v540_v50 }
 0x17d   :  { %558 = vmatmul.bf16.vlgmr.msra.gmra.mxu0 %v6868_v52  ;;  %571 = vmatmul.bf16.vlgmr.msra.gmra.mxu1 %v6868_v52 }
 0x17e   :  { %584 = vmatmul.bf16.vlgmr.msra.gmra.mxu2 %v6868_v52  ;;  %597 = vmatmul.bf16.vlgmr.msra.gmra.mxu3 %v6868_v52 }
 0x17f   :  { %708 = vmatpush.bf16.msra.mxu0 %v6633_v4  ;;  %721 = vmatpush.bf16.msra.mxu1 %v6635_v8 }
 0x180   :  { %734 = vmatpush.bf16.msra.mxu2 %v6637_v9  ;;  %747 = vmatpush.bf16.msra.mxu3 %v6640_v13 }
 0x183   :  { %709 = vmatpush.bf16.msra.mxu0 %v6644_v17  ;;  %722 = vmatpush.bf16.msra.mxu1 %v6646_v18 }
 0x184   :  { %735 = vmatpush.bf16.msra.mxu2 %v6649_v22  ;;  %748 = vmatpush.bf16.msra.mxu3 %v6651_v26 }
 0x187   :  { %710 = vmatpush.bf16.msra.mxu0 %v6654_v30  ;;  %723 = vmatpush.bf16.msra.mxu1 %v6658_v34 }
 0x188   :  { %736 = vmatpush.bf16.msra.mxu2 %v6660_v35  ;;  %749 = vmatpush.bf16.msra.mxu3 %v6663_v39 }
 0x18b   :  { %711 = vmatpush.bf16.msra.mxu0 %v6666_v45  ;;  %724 = vmatpush.bf16.msra.mxu1 %v6670_v46 }
 0x18c   :  { %737 = vmatpush.bf16.msra.mxu2 %v6672_v47  ;;  %750 = vmatpush.bf16.msra.mxu3 %v6675_v51 }
 0x18f   :  { %712 = vmatpush.bf16.msra.mxu0 %v6678_v57  ;;  %725 = vmatpush.bf16.msra.mxu1 %v6682_v58 }
 0x190   :  { %738 = vmatpush.bf16.msra.mxu2 %v6684_v59  ;;  %751 = vmatpush.bf16.msra.mxu3 %v6687_v63 }
 0x193   :  { %713 = vmatpush.bf16.msra.mxu0 %v6690_v6  ;;  %726 = vmatpush.bf16.msra.mxu1 %v6694_v10 }
 0x194   :  { %739 = vmatpush.bf16.msra.mxu2 %v6696_v11  ;;  %752 = vmatpush.bf16.msra.mxu3 %v6699_v16 }
 0x197   :  { %714 = vmatpush.bf16.msra.mxu0 %v6706_v27  ;;  %727 = vmatpush.bf16.msra.mxu1 %v6710_v28 }
 0x198   :  { %740 = vmatpush.bf16.msra.mxu2 %v6712_v29  ;;  %753 = vmatpush.bf16.msra.mxu3 %v6715_v36 }
 0x19b   :  { %715 = vmatpush.bf16.msra.mxu0 %v6718_v43  ;;  %728 = vmatpush.bf16.msra.mxu1 %v6722_v44 }
 0x19c   :  { %741 = vmatpush.bf16.msra.mxu2 %v6724_v48  ;;  %754 = vmatpush.bf16.msra.mxu3 %v6727_v49 }
 0x1fa   :  { %v559_v54 = vpop.f32.mrf.mxu0  ;;  %v572_v55 = vpop.f32.mrf.mxu1 }
 0x1fb   :  { %v560_v56 = vadd.f32 %v559_v54, %v542_v12  ;;  %v573_v60 = vadd.f32 %v572_v55, %v543_v53 }
 0x1fd   :  { %v602_v61 = vmul.f32 0.5, %v560_v56  ;;  %v603_v62 = vmul.f32 0.5, %v573_v60 }
 0x1ff   :  { %6022 = vtanh.f32 %v602_v61 }
 0x200   :  { %6024 = vtanh.f32 %v603_v62 }
 0x201   :  { %v585_v5 = vpop.f32.mrf.mxu2  ;;  %v598_v7 = vpop.f32.mrf.mxu3 }
 0x202   :  { %v586_v14 = vadd.f32 %v585_v5, %v544_v1  ;;  %v599_v15 = vadd.f32 %v598_v7, %v545_v3  ;;  %v561_v19 = vpop.f32.mrf.mxu0  ;;  %v574_v20 = vpop.f32.mrf.mxu1  ;;  %v622_v7 = vrot.slane %v6809_v2, 3 }
 0x204   :  { %6026 = vtanh.f32 %v586_v14  ;;  %v611_v23 = vmul.f32 0.5, %v599_v15 }
 0x205   :  { %v6023_v24 = vpop.eup %6022 }
 0x206   :  { %v6025_v33 = vpop.eup %6024  ;;  %v606_v37 = vmul.f32 0.5, %v6023_v24  ;;  %6028 = vtanh.f32 %v611_v23 }
 0x207   :  { %v607_v40 = vmul.f32 0.5, %v6025_v33  ;;  %v623_v33 = vrot.slane %v6813_v31, 3 }
 0x208   :  { %v608_v41 = vadd.f32 0.5, %v606_v37  ;;  %v624_v37 = vrot.slane %v6815_v32, 3 }
 0x209   :  { %v609_v42 = vadd.f32 0.5, %v607_v40  ;;  %v587_v50 = vpop.f32.mrf.mxu2  ;;  %v600_v12 = vpop.f32.mrf.mxu3 }
 0x20a   :  { %v6027_v53 = vpop.eup %6026 }
 0x20b   :  { %v615_v54 = vmul.f32 %v609_v42, %v6865_v38  ;;  %v616_v55 = vmul.f32 %v6027_v53, %v608_v41  ;;  %v621_v38 = vrot.slane %v6807_v0, 3 }
 0x20c   :  { %v6029_v56 = vpop.eup %6028 }
 0x20d   :  { %v6911_v60 = vadd.f32 %v616_v55, %v615_v54  ;;  %v613_v61 = vmul.f32 0.5, %v6029_v56 }
 0x20f   :  { %6030 = vtanh.f32 %v6911_v60  ;;  %v614_v62 = vadd.f32 0.5, %v613_v61 }
 0x215   :  { %v6031_v1 = vpop.eup %6030 }
 0x216   :  { %v619_v3 = vmul.f32 %v6031_v1, %v614_v62 }
 0x218   :  { %v6914_v5 = vpack.c.bf16 %v619_v3, %v619_v3 }
 0x21a   :  { %9442 = vst [vmem:[#allocation22_spill] sm:$0xff] %v6914_v5  ;;  %637 = vmatmul.bf16.vlgmr.msrb.gmra.mxu0 %v6914_v5  ;;  %650 = vmatmul.bf16.vlgmr.msrb.gmra.mxu1 %v6914_v5 }
 0x21b   :  { %663 = vmatmul.bf16.vlgmr.msrb.gmra.mxu2 %v6914_v5  ;;  %676 = vmatmul.bf16.vlgmr.msrb.gmra.mxu3 %v6914_v5  ;;  %v5200_v5 = vld [vmem:[#allocation7 + $0x88] sm:$0xf] }
 0x21c   :  { %787 = vmatpush.bf16.msrb.mxu0 %v6633_v4  ;;  %800 = vmatpush.bf16.msrb.mxu1 %v6635_v8 }
 0x21d   :  { %813 = vmatpush.bf16.msrb.mxu2 %v6637_v9  ;;  %826 = vmatpush.bf16.msrb.mxu3 %v6640_v13 }
 0x220   :  { %788 = vmatpush.bf16.msrb.mxu0 %v6644_v17  ;;  %801 = vmatpush.bf16.msrb.mxu1 %v6646_v18 }
 0x221   :  { %814 = vmatpush.bf16.msrb.mxu2 %v6649_v22  ;;  %827 = vmatpush.bf16.msrb.mxu3 %v6651_v26 }
 0x224   :  { %789 = vmatpush.bf16.msrb.mxu0 %v6654_v30  ;;  %802 = vmatpush.bf16.msrb.mxu1 %v6658_v34 }
 0x225   :  { %815 = vmatpush.bf16.msrb.mxu2 %v6660_v35  ;;  %828 = vmatpush.bf16.msrb.mxu3 %v6663_v39 }
 0x228   :  { %790 = vmatpush.bf16.msrb.mxu0 %v6666_v45  ;;  %803 = vmatpush.bf16.msrb.mxu1 %v6670_v46 }
 0x229   :  { %816 = vmatpush.bf16.msrb.mxu2 %v6672_v47  ;;  %829 = vmatpush.bf16.msrb.mxu3 %v6675_v51 }
 0x22c   :  { %791 = vmatpush.bf16.msrb.mxu0 %v6678_v57  ;;  %804 = vmatpush.bf16.msrb.mxu1 %v6682_v58 }
 0x22d   :  { %817 = vmatpush.bf16.msrb.mxu2 %v6684_v59  ;;  %830 = vmatpush.bf16.msrb.mxu3 %v6687_v63 }
 0x230   :  { %792 = vmatpush.bf16.msrb.mxu0 %v6690_v6  ;;  %805 = vmatpush.bf16.msrb.mxu1 %v6694_v10 }
 0x231   :  { %818 = vmatpush.bf16.msrb.mxu2 %v6696_v11  ;;  %831 = vmatpush.bf16.msrb.mxu3 %v6699_v16 }
 0x234   :  { %793 = vmatpush.bf16.msrb.mxu0 %v6706_v27  ;;  %806 = vmatpush.bf16.msrb.mxu1 %v6710_v28 }
 0x235   :  { %819 = vmatpush.bf16.msrb.mxu2 %v6712_v29  ;;  %832 = vmatpush.bf16.msrb.mxu3 %v6715_v36 }
 0x238   :  { %794 = vmatpush.bf16.msrb.mxu0 %v6718_v43  ;;  %807 = vmatpush.bf16.msrb.mxu1 %v6722_v44 }
 0x239   :  { %820 = vmatpush.bf16.msrb.mxu2 %v6724_v48  ;;  %833 = vmatpush.bf16.msrb.mxu3 %v6727_v49 }
 0x297   :  { %v638_v14 = vpop.f32.mrf.mxu0  ;;  %v651_v15 = vpop.f32.mrf.mxu1 }
 0x298   :  { %v639_v19 = vadd.f32 %v638_v14, %v621_v38  ;;  %v652_v20 = vadd.f32 %v651_v15, %v622_v7 }
 0x29a   :  { %v681_v23 = vmul.f32 0.5, %v639_v19  ;;  %v682_v24 = vmul.f32 0.5, %v652_v20 }
 0x29c   :  { %6032 = vtanh.f32 %v681_v23 }
 0x29d   :  { %6034 = vtanh.f32 %v682_v24 }
 0x29e   :  { %v664_v40 = vpop.f32.mrf.mxu2  ;;  %v677_v41 = vpop.f32.mrf.mxu3 }
 0x29f   :  { %v665_v42 = vadd.f32 %v664_v40, %v623_v33  ;;  %v678_v50 = vadd.f32 %v677_v41, %v624_v37  ;;  %v640_v12 = vpop.f32.mrf.mxu0  ;;  %v653_v53 = vpop.f32.mrf.mxu1 }
 0x2a1   :  { %6036 = vtanh.f32 %v665_v42  ;;  %v690_v54 = vmul.f32 0.5, %v678_v50  ;;  %v701_v42 = vrot.slane %v6809_v2, 4 }
 0x2a2   :  { %v6033_v55 = vpop.eup %6032 }
 0x2a3   :  { %v6035_v56 = vpop.eup %6034  ;;  %v685_v61 = vmul.f32 0.5, %v6033_v55  ;;  %6038 = vtanh.f32 %v690_v54 }
 0x2a4   :  { %v686_v62 = vmul.f32 0.5, %v6035_v56 }
 0x2a5   :  { %v687_v1 = vadd.f32 0.5, %v685_v61  ;;  %v702_v61 = vrot.slane %v6813_v31, 4 }
 0x2a6   :  { %v688_v3 = vadd.f32 0.5, %v686_v62  ;;  %v666_v38 = vpop.f32.mrf.mxu2  ;;  %v679_v7 = vpop.f32.mrf.mxu3  ;;  %v703_v62 = vrot.slane %v6815_v32, 4 }
 0x2a7   :  { %v6037_v14 = vpop.eup %6036 }
 0x2a8   :  { %v694_v15 = vmul.f32 %v688_v3, %v6911_v60  ;;  %v695_v19 = vmul.f32 %v6037_v14, %v687_v1  ;;  %v700_v60 = vrot.slane %v6807_v0, 4 }
 0x2a9   :  { %v6039_v20 = vpop.eup %6038 }
 0x2aa   :  { %v6957_v23 = vadd.f32 %v695_v19, %v694_v15  ;;  %v692_v24 = vmul.f32 0.5, %v6039_v20 }
 0x2ac   :  { %6040 = vtanh.f32 %v6957_v23  ;;  %v693_v33 = vadd.f32 0.5, %v692_v24 }
 0x2b2   :  { %v6041_v37 = vpop.eup %6040 }
 0x2b3   :  { %v698_v40 = vmul.f32 %v6041_v37, %v693_v33 }
 0x2b5   :  { %v6960_v41 = vpack.c.bf16 %v698_v40, %v698_v40 }
 0x2b7   :  { %9443 = vst [vmem:[#allocation23_spill] sm:$0xff] %v6960_v41  ;;  %716 = vmatmul.bf16.vlgmr.msra.gmra.mxu0 %v6960_v41  ;;  %729 = vmatmul.bf16.vlgmr.msra.gmra.mxu1 %v6960_v41 }
 0x2b8   :  { %742 = vmatmul.bf16.vlgmr.msra.gmra.mxu2 %v6960_v41  ;;  %755 = vmatmul.bf16.vlgmr.msra.gmra.mxu3 %v6960_v41  ;;  %v5218_v41 = vld [vmem:[#allocation7 + $0xb8] sm:$0xf0] }
 0x2b9   :  { %866 = vmatpush.bf16.msra.mxu0 %v6633_v4  ;;  %879 = vmatpush.bf16.msra.mxu1 %v6635_v8 }
 0x2ba   :  { %892 = vmatpush.bf16.msra.mxu2 %v6637_v9  ;;  %905 = vmatpush.bf16.msra.mxu3 %v6640_v13 }
 0x2bd   :  { %867 = vmatpush.bf16.msra.mxu0 %v6644_v17  ;;  %880 = vmatpush.bf16.msra.mxu1 %v6646_v18 }
 0x2be   :  { %893 = vmatpush.bf16.msra.mxu2 %v6649_v22  ;;  %906 = vmatpush.bf16.msra.mxu3 %v6651_v26 }
 0x2c1   :  { %868 = vmatpush.bf16.msra.mxu0 %v6654_v30  ;;  %881 = vmatpush.bf16.msra.mxu1 %v6658_v34 }
 0x2c2   :  { %894 = vmatpush.bf16.msra.mxu2 %v6660_v35  ;;  %907 = vmatpush.bf16.msra.mxu3 %v6663_v39 }
 0x2c5   :  { %869 = vmatpush.bf16.msra.mxu0 %v6666_v45  ;;  %882 = vmatpush.bf16.msra.mxu1 %v6670_v46 }
 0x2c6   :  { %895 = vmatpush.bf16.msra.mxu2 %v6672_v47  ;;  %908 = vmatpush.bf16.msra.mxu3 %v6675_v51 }
 0x2c9   :  { %870 = vmatpush.bf16.msra.mxu0 %v6678_v57  ;;  %883 = vmatpush.bf16.msra.mxu1 %v6682_v58 }
 0x2ca   :  { %896 = vmatpush.bf16.msra.mxu2 %v6684_v59  ;;  %909 = vmatpush.bf16.msra.mxu3 %v6687_v63 }
 0x2cd   :  { %871 = vmatpush.bf16.msra.mxu0 %v6690_v6  ;;  %884 = vmatpush.bf16.msra.mxu1 %v6694_v10 }
 0x2ce   :  { %897 = vmatpush.bf16.msra.mxu2 %v6696_v11  ;;  %910 = vmatpush.bf16.msra.mxu3 %v6699_v16 }
 0x2d1   :  { %872 = vmatpush.bf16.msra.mxu0 %v6706_v27  ;;  %885 = vmatpush.bf16.msra.mxu1 %v6710_v28 }
 0x2d2   :  { %898 = vmatpush.bf16.msra.mxu2 %v6712_v29  ;;  %911 = vmatpush.bf16.msra.mxu3 %v6715_v36 }
 0x2d5   :  { %873 = vmatpush.bf16.msra.mxu0 %v6718_v43  ;;  %886 = vmatpush.bf16.msra.mxu1 %v6722_v44 }
 0x2d6   :  { %899 = vmatpush.bf16.msra.mxu2 %v6724_v48  ;;  %912 = vmatpush.bf16.msra.mxu3 %v6727_v49 }
 0x334   :  { %v717_v50 = vpop.f32.mrf.mxu0  ;;  %v730_v12 = vpop.f32.mrf.mxu1 }
 0x335   :  { %v718_v53 = vadd.f32 %v717_v50, %v700_v60  ;;  %v731_v54 = vadd.f32 %v730_v12, %v701_v42 }
 0x337   :  { %v760_v55 = vmul.f32 0.5, %v718_v53  ;;  %v761_v56 = vmul.f32 0.5, %v731_v54 }
 0x339   :  { %6042 = vtanh.f32 %v760_v55 }
 0x33a   :  { %6044 = vtanh.f32 %v761_v56 }
 0x33b   :  { %v743_v1 = vpop.f32.mrf.mxu2  ;;  %v756_v3 = vpop.f32.mrf.mxu3 }
 0x33c   :  { %v744_v38 = vadd.f32 %v743_v1, %v702_v61  ;;  %v757_v7 = vadd.f32 %v756_v3, %v703_v62  ;;  %v719_v14 = vpop.f32.mrf.mxu0  ;;  %v732_v15 = vpop.f32.mrf.mxu1 }
 0x33d   :  { %v5112_v15 = vld [vmem:[#allocation5 + $0xe0] sm:$0xf] }
 0x33e   :  { %6046 = vtanh.f32 %v744_v38  ;;  %v769_v19 = vmul.f32 0.5, %v757_v7 }
 0x33f   :  { %v6043_v20 = vpop.eup %6042 }
 0x340   :  { %v6045_v24 = vpop.eup %6044  ;;  %v764_v33 = vmul.f32 0.5, %v6043_v20  ;;  %6048 = vtanh.f32 %v769_v19  ;;  %v5828_v19 = vld [vmem:[#allocation5 + $0xec] sm:$0xf0]  ;;  %v5826_v20 = vld [vmem:[#allocation5 + $0xe4] sm:$0xf] }
 0x341   :  { %v765_v37 = vmul.f32 0.5, %v6045_v24  ;;  %v7058_v24 = vor.u32 %v5828_v19, %v5112_v15  ;;  %v5050_v15 = vld [vmem:[#allocation5 + $0x70] sm:$0xf0]  ;;  %v5056_v19 = vld [vmem:[#allocation5 + $0x68] sm:$0xf] }
 0x342   :  { %v766_v40 = vadd.f32 0.5, %v764_v33  ;;  %v5114_v33 = vld [vmem:[#allocation5 + $0xf0] sm:$0xf0] }
 0x343   :  { %v767_v60 = vadd.f32 0.5, %v765_v37  ;;  %v745_v42 = vpop.f32.mrf.mxu2  ;;  %v758_v50 = vpop.f32.mrf.mxu3  ;;  %v5120_v37 = vld [vmem:[#allocation5 + $0xe8] sm:$0xf] }
 0x344   :  { %v6047_v12 = vpop.eup %6046  ;;  %v5827_v50 = vld [vmem:[#allocation5 + $0xec] sm:$0xf] }
 0x345   :  { %v773_v53 = vmul.f32 %v767_v60, %v6957_v23  ;;  %v774_v54 = vmul.f32 %v6047_v12, %v766_v40  ;;  %v5829_v40 = vld [vmem:[#allocation5 + $0xf4] sm:$0xf0]  ;;  %v7060_v60 = vor.u32 %v5826_v20, %v5114_v33  ;;  %v5122_v12 = vld [vmem:[#allocation5 + $0xf8] sm:$0xf0] }
 0x346   :  { %v6049_v55 = vpop.eup %6048  ;;  %v7062_v42 = vor.u32 %v5829_v40, %v5120_v37  ;;  %v5813_v20 = vld [vmem:[#allocation5 + $0x74] sm:$0xf0]  ;;  %v5811_v40 = vld [vmem:[#allocation5 + $0x6c] sm:$0xf] }
 0x347   :  { %v7003_v56 = vadd.f32 %v774_v54, %v773_v53  ;;  %v771_v61 = vmul.f32 0.5, %v6049_v55  ;;  %v7065_v53 = vor.u32 %v5827_v50, %v5122_v12  ;;  %v5096_v54 = vld [vmem:[#allocation5 + $0xc0] sm:$0xf]  ;;  %v5824_v55 = vld [vmem:[#allocation5 + $0xcc] sm:$0xf0]  ;;  %v7110_v37 = vor.u32 %v5813_v20, %v5056_v19 }
 0x348   :  { %v5058_v50 = vld [vmem:[#allocation5 + $0x78] sm:$0xf0]  ;;  %v5002_v19 = vld [vmem:[#allocation5 + $0x10] sm:$0xf0]  ;;  %v5008_v20 = vld [vmem:[#allocation5 + $0x8] sm:$0xf] }
 0x349   :  { %6050 = vtanh.f32 %v7003_v56  ;;  %v772_v62 = vadd.f32 0.5, %v771_v61  ;;  %v7070_v61 = vor.u32 %v5824_v55, %v5096_v54  ;;  %9454 = vst [vmem:[#allocation34_spill] sm:$0xff] %v7110_v37  ;;  %v7113_v12 = vor.u32 %v5811_v40, %v5058_v50  ;;  %v5032_v54 = vld [vmem:[#allocation5 + $0x40] sm:$0xf]  ;;  %v5808_v55 = vld [vmem:[#allocation5 + $0x4c] sm:$0xf0] }
 0x34a   :  { %v5801_v40 = vld [vmem:[#allocation5 + $0x14] sm:$0xf0] }
 0x34b   :  { %9455 = vst [vmem:[#allocation35_spill] sm:$0xff] %v7113_v12 }
 0x34f   :  { %v6051_v1 = vpop.eup %6050 }
 0x350   :  { %v777_v3 = vmul.f32 %v6051_v1, %v772_v62  ;;  %v5098_v62 = vld [vmem:[#allocation5 + $0xd0] sm:$0xf0]  ;;  %v5104_v1 = vld [vmem:[#allocation5 + $0xc8] sm:$0xf] }
 0x352   :  { %v7006_v38 = vpack.c.bf16 %v777_v3, %v777_v3  ;;  %v5825_v3 = vld [vmem:[#allocation5 + $0xd4] sm:$0xf0] }
 0x354   :  { %9444 = vst [vmem:[#allocation24_spill] sm:$0xff] %v7006_v38  ;;  %795 = vmatmul.bf16.vlgmr.msrb.gmra.mxu0 %v7006_v38  ;;  %808 = vmatmul.bf16.vlgmr.msrb.gmra.mxu1 %v7006_v38 }
 0x355   :  { %821 = vmatmul.bf16.vlgmr.msrb.gmra.mxu2 %v7006_v38  ;;  %834 = vmatmul.bf16.vlgmr.msrb.gmra.mxu3 %v7006_v38  ;;  %v5851_v38 = vld [vmem:[#allocation7 + $0xac] sm:$0xf] }
 0x356   :  { %945 = vmatpush.bf16.msrb.mxu0 %v6633_v4  ;;  %958 = vmatpush.bf16.msrb.mxu1 %v6635_v8  ;;  %v779_v4 = vrot.slane %v6807_v0, 5  ;;  %v780_v8 = vrot.slane %v6809_v2, 5 }
 0x357   :  { %971 = vmatpush.bf16.msrb.mxu2 %v6637_v9  ;;  %984 = vmatpush.bf16.msrb.mxu3 %v6640_v13 }
 0x35a   :  { %946 = vmatpush.bf16.msrb.mxu0 %v6644_v17  ;;  %959 = vmatpush.bf16.msrb.mxu1 %v6646_v18 }
 0x35b   :  { %972 = vmatpush.bf16.msrb.mxu2 %v6649_v22  ;;  %985 = vmatpush.bf16.msrb.mxu3 %v6651_v26 }
 0x35e   :  { %947 = vmatpush.bf16.msrb.mxu0 %v6654_v30  ;;  %960 = vmatpush.bf16.msrb.mxu1 %v6658_v34  ;;  %v781_v30 = vrot.slane %v6813_v31, 5  ;;  %v782_v34 = vrot.slane %v6815_v32, 5 }
 0x35f   :  { %973 = vmatpush.bf16.msrb.mxu2 %v6660_v35  ;;  %986 = vmatpush.bf16.msrb.mxu3 %v6663_v39 }
 0x362   :  { %948 = vmatpush.bf16.msrb.mxu0 %v6666_v45  ;;  %961 = vmatpush.bf16.msrb.mxu1 %v6670_v46 }
 0x363   :  { %974 = vmatpush.bf16.msrb.mxu2 %v6672_v47  ;;  %987 = vmatpush.bf16.msrb.mxu3 %v6675_v51 }
 0x366   :  { %949 = vmatpush.bf16.msrb.mxu0 %v6678_v57  ;;  %962 = vmatpush.bf16.msrb.mxu1 %v6682_v58 }
 0x367   :  { %975 = vmatpush.bf16.msrb.mxu2 %v6684_v59  ;;  %988 = vmatpush.bf16.msrb.mxu3 %v6687_v63 }
 0x36a   :  { %950 = vmatpush.bf16.msrb.mxu0 %v6690_v6  ;;  %963 = vmatpush.bf16.msrb.mxu1 %v6694_v10 }
 0x36b   :  { %976 = vmatpush.bf16.msrb.mxu2 %v6696_v11  ;;  %989 = vmatpush.bf16.msrb.mxu3 %v6699_v16 }
 0x36e   :  { %951 = vmatpush.bf16.msrb.mxu0 %v6706_v27  ;;  %964 = vmatpush.bf16.msrb.mxu1 %v6710_v28 }
 0x36f   :  { %977 = vmatpush.bf16.msrb.mxu2 %v6712_v29  ;;  %990 = vmatpush.bf16.msrb.mxu3 %v6715_v36 }
 0x372   :  { %952 = vmatpush.bf16.msrb.mxu0 %v6718_v43  ;;  %965 = vmatpush.bf16.msrb.mxu1 %v6722_v44 }
 0x373   :  { %978 = vmatpush.bf16.msrb.mxu2 %v6724_v48  ;;  %991 = vmatpush.bf16.msrb.mxu3 %v6727_v49 }
 0x3d1   :  { %v796_v9 = vpop.f32.mrf.mxu0  ;;  %v809_v13 = vpop.f32.mrf.mxu1 }
 0x3d2   :  { %v797_v17 = vadd.f32 %v796_v9, %v779_v4  ;;  %v810_v18 = vadd.f32 %v809_v13, %v780_v8  ;;  %v7074_v8 = vor.u32 %v5825_v3, %v5104_v1  ;;  %v5823_v9 = vld [vmem:[#allocation5 + $0xcc] sm:$0xf]  ;;  %v5106_v13 = vld [vmem:[#allocation5 + $0xd8] sm:$0xf0]  ;;  %v5034_v1 = vld [vmem:[#allocation5 + $0x50] sm:$0xf0] }
 0x3d3   :  { %v5040_v3 = vld [vmem:[#allocation5 + $0x48] sm:$0xf] }
 0x3d4   :  { %v839_v22 = vmul.f32 0.5, %v797_v17  ;;  %v840_v26 = vmul.f32 0.5, %v810_v18  ;;  %v7077_v17 = vor.u32 %v5823_v9, %v5106_v13  ;;  %v5080_v18 = vld [vmem:[#allocation5 + $0xa0] sm:$0xf]  ;;  %v5809_v9 = vld [vmem:[#allocation5 + $0x54] sm:$0xf0] }
 0x3d6   :  { %6052 = vtanh.f32 %v839_v22  ;;  %v5820_v22 = vld [vmem:[#allocation5 + $0xac] sm:$0xf0] }
 0x3d7   :  { %6054 = vtanh.f32 %v840_v26  ;;  %v5818_v26 = vld [vmem:[#allocation5 + $0xa4] sm:$0xf] }
 0x3d8   :  { %v822_v35 = vpop.f32.mrf.mxu2  ;;  %v835_v39 = vpop.f32.mrf.mxu3 }
 0x3d9   :  { %v823_v45 = vadd.f32 %v822_v35, %v781_v30  ;;  %v836_v46 = vadd.f32 %v835_v39, %v782_v34  ;;  %v798_v47 = vpop.f32.mrf.mxu0  ;;  %v811_v51 = vpop.f32.mrf.mxu1  ;;  %v7082_v30 = vor.u32 %v5820_v22, %v5080_v18  ;;  %v5082_v34 = vld [vmem:[#allocation5 + $0xb0] sm:$0xf0]  ;;  %v5088_v35 = vld [vmem:[#allocation5 + $0xa8] sm:$0xf]  ;;  %v5821_v39 = vld [vmem:[#allocation5 + $0xb4] sm:$0xf0]  ;;  %v7122_v18 = vor.u32 %v5809_v9, %v5040_v3 }
 0x3da   :  { %v5819_v47 = vld [vmem:[#allocation5 + $0xac] sm:$0xf]  ;;  %v5090_v51 = vld [vmem:[#allocation5 + $0xb8] sm:$0xf0]  ;;  %v859_v3 = vrot.slane %v6809_v2, 6 }
 0x3db   :  { %6056 = vtanh.f32 %v823_v45  ;;  %v848_v57 = vmul.f32 0.5, %v836_v46  ;;  %v7084_v45 = vor.u32 %v5818_v26, %v5082_v34  ;;  %v7086_v46 = vor.u32 %v5821_v39, %v5088_v35  ;;  %9458 = vst [vmem:[#allocation38_spill] sm:$0xff] %v7122_v18  ;;  %v5807_v22 = vld [vmem:[#allocation5 + $0x4c] sm:$0xf]  ;;  %v5042_v26 = vld [vmem:[#allocation5 + $0x58] sm:$0xf0] }
 0x3dc   :  { %v6053_v58 = vpop.eup %6052  ;;  %v7125_v34 = vor.u32 %v5807_v22, %v5042_v26  ;;  %v5016_v35 = vld [vmem:[#allocation5 + $0x20] sm:$0xf]  ;;  %v5804_v39 = vld [vmem:[#allocation5 + $0x2c] sm:$0xf0]  ;;  %v5184_v2 = vld [vmem:[#allocation7 + $0x68] sm:$0xf] }
 0x3dd   :  { %v6055_v59 = vpop.eup %6054  ;;  %v843_v63 = vmul.f32 0.5, %v6053_v58  ;;  %6058 = vtanh.f32 %v848_v57  ;;  %9446 = vst [vmem:[#allocation26_spill] sm:$0xff] %v7086_v46  ;;  %v7089_v57 = vor.u32 %v5819_v47, %v5090_v51  ;;  %v5064_v58 = vld [vmem:[#allocation5 + $0x80] sm:$0xf]  ;;  %v5802_v47 = vld [vmem:[#allocation5 + $0x24] sm:$0xf]  ;;  %v7130_v51 = vor.u32 %v5804_v39, %v5016_v35 }
 0x3de   :  { %v844_v6 = vmul.f32 0.5, %v6055_v59  ;;  %v5816_v59 = vld [vmem:[#allocation5 + $0x8c] sm:$0xf0]  ;;  %9459 = vst [vmem:[#allocation39_spill] sm:$0xff] %v7125_v34 }
 0x3df   :  { %v845_v10 = vadd.f32 0.5, %v843_v63  ;;  %9447 = vst [vmem:[#allocation27_spill] sm:$0xff] %v7089_v57  ;;  %v5814_v63 = vld [vmem:[#allocation5 + $0x84] sm:$0xf] }
 0x3e0   :  { %v846_v11 = vadd.f32 0.5, %v844_v6  ;;  %v824_v16 = vpop.f32.mrf.mxu2  ;;  %v837_v27 = vpop.f32.mrf.mxu3  ;;  %v7094_v6 = vor.u32 %v5816_v59, %v5064_v58  ;;  %9460 = vst [vmem:[#allocation40_spill] sm:$0xff] %v7130_v51  ;;  %v5018_v58 = vld [vmem:[#allocation5 + $0x30] sm:$0xf0]  ;;  %v5024_v59 = vld [vmem:[#allocation5 + $0x28] sm:$0xf] }
 0x3e1   :  { %v6057_v28 = vpop.eup %6056  ;;  %v5817_v16 = vld [vmem:[#allocation5 + $0x94] sm:$0xf0] }
 0x3e2   :  { %v852_v29 = vmul.f32 %v846_v11, %v7003_v56  ;;  %v853_v36 = vmul.f32 %v6057_v28, %v845_v10  ;;  %v5822_v56 = vld [vmem:[#allocation5 + $0xc4] sm:$0xf]  ;;  %9448 = vst [vmem:[#allocation28_spill] sm:$0xff] %v7094_v6  ;;  %v5066_v10 = vld [vmem:[#allocation5 + $0x90] sm:$0xf0] }
 0x3e3   :  { %v6059_v43 = vpop.eup %6058  ;;  %v7072_v4 = vor.u32 %v5822_v56, %v5098_v62  ;;  %v5072_v11 = vld [vmem:[#allocation5 + $0x88] sm:$0xf]  ;;  %v7096_v27 = vor.u32 %v5814_v63, %v5066_v10  ;;  %v5806_v56 = vld [vmem:[#allocation5 + $0x44] sm:$0xf]  ;;  %v7118_v62 = vor.u32 %v5808_v55, %v5032_v54  ;;  %v5805_v63 = vld [vmem:[#allocation5 + $0x34] sm:$0xf0]  ;;  %v7132_v10 = vor.u32 %v5802_v47, %v5018_v58 }
 0x3e4   :  { %v7049_v44 = vadd.f32 %v853_v36, %v852_v29  ;;  %v850_v48 = vmul.f32 0.5, %v6059_v43  ;;  %v7098_v28 = vor.u32 %v5817_v16, %v5072_v11  ;;  %v5815_v29 = vld [vmem:[#allocation5 + $0x8c] sm:$0xf]  ;;  %v5074_v36 = vld [vmem:[#allocation5 + $0x98] sm:$0xf0]  ;;  %v7120_v13 = vor.u32 %v5806_v56, %v5034_v1 }
 0x3e5   :  { %9449 = vst [vmem:[#allocation29_spill] sm:$0xff] %v7096_v27  ;;  %v7101_v43 = vor.u32 %v5815_v29, %v5074_v36  ;;  %v7134_v11 = vor.u32 %v5805_v63, %v5024_v59  ;;  %v5803_v16 = vld [vmem:[#allocation5 + $0x2c] sm:$0xf]  ;;  %v5026_v29 = vld [vmem:[#allocation5 + $0x38] sm:$0xf0]  ;;  %v7146_v54 = vor.u32 %v5801_v40, %v5008_v20  ;;  %v858_v1 = vrot.slane %v6807_v0, 6 }
 0x3e6   :  { %6060 = vtanh.f32 %v7049_v44  ;;  %v851_v49 = vadd.f32 0.5, %v850_v48  ;;  %9450 = vst [vmem:[#allocation30_spill] sm:$0xff] %v7098_v28  ;;  %v5048_v48 = vld [vmem:[#allocation5 + $0x60] sm:$0xf]  ;;  %v7137_v36 = vor.u32 %v5803_v16, %v5026_v29  ;;  %v5799_v55 = vld [vmem:[#allocation5 + $0xc] sm:$0xf] }
 0x3e7   :  { %9451 = vst [vmem:[#allocation31_spill] sm:$0xff] %v7101_v43  ;;  %v5010_v56 = vld [vmem:[#allocation5 + $0x18] sm:$0xf0]  ;;  %v860_v59 = vrot.slane %v6813_v31, 6  ;;  %v861_v63 = vrot.slane %v6815_v32, 6 }
 0x3e8   :  { %9456 = vst [vmem:[#allocation36_spill] sm:$0xff] %v7118_v62  ;;  %v7151_v9 = vor.u32 %v5799_v55, %v5010_v56  ;;  %v5847_v32 = vld [vmem:[#allocation7 + $0x8c] sm:$0xf]  ;;  %v5202_v31 = vld [vmem:[#allocation7 + $0x98] sm:$0xf0] }
 0x3e9   :  { %9457 = vst [vmem:[#allocation37_spill] sm:$0xff] %v7120_v13  ;;  %v5845_v0 = vld [vmem:[#allocation7 + $0x74] sm:$0xf0] }
 0x3ea   :  { %9461 = vst [vmem:[#allocation41_spill] sm:$0xff] %v7132_v10 }
 0x3eb   :  { %9462 = vst [vmem:[#allocation42_spill] sm:$0xff] %v7134_v11 }
 0x3ec   :  { %v6061_v23 = vpop.eup %6060  ;;  %9463 = vst [vmem:[#allocation43_spill] sm:$0xff] %v7137_v36 }
 0x3ed   :  { %v856_v7 = vmul.f32 %v6061_v23, %v851_v49  ;;  %v5812_v49 = vld [vmem:[#allocation5 + $0x6c] sm:$0xf0]  ;;  %v5810_v23 = vld [vmem:[#allocation5 + $0x64] sm:$0xf]  ;;  %9466 = vst [vmem:[#allocation46_spill] sm:$0xff] %v7146_v54 }
 0x3ee   :  { %v7108_v33 = vor.u32 %v5810_v23, %v5050_v15  ;;  %v5798_v23 = vld [vmem:[#allocation5 + $0x4] sm:$0xf]  ;;  %9467 = vst [vmem:[#allocation47_spill] sm:$0xff] %v7151_v9 }
 0x3ef   :  { %v7052_v14 = vpack.c.bf16 %v856_v7, %v856_v7  ;;  %v7106_v7 = vor.u32 %v5812_v49, %v5048_v48  ;;  %v5000_v48 = vld [vmem:[#allocation5] sm:$0xf]  ;;  %v5800_v49 = vld [vmem:[#allocation5 + $0xc] sm:$0xf0]  ;;  %v7144_v50 = vor.u32 %v5798_v23, %v5002_v19 }
 0x3f0   :  { %9453 = vst [vmem:[#allocation33_spill] sm:$0xff] %v7108_v33  ;;  %v7142_v15 = vor.u32 %v5800_v49, %v5000_v48 }
 0x3f1   :  { %9445 = vst [vmem:[#allocation25_spill] sm:$0xff] %v7052_v14  ;;  %874 = vmatmul.bf16.vlgmr.msra.gmra.mxu0 %v7052_v14  ;;  %887 = vmatmul.bf16.vlgmr.msra.gmra.mxu1 %v7052_v14 }
 0x3f2   :  { %900 = vmatmul.bf16.vlgmr.msra.gmra.mxu2 %v7052_v14  ;;  %913 = vmatmul.bf16.vlgmr.msra.gmra.mxu3 %v7052_v14  ;;  %9452 = vst [vmem:[#allocation32_spill] sm:$0xff] %v7106_v7  ;;  %v5853_v14 = vld [vmem:[#allocation7 + $0xb4] sm:$0xf0] }
 0x3f3   :  { %1249 = vmatpush.bf16.msra.mxu0 %v7058_v24  ;;  %1262 = vmatpush.bf16.msra.mxu1 %v7060_v60  ;;  %9464 = vst [vmem:[#allocation44_spill] sm:$0xff] %v7142_v15 }
 0x3f4   :  { %1275 = vmatpush.bf16.msra.mxu2 %v7062_v42  ;;  %1288 = vmatpush.bf16.msra.mxu3 %v7065_v53  ;;  %9465 = vst [vmem:[#allocation45_spill] sm:$0xff] %v7144_v50 }
 0x3f7   :  { %1250 = vmatpush.bf16.msra.mxu0 %v7070_v61  ;;  %1263 = vmatpush.bf16.msra.mxu1 %v7072_v4 }
 0x3f8   :  { %1276 = vmatpush.bf16.msra.mxu2 %v7074_v8  ;;  %1289 = vmatpush.bf16.msra.mxu3 %v7077_v17 }
 0x3fb   :  { %1251 = vmatpush.bf16.msra.mxu0 %v7082_v30  ;;  %1264 = vmatpush.bf16.msra.mxu1 %v7084_v45 }
 0x3fc   :  { %1277 = vmatpush.bf16.msra.mxu2 %v7086_v46  ;;  %1290 = vmatpush.bf16.msra.mxu3 %v7089_v57 }
 0x3ff   :  { %1252 = vmatpush.bf16.msra.mxu0 %v7094_v6  ;;  %1265 = vmatpush.bf16.msra.mxu1 %v7096_v27 }
 0x400   :  { %1278 = vmatpush.bf16.msra.mxu2 %v7098_v28  ;;  %1291 = vmatpush.bf16.msra.mxu3 %v7101_v43 }
 0x403   :  { %1253 = vmatpush.bf16.msra.mxu0 %v7106_v7  ;;  %1266 = vmatpush.bf16.msra.mxu1 %v7108_v33 }
 0x404   :  { %1279 = vmatpush.bf16.msra.mxu2 %v7110_v37  ;;  %1292 = vmatpush.bf16.msra.mxu3 %v7113_v12 }
 0x407   :  { %1254 = vmatpush.bf16.msra.mxu0 %v7118_v62  ;;  %1267 = vmatpush.bf16.msra.mxu1 %v7120_v13 }
 0x408   :  { %1280 = vmatpush.bf16.msra.mxu2 %v7122_v18  ;;  %1293 = vmatpush.bf16.msra.mxu3 %v7125_v34 }
 0x40b   :  { %1255 = vmatpush.bf16.msra.mxu0 %v7130_v51  ;;  %1268 = vmatpush.bf16.msra.mxu1 %v7132_v10 }
 0x40c   :  { %1281 = vmatpush.bf16.msra.mxu2 %v7134_v11  ;;  %1294 = vmatpush.bf16.msra.mxu3 %v7137_v36 }
 0x40f   :  { %1256 = vmatpush.bf16.msra.mxu0 %v7142_v15  ;;  %1269 = vmatpush.bf16.msra.mxu1 %v7144_v50 }
 0x410   :  { %1282 = vmatpush.bf16.msra.mxu2 %v7146_v54  ;;  %1295 = vmatpush.bf16.msra.mxu3 %v7151_v9 }
 0x46e   :  { %v875_v22 = vpop.f32.mrf.mxu0  ;;  %v888_v26 = vpop.f32.mrf.mxu1 }
 0x46f   :  { %v876_v35 = vadd.f32 %v875_v22, %v858_v1  ;;  %v889_v39 = vadd.f32 %v888_v26, %v859_v3 }
 0x471   :  { %v918_v47 = vmul.f32 0.5, %v876_v35  ;;  %v919_v58 = vmul.f32 0.5, %v889_v39 }
 0x473   :  { %6062 = vtanh.f32 %v918_v47 }
 0x474   :  { %6064 = vtanh.f32 %v919_v58 }
 0x475   :  { %v901_v16 = vpop.f32.mrf.mxu2  ;;  %v914_v29 = vpop.f32.mrf.mxu3 }
 0x476   :  { %v902_v48 = vadd.f32 %v901_v16, %v860_v59  ;;  %v915_v49 = vadd.f32 %v914_v29, %v861_v63  ;;  %v877_v23 = vpop.f32.mrf.mxu0  ;;  %v890_v19 = vpop.f32.mrf.mxu1  ;;  %v5240_v29 = vld [vmem:[#allocation7 + $0xe0] sm:$0xf] }
 0x477   :  { %v5858_v23 = vld [vmem:[#allocation7 + $0xe4] sm:$0xf]  ;;  %v5242_v19 = vld [vmem:[#allocation7 + $0xf0] sm:$0xf0] }
 0x478   :  { %6066 = vtanh.f32 %v902_v48  ;;  %v927_v20 = vmul.f32 0.5, %v915_v49  ;;  %v5860_v48 = vld [vmem:[#allocation7 + $0xec] sm:$0xf0] }
 0x479   :  { %v6063_v40 = vpop.eup %6062 }
 0x47a   :  { %v6065_v55 = vpop.eup %6064  ;;  %v922_v56 = vmul.f32 0.5, %v6063_v40  ;;  %6068 = vtanh.f32 %v927_v20  ;;  %v5248_v20 = vld [vmem:[#allocation7 + $0xe8] sm:$0xf] }
 0x47b   :  { %v923_v1 = vmul.f32 0.5, %v6065_v55  ;;  %v5861_v55 = vld [vmem:[#allocation7 + $0xf4] sm:$0xf0] }
 0x47c   :  { %v924_v3 = vadd.f32 0.5, %v922_v56  ;;  %v5859_v56 = vld [vmem:[#allocation7 + $0xec] sm:$0xf] }
 0x47d   :  { %v925_v22 = vadd.f32 0.5, %v923_v1  ;;  %v903_v26 = vpop.f32.mrf.mxu2  ;;  %v916_v35 = vpop.f32.mrf.mxu3  ;;  %v5250_v1 = vld [vmem:[#allocation7 + $0xf8] sm:$0xf0] }
 0x47e   :  { %v6067_v39 = vpop.eup %6066  ;;  %v5856_v35 = vld [vmem:[#allocation7 + $0xcc] sm:$0xf0] }
 0x47f   :  { %v931_v47 = vmul.f32 %v925_v22, %v7049_v44  ;;  %v932_v58 = vmul.f32 %v6067_v39, %v924_v3  ;;  %v7164_v44 = vor.u32 %v5860_v48, %v5240_v29  ;;  %v7166_v3 = vor.u32 %v5858_v23, %v5242_v19  ;;  %v5224_v22 = vld [vmem:[#allocation7 + $0xc0] sm:$0xf]  ;;  %v5852_v19 = vld [vmem:[#allocation7 + $0xac] sm:$0xf0] }
 0x480   :  { %v6069_v25 = vpop.eup %6068  ;;  %v7170_v39 = vor.u32 %v5859_v56, %v5250_v1  ;;  %v7178_v29 = vor.u32 %v5856_v35, %v5224_v22  ;;  %v5208_v23 = vld [vmem:[#allocation7 + $0xa0] sm:$0xf]  ;;  %v5850_v56 = vld [vmem:[#allocation7 + $0xa4] sm:$0xf]  ;;  %v5210_v1 = vld [vmem:[#allocation7 + $0xb0] sm:$0xf0] }
 0x481   :  { %v7159_v59 = vadd.f32 %v932_v58, %v931_v47  ;;  %v929_v63 = vmul.f32 0.5, %v6069_v25  ;;  %v7168_v25 = vor.u32 %v5861_v55, %v5248_v20  ;;  %v5854_v47 = vld [vmem:[#allocation7 + $0xc4] sm:$0xf]  ;;  %v5226_v58 = vld [vmem:[#allocation7 + $0xd0] sm:$0xf0]  ;;  %v7190_v22 = vor.u32 %v5852_v19, %v5208_v23 }
 0x482   :  { %v7180_v48 = vor.u32 %v5854_v47, %v5226_v58  ;;  %v7192_v35 = vor.u32 %v5850_v56, %v5210_v1  ;;  %v5192_v47 = vld [vmem:[#allocation7 + $0x80] sm:$0xf]  ;;  %v5848_v58 = vld [vmem:[#allocation7 + $0x8c] sm:$0xf0] }
 0x483   :  { %9468 = vst [vmem:[#allocation48_spill] sm:$0xff] %v7159_v59  ;;  %6070 = vtanh.f32 %v7159_v59  ;;  %v930_v16 = vadd.f32 0.5, %v929_v63  ;;  %v5232_v63 = vld [vmem:[#allocation7 + $0xc8] sm:$0xf]  ;;  %v5849_v59 = vld [vmem:[#allocation7 + $0x94] sm:$0xf0]  ;;  %v7202_v23 = vor.u32 %v5848_v58, %v5192_v47 }
 0x484   :  { %9470 = vst [vmem:[#allocation50_spill] sm:$0xff] %v7190_v22  ;;  %v5176_v56 = vld [vmem:[#allocation7 + $0x60] sm:$0xf]  ;;  %v5844_v1 = vld [vmem:[#allocation7 + $0x6c] sm:$0xf0] }
 0x485   :  { %9471 = vst [vmem:[#allocation51_spill] sm:$0xff] %v7192_v35  ;;  %v7214_v47 = vor.u32 %v5844_v1, %v5176_v56  ;;  %v5841_v56 = vld [vmem:[#allocation7 + $0x54] sm:$0xf0]  ;;  %v5839_v1 = vld [vmem:[#allocation7 + $0x4c] sm:$0xf] }
 0x486   :  { %9473 = vst [vmem:[#allocation53_spill] sm:$0xff] %v7202_v23 }
 0x487   :  { %9477 = vst [vmem:[#allocation57_spill] sm:$0xff] %v7214_v47 }
 0x489   :  { %v6071_v49 = vpop.eup %6070 }
 0x48a   :  { %v935_v40 = vmul.f32 %v6071_v49, %v930_v16  ;;  %v5857_v16 = vld [vmem:[#allocation7 + $0xd4] sm:$0xf0]  ;;  %v5855_v49 = vld [vmem:[#allocation7 + $0xcc] sm:$0xf] }
 0x48b   :  { %v7184_v20 = vor.u32 %v5857_v16, %v5232_v63  ;;  %v7198_v16 = vor.u32 %v5851_v38, %v5218_v41  ;;  %v7208_v41 = vor.u32 %v5849_v59, %v5200_v5  ;;  %v7210_v38 = vor.u32 %v5847_v32, %v5202_v31  ;;  %v5838_v5 = vld [vmem:[#allocation7 + $0x44] sm:$0xf]  ;;  %v5162_v59 = vld [vmem:[#allocation7 + $0x50] sm:$0xf0] }
 0x48c   :  { %v7162_v26 = vpack.c.bf16 %v935_v40, %v935_v40  ;;  %v5234_v40 = vld [vmem:[#allocation7 + $0xd8] sm:$0xf0]  ;;  %v7220_v31 = vor.u32 %v5845_v0, %v5184_v2  ;;  %v7232_v2 = vor.u32 %v5838_v5, %v5162_v59  ;;  %v5128_v5 = vld [vmem:[#allocation7] sm:$0xf]  ;;  %v5832_v59 = vld [vmem:[#allocation7 + $0xc] sm:$0xf0] }
 0x48d   :  { %v7186_v55 = vor.u32 %v5855_v49, %v5234_v40  ;;  %9472 = vst [vmem:[#allocation52_spill] sm:$0xff] %v7198_v16  ;;  %v5846_v49 = vld [vmem:[#allocation7 + $0x84] sm:$0xf]  ;;  %v5194_v40 = vld [vmem:[#allocation7 + $0x90] sm:$0xf0] }
 0x48e   :  { %9469 = vst [vmem:[#allocation49_spill] sm:$0xff] %v7162_v26  ;;  %953 = vmatmul.bf16.vlgmr.msrb.gmra.mxu0 %v7162_v26  ;;  %966 = vmatmul.bf16.vlgmr.msrb.gmra.mxu1 %v7162_v26  ;;  %v7204_v19 = vor.u32 %v5846_v49, %v5194_v40  ;;  %v5160_v49 = vld [vmem:[#allocation7 + $0x40] sm:$0xf]  ;;  %v5840_v40 = vld [vmem:[#allocation7 + $0x4c] sm:$0xf0] }
 0x48f   :  { %979 = vmatmul.bf16.vlgmr.msrb.gmra.mxu2 %v7162_v26  ;;  %992 = vmatmul.bf16.vlgmr.msrb.gmra.mxu3 %v7162_v26  ;;  %v5216_v26 = vld [vmem:[#allocation7 + $0xa8] sm:$0xf]  ;;  %9475 = vst [vmem:[#allocation55_spill] sm:$0xff] %v7208_v41  ;;  %v7230_v0 = vor.u32 %v5840_v40, %v5160_v49 }
 0x490   :  { %1461 = vmatpush.bf16.msrb.mxu0 %v7164_v44  ;;  %1474 = vmatpush.bf16.msrb.mxu1 %v7166_v3  ;;  %v7196_v63 = vor.u32 %v5853_v14, %v5216_v26  ;;  %9474 = vst [vmem:[#allocation54_spill] sm:$0xff] %v7204_v19  ;;  %v5842_v14 = vld [vmem:[#allocation7 + $0x64] sm:$0xf]  ;;  %v5178_v26 = vld [vmem:[#allocation7 + $0x70] sm:$0xf0] }
 0x491   :  { %1487 = vmatpush.bf16.msrb.mxu2 %v7168_v25  ;;  %1500 = vmatpush.bf16.msrb.mxu3 %v7170_v39  ;;  %9476 = vst [vmem:[#allocation56_spill] sm:$0xff] %v7210_v38  ;;  %v7216_v58 = vor.u32 %v5842_v14, %v5178_v26  ;;  %v5170_v14 = vld [vmem:[#allocation7 + $0x58] sm:$0xf0] }
 0x492   :  { %9479 = vst [vmem:[#allocation59_spill] sm:$0xff] %v7220_v31 }
 0x493   :  { %9478 = vst [vmem:[#allocation58_spill] sm:$0xff] %v7216_v58 }
 0x494   :  { %1462 = vmatpush.bf16.msrb.mxu0 %v7178_v29  ;;  %1475 = vmatpush.bf16.msrb.mxu1 %v7180_v48  ;;  %9481 = vst [vmem:[#allocation61_spill] sm:$0xff] %v7230_v0 }
 0x495   :  { %1488 = vmatpush.bf16.msrb.mxu2 %v7184_v20  ;;  %1501 = vmatpush.bf16.msrb.mxu3 %v7186_v55  ;;  %9482 = vst [vmem:[#allocation62_spill] sm:$0xff] %v7232_v2 }
 0x498   :  { %1463 = vmatpush.bf16.msrb.mxu0 %v7190_v22  ;;  %1476 = vmatpush.bf16.msrb.mxu1 %v7192_v35  ;;  %v5843_v22 = vld [vmem:[#allocation7 + $0x6c] sm:$0xf]  ;;  %v5186_v35 = vld [vmem:[#allocation7 + $0x78] sm:$0xf0] }
 0x499   :  { %1489 = vmatpush.bf16.msrb.mxu2 %v7196_v63  ;;  %1502 = vmatpush.bf16.msrb.mxu3 %v7198_v16  ;;  %v7222_v32 = vor.u32 %v5843_v22, %v5186_v35  ;;  %v5168_v16 = vld [vmem:[#allocation7 + $0x48] sm:$0xf]  ;;  %v5144_v22 = vld [vmem:[#allocation7 + $0x20] sm:$0xf]  ;;  %v5836_v35 = vld [vmem:[#allocation7 + $0x2c] sm:$0xf0] }
 0x49a   :  { %v7236_v26 = vor.u32 %v5841_v56, %v5168_v16  ;;  %v7242_v49 = vor.u32 %v5836_v35, %v5144_v22  ;;  %v9490_v35 = vld [vmem:[#allocation56_spill] sm:$0xff] }
 0x49b   :  { %9480 = vst [vmem:[#allocation60_spill] sm:$0xff] %v7222_v32 }
 0x49c   :  { %1464 = vmatpush.bf16.msrb.mxu0 %v7202_v23  ;;  %1477 = vmatpush.bf16.msrb.mxu1 %v7204_v19  ;;  %v5152_v19 = vld [vmem:[#allocation7 + $0x28] sm:$0xf]  ;;  %v5835_v23 = vld [vmem:[#allocation7 + $0x2c] sm:$0xf] }
 0x49d   :  { %1490 = vmatpush.bf16.msrb.mxu2 %v7208_v41  ;;  %1503 = vmatpush.bf16.msrb.mxu3 %v7210_v38  ;;  %v7238_v38 = vor.u32 %v5839_v1, %v5170_v14  ;;  %v5834_v41 = vld [vmem:[#allocation7 + $0x24] sm:$0xf]  ;;  %v5130_v14 = vld [vmem:[#allocation7 + $0x10] sm:$0xf0] }
 0x49e   :  { %1257 = vmatmul.bf16.vlgmr.msra.gmra.mxu0 %v6822_v21  ;;  %1270 = vmatmul.bf16.vlgmr.msra.gmra.mxu1 %v6822_v21  ;;  %v5830_v1 = vld [vmem:[#allocation7 + $0x4] sm:$0xf] }
 0x49f   :  { %1283 = vmatmul.bf16.vlgmr.msra.gmra.mxu2 %v6822_v21  ;;  %1296 = vmatmul.bf16.vlgmr.msra.gmra.mxu3 %v6822_v21  ;;  %v5146_v21 = vld [vmem:[#allocation7 + $0x30] sm:$0xf0]  ;;  %v7256_v22 = vor.u32 %v5830_v1, %v5130_v14  ;;  %v9495_v14 = vld [vmem:[#allocation61_spill] sm:$0xff] }
 0x4a0   :  { %1465 = vmatpush.bf16.msrb.mxu0 %v7214_v47  ;;  %1478 = vmatpush.bf16.msrb.mxu1 %v7216_v58  ;;  %v5837_v47 = vld [vmem:[#allocation7 + $0x34] sm:$0xf0]  ;;  %v5154_v58 = vld [vmem:[#allocation7 + $0x38] sm:$0xf0]  ;;  %v7244_v40 = vor.u32 %v5834_v41, %v5146_v21  ;;  %v7254_v41 = vor.u32 %v5832_v59, %v5128_v5  ;;  %v9492_v5 = vld [vmem:[#allocation58_spill] sm:$0xff] }
 0x4a1   :  { %1491 = vmatpush.bf16.msrb.mxu2 %v7220_v31  ;;  %1504 = vmatpush.bf16.msrb.mxu3 %v7222_v32  ;;  %v7248_v16 = vor.u32 %v5837_v47, %v5152_v19  ;;  %v7250_v56 = vor.u32 %v5835_v23, %v5154_v58  ;;  %v5136_v32 = vld [vmem:[#allocation7 + $0x8] sm:$0xf]  ;;  %v5831_v31 = vld [vmem:[#allocation7 + $0xc] sm:$0xf]  ;;  %v9483_v47 = vmov 0   ;;  %v9484_v58 = vld [vmem:[#allocation50_spill] sm:$0xff] }
 0x4a2   :  { %v9491_v21 = vld [vmem:[#allocation57_spill] sm:$0xff]  ;;  %v9493_v59 = vld [vmem:[#allocation59_spill] sm:$0xff]  ;;  %v9494_v1 = vld [vmem:[#allocation60_spill] sm:$0xff] }
 0x4a4   :  { %1466 = vmatpush.bf16.msrb.mxu0 %v7230_v0  ;;  %1479 = vmatpush.bf16.msrb.mxu1 %v7232_v2  ;;  %v5833_v0 = vld [vmem:[#allocation7 + $0x14] sm:$0xf0]  ;;  %v5138_v2 = vld [vmem:[#allocation7 + $0x18] sm:$0xf0] }
 0x4a5   :  { %1492 = vmatpush.bf16.msrb.mxu2 %v7236_v26  ;;  %1505 = vmatpush.bf16.msrb.mxu3 %v7238_v38  ;;  %v7260_v23 = vor.u32 %v5833_v0, %v5136_v32  ;;  %v7262_v19 = vor.u32 %v5831_v31, %v5138_v2  ;;  %v9485_v31 = vld [vmem:[#allocation51_spill] sm:$0xff]  ;;  %v9486_v32 = vld [vmem:[#allocation52_spill] sm:$0xff]  ;;  %v9488_v0 = vld [vmem:[#allocation54_spill] sm:$0xff] }
 0x4a6   :  { %v9489_v2 = vld [vmem:[#allocation55_spill] sm:$0xff] }
 0x4a8   :  { %1467 = vmatpush.bf16.msrb.mxu0 %v7242_v49  ;;  %1480 = vmatpush.bf16.msrb.mxu1 %v7244_v40 }
 0x4a9   :  { %1493 = vmatpush.bf16.msrb.mxu2 %v7248_v16  ;;  %1506 = vmatpush.bf16.msrb.mxu3 %v7250_v56 }
 0x4ac   :  { %1468 = vmatpush.bf16.msrb.mxu0 %v7254_v41  ;;  %1481 = vmatpush.bf16.msrb.mxu1 %v7256_v22 }
 0x4ad   :  { %1494 = vmatpush.bf16.msrb.mxu2 %v7260_v23  ;;  %1507 = vmatpush.bf16.msrb.mxu3 %v7262_v19 }
 0x4af   :  { %1469 = vmatmul.bf16.vlgmr.msrb.gmra.mxu0 %v9483_v47  ;;  %1482 = vmatmul.bf16.vlgmr.msrb.gmra.mxu1 %v9483_v47 }
 0x4b0   :  { %1531 = vmatpush.bf16.msra.mxu0 %v7058_v24  ;;  %1544 = vmatpush.bf16.msra.mxu1 %v7060_v60 }
 0x4b1   :  { %1557 = vmatpush.bf16.msra.mxu2 %v7062_v42  ;;  %1570 = vmatpush.bf16.msra.mxu3 %v7065_v53 }
 0x4b2   :  { %1495 = vmatmul.bf16.vlgmr.msrb.gmra.mxu2 %v9483_v47  ;;  %1508 = vmatmul.bf16.vlgmr.msrb.gmra.mxu3 %v9483_v47  ;;  %v9496_v47 = vld [vmem:[#allocation62_spill] sm:$0xff] }
 0x4b4   :  { %1532 = vmatpush.bf16.msra.mxu0 %v7070_v61  ;;  %1545 = vmatpush.bf16.msra.mxu1 %v7072_v4 }
 0x4b5   :  { %1558 = vmatpush.bf16.msra.mxu2 %v7074_v8  ;;  %1571 = vmatpush.bf16.msra.mxu3 %v7077_v17 }
 0x4b8   :  { %1533 = vmatpush.bf16.msra.mxu0 %v7082_v30  ;;  %1546 = vmatpush.bf16.msra.mxu1 %v7084_v45 }
 0x4b9   :  { %1559 = vmatpush.bf16.msra.mxu2 %v7086_v46  ;;  %1572 = vmatpush.bf16.msra.mxu3 %v7089_v57 }
 0x4bc   :  { %1534 = vmatpush.bf16.msra.mxu0 %v7094_v6  ;;  %1547 = vmatpush.bf16.msra.mxu1 %v7096_v27 }
 0x4bd   :  { %1560 = vmatpush.bf16.msra.mxu2 %v7098_v28  ;;  %1573 = vmatpush.bf16.msra.mxu3 %v7101_v43 }
 0x4c0   :  { %1535 = vmatpush.bf16.msra.mxu0 %v7106_v7  ;;  %1548 = vmatpush.bf16.msra.mxu1 %v7108_v33 }
 0x4c1   :  { %1561 = vmatpush.bf16.msra.mxu2 %v7110_v37  ;;  %1574 = vmatpush.bf16.msra.mxu3 %v7113_v12 }
 0x4c4   :  { %1536 = vmatpush.bf16.msra.mxu0 %v7118_v62  ;;  %1549 = vmatpush.bf16.msra.mxu1 %v7120_v13 }
 0x4c5   :  { %1562 = vmatpush.bf16.msra.mxu2 %v7122_v18  ;;  %1575 = vmatpush.bf16.msra.mxu3 %v7125_v34 }
 0x4c8   :  { %1537 = vmatpush.bf16.msra.mxu0 %v7130_v51  ;;  %1550 = vmatpush.bf16.msra.mxu1 %v7132_v10 }
 0x4c9   :  { %1563 = vmatpush.bf16.msra.mxu2 %v7134_v11  ;;  %1576 = vmatpush.bf16.msra.mxu3 %v7137_v36 }
 0x4cc   :  { %1538 = vmatpush.bf16.msra.mxu0 %v7142_v15  ;;  %1551 = vmatpush.bf16.msra.mxu1 %v7144_v50 }
 0x4cd   :  { %1564 = vmatpush.bf16.msra.mxu2 %v7146_v54  ;;  %1577 = vmatpush.bf16.msra.mxu3 %v7151_v9 }
 0x4cf   :  { %1539 = vmatmul.bf16.vlgmr.msra.gmra.mxu0 %v6868_v52  ;;  %1552 = vmatmul.bf16.vlgmr.msra.gmra.mxu1 %v6868_v52 }
 0x4d0   :  { %1584 = vmatpush.bf16.msrb.mxu0 %v7164_v44  ;;  %1597 = vmatpush.bf16.msrb.mxu1 %v7166_v3 }
 0x4d1   :  { %1565 = vmatmul.bf16.vlgmr.msra.gmra.mxu2 %v6868_v52  ;;  %1578 = vmatmul.bf16.vlgmr.msra.gmra.mxu3 %v6868_v52  ;;  %v9487_v52 = vld [vmem:[#allocation53_spill] sm:$0xff] }
 0x4d2   :  { %1610 = vmatpush.bf16.msrb.mxu2 %v7168_v25  ;;  %1623 = vmatpush.bf16.msrb.mxu3 %v7170_v39 }
 0x4d4   :  { %1585 = vmatpush.bf16.msrb.mxu0 %v7178_v29  ;;  %1598 = vmatpush.bf16.msrb.mxu1 %v7180_v48 }
 0x4d6   :  { %1611 = vmatpush.bf16.msrb.mxu2 %v7184_v20  ;;  %1624 = vmatpush.bf16.msrb.mxu3 %v7186_v55 }
 0x4d8   :  { %1586 = vmatpush.bf16.msrb.mxu0 %v9484_v58  ;;  %1599 = vmatpush.bf16.msrb.mxu1 %v9485_v31 }
 0x4da   :  { %1612 = vmatpush.bf16.msrb.mxu2 %v7196_v63  ;;  %1625 = vmatpush.bf16.msrb.mxu3 %v9486_v32 }
 0x4dc   :  { %1587 = vmatpush.bf16.msrb.mxu0 %v9487_v52  ;;  %1600 = vmatpush.bf16.msrb.mxu1 %v9488_v0 }
 0x4de   :  { %1613 = vmatpush.bf16.msrb.mxu2 %v9489_v2  ;;  %1626 = vmatpush.bf16.msrb.mxu3 %v9490_v35 }
 0x4e0   :  { %1588 = vmatpush.bf16.msrb.mxu0 %v9491_v21  ;;  %1601 = vmatpush.bf16.msrb.mxu1 %v9492_v5 }
 0x4e2   :  { %1614 = vmatpush.bf16.msrb.mxu2 %v9493_v59  ;;  %1627 = vmatpush.bf16.msrb.mxu3 %v9494_v1 }
 0x4e4   :  { %1589 = vmatpush.bf16.msrb.mxu0 %v9495_v14  ;;  %1602 = vmatpush.bf16.msrb.mxu1 %v9496_v47 }
 0x4e6   :  { %1615 = vmatpush.bf16.msrb.mxu2 %v7236_v26  ;;  %1628 = vmatpush.bf16.msrb.mxu3 %v7238_v38 }
 0x4e8   :  { %1590 = vmatpush.bf16.msrb.mxu0 %v7242_v49  ;;  %1603 = vmatpush.bf16.msrb.mxu1 %v7244_v40 }
 0x4ea   :  { %1616 = vmatpush.bf16.msrb.mxu2 %v7248_v16  ;;  %1629 = vmatpush.bf16.msrb.mxu3 %v7250_v56 }
 0x4ec   :  { %1591 = vmatpush.bf16.msrb.mxu0 %v7254_v41  ;;  %1604 = vmatpush.bf16.msrb.mxu1 %v7256_v22 }
 0x4ee   :  { %1617 = vmatpush.bf16.msrb.mxu2 %v7260_v23  ;;  %1630 = vmatpush.bf16.msrb.mxu3 %v7262_v19 }
 0x4f0   :  { %1654 = vmatpush.bf16.msra.mxu0 %v7058_v24  ;;  %1667 = vmatpush.bf16.msra.mxu1 %v7060_v60 }
 0x4f2   :  { %1680 = vmatpush.bf16.msra.mxu2 %v7062_v42  ;;  %1693 = vmatpush.bf16.msra.mxu3 %v7065_v53 }
 0x4f4   :  { %1655 = vmatpush.bf16.msra.mxu0 %v7070_v61  ;;  %1668 = vmatpush.bf16.msra.mxu1 %v7072_v4 }
 0x4f6   :  { %1681 = vmatpush.bf16.msra.mxu2 %v7074_v8  ;;  %1694 = vmatpush.bf16.msra.mxu3 %v7077_v17 }
 0x4f8   :  { %1656 = vmatpush.bf16.msra.mxu0 %v7082_v30  ;;  %1669 = vmatpush.bf16.msra.mxu1 %v7084_v45 }
 0x4fa   :  { %1682 = vmatpush.bf16.msra.mxu2 %v7086_v46  ;;  %1695 = vmatpush.bf16.msra.mxu3 %v7089_v57 }
 0x4fc   :  { %1657 = vmatpush.bf16.msra.mxu0 %v7094_v6  ;;  %1670 = vmatpush.bf16.msra.mxu1 %v7096_v27 }
 0x4fe   :  { %1683 = vmatpush.bf16.msra.mxu2 %v7098_v28  ;;  %1696 = vmatpush.bf16.msra.mxu3 %v7101_v43 }
 0x500   :  { %1658 = vmatpush.bf16.msra.mxu0 %v7106_v7  ;;  %1671 = vmatpush.bf16.msra.mxu1 %v7108_v33  ;;  %v9500_v7 = vld [vmem:[#allocation21_spill] sm:$0xff] }
 0x502   :  { %1684 = vmatpush.bf16.msra.mxu2 %v7110_v37  ;;  %1697 = vmatpush.bf16.msra.mxu3 %v7113_v12 }
 0x504   :  { %1659 = vmatpush.bf16.msra.mxu0 %v7118_v62  ;;  %1672 = vmatpush.bf16.msra.mxu1 %v7120_v13  ;;  %v9497_v13 = vld [vmem:[#allocation18_spill] sm:$0xff]  ;;  %v9498_v62 = vld [vmem:[#allocation19_spill] sm:$0xff] }
 0x506   :  { %1685 = vmatpush.bf16.msra.mxu2 %v7122_v18  ;;  %1698 = vmatpush.bf16.msra.mxu3 %v7125_v34  ;;  %v937_v18 = vrot.slane %v9497_v13, 7  ;;  %v938_v34 = vrot.slane %v9498_v62, 7 }
 0x508   :  { %1660 = vmatpush.bf16.msra.mxu0 %v7130_v51  ;;  %1673 = vmatpush.bf16.msra.mxu1 %v7132_v10 }
 0x50a   :  { %1686 = vmatpush.bf16.msra.mxu2 %v7134_v11  ;;  %1699 = vmatpush.bf16.msra.mxu3 %v7137_v36  ;;  %v9499_v36 = vld [vmem:[#allocation20_spill] sm:$0xff] }
 0x50b   :  { %v954_v12 = vpop.f32.mrf.mxu0  ;;  %v967_v51 = vpop.f32.mrf.mxu1 }
 0x50c   :  { %1661 = vmatpush.bf16.msra.mxu0 %v7142_v15  ;;  %1674 = vmatpush.bf16.msra.mxu1 %v7144_v50  ;;  %v955_v37 = vadd.f32 %v954_v12, %v937_v18  ;;  %v968_v10 = vadd.f32 %v967_v51, %v938_v34  ;;  %v939_v15 = vrot.slane %v9499_v36, 7  ;;  %v940_v50 = vrot.slane %v9500_v7, 7  ;;  %v9501_v36 = vld [vmem:[#allocation48_spill] sm:$0xff] }
 0x50e   :  { %1687 = vmatpush.bf16.msra.mxu2 %v7146_v54  ;;  %1700 = vmatpush.bf16.msra.mxu3 %v7151_v9  ;;  %v997_v33 = vmul.f32 0.5, %v955_v37  ;;  %v998_v11 = vmul.f32 0.5, %v968_v10 }
 0x510   :  { %6072 = vtanh.f32 %v997_v33 }
 0x511   :  { %6074 = vtanh.f32 %v998_v11 }
 0x512   :  { %v980_v43 = vpop.f32.mrf.mxu2  ;;  %v993_v54 = vpop.f32.mrf.mxu3 }
 0x513   :  { %v981_v28 = vadd.f32 %v980_v43, %v939_v15  ;;  %v994_v9 = vadd.f32 %v993_v54, %v940_v50  ;;  %v956_v27 = vpop.f32.mrf.mxu0  ;;  %v969_v13 = vpop.f32.mrf.mxu1 }
 0x514   :  { %v1079_v13 = vld [vmem:[%s9234_s6] sm:$0xf] }
 0x515   :  { %6076 = vtanh.f32 %v981_v28  ;;  %v1006_v62 = vmul.f32 0.5, %v994_v9 }
 0x516   :  { %v6073_v6 = vpop.eup %6072 }
 0x517   :  { %v6075_v57 = vpop.eup %6074  ;;  %v1001_v12 = vmul.f32 0.5, %v6073_v6  ;;  %6078 = vtanh.f32 %v1006_v62 }
 0x518   :  { %v1002_v18 = vmul.f32 0.5, %v6075_v57 }
 0x519   :  { %v1003_v37 = vadd.f32 0.5, %v1001_v12 }
 0x51a   :  { %v1004_v33 = vadd.f32 0.5, %v1002_v18  ;;  %v982_v34 = vpop.f32.mrf.mxu2  ;;  %v995_v51 = vpop.f32.mrf.mxu3  ;;  %v7382_v18 = vperm.slane %v1079_v13, 0 }
 0x51b   :  { %v6077_v10 = vpop.eup %6076  ;;  %v1258_v11 = vpop.f32.mrf.mxu0 }
 0x51c   :  { %v1271_v7 = vpop.f32.mrf.mxu1  ;;  %v1010_v46 = vmul.f32 %v1004_v33, %v9501_v36  ;;  %v1011_v43 = vmul.f32 %v6077_v10, %v1003_v37  ;;  %9503 = vst [vmem:[#allocation51_spill] sm:$0xff] %v7382_v18  ;;  %v7384_v33 = vperm.slane %v1079_v13, 1  ;;  %v1259_v34 = vadd.f32 %v1258_v11, %v7382_v18 }
 0x51d   :  { %v6079_v15 = vpop.eup %6078 }
 0x51e   :  { %v1012_v27 = vadd.f32 %v1011_v43, %v1010_v46  ;;  %v1008_v28 = vmul.f32 0.5, %v6079_v15  ;;  %9504 = vst [vmem:[#allocation52_spill] sm:$0xff] %v7384_v33  ;;  %v1272_v51 = vadd.f32 %v1271_v7, %v7384_v33 }
 0x520   :  { %6080 = vtanh.f32 %v1012_v27  ;;  %v1009_v57 = vadd.f32 0.5, %v1008_v28  ;;  %v7388_v27 = vperm.slane %v1079_v13, 2  ;;  %v7390_v28 = vperm.slane %v1079_v13, 3 }
 0x522   :  { %v1284_v50 = vpop.f32.mrf.mxu2  ;;  %v1297_v54 = vpop.f32.mrf.mxu3  ;;  %9505 = vst [vmem:[#allocation53_spill] sm:$0xff] %v7388_v27 }
 0x523   :  { %v1260_v9 = vpop.f32.mrf.mxu0  ;;  %9506 = vst [vmem:[#allocation54_spill] sm:$0xff] %v7390_v28 }
 0x524   :  { %v1273_v6 = vpop.f32.mrf.mxu1 }
 0x526   :  { %v6081_v62 = vpop.eup %6080 }
 0x527   :  { %v7380_v12 = vmul.f32 %v6081_v62, %v1009_v57  ;;  %v1285_v57 = vadd.f32 %v1284_v50, %v7388_v27  ;;  %v1298_v62 = vadd.f32 %v1297_v54, %v7390_v28 }
 0x529   :  { %9502 = vst [vmem:[#allocation50_spill] sm:$0xff] %v7380_v12 }
 0x52a   :  { %v1286_v37 = vpop.f32.mrf.mxu2  ;;  %v1299_v46 = vpop.f32.mrf.mxu3 }
 0x52c   :  { %v1470_v10 = vpop.f32.mrf.mxu0  ;;  %v1483_v36 = vpop.f32.mrf.mxu1 }
 0x52d   :  { %v1471_v43 = vadd.f32 %v1470_v10, %v1259_v34  ;;  %v1484_v15 = vadd.f32 %v1483_v36, %v1272_v51 }
 0x52f   :  { %v1513_v9 = vmul.f32 0.5, %v1471_v43  ;;  %v1514_v6 = vmul.f32 0.5, %v1484_v15 }
 0x531   :  { %6082 = vtanh.f32 %v1513_v9 }
 0x532   :  { %6084 = vtanh.f32 %v1514_v6 }
 0x534   :  { %v1472_v12 = vpop.f32.mrf.mxu0  ;;  %v1485_v33 = vpop.f32.mrf.mxu1 }
 0x535   :  { %v1496_v37 = vpop.f32.mrf.mxu2  ;;  %v1509_v11 = vpop.f32.mrf.mxu3 }
 0x536   :  { %v1497_v46 = vadd.f32 %v1496_v37, %v1285_v57  ;;  %v1510_v7 = vadd.f32 %v1509_v11, %v1298_v62 }
 0x537   :  { %v6083_v51 = vpop.eup %6082 }
 0x538   :  { %6086 = vtanh.f32 %v1497_v46  ;;  %v1522_v34 = vmul.f32 0.5, %v1510_v7  ;;  %v6085_v10 = vpop.eup %6084  ;;  %v1517_v13 = vmul.f32 0.5, %v6083_v51 }
 0x539   :  { %v1518_v36 = vmul.f32 0.5, %v6085_v10 }
 0x53a   :  { %6088 = vtanh.f32 %v1522_v34  ;;  %v1519_v43 = vadd.f32 0.5, %v1517_v13  ;;  %v9507_v13 = vld [vmem:[#allocation22_spill] sm:$0xff] }
 0x53b   :  { %v1520_v15 = vadd.f32 0.5, %v1518_v36  ;;  %v9508_v36 = vld [vmem:[#allocation26_spill] sm:$0xff] }
 0x53d   :  { %v1498_v9 = vpop.f32.mrf.mxu2  ;;  %v1511_v50 = vpop.f32.mrf.mxu3  ;;  %v1526_v54 = vmul.f32 0.0, %v1520_v15  ;;  %v9510_v15 = vld [vmem:[#allocation28_spill] sm:$0xff] }
 0x53e   :  { %v6087_v27 = vpop.eup %6086  ;;  %v9511_v9 = vld [vmem:[#allocation29_spill] sm:$0xff]  ;;  %v9512_v50 = vld [vmem:[#allocation30_spill] sm:$0xff] }
 0x53f   :  { %v1527_v6 = vmul.f32 %v6087_v27, %v1519_v43  ;;  %v9509_v43 = vld [vmem:[#allocation27_spill] sm:$0xff] }
 0x540   :  { %v6089_v28 = vpop.eup %6088 }
 0x541   :  { %v7394_v18 = vadd.f32 %v1527_v6, %v1526_v54  ;;  %v1524_v12 = vmul.f32 0.5, %v6089_v28  ;;  %v9513_v54 = vld [vmem:[#allocation31_spill] sm:$0xff]  ;;  %v9514_v6 = vld [vmem:[#allocation32_spill] sm:$0xff] }
 0x543   :  { %6090 = vtanh.f32 %v7394_v18  ;;  %v1525_v33 = vadd.f32 0.5, %v1524_v12  ;;  %v9515_v12 = vld [vmem:[#allocation33_spill] sm:$0xff] }
 0x549   :  { %v6091_v57 = vpop.eup %6090 }
 0x54a   :  { %v1530_v62 = vmul.f32 %v6091_v57, %v1525_v33  ;;  %v9516_v33 = vld [vmem:[#allocation34_spill] sm:$0xff]  ;;  %v9517_v57 = vld [vmem:[#allocation35_spill] sm:$0xff] }
 0x54c   :  { %v7397_v37 = vpop.f32.mrf.mxu0  ;;  %v7399_v11 = vpop.f32.mrf.mxu1  ;;  %v1583_v46 = vpack.c.bf16 %v1530_v62, %v1530_v62  ;;  %v9518_v62 = vld [vmem:[#allocation36_spill] sm:$0xff] }
 0x54e   :  { %1592 = vmatmul.bf16.vlgmr.msrb.gmra.mxu0 %v1583_v46  ;;  %1605 = vmatmul.bf16.vlgmr.msrb.gmra.mxu1 %v1583_v46 }
 0x54f   :  { %1618 = vmatmul.bf16.vlgmr.msrb.gmra.mxu2 %v1583_v46  ;;  %1631 = vmatmul.bf16.vlgmr.msrb.gmra.mxu3 %v1583_v46  ;;  %v9519_v46 = vld [vmem:[#allocation37_spill] sm:$0xff] }
 0x550   :  { %1707 = vmatpush.bf16.msrb.mxu0 %v7164_v44  ;;  %1720 = vmatpush.bf16.msrb.mxu1 %v7166_v3 }
 0x551   :  { %1733 = vmatpush.bf16.msrb.mxu2 %v7168_v25  ;;  %1746 = vmatpush.bf16.msrb.mxu3 %v7170_v39 }
 0x554   :  { %v7405_v27 = vpop.f32.mrf.mxu2  ;;  %v7407_v28 = vpop.f32.mrf.mxu3  ;;  %1708 = vmatpush.bf16.msrb.mxu0 %v7178_v29  ;;  %1721 = vmatpush.bf16.msrb.mxu1 %v7180_v48 }
 0x555   :  { %v1542_v7 = vpop.f32.mrf.mxu0  ;;  %v1555_v34 = vpop.f32.mrf.mxu1  ;;  %1734 = vmatpush.bf16.msrb.mxu2 %v7184_v20  ;;  %1747 = vmatpush.bf16.msrb.mxu3 %v7186_v55 }
 0x556   :  { %v9520_v7 = vld [vmem:[#allocation38_spill] sm:$0xff]  ;;  %v9521_v34 = vld [vmem:[#allocation39_spill] sm:$0xff] }
 0x558   :  { %1709 = vmatpush.bf16.msrb.mxu0 %v9484_v58  ;;  %1722 = vmatpush.bf16.msrb.mxu1 %v9485_v31 }
 0x559   :  { %1735 = vmatpush.bf16.msrb.mxu2 %v7196_v63  ;;  %1748 = vmatpush.bf16.msrb.mxu3 %v9486_v32 }
 0x55c   :  { %v1568_v51 = vpop.f32.mrf.mxu2  ;;  %v1581_v10 = vpop.f32.mrf.mxu3  ;;  %1710 = vmatpush.bf16.msrb.mxu0 %v9487_v52  ;;  %1723 = vmatpush.bf16.msrb.mxu1 %v9488_v0 }
 0x55d   :  { %1736 = vmatpush.bf16.msrb.mxu2 %v9489_v2  ;;  %1749 = vmatpush.bf16.msrb.mxu3 %v9490_v35  ;;  %v9522_v51 = vld [vmem:[#allocation40_spill] sm:$0xff]  ;;  %v9523_v10 = vld [vmem:[#allocation41_spill] sm:$0xff] }
 0x55e   :  { %1662 = vmatmul.bf16.vlgmr.msra.gmra.mxu0 %v9507_v13  ;;  %1675 = vmatmul.bf16.vlgmr.msra.gmra.mxu1 %v9507_v13 }
 0x55f   :  { %1688 = vmatmul.bf16.vlgmr.msra.gmra.mxu2 %v9507_v13  ;;  %1701 = vmatmul.bf16.vlgmr.msra.gmra.mxu3 %v9507_v13  ;;  %v9524_v13 = vld [vmem:[#allocation42_spill] sm:$0xff] }
 0x560   :  { %1711 = vmatpush.bf16.msrb.mxu0 %v9491_v21  ;;  %1724 = vmatpush.bf16.msrb.mxu1 %v9492_v5 }
 0x561   :  { %1737 = vmatpush.bf16.msrb.mxu2 %v9493_v59  ;;  %1750 = vmatpush.bf16.msrb.mxu3 %v9494_v1 }
 0x564   :  { %1712 = vmatpush.bf16.msrb.mxu0 %v9495_v14  ;;  %1725 = vmatpush.bf16.msrb.mxu1 %v9496_v47 }
 0x565   :  { %1738 = vmatpush.bf16.msrb.mxu2 %v7236_v26  ;;  %1751 = vmatpush.bf16.msrb.mxu3 %v7238_v38 }
 0x568   :  { %1713 = vmatpush.bf16.msrb.mxu0 %v7242_v49  ;;  %1726 = vmatpush.bf16.msrb.mxu1 %v7244_v40 }
 0x569   :  { %1739 = vmatpush.bf16.msrb.mxu2 %v7248_v16  ;;  %1752 = vmatpush.bf16.msrb.mxu3 %v7250_v56 }
 0x56c   :  { %1714 = vmatpush.bf16.msrb.mxu0 %v7254_v41  ;;  %1727 = vmatpush.bf16.msrb.mxu1 %v7256_v22 }
 0x56d   :  { %1740 = vmatpush.bf16.msrb.mxu2 %v7260_v23  ;;  %1753 = vmatpush.bf16.msrb.mxu3 %v7262_v19 }
 0x570   :  { %1777 = vmatpush.bf16.msra.mxu0 %v7058_v24  ;;  %1790 = vmatpush.bf16.msra.mxu1 %v7060_v60 }
 0x571   :  { %1803 = vmatpush.bf16.msra.mxu2 %v7062_v42  ;;  %1816 = vmatpush.bf16.msra.mxu3 %v7065_v53 }
 0x574   :  { %1778 = vmatpush.bf16.msra.mxu0 %v7070_v61  ;;  %1791 = vmatpush.bf16.msra.mxu1 %v7072_v4 }
 0x575   :  { %1804 = vmatpush.bf16.msra.mxu2 %v7074_v8  ;;  %1817 = vmatpush.bf16.msra.mxu3 %v7077_v17 }
 0x578   :  { %1779 = vmatpush.bf16.msra.mxu0 %v7082_v30  ;;  %1792 = vmatpush.bf16.msra.mxu1 %v7084_v45 }
 0x579   :  { %1805 = vmatpush.bf16.msra.mxu2 %v9508_v36  ;;  %1818 = vmatpush.bf16.msra.mxu3 %v9509_v43 }
 0x57c   :  { %1780 = vmatpush.bf16.msra.mxu0 %v9510_v15  ;;  %1793 = vmatpush.bf16.msra.mxu1 %v9511_v9  ;;  %v9533_v15 = vld [vmem:[#allocation54_spill] sm:$0xff] }
 0x57d   :  { %1806 = vmatpush.bf16.msra.mxu2 %v9512_v50  ;;  %1819 = vmatpush.bf16.msra.mxu3 %v9513_v54 }
 0x580   :  { %1781 = vmatpush.bf16.msra.mxu0 %v9514_v6  ;;  %1794 = vmatpush.bf16.msra.mxu1 %v9515_v12  ;;  %v9525_v6 = vld [vmem:[#allocation43_spill] sm:$0xff]  ;;  %v9526_v12 = vld [vmem:[#allocation44_spill] sm:$0xff] }
 0x581   :  { %1807 = vmatpush.bf16.msra.mxu2 %v9516_v33  ;;  %1820 = vmatpush.bf16.msra.mxu3 %v9517_v57  ;;  %v9527_v33 = vld [vmem:[#allocation45_spill] sm:$0xff]  ;;  %v9528_v57 = vld [vmem:[#allocation46_spill] sm:$0xff] }
 0x584   :  { %1782 = vmatpush.bf16.msra.mxu0 %v9518_v62  ;;  %1795 = vmatpush.bf16.msra.mxu1 %v9519_v46  ;;  %v9529_v62 = vld [vmem:[#allocation47_spill] sm:$0xff] }
 0x585   :  { %1808 = vmatpush.bf16.msra.mxu2 %v9520_v7  ;;  %1821 = vmatpush.bf16.msra.mxu3 %v9521_v34  ;;  %v9530_v46 = vld [vmem:[#allocation51_spill] sm:$0xff]  ;;  %v9531_v34 = vld [vmem:[#allocation52_spill] sm:$0xff] }
 0x586   :  { %v1541_v7 = vadd.f32 %v7397_v37, %v9530_v46 }
 0x588   :  { %1783 = vmatpush.bf16.msra.mxu0 %v9522_v51  ;;  %1796 = vmatpush.bf16.msra.mxu1 %v9523_v10  ;;  %v1554_v51 = vadd.f32 %v7399_v11, %v9531_v34 }
 0x589   :  { %1809 = vmatpush.bf16.msra.mxu2 %v9524_v13  ;;  %1822 = vmatpush.bf16.msra.mxu3 %v9525_v6 }
 0x58c   :  { %1784 = vmatpush.bf16.msra.mxu0 %v9526_v12  ;;  %1797 = vmatpush.bf16.msra.mxu1 %v9527_v33  ;;  %v9532_v12 = vld [vmem:[#allocation53_spill] sm:$0xff] }
 0x58d   :  { %1810 = vmatpush.bf16.msra.mxu2 %v9528_v57  ;;  %1823 = vmatpush.bf16.msra.mxu3 %v9529_v62  ;;  %v1567_v33 = vadd.f32 %v7405_v27, %v9532_v12  ;;  %v1580_v57 = vadd.f32 %v7407_v28, %v9533_v15 }
 0x5cb   :  { %v1593_v54 = vpop.f32.mrf.mxu0  ;;  %v1606_v10 = vpop.f32.mrf.mxu1 }
 0x5cc   :  { %v1594_v50 = vadd.f32 %v1593_v54, %v1541_v7  ;;  %v1607_v13 = vadd.f32 %v1606_v10, %v1554_v51 }
 0x5ce   :  { %v1636_v9 = vmul.f32 0.5, %v1594_v50  ;;  %v1637_v6 = vmul.f32 0.5, %v1607_v13 }
 0x5d0   :  { %6092 = vtanh.f32 %v1636_v9 }
 0x5d1   :  { %6094 = vtanh.f32 %v1637_v6 }
 0x5d2   :  { %v1619_v62 = vpop.f32.mrf.mxu2  ;;  %v1632_v43 = vpop.f32.mrf.mxu3 }
 0x5d3   :  { %v1620_v37 = vadd.f32 %v1619_v62, %v1567_v33  ;;  %v1633_v46 = vadd.f32 %v1632_v43, %v1580_v57  ;;  %v1595_v36 = vpop.f32.mrf.mxu0  ;;  %v1608_v11 = vpop.f32.mrf.mxu1 }
 0x5d5   :  { %6096 = vtanh.f32 %v1620_v37  ;;  %v1645_v34 = vmul.f32 0.5, %v1633_v46 }
 0x5d6   :  { %v6093_v54 = vpop.eup %6092 }
 0x5d7   :  { %v6095_v7 = vpop.eup %6094  ;;  %v1640_v50 = vmul.f32 0.5, %v6093_v54  ;;  %6098 = vtanh.f32 %v1645_v34 }
 0x5d8   :  { %v1641_v51 = vmul.f32 0.5, %v6095_v7 }
 0x5d9   :  { %v1642_v9 = vadd.f32 0.5, %v1640_v50 }
 0x5da   :  { %v1643_v10 = vadd.f32 0.5, %v1641_v51  ;;  %v1621_v27 = vpop.f32.mrf.mxu2  ;;  %v1634_v13 = vpop.f32.mrf.mxu3 }
 0x5db   :  { %v6097_v12 = vpop.eup %6096  ;;  %v7481_v28 = vpop.f32.mrf.mxu0 }
 0x5dc   :  { %v7483_v6 = vpop.f32.mrf.mxu1  ;;  %v1649_v43 = vmul.f32 %v1643_v10, %v7394_v18  ;;  %v1650_v36 = vmul.f32 %v6097_v12, %v1642_v9  ;;  %v9534_v18 = vld [vmem:[#allocation23_spill] sm:$0xff]  ;;  %v9535_v12 = vld [vmem:[#allocation26_spill] sm:$0xff]  ;;  %v9537_v10 = vld [vmem:[#allocation28_spill] sm:$0xff] }
 0x5dd   :  { %v6099_v33 = vpop.eup %6098  ;;  %v9536_v9 = vld [vmem:[#allocation27_spill] sm:$0xff] }
 0x5de   :  { %v7486_v57 = vadd.f32 %v1650_v36, %v1649_v43  ;;  %v1647_v62 = vmul.f32 0.5, %v6099_v33  ;;  %v9538_v43 = vld [vmem:[#allocation29_spill] sm:$0xff]  ;;  %v9539_v36 = vld [vmem:[#allocation30_spill] sm:$0xff]  ;;  %v9540_v33 = vld [vmem:[#allocation31_spill] sm:$0xff] }
 0x5e0   :  { %6100 = vtanh.f32 %v7486_v57  ;;  %v1648_v54 = vadd.f32 0.5, %v1647_v62  ;;  %v9541_v62 = vld [vmem:[#allocation32_spill] sm:$0xff] }
 0x5e2   :  { %v7489_v46 = vpop.f32.mrf.mxu2  ;;  %v7491_v34 = vpop.f32.mrf.mxu3 }
 0x5e3   :  { %v1665_v37 = vpop.f32.mrf.mxu0 }
 0x5e4   :  { %v1678_v11 = vpop.f32.mrf.mxu1  ;;  %v9542_v37 = vld [vmem:[#allocation33_spill] sm:$0xff] }
 0x5e5   :  { %v9543_v11 = vld [vmem:[#allocation34_spill] sm:$0xff] }
 0x5e6   :  { %v6101_v7 = vpop.eup %6100 }
 0x5e7   :  { %v1653_v50 = vmul.f32 %v6101_v7, %v1648_v54  ;;  %v9544_v54 = vld [vmem:[#allocation35_spill] sm:$0xff]  ;;  %v9545_v7 = vld [vmem:[#allocation36_spill] sm:$0xff] }
 0x5e9   :  { %v1706_v51 = vpack.c.bf16 %v1653_v50, %v1653_v50  ;;  %v9546_v50 = vld [vmem:[#allocation37_spill] sm:$0xff] }
 0x5ea   :  { %v1691_v27 = vpop.f32.mrf.mxu2  ;;  %v1704_v13 = vpop.f32.mrf.mxu3 }
 0x5eb   :  { %1715 = vmatmul.bf16.vlgmr.msrb.gmra.mxu0 %v1706_v51  ;;  %1728 = vmatmul.bf16.vlgmr.msrb.gmra.mxu1 %v1706_v51  ;;  %v9548_v27 = vld [vmem:[#allocation39_spill] sm:$0xff]  ;;  %v9549_v13 = vld [vmem:[#allocation40_spill] sm:$0xff] }
 0x5ec   :  { %1741 = vmatmul.bf16.vlgmr.msrb.gmra.mxu2 %v1706_v51  ;;  %1754 = vmatmul.bf16.vlgmr.msrb.gmra.mxu3 %v1706_v51  ;;  %v9547_v51 = vld [vmem:[#allocation38_spill] sm:$0xff] }
 0x5ed   :  { %1830 = vmatpush.bf16.msrb.mxu0 %v7164_v44  ;;  %1843 = vmatpush.bf16.msrb.mxu1 %v7166_v3 }
 0x5ee   :  { %1856 = vmatpush.bf16.msrb.mxu2 %v7168_v25  ;;  %1869 = vmatpush.bf16.msrb.mxu3 %v7170_v39 }
 0x5f1   :  { %1831 = vmatpush.bf16.msrb.mxu0 %v7178_v29  ;;  %1844 = vmatpush.bf16.msrb.mxu1 %v7180_v48 }
 0x5f2   :  { %1857 = vmatpush.bf16.msrb.mxu2 %v7184_v20  ;;  %1870 = vmatpush.bf16.msrb.mxu3 %v7186_v55 }
 0x5f5   :  { %1832 = vmatpush.bf16.msrb.mxu0 %v9484_v58  ;;  %1845 = vmatpush.bf16.msrb.mxu1 %v9485_v31 }
 0x5f6   :  { %1858 = vmatpush.bf16.msrb.mxu2 %v7196_v63  ;;  %1871 = vmatpush.bf16.msrb.mxu3 %v9486_v32 }
 0x5f9   :  { %1833 = vmatpush.bf16.msrb.mxu0 %v9487_v52  ;;  %1846 = vmatpush.bf16.msrb.mxu1 %v9488_v0 }
 0x5fa   :  { %1859 = vmatpush.bf16.msrb.mxu2 %v9489_v2  ;;  %1872 = vmatpush.bf16.msrb.mxu3 %v9490_v35 }
 0x5fb   :  { %1785 = vmatmul.bf16.vlgmr.msra.gmra.mxu0 %v9534_v18  ;;  %1798 = vmatmul.bf16.vlgmr.msra.gmra.mxu1 %v9534_v18 }
 0x5fc   :  { %1811 = vmatmul.bf16.vlgmr.msra.gmra.mxu2 %v9534_v18  ;;  %1824 = vmatmul.bf16.vlgmr.msra.gmra.mxu3 %v9534_v18  ;;  %v9550_v18 = vld [vmem:[#allocation41_spill] sm:$0xff] }
 0x5fd   :  { %1834 = vmatpush.bf16.msrb.mxu0 %v9491_v21  ;;  %1847 = vmatpush.bf16.msrb.mxu1 %v9492_v5 }
 0x5fe   :  { %1860 = vmatpush.bf16.msrb.mxu2 %v9493_v59  ;;  %1873 = vmatpush.bf16.msrb.mxu3 %v9494_v1 }
 0x601   :  { %1835 = vmatpush.bf16.msrb.mxu0 %v9495_v14  ;;  %1848 = vmatpush.bf16.msrb.mxu1 %v9496_v47 }
 0x602   :  { %1861 = vmatpush.bf16.msrb.mxu2 %v7236_v26  ;;  %1874 = vmatpush.bf16.msrb.mxu3 %v7238_v38 }
 0x605   :  { %1836 = vmatpush.bf16.msrb.mxu0 %v7242_v49  ;;  %1849 = vmatpush.bf16.msrb.mxu1 %v7244_v40 }
 0x606   :  { %1862 = vmatpush.bf16.msrb.mxu2 %v7248_v16  ;;  %1875 = vmatpush.bf16.msrb.mxu3 %v7250_v56 }
 0x609   :  { %1837 = vmatpush.bf16.msrb.mxu0 %v7254_v41  ;;  %1850 = vmatpush.bf16.msrb.mxu1 %v7256_v22 }
 0x60a   :  { %1863 = vmatpush.bf16.msrb.mxu2 %v7260_v23  ;;  %1876 = vmatpush.bf16.msrb.mxu3 %v7262_v19 }
 0x60d   :  { %1900 = vmatpush.bf16.msra.mxu0 %v7058_v24  ;;  %1913 = vmatpush.bf16.msra.mxu1 %v7060_v60 }
 0x60e   :  { %1926 = vmatpush.bf16.msra.mxu2 %v7062_v42  ;;  %1939 = vmatpush.bf16.msra.mxu3 %v7065_v53 }
 0x611   :  { %1901 = vmatpush.bf16.msra.mxu0 %v7070_v61  ;;  %1914 = vmatpush.bf16.msra.mxu1 %v7072_v4 }
 0x612   :  { %1927 = vmatpush.bf16.msra.mxu2 %v7074_v8  ;;  %1940 = vmatpush.bf16.msra.mxu3 %v7077_v17 }
 0x615   :  { %1902 = vmatpush.bf16.msra.mxu0 %v7082_v30  ;;  %1915 = vmatpush.bf16.msra.mxu1 %v7084_v45 }
 0x616   :  { %1928 = vmatpush.bf16.msra.mxu2 %v9535_v12  ;;  %1941 = vmatpush.bf16.msra.mxu3 %v9536_v9 }
 0x619   :  { %1903 = vmatpush.bf16.msra.mxu0 %v9537_v10  ;;  %1916 = vmatpush.bf16.msra.mxu1 %v9538_v43 }
 0x61a   :  { %1929 = vmatpush.bf16.msra.mxu2 %v9539_v36  ;;  %1942 = vmatpush.bf16.msra.mxu3 %v9540_v33  ;;  %v9551_v33 = vld [vmem:[#allocation42_spill] sm:$0xff] }
 0x61d   :  { %1904 = vmatpush.bf16.msra.mxu0 %v9541_v62  ;;  %1917 = vmatpush.bf16.msra.mxu1 %v9542_v37  ;;  %v9552_v62 = vld [vmem:[#allocation43_spill] sm:$0xff]  ;;  %v9553_v37 = vld [vmem:[#allocation44_spill] sm:$0xff] }
 0x61e   :  { %1930 = vmatpush.bf16.msra.mxu2 %v9543_v11  ;;  %1943 = vmatpush.bf16.msra.mxu3 %v9544_v54  ;;  %v9554_v11 = vld [vmem:[#allocation45_spill] sm:$0xff]  ;;  %v9555_v54 = vld [vmem:[#allocation46_spill] sm:$0xff] }
 0x621   :  { %1905 = vmatpush.bf16.msra.mxu0 %v9545_v7  ;;  %1918 = vmatpush.bf16.msra.mxu1 %v9546_v50  ;;  %v9556_v7 = vld [vmem:[#allocation47_spill] sm:$0xff] }
 0x622   :  { %1931 = vmatpush.bf16.msra.mxu2 %v9547_v51  ;;  %1944 = vmatpush.bf16.msra.mxu3 %v9548_v27  ;;  %v9557_v50 = vld [vmem:[#allocation51_spill] sm:$0xff]  ;;  %v9558_v27 = vld [vmem:[#allocation52_spill] sm:$0xff] }
 0x623   :  { %v1664_v51 = vadd.f32 %v7481_v28, %v9557_v50 }
 0x625   :  { %1906 = vmatpush.bf16.msra.mxu0 %v9549_v13  ;;  %1919 = vmatpush.bf16.msra.mxu1 %v9550_v18  ;;  %v1677_v13 = vadd.f32 %v7483_v6, %v9558_v27 }
 0x626   :  { %1932 = vmatpush.bf16.msra.mxu2 %v9551_v33  ;;  %1945 = vmatpush.bf16.msra.mxu3 %v9552_v62 }
 0x629   :  { %1907 = vmatpush.bf16.msra.mxu0 %v9553_v37  ;;  %1920 = vmatpush.bf16.msra.mxu1 %v9554_v11  ;;  %v9559_v37 = vld [vmem:[#allocation53_spill] sm:$0xff] }
 0x62a   :  { %1933 = vmatpush.bf16.msra.mxu2 %v9555_v54  ;;  %1946 = vmatpush.bf16.msra.mxu3 %v9556_v7  ;;  %v1690_v11 = vadd.f32 %v7489_v46, %v9559_v37  ;;  %v1703_v54 = vadd.f32 %v7491_v34, %v9533_v15 }
 0x668   :  { %v1716_v36 = vpop.f32.mrf.mxu0  ;;  %v1729_v18 = vpop.f32.mrf.mxu1 }
 0x669   :  { %v1717_v43 = vadd.f32 %v1716_v36, %v1664_v51  ;;  %v1730_v33 = vadd.f32 %v1729_v18, %v1677_v13 }
 0x66b   :  { %v1759_v10 = vmul.f32 0.5, %v1717_v43  ;;  %v1760_v62 = vmul.f32 0.5, %v1730_v33 }
 0x66d   :  { %6102 = vtanh.f32 %v1759_v10 }
 0x66e   :  { %6104 = vtanh.f32 %v1760_v62 }
 0x66f   :  { %v1742_v7 = vpop.f32.mrf.mxu2  ;;  %v1755_v9 = vpop.f32.mrf.mxu3 }
 0x670   :  { %v1743_v28 = vadd.f32 %v1742_v7, %v1690_v11  ;;  %v1756_v50 = vadd.f32 %v1755_v9, %v1703_v54  ;;  %v1718_v12 = vpop.f32.mrf.mxu0  ;;  %v1731_v6 = vpop.f32.mrf.mxu1 }
 0x672   :  { %6106 = vtanh.f32 %v1743_v28  ;;  %v1768_v27 = vmul.f32 0.5, %v1756_v50 }
 0x673   :  { %v6103_v36 = vpop.eup %6102 }
 0x674   :  { %v6105_v51 = vpop.eup %6104  ;;  %v1763_v43 = vmul.f32 0.5, %v6103_v36  ;;  %6108 = vtanh.f32 %v1768_v27 }
 0x675   :  { %v1764_v33 = vmul.f32 0.5, %v6105_v51 }
 0x676   :  { %v1765_v10 = vadd.f32 0.5, %v1763_v43 }
 0x677   :  { %v1766_v13 = vadd.f32 0.5, %v1764_v33  ;;  %v1744_v46 = vpop.f32.mrf.mxu2  ;;  %v1757_v18 = vpop.f32.mrf.mxu3 }
 0x678   :  { %v6107_v37 = vpop.eup %6106  ;;  %v7569_v34 = vpop.f32.mrf.mxu0 }
 0x679   :  { %v7571_v62 = vpop.f32.mrf.mxu1  ;;  %v1772_v9 = vmul.f32 %v1766_v13, %v7486_v57  ;;  %v1773_v12 = vmul.f32 %v6107_v37, %v1765_v10  ;;  %v9560_v57 = vld [vmem:[#allocation24_spill] sm:$0xff]  ;;  %v9561_v37 = vld [vmem:[#allocation26_spill] sm:$0xff]  ;;  %v9562_v10 = vld [vmem:[#allocation27_spill] sm:$0xff] }
 0x67a   :  { %v6109_v11 = vpop.eup %6108  ;;  %v9563_v13 = vld [vmem:[#allocation28_spill] sm:$0xff] }
 0x67b   :  { %v7574_v54 = vadd.f32 %v1773_v12, %v1772_v9  ;;  %v1770_v7 = vmul.f32 0.5, %v6109_v11  ;;  %v9564_v9 = vld [vmem:[#allocation29_spill] sm:$0xff]  ;;  %v9565_v12 = vld [vmem:[#allocation30_spill] sm:$0xff]  ;;  %v9566_v11 = vld [vmem:[#allocation31_spill] sm:$0xff] }
 0x67d   :  { %6110 = vtanh.f32 %v7574_v54  ;;  %v1771_v36 = vadd.f32 0.5, %v1770_v7  ;;  %v9567_v7 = vld [vmem:[#allocation32_spill] sm:$0xff] }
 0x67f   :  { %v7577_v50 = vpop.f32.mrf.mxu2  ;;  %v7579_v27 = vpop.f32.mrf.mxu3 }
 0x680   :  { %v1788_v28 = vpop.f32.mrf.mxu0 }
 0x681   :  { %v1801_v6 = vpop.f32.mrf.mxu1  ;;  %v9568_v28 = vld [vmem:[#allocation33_spill] sm:$0xff] }
 0x682   :  { %v9569_v6 = vld [vmem:[#allocation34_spill] sm:$0xff] }
 0x683   :  { %v6111_v51 = vpop.eup %6110 }
 0x684   :  { %v1776_v43 = vmul.f32 %v6111_v51, %v1771_v36  ;;  %v9570_v36 = vld [vmem:[#allocation35_spill] sm:$0xff]  ;;  %v9571_v51 = vld [vmem:[#allocation36_spill] sm:$0xff] }
 0x686   :  { %v1829_v33 = vpack.c.bf16 %v1776_v43, %v1776_v43  ;;  %v9572_v43 = vld [vmem:[#allocation37_spill] sm:$0xff] }
 0x687   :  { %v1814_v46 = vpop.f32.mrf.mxu2  ;;  %v1827_v18 = vpop.f32.mrf.mxu3 }
 0x688   :  { %1838 = vmatmul.bf16.vlgmr.msrb.gmra.mxu0 %v1829_v33  ;;  %1851 = vmatmul.bf16.vlgmr.msrb.gmra.mxu1 %v1829_v33  ;;  %v9574_v46 = vld [vmem:[#allocation39_spill] sm:$0xff]  ;;  %v9575_v18 = vld [vmem:[#allocation40_spill] sm:$0xff] }
 0x689   :  { %1864 = vmatmul.bf16.vlgmr.msrb.gmra.mxu2 %v1829_v33  ;;  %1877 = vmatmul.bf16.vlgmr.msrb.gmra.mxu3 %v1829_v33  ;;  %v9573_v33 = vld [vmem:[#allocation38_spill] sm:$0xff] }
 0x68a   :  { %1953 = vmatpush.bf16.msrb.mxu0 %v7164_v44  ;;  %1966 = vmatpush.bf16.msrb.mxu1 %v7166_v3 }
 0x68b   :  { %1979 = vmatpush.bf16.msrb.mxu2 %v7168_v25  ;;  %1992 = vmatpush.bf16.msrb.mxu3 %v7170_v39 }
 0x68e   :  { %1954 = vmatpush.bf16.msrb.mxu0 %v7178_v29  ;;  %1967 = vmatpush.bf16.msrb.mxu1 %v7180_v48 }
 0x68f   :  { %1980 = vmatpush.bf16.msrb.mxu2 %v7184_v20  ;;  %1993 = vmatpush.bf16.msrb.mxu3 %v7186_v55 }
 0x692   :  { %1955 = vmatpush.bf16.msrb.mxu0 %v9484_v58  ;;  %1968 = vmatpush.bf16.msrb.mxu1 %v9485_v31 }
 0x693   :  { %1981 = vmatpush.bf16.msrb.mxu2 %v7196_v63  ;;  %1994 = vmatpush.bf16.msrb.mxu3 %v9486_v32 }
 0x696   :  { %1956 = vmatpush.bf16.msrb.mxu0 %v9487_v52  ;;  %1969 = vmatpush.bf16.msrb.mxu1 %v9488_v0 }
 0x697   :  { %1982 = vmatpush.bf16.msrb.mxu2 %v9489_v2  ;;  %1995 = vmatpush.bf16.msrb.mxu3 %v9490_v35 }
 0x698   :  { %1908 = vmatmul.bf16.vlgmr.msra.gmra.mxu0 %v9560_v57  ;;  %1921 = vmatmul.bf16.vlgmr.msra.gmra.mxu1 %v9560_v57 }
 0x699   :  { %1934 = vmatmul.bf16.vlgmr.msra.gmra.mxu2 %v9560_v57  ;;  %1947 = vmatmul.bf16.vlgmr.msra.gmra.mxu3 %v9560_v57  ;;  %v9576_v57 = vld [vmem:[#allocation41_spill] sm:$0xff] }
 0x69a   :  { %1957 = vmatpush.bf16.msrb.mxu0 %v9491_v21  ;;  %1970 = vmatpush.bf16.msrb.mxu1 %v9492_v5 }
 0x69b   :  { %1983 = vmatpush.bf16.msrb.mxu2 %v9493_v59  ;;  %1996 = vmatpush.bf16.msrb.mxu3 %v9494_v1 }
 0x69e   :  { %1958 = vmatpush.bf16.msrb.mxu0 %v9495_v14  ;;  %1971 = vmatpush.bf16.msrb.mxu1 %v9496_v47 }
 0x69f   :  { %1984 = vmatpush.bf16.msrb.mxu2 %v7236_v26  ;;  %1997 = vmatpush.bf16.msrb.mxu3 %v7238_v38 }
 0x6a2   :  { %1959 = vmatpush.bf16.msrb.mxu0 %v7242_v49  ;;  %1972 = vmatpush.bf16.msrb.mxu1 %v7244_v40 }
 0x6a3   :  { %1985 = vmatpush.bf16.msrb.mxu2 %v7248_v16  ;;  %1998 = vmatpush.bf16.msrb.mxu3 %v7250_v56 }
 0x6a6   :  { %1960 = vmatpush.bf16.msrb.mxu0 %v7254_v41  ;;  %1973 = vmatpush.bf16.msrb.mxu1 %v7256_v22 }
 0x6a7   :  { %1986 = vmatpush.bf16.msrb.mxu2 %v7260_v23  ;;  %1999 = vmatpush.bf16.msrb.mxu3 %v7262_v19 }
 0x6aa   :  { %2023 = vmatpush.bf16.msra.mxu0 %v7058_v24  ;;  %2036 = vmatpush.bf16.msra.mxu1 %v7060_v60 }
 0x6ab   :  { %2049 = vmatpush.bf16.msra.mxu2 %v7062_v42  ;;  %2062 = vmatpush.bf16.msra.mxu3 %v7065_v53 }
 0x6ae   :  { %2024 = vmatpush.bf16.msra.mxu0 %v7070_v61  ;;  %2037 = vmatpush.bf16.msra.mxu1 %v7072_v4 }
 0x6af   :  { %2050 = vmatpush.bf16.msra.mxu2 %v7074_v8  ;;  %2063 = vmatpush.bf16.msra.mxu3 %v7077_v17 }
 0x6b2   :  { %2025 = vmatpush.bf16.msra.mxu0 %v7082_v30  ;;  %2038 = vmatpush.bf16.msra.mxu1 %v7084_v45 }
 0x6b3   :  { %2051 = vmatpush.bf16.msra.mxu2 %v9561_v37  ;;  %2064 = vmatpush.bf16.msra.mxu3 %v9562_v10 }
 0x6b6   :  { %2026 = vmatpush.bf16.msra.mxu0 %v9563_v13  ;;  %2039 = vmatpush.bf16.msra.mxu1 %v9564_v9 }
 0x6b7   :  { %2052 = vmatpush.bf16.msra.mxu2 %v9565_v12  ;;  %2065 = vmatpush.bf16.msra.mxu3 %v9566_v11  ;;  %v9577_v11 = vld [vmem:[#allocation42_spill] sm:$0xff] }
 0x6ba   :  { %2027 = vmatpush.bf16.msra.mxu0 %v9567_v7  ;;  %2040 = vmatpush.bf16.msra.mxu1 %v9568_v28  ;;  %v9578_v7 = vld [vmem:[#allocation43_spill] sm:$0xff]  ;;  %v9579_v28 = vld [vmem:[#allocation44_spill] sm:$0xff] }
 0x6bb   :  { %2053 = vmatpush.bf16.msra.mxu2 %v9569_v6  ;;  %2066 = vmatpush.bf16.msra.mxu3 %v9570_v36  ;;  %v9580_v6 = vld [vmem:[#allocation45_spill] sm:$0xff]  ;;  %v9581_v36 = vld [vmem:[#allocation46_spill] sm:$0xff] }
 0x6be   :  { %2028 = vmatpush.bf16.msra.mxu0 %v9571_v51  ;;  %2041 = vmatpush.bf16.msra.mxu1 %v9572_v43  ;;  %v9582_v51 = vld [vmem:[#allocation47_spill] sm:$0xff] }
 0x6bf   :  { %2054 = vmatpush.bf16.msra.mxu2 %v9573_v33  ;;  %2067 = vmatpush.bf16.msra.mxu3 %v9574_v46  ;;  %v9583_v43 = vld [vmem:[#allocation51_spill] sm:$0xff]  ;;  %v9584_v46 = vld [vmem:[#allocation52_spill] sm:$0xff] }
 0x6c0   :  { %v1787_v33 = vadd.f32 %v7569_v34, %v9583_v43 }
 0x6c2   :  { %2029 = vmatpush.bf16.msra.mxu0 %v9575_v18  ;;  %2042 = vmatpush.bf16.msra.mxu1 %v9576_v57  ;;  %v1800_v18 = vadd.f32 %v7571_v62, %v9584_v46 }
 0x6c3   :  { %2055 = vmatpush.bf16.msra.mxu2 %v9577_v11  ;;  %2068 = vmatpush.bf16.msra.mxu3 %v9578_v7 }
 0x6c6   :  { %2030 = vmatpush.bf16.msra.mxu0 %v9579_v28  ;;  %2043 = vmatpush.bf16.msra.mxu1 %v9580_v6  ;;  %v9585_v28 = vld [vmem:[#allocation53_spill] sm:$0xff] }
 0x6c7   :  { %2056 = vmatpush.bf16.msra.mxu2 %v9581_v36  ;;  %2069 = vmatpush.bf16.msra.mxu3 %v9582_v51  ;;  %v1813_v6 = vadd.f32 %v7577_v50, %v9585_v28  ;;  %v1826_v36 = vadd.f32 %v7579_v27, %v9533_v15 }
 0x705   :  { %v1839_v12 = vpop.f32.mrf.mxu0  ;;  %v1852_v57 = vpop.f32.mrf.mxu1 }
 0x706   :  { %v1840_v9 = vadd.f32 %v1839_v12, %v1787_v33  ;;  %v1853_v11 = vadd.f32 %v1852_v57, %v1800_v18 }
 0x708   :  { %v1882_v13 = vmul.f32 0.5, %v1840_v9  ;;  %v1883_v7 = vmul.f32 0.5, %v1853_v11 }
 0x70a   :  { %6112 = vtanh.f32 %v1882_v13 }
 0x70b   :  { %6114 = vtanh.f32 %v1883_v7 }
 0x70c   :  { %v1865_v51 = vpop.f32.mrf.mxu2  ;;  %v1878_v10 = vpop.f32.mrf.mxu3 }
 0x70d   :  { %v1866_v34 = vadd.f32 %v1865_v51, %v1813_v6  ;;  %v1879_v43 = vadd.f32 %v1878_v10, %v1826_v36  ;;  %v1841_v37 = vpop.f32.mrf.mxu0  ;;  %v1854_v62 = vpop.f32.mrf.mxu1 }
 0x70f   :  { %6116 = vtanh.f32 %v1866_v34  ;;  %v1891_v46 = vmul.f32 0.5, %v1879_v43 }
 0x710   :  { %v6113_v12 = vpop.eup %6112 }
 0x711   :  { %v6115_v33 = vpop.eup %6114  ;;  %v1886_v9 = vmul.f32 0.5, %v6113_v12  ;;  %6118 = vtanh.f32 %v1891_v46 }
 0x712   :  { %v1887_v11 = vmul.f32 0.5, %v6115_v33 }
 0x713   :  { %v1888_v13 = vadd.f32 0.5, %v1886_v9 }
 0x714   :  { %v1889_v18 = vadd.f32 0.5, %v1887_v11  ;;  %v1867_v50 = vpop.f32.mrf.mxu2  ;;  %v1880_v57 = vpop.f32.mrf.mxu3 }
 0x715   :  { %v6117_v28 = vpop.eup %6116  ;;  %v7657_v27 = vpop.f32.mrf.mxu0 }
 0x716   :  { %v7659_v7 = vpop.f32.mrf.mxu1  ;;  %v1895_v10 = vmul.f32 %v1889_v18, %v7574_v54  ;;  %v1896_v37 = vmul.f32 %v6117_v28, %v1888_v13  ;;  %v9586_v54 = vld [vmem:[#allocation25_spill] sm:$0xff]  ;;  %v9587_v28 = vld [vmem:[#allocation26_spill] sm:$0xff]  ;;  %v9588_v13 = vld [vmem:[#allocation27_spill] sm:$0xff] }
 0x717   :  { %v6119_v6 = vpop.eup %6118  ;;  %v9589_v18 = vld [vmem:[#allocation28_spill] sm:$0xff] }
 0x718   :  { %v7662_v36 = vadd.f32 %v1896_v37, %v1895_v10  ;;  %v1893_v51 = vmul.f32 0.5, %v6119_v6  ;;  %v9590_v10 = vld [vmem:[#allocation29_spill] sm:$0xff]  ;;  %v9591_v37 = vld [vmem:[#allocation30_spill] sm:$0xff]  ;;  %v9592_v6 = vld [vmem:[#allocation31_spill] sm:$0xff] }
 0x71a   :  { %6120 = vtanh.f32 %v7662_v36  ;;  %v1894_v12 = vadd.f32 0.5, %v1893_v51  ;;  %v9593_v51 = vld [vmem:[#allocation32_spill] sm:$0xff] }
 0x71c   :  { %v7665_v43 = vpop.f32.mrf.mxu2  ;;  %v7667_v46 = vpop.f32.mrf.mxu3 }
 0x71d   :  { %v1911_v34 = vpop.f32.mrf.mxu0 }
 0x71e   :  { %v1924_v62 = vpop.f32.mrf.mxu1  ;;  %v9594_v34 = vld [vmem:[#allocation33_spill] sm:$0xff] }
 0x71f   :  { %v9595_v62 = vld [vmem:[#allocation34_spill] sm:$0xff] }
 0x720   :  { %v6121_v33 = vpop.eup %6120 }
 0x721   :  { %v1899_v9 = vmul.f32 %v6121_v33, %v1894_v12  ;;  %v9596_v12 = vld [vmem:[#allocation35_spill] sm:$0xff]  ;;  %v9597_v33 = vld [vmem:[#allocation36_spill] sm:$0xff] }
 0x723   :  { %v1952_v11 = vpack.c.bf16 %v1899_v9, %v1899_v9  ;;  %v9598_v9 = vld [vmem:[#allocation37_spill] sm:$0xff] }
 0x724   :  { %v1937_v50 = vpop.f32.mrf.mxu2  ;;  %v1950_v57 = vpop.f32.mrf.mxu3 }
 0x725   :  { %1961 = vmatmul.bf16.vlgmr.msrb.gmra.mxu0 %v1952_v11  ;;  %1974 = vmatmul.bf16.vlgmr.msrb.gmra.mxu1 %v1952_v11  ;;  %v9600_v50 = vld [vmem:[#allocation39_spill] sm:$0xff]  ;;  %v9601_v57 = vld [vmem:[#allocation40_spill] sm:$0xff] }
 0x726   :  { %1987 = vmatmul.bf16.vlgmr.msrb.gmra.mxu2 %v1952_v11  ;;  %2000 = vmatmul.bf16.vlgmr.msrb.gmra.mxu3 %v1952_v11  ;;  %v9599_v11 = vld [vmem:[#allocation38_spill] sm:$0xff] }
 0x727   :  { %2076 = vmatpush.bf16.msrb.mxu0 %v7164_v44  ;;  %2089 = vmatpush.bf16.msrb.mxu1 %v7166_v3 }
 0x728   :  { %2102 = vmatpush.bf16.msrb.mxu2 %v7168_v25  ;;  %2115 = vmatpush.bf16.msrb.mxu3 %v7170_v39 }
 0x72b   :  { %2077 = vmatpush.bf16.msrb.mxu0 %v7178_v29  ;;  %2090 = vmatpush.bf16.msrb.mxu1 %v7180_v48 }
 0x72c   :  { %2103 = vmatpush.bf16.msrb.mxu2 %v7184_v20  ;;  %2116 = vmatpush.bf16.msrb.mxu3 %v7186_v55 }
 0x72f   :  { %2078 = vmatpush.bf16.msrb.mxu0 %v9484_v58  ;;  %2091 = vmatpush.bf16.msrb.mxu1 %v9485_v31 }
 0x730   :  { %2104 = vmatpush.bf16.msrb.mxu2 %v7196_v63  ;;  %2117 = vmatpush.bf16.msrb.mxu3 %v9486_v32 }
 0x733   :  { %2079 = vmatpush.bf16.msrb.mxu0 %v9487_v52  ;;  %2092 = vmatpush.bf16.msrb.mxu1 %v9488_v0 }
 0x734   :  { %2105 = vmatpush.bf16.msrb.mxu2 %v9489_v2  ;;  %2118 = vmatpush.bf16.msrb.mxu3 %v9490_v35 }
 0x735   :  { %2031 = vmatmul.bf16.vlgmr.msra.gmra.mxu0 %v9586_v54  ;;  %2044 = vmatmul.bf16.vlgmr.msra.gmra.mxu1 %v9586_v54 }
 0x736   :  { %2057 = vmatmul.bf16.vlgmr.msra.gmra.mxu2 %v9586_v54  ;;  %2070 = vmatmul.bf16.vlgmr.msra.gmra.mxu3 %v9586_v54  ;;  %v9602_v54 = vld [vmem:[#allocation41_spill] sm:$0xff] }
 0x737   :  { %2080 = vmatpush.bf16.msrb.mxu0 %v9491_v21  ;;  %2093 = vmatpush.bf16.msrb.mxu1 %v9492_v5 }
 0x738   :  { %2106 = vmatpush.bf16.msrb.mxu2 %v9493_v59  ;;  %2119 = vmatpush.bf16.msrb.mxu3 %v9494_v1 }
 0x73b   :  { %2081 = vmatpush.bf16.msrb.mxu0 %v9495_v14  ;;  %2094 = vmatpush.bf16.msrb.mxu1 %v9496_v47 }
 0x73c   :  { %2107 = vmatpush.bf16.msrb.mxu2 %v7236_v26  ;;  %2120 = vmatpush.bf16.msrb.mxu3 %v7238_v38 }
 0x73f   :  { %2082 = vmatpush.bf16.msrb.mxu0 %v7242_v49  ;;  %2095 = vmatpush.bf16.msrb.mxu1 %v7244_v40 }
 0x740   :  { %2108 = vmatpush.bf16.msrb.mxu2 %v7248_v16  ;;  %2121 = vmatpush.bf16.msrb.mxu3 %v7250_v56 }
 0x743   :  { %2083 = vmatpush.bf16.msrb.mxu0 %v7254_v41  ;;  %2096 = vmatpush.bf16.msrb.mxu1 %v7256_v22 }
 0x744   :  { %2109 = vmatpush.bf16.msrb.mxu2 %v7260_v23  ;;  %2122 = vmatpush.bf16.msrb.mxu3 %v7262_v19 }
 0x747   :  { %2146 = vmatpush.bf16.msra.mxu0 %v7058_v24  ;;  %2159 = vmatpush.bf16.msra.mxu1 %v7060_v60 }
 0x748   :  { %2172 = vmatpush.bf16.msra.mxu2 %v7062_v42  ;;  %2185 = vmatpush.bf16.msra.mxu3 %v7065_v53 }
 0x74b   :  { %2147 = vmatpush.bf16.msra.mxu0 %v7070_v61  ;;  %2160 = vmatpush.bf16.msra.mxu1 %v7072_v4 }
 0x74c   :  { %2173 = vmatpush.bf16.msra.mxu2 %v7074_v8  ;;  %2186 = vmatpush.bf16.msra.mxu3 %v7077_v17 }
 0x74f   :  { %2148 = vmatpush.bf16.msra.mxu0 %v7082_v30  ;;  %2161 = vmatpush.bf16.msra.mxu1 %v7084_v45 }
 0x750   :  { %2174 = vmatpush.bf16.msra.mxu2 %v9587_v28  ;;  %2187 = vmatpush.bf16.msra.mxu3 %v9588_v13 }
 0x753   :  { %2149 = vmatpush.bf16.msra.mxu0 %v9589_v18  ;;  %2162 = vmatpush.bf16.msra.mxu1 %v9590_v10 }
 0x754   :  { %2175 = vmatpush.bf16.msra.mxu2 %v9591_v37  ;;  %2188 = vmatpush.bf16.msra.mxu3 %v9592_v6  ;;  %v9603_v6 = vld [vmem:[#allocation42_spill] sm:$0xff] }
 0x757   :  { %2150 = vmatpush.bf16.msra.mxu0 %v9593_v51  ;;  %2163 = vmatpush.bf16.msra.mxu1 %v9594_v34  ;;  %v9604_v51 = vld [vmem:[#allocation43_spill] sm:$0xff]  ;;  %v9605_v34 = vld [vmem:[#allocation44_spill] sm:$0xff] }
 0x758   :  { %2176 = vmatpush.bf16.msra.mxu2 %v9595_v62  ;;  %2189 = vmatpush.bf16.msra.mxu3 %v9596_v12  ;;  %v9606_v62 = vld [vmem:[#allocation45_spill] sm:$0xff]  ;;  %v9607_v12 = vld [vmem:[#allocation46_spill] sm:$0xff] }
 0x75b   :  { %2151 = vmatpush.bf16.msra.mxu0 %v9597_v33  ;;  %2164 = vmatpush.bf16.msra.mxu1 %v9598_v9  ;;  %v9608_v33 = vld [vmem:[#allocation47_spill] sm:$0xff] }
 0x75c   :  { %2177 = vmatpush.bf16.msra.mxu2 %v9599_v11  ;;  %2190 = vmatpush.bf16.msra.mxu3 %v9600_v50  ;;  %v9609_v9 = vld [vmem:[#allocation51_spill] sm:$0xff]  ;;  %v9610_v50 = vld [vmem:[#allocation52_spill] sm:$0xff] }
 0x75d   :  { %v1910_v11 = vadd.f32 %v7657_v27, %v9609_v9 }
 0x75f   :  { %2152 = vmatpush.bf16.msra.mxu0 %v9601_v57  ;;  %2165 = vmatpush.bf16.msra.mxu1 %v9602_v54  ;;  %v1923_v57 = vadd.f32 %v7659_v7, %v9610_v50 }
 0x760   :  { %2178 = vmatpush.bf16.msra.mxu2 %v9603_v6  ;;  %2191 = vmatpush.bf16.msra.mxu3 %v9604_v51 }
 0x763   :  { %2153 = vmatpush.bf16.msra.mxu0 %v9605_v34  ;;  %2166 = vmatpush.bf16.msra.mxu1 %v9606_v62  ;;  %v9611_v34 = vld [vmem:[#allocation53_spill] sm:$0xff] }
 0x764   :  { %2179 = vmatpush.bf16.msra.mxu2 %v9607_v12  ;;  %2192 = vmatpush.bf16.msra.mxu3 %v9608_v33  ;;  %v1936_v62 = vadd.f32 %v7665_v43, %v9611_v34  ;;  %v1949_v12 = vadd.f32 %v7667_v46, %v9533_v15 }
 0x7a2   :  { %v1962_v37 = vpop.f32.mrf.mxu0  ;;  %v1975_v54 = vpop.f32.mrf.mxu1 }
 0x7a3   :  { %v1963_v10 = vadd.f32 %v1962_v37, %v1910_v11  ;;  %v1976_v6 = vadd.f32 %v1975_v54, %v1923_v57 }
 0x7a5   :  { %v2005_v18 = vmul.f32 0.5, %v1963_v10  ;;  %v2006_v51 = vmul.f32 0.5, %v1976_v6 }
 0x7a7   :  { %6122 = vtanh.f32 %v2005_v18 }
 0x7a8   :  { %6124 = vtanh.f32 %v2006_v51 }
 0x7a9   :  { %v1988_v33 = vpop.f32.mrf.mxu2  ;;  %v2001_v13 = vpop.f32.mrf.mxu3 }
 0x7aa   :  { %v1989_v27 = vadd.f32 %v1988_v33, %v1936_v62  ;;  %v2002_v9 = vadd.f32 %v2001_v13, %v1949_v12  ;;  %v1964_v28 = vpop.f32.mrf.mxu0  ;;  %v1977_v7 = vpop.f32.mrf.mxu1 }
 0x7ac   :  { %6126 = vtanh.f32 %v1989_v27  ;;  %v2014_v50 = vmul.f32 0.5, %v2002_v9 }
 0x7ad   :  { %v6123_v37 = vpop.eup %6122 }
 0x7ae   :  { %v6125_v11 = vpop.eup %6124  ;;  %v2009_v10 = vmul.f32 0.5, %v6123_v37  ;;  %6128 = vtanh.f32 %v2014_v50 }
 0x7af   :  { %v2010_v6 = vmul.f32 0.5, %v6125_v11 }
 0x7b0   :  { %v2011_v18 = vadd.f32 0.5, %v2009_v10 }
 0x7b1   :  { %v2012_v57 = vadd.f32 0.5, %v2010_v6  ;;  %v1990_v43 = vpop.f32.mrf.mxu2  ;;  %v2003_v54 = vpop.f32.mrf.mxu3 }
 0x7b2   :  { %v6127_v34 = vpop.eup %6126  ;;  %v7745_v46 = vpop.f32.mrf.mxu0 }
 0x7b3   :  { %v7747_v51 = vpop.f32.mrf.mxu1  ;;  %v2018_v13 = vmul.f32 %v2012_v57, %v7662_v36  ;;  %v2019_v28 = vmul.f32 %v6127_v34, %v2011_v18  ;;  %v9612_v36 = vld [vmem:[#allocation49_spill] sm:$0xff]  ;;  %v9613_v34 = vld [vmem:[#allocation26_spill] sm:$0xff] }
 0x7b4   :  { %v6129_v62 = vpop.eup %6128  ;;  %v9624_v18 = vld [vmem:[#allocation37_spill] sm:$0xff]  ;;  %v9625_v57 = vld [vmem:[#allocation38_spill] sm:$0xff] }
 0x7b5   :  { %v7750_v12 = vadd.f32 %v2019_v28, %v2018_v13  ;;  %v2016_v33 = vmul.f32 0.5, %v6129_v62  ;;  %v9626_v13 = vld [vmem:[#allocation39_spill] sm:$0xff]  ;;  %v9627_v28 = vld [vmem:[#allocation40_spill] sm:$0xff]  ;;  %v9628_v62 = vld [vmem:[#allocation41_spill] sm:$0xff] }
 0x7b7   :  { %6130 = vtanh.f32 %v7750_v12  ;;  %v2017_v37 = vadd.f32 0.5, %v2016_v33  ;;  %v9629_v33 = vld [vmem:[#allocation42_spill] sm:$0xff] }
 0x7b9   :  { %v7753_v9 = vpop.f32.mrf.mxu2  ;;  %v7755_v50 = vpop.f32.mrf.mxu3 }
 0x7ba   :  { %v2034_v27 = vpop.f32.mrf.mxu0 }
 0x7bb   :  { %v2047_v7 = vpop.f32.mrf.mxu1  ;;  %v9630_v27 = vld [vmem:[#allocation43_spill] sm:$0xff] }
 0x7bc   :  { %v9631_v7 = vld [vmem:[#allocation44_spill] sm:$0xff] }
 0x7bd   :  { %v6131_v11 = vpop.eup %6130 }
 0x7be   :  { %v2022_v10 = vmul.f32 %v6131_v11, %v2017_v37  ;;  %v9632_v37 = vld [vmem:[#allocation45_spill] sm:$0xff]  ;;  %v9633_v11 = vld [vmem:[#allocation46_spill] sm:$0xff] }
 0x7c0   :  { %v2075_v6 = vpack.c.bf16 %v2022_v10, %v2022_v10  ;;  %v9634_v10 = vld [vmem:[#allocation47_spill] sm:$0xff] }
 0x7c1   :  { %v2060_v43 = vpop.f32.mrf.mxu2  ;;  %v2073_v54 = vpop.f32.mrf.mxu3 }
 0x7c2   :  { %2084 = vmatmul.bf16.vlgmr.msrb.gmra.mxu0 %v2075_v6  ;;  %2097 = vmatmul.bf16.vlgmr.msrb.gmra.mxu1 %v2075_v6  ;;  %v9636_v54 = vld [vmem:[#allocation52_spill] sm:$0xff] }
 0x7c3   :  { %2110 = vmatmul.bf16.vlgmr.msrb.gmra.mxu2 %v2075_v6  ;;  %2123 = vmatmul.bf16.vlgmr.msrb.gmra.mxu3 %v2075_v6  ;;  %v9635_v6 = vld [vmem:[#allocation51_spill] sm:$0xff] }
 0x7c4   :  { %2199 = vmatpush.bf16.msrb.mxu0 %v7164_v44  ;;  %2212 = vmatpush.bf16.msrb.mxu1 %v7166_v3  ;;  %v2033_v43 = vadd.f32 %v7745_v46, %v9635_v6 }
 0x7c5   :  { %2225 = vmatpush.bf16.msrb.mxu2 %v7168_v25  ;;  %2238 = vmatpush.bf16.msrb.mxu3 %v7170_v39 }
 0x7c8   :  { %2200 = vmatpush.bf16.msrb.mxu0 %v7178_v29  ;;  %2213 = vmatpush.bf16.msrb.mxu1 %v7180_v48 }
 0x7c9   :  { %2226 = vmatpush.bf16.msrb.mxu2 %v7184_v20  ;;  %2239 = vmatpush.bf16.msrb.mxu3 %v7186_v55 }
 0x7cc   :  { %2201 = vmatpush.bf16.msrb.mxu0 %v9484_v58  ;;  %2214 = vmatpush.bf16.msrb.mxu1 %v9485_v31 }
 0x7cd   :  { %2227 = vmatpush.bf16.msrb.mxu2 %v7196_v63  ;;  %2240 = vmatpush.bf16.msrb.mxu3 %v9486_v32 }
 0x7d0   :  { %2202 = vmatpush.bf16.msrb.mxu0 %v9487_v52  ;;  %2215 = vmatpush.bf16.msrb.mxu1 %v9488_v0 }
 0x7d1   :  { %2228 = vmatpush.bf16.msrb.mxu2 %v9489_v2  ;;  %2241 = vmatpush.bf16.msrb.mxu3 %v9490_v35 }
 0x7d2   :  { %2154 = vmatmul.bf16.vlgmr.msra.gmra.mxu0 %v9612_v36  ;;  %2167 = vmatmul.bf16.vlgmr.msra.gmra.mxu1 %v9612_v36 }
 0x7d3   :  { %2180 = vmatmul.bf16.vlgmr.msra.gmra.mxu2 %v9612_v36  ;;  %2193 = vmatmul.bf16.vlgmr.msra.gmra.mxu3 %v9612_v36  ;;  %v2046_v36 = vadd.f32 %v7747_v51, %v9636_v54 }
 0x7d4   :  { %2203 = vmatpush.bf16.msrb.mxu0 %v9491_v21  ;;  %2216 = vmatpush.bf16.msrb.mxu1 %v9492_v5 }
 0x7d5   :  { %2229 = vmatpush.bf16.msrb.mxu2 %v9493_v59  ;;  %2242 = vmatpush.bf16.msrb.mxu3 %v9494_v1 }
 0x7d8   :  { %2204 = vmatpush.bf16.msrb.mxu0 %v9495_v14  ;;  %2217 = vmatpush.bf16.msrb.mxu1 %v9496_v47 }
 0x7d9   :  { %2230 = vmatpush.bf16.msrb.mxu2 %v7236_v26  ;;  %2243 = vmatpush.bf16.msrb.mxu3 %v7238_v38 }
 0x7dc   :  { %2205 = vmatpush.bf16.msrb.mxu0 %v7242_v49  ;;  %2218 = vmatpush.bf16.msrb.mxu1 %v7244_v40 }
 0x7dd   :  { %2231 = vmatpush.bf16.msrb.mxu2 %v7248_v16  ;;  %2244 = vmatpush.bf16.msrb.mxu3 %v7250_v56 }
 0x7e0   :  { %2206 = vmatpush.bf16.msrb.mxu0 %v7254_v41  ;;  %2219 = vmatpush.bf16.msrb.mxu1 %v7256_v22 }
 0x7e1   :  { %2232 = vmatpush.bf16.msrb.mxu2 %v7260_v23  ;;  %2245 = vmatpush.bf16.msrb.mxu3 %v7262_v19 }
 0x7e4   :  { %2270 = vmatpush.bf16.msra.mxu0 %v7058_v24  ;;  %2283 = vmatpush.bf16.msra.mxu1 %v7060_v60  ;;  %v9614_v24 = vld [vmem:[#allocation27_spill] sm:$0xff]  ;;  %v9615_v60 = vld [vmem:[#allocation28_spill] sm:$0xff] }
 0x7e5   :  { %2296 = vmatpush.bf16.msra.mxu2 %v7062_v42  ;;  %2309 = vmatpush.bf16.msra.mxu3 %v7065_v53  ;;  %v9616_v42 = vld [vmem:[#allocation29_spill] sm:$0xff]  ;;  %v9617_v53 = vld [vmem:[#allocation30_spill] sm:$0xff] }
 0x7e8   :  { %2271 = vmatpush.bf16.msra.mxu0 %v7070_v61  ;;  %2284 = vmatpush.bf16.msra.mxu1 %v7072_v4  ;;  %v9618_v61 = vld [vmem:[#allocation31_spill] sm:$0xff]  ;;  %v9619_v4 = vld [vmem:[#allocation32_spill] sm:$0xff] }
 0x7e9   :  { %2297 = vmatpush.bf16.msra.mxu2 %v7074_v8  ;;  %2310 = vmatpush.bf16.msra.mxu3 %v7077_v17  ;;  %v9620_v8 = vld [vmem:[#allocation33_spill] sm:$0xff]  ;;  %v9621_v17 = vld [vmem:[#allocation34_spill] sm:$0xff] }
 0x7ec   :  { %2272 = vmatpush.bf16.msra.mxu0 %v7082_v30  ;;  %2285 = vmatpush.bf16.msra.mxu1 %v7084_v45  ;;  %v9622_v30 = vld [vmem:[#allocation35_spill] sm:$0xff]  ;;  %v9623_v45 = vld [vmem:[#allocation36_spill] sm:$0xff] }
 0x7ed   :  { %2298 = vmatpush.bf16.msra.mxu2 %v9613_v34  ;;  %2311 = vmatpush.bf16.msra.mxu3 %v9614_v24 }
 0x7f0   :  { %2273 = vmatpush.bf16.msra.mxu0 %v9615_v60  ;;  %2286 = vmatpush.bf16.msra.mxu1 %v9616_v42 }
 0x7f1   :  { %2299 = vmatpush.bf16.msra.mxu2 %v9617_v53  ;;  %2312 = vmatpush.bf16.msra.mxu3 %v9618_v61 }
 0x7f4   :  { %2274 = vmatpush.bf16.msra.mxu0 %v9619_v4  ;;  %2287 = vmatpush.bf16.msra.mxu1 %v9620_v8  ;;  %v9637_v4 = vld [vmem:[#allocation53_spill] sm:$0xff] }
 0x7f5   :  { %2300 = vmatpush.bf16.msra.mxu2 %v9621_v17  ;;  %2313 = vmatpush.bf16.msra.mxu3 %v9622_v30  ;;  %v2059_v8 = vadd.f32 %v7753_v9, %v9637_v4  ;;  %v2072_v17 = vadd.f32 %v7755_v50, %v9533_v15 }
 0x7f8   :  { %2275 = vmatpush.bf16.msra.mxu0 %v9623_v45  ;;  %2288 = vmatpush.bf16.msra.mxu1 %v9624_v18 }
 0x7f9   :  { %2301 = vmatpush.bf16.msra.mxu2 %v9625_v57  ;;  %2314 = vmatpush.bf16.msra.mxu3 %v9626_v13 }
 0x7fc   :  { %2276 = vmatpush.bf16.msra.mxu0 %v9627_v28  ;;  %2289 = vmatpush.bf16.msra.mxu1 %v9628_v62 }
 0x7fd   :  { %2302 = vmatpush.bf16.msra.mxu2 %v9629_v33  ;;  %2315 = vmatpush.bf16.msra.mxu3 %v9630_v27 }
 0x800   :  { %2277 = vmatpush.bf16.msra.mxu0 %v9631_v7  ;;  %2290 = vmatpush.bf16.msra.mxu1 %v9632_v37 }
 0x801   :  { %2303 = vmatpush.bf16.msra.mxu2 %v9633_v11  ;;  %2316 = vmatpush.bf16.msra.mxu3 %v9634_v10 }
 0x83f   :  { %v2085_v34 = vpop.f32.mrf.mxu0  ;;  %v2098_v24 = vpop.f32.mrf.mxu1 }
 0x840   :  { %v2086_v60 = vadd.f32 %v2085_v34, %v2033_v43  ;;  %v2099_v42 = vadd.f32 %v2098_v24, %v2046_v36 }
 0x842   :  { %v2128_v53 = vmul.f32 0.5, %v2086_v60  ;;  %v2129_v61 = vmul.f32 0.5, %v2099_v42 }
 0x844   :  { %6132 = vtanh.f32 %v2128_v53 }
 0x845   :  { %6134 = vtanh.f32 %v2129_v61 }
 0x846   :  { %v2111_v30 = vpop.f32.mrf.mxu2  ;;  %v2124_v45 = vpop.f32.mrf.mxu3 }
 0x847   :  { %v2112_v46 = vadd.f32 %v2111_v30, %v2059_v8  ;;  %v2125_v18 = vadd.f32 %v2124_v45, %v2072_v17  ;;  %v2087_v57 = vpop.f32.mrf.mxu0  ;;  %v2100_v51 = vpop.f32.mrf.mxu1 }
 0x849   :  { %6136 = vtanh.f32 %v2112_v46  ;;  %v2137_v13 = vmul.f32 0.5, %v2125_v18 }
 0x84a   :  { %v6133_v28 = vpop.eup %6132 }
 0x84b   :  { %v6135_v62 = vpop.eup %6134  ;;  %v2132_v33 = vmul.f32 0.5, %v6133_v28  ;;  %6138 = vtanh.f32 %v2137_v13  ;;  %v5887_v13 = vld [vmem:[#allocation8 + $0xcc] sm:$0xf]  ;;  %v5362_v28 = vld [vmem:[#allocation8 + $0xd8] sm:$0xf0] }
 0x84c   :  { %v2133_v27 = vmul.f32 0.5, %v6135_v62  ;;  %v5336_v62 = vld [vmem:[#allocation8 + $0xa0] sm:$0xf] }
 0x84d   :  { %v2134_v7 = vadd.f32 0.5, %v2132_v33 }
 0x84e   :  { %v2135_v37 = vadd.f32 0.5, %v2133_v27  ;;  %v2113_v9 = vpop.f32.mrf.mxu2  ;;  %v2126_v11 = vpop.f32.mrf.mxu3 }
 0x84f   :  { %v6137_v10 = vpop.eup %6136  ;;  %v2155_v50 = vpop.f32.mrf.mxu0  ;;  %v5882_v9 = vld [vmem:[#allocation8 + $0xa4] sm:$0xf]  ;;  %v5338_v11 = vld [vmem:[#allocation8 + $0xb0] sm:$0xf0] }
 0x850   :  { %v2168_v43 = vpop.f32.mrf.mxu1  ;;  %v2141_v36 = vmul.f32 %v2135_v37, %v7750_v12  ;;  %v2142_v34 = vmul.f32 %v6137_v10, %v2134_v7  ;;  %v5365_v7 = vor.u32 %v5887_v13, %v5362_v28  ;;  %v5884_v37 = vld [vmem:[#allocation8 + $0xac] sm:$0xf0]  ;;  %v5304_v13 = vld [vmem:[#allocation8 + $0x60] sm:$0xf] }
 0x851   :  { %v6139_v24 = vpop.eup %6138  ;;  %v5876_v28 = vld [vmem:[#allocation8 + $0x6c] sm:$0xf0] }
 0x852   :  { %v7834_v60 = vadd.f32 %v2142_v34, %v2141_v36  ;;  %v2139_v42 = vmul.f32 0.5, %v6139_v24  ;;  %v5337_v34 = vor.u32 %v5884_v37, %v5336_v62  ;;  %v5344_v24 = vld [vmem:[#allocation8 + $0xa8] sm:$0xf]  ;;  %v5874_v62 = vld [vmem:[#allocation8 + $0x64] sm:$0xf] }
 0x853   :  { %v5877_v37 = vld [vmem:[#allocation8 + $0x74] sm:$0xf0] }
 0x854   :  { %6140 = vtanh.f32 %v7834_v60  ;;  %v2140_v30 = vadd.f32 0.5, %v2139_v42  ;;  %v5885_v42 = vld [vmem:[#allocation8 + $0xb4] sm:$0xf0] }
 0x856   :  { %v7837_v53 = vpop.f32.mrf.mxu2  ;;  %v7839_v61 = vpop.f32.mrf.mxu3 }
 0x857   :  { %v2157_v8 = vpop.f32.mrf.mxu0 }
 0x858   :  { %v2170_v17 = vpop.f32.mrf.mxu1  ;;  %v5345_v8 = vor.u32 %v5885_v42, %v5344_v24  ;;  %v5870_v24 = vld [vmem:[#allocation8 + $0x44] sm:$0xf] }
 0x859   :  { %v5346_v17 = vld [vmem:[#allocation8 + $0xb8] sm:$0xf0] }
 0x85a   :  { %v6141_v45 = vpop.eup %6140 }
 0x85b   :  { %v2145_v46 = vmul.f32 %v6141_v45, %v2140_v30  ;;  %v5320_v30 = vld [vmem:[#allocation8 + $0x80] sm:$0xf]  ;;  %v5880_v45 = vld [vmem:[#allocation8 + $0x8c] sm:$0xf0] }
 0x85d   :  { %v2198_v18 = vpack.c.bf16 %v2145_v46, %v2145_v46 }
 0x85e   :  { %v2183_v57 = vpop.f32.mrf.mxu2  ;;  %v2196_v51 = vpop.f32.mrf.mxu3 }
 0x85f   :  { %2207 = vmatmul.bf16.vlgmr.msrb.gmra.mxu0 %v2198_v18  ;;  %2220 = vmatmul.bf16.vlgmr.msrb.gmra.mxu1 %v2198_v18  ;;  %v5878_v57 = vld [vmem:[#allocation8 + $0x84] sm:$0xf]  ;;  %v5322_v51 = vld [vmem:[#allocation8 + $0x90] sm:$0xf0] }
 0x860   :  { %2233 = vmatmul.bf16.vlgmr.msrb.gmra.mxu2 %v2198_v18  ;;  %2246 = vmatmul.bf16.vlgmr.msrb.gmra.mxu3 %v2198_v18 }
 0x861   :  { %2323 = vmatpush.bf16.msrb.mxu0 %v7164_v44  ;;  %2336 = vmatpush.bf16.msrb.mxu1 %v7166_v3  ;;  %v9638_v44 = vld [vmem:[#allocation50_spill] sm:$0xff] }
 0x862   :  { %2349 = vmatpush.bf16.msrb.mxu2 %v7168_v25  ;;  %2362 = vmatpush.bf16.msrb.mxu3 %v7170_v39  ;;  %v2269_v3 = vpack.c.bf16 %v9638_v44, %v9638_v44  ;;  %v2156_v25 = vadd.f32 %v2155_v50, %v9635_v6  ;;  %v2169_v39 = vadd.f32 %v2168_v43, %v9636_v54 }
 0x865   :  { %2324 = vmatpush.bf16.msrb.mxu0 %v7178_v29  ;;  %2337 = vmatpush.bf16.msrb.mxu1 %v7180_v48 }
 0x866   :  { %2350 = vmatpush.bf16.msrb.mxu2 %v7184_v20  ;;  %2363 = vmatpush.bf16.msrb.mxu3 %v7186_v55 }
 0x869   :  { %2325 = vmatpush.bf16.msrb.mxu0 %v9484_v58  ;;  %2338 = vmatpush.bf16.msrb.mxu1 %v9485_v31  ;;  %v5378_v58 = vld [vmem:[#allocation8 + $0xf8] sm:$0xf0] }
 0x86a   :  { %2351 = vmatpush.bf16.msrb.mxu2 %v7196_v63  ;;  %2364 = vmatpush.bf16.msrb.mxu3 %v9486_v32  ;;  %v5368_v63 = vld [vmem:[#allocation8 + $0xe0] sm:$0xf] }
 0x86b   :  { %v5352_v32 = vld [vmem:[#allocation8 + $0xc0] sm:$0xf] }
 0x86d   :  { %2326 = vmatpush.bf16.msrb.mxu0 %v9487_v52  ;;  %2339 = vmatpush.bf16.msrb.mxu1 %v9488_v0  ;;  %v5888_v52 = vld [vmem:[#allocation8 + $0xcc] sm:$0xf0]  ;;  %v5886_v0 = vld [vmem:[#allocation8 + $0xc4] sm:$0xf] }
 0x86e   :  { %2352 = vmatpush.bf16.msrb.mxu2 %v9489_v2  ;;  %2365 = vmatpush.bf16.msrb.mxu3 %v9490_v35  ;;  %v2182_v2 = vadd.f32 %v7837_v53, %v9637_v4  ;;  %v5353_v35 = vor.u32 %v5888_v52, %v5352_v32  ;;  %v5883_v53 = vld [vmem:[#allocation8 + $0xac] sm:$0xf] }
 0x86f   :  { %2278 = vmatmul.bf16.vlgmr.msra.gmra.mxu0 %v2269_v3  ;;  %2291 = vmatmul.bf16.vlgmr.msra.gmra.mxu1 %v2269_v3  ;;  %v5349_v18 = vor.u32 %v5883_v53, %v5346_v17  ;;  %v5290_v53 = vld [vmem:[#allocation8 + $0x50] sm:$0xf0] }
 0x870   :  { %2304 = vmatmul.bf16.vlgmr.msra.gmra.mxu2 %v2269_v3  ;;  %2317 = vmatmul.bf16.vlgmr.msra.gmra.mxu3 %v2269_v3  ;;  %v5328_v3 = vld [vmem:[#allocation8 + $0x88] sm:$0xf]  ;;  %v5293_v17 = vor.u32 %v5870_v24, %v5290_v53  ;;  %v5490_v24 = vld [vmem:[#allocation10 + $0xd8] sm:$0xf0] }
 0x871   :  { %2327 = vmatpush.bf16.msrb.mxu0 %v9491_v21  ;;  %2340 = vmatpush.bf16.msrb.mxu1 %v9492_v5  ;;  %v5354_v21 = vld [vmem:[#allocation8 + $0xd0] sm:$0xf0]  ;;  %v5360_v5 = vld [vmem:[#allocation8 + $0xc8] sm:$0xf] }
 0x872   :  { %2353 = vmatpush.bf16.msrb.mxu2 %v9493_v59  ;;  %2366 = vmatpush.bf16.msrb.mxu3 %v9494_v1  ;;  %v5889_v59 = vld [vmem:[#allocation8 + $0xd4] sm:$0xf0]  ;;  %v2195_v1 = vadd.f32 %v7839_v61, %v9533_v15  ;;  %v5341_v61 = vor.u32 %v5882_v9, %v5338_v11 }
 0x873   :  { %v5361_v12 = vor.u32 %v5889_v59, %v5360_v5 }
 0x875   :  { %2328 = vmatpush.bf16.msrb.mxu0 %v9495_v14  ;;  %2341 = vmatpush.bf16.msrb.mxu1 %v9496_v47  ;;  %v5357_v14 = vor.u32 %v5886_v0, %v5354_v21 }
 0x876   :  { %2354 = vmatpush.bf16.msrb.mxu2 %v7236_v26  ;;  %2367 = vmatpush.bf16.msrb.mxu3 %v7238_v38  ;;  %v5892_v38 = vld [vmem:[#allocation8 + $0xec] sm:$0xf0]  ;;  %v5890_v26 = vld [vmem:[#allocation8 + $0xe4] sm:$0xf] }
 0x879   :  { %2329 = vmatpush.bf16.msrb.mxu0 %v7242_v49  ;;  %2342 = vmatpush.bf16.msrb.mxu1 %v7244_v40  ;;  %v5369_v49 = vor.u32 %v5892_v38, %v5368_v63  ;;  %v5370_v40 = vld [vmem:[#allocation8 + $0xf0] sm:$0xf0]  ;;  %v5325_v38 = vor.u32 %v5878_v57, %v5322_v51  ;;  %v5272_v57 = vld [vmem:[#allocation8 + $0x20] sm:$0xf]  ;;  %v5868_v51 = vld [vmem:[#allocation8 + $0x2c] sm:$0xf0] }
 0x87a   :  { %2355 = vmatpush.bf16.msrb.mxu2 %v7248_v16  ;;  %2368 = vmatpush.bf16.msrb.mxu3 %v7250_v56  ;;  %v5376_v16 = vld [vmem:[#allocation8 + $0xe8] sm:$0xf]  ;;  %v5893_v56 = vld [vmem:[#allocation8 + $0xf4] sm:$0xf0] }
 0x87b   :  { %v5377_v47 = vor.u32 %v5893_v56, %v5376_v16 }
 0x87d   :  { %2330 = vmatpush.bf16.msrb.mxu0 %v7254_v41  ;;  %2343 = vmatpush.bf16.msrb.mxu1 %v7256_v22 }
 0x87e   :  { %2356 = vmatpush.bf16.msrb.mxu2 %v7260_v23  ;;  %2369 = vmatpush.bf16.msrb.mxu3 %v7262_v19  ;;  %v5373_v23 = vor.u32 %v5890_v26, %v5370_v40  ;;  %v5891_v19 = vld [vmem:[#allocation8 + $0xec] sm:$0xf] }
 0x87f   :  { %v5381_v31 = vor.u32 %v5891_v19, %v5378_v58 }
 0x881   :  { %2596 = vmatpush.bf16.msra.mxu0 %v5369_v49  ;;  %2609 = vmatpush.bf16.msra.mxu1 %v5373_v23 }
 0x882   :  { %2622 = vmatpush.bf16.msra.mxu2 %v5377_v47  ;;  %2635 = vmatpush.bf16.msra.mxu3 %v5381_v31 }
 0x885   :  { %2597 = vmatpush.bf16.msra.mxu0 %v5353_v35  ;;  %2610 = vmatpush.bf16.msra.mxu1 %v5357_v14 }
 0x886   :  { %2623 = vmatpush.bf16.msra.mxu2 %v5361_v12  ;;  %2636 = vmatpush.bf16.msra.mxu3 %v5365_v7  ;;  %v5312_v7 = vld [vmem:[#allocation8 + $0x68] sm:$0xf] }
 0x887   :  { %v5313_v11 = vor.u32 %v5877_v37, %v5312_v7  ;;  %v5920_v7 = vld [vmem:[#allocation10 + $0xcc] sm:$0xf0] }
 0x889   :  { %2598 = vmatpush.bf16.msra.mxu0 %v5337_v34  ;;  %2611 = vmatpush.bf16.msra.mxu1 %v5341_v61  ;;  %v5872_v34 = vld [vmem:[#allocation8 + $0x4c] sm:$0xf0]  ;;  %v5296_v61 = vld [vmem:[#allocation8 + $0x48] sm:$0xf] }
 0x88a   :  { %2624 = vmatpush.bf16.msra.mxu2 %v5345_v8  ;;  %2637 = vmatpush.bf16.msra.mxu3 %v5349_v18  ;;  %v5873_v8 = vld [vmem:[#allocation8 + $0x54] sm:$0xf0] }
 0x88d   :  { %2612 = vmatpush.bf16.msra.mxu1 %v5325_v38 }
 0x8dc   :  { %v2208_v29 = vpop.f32.mrf.mxu0  ;;  %v2221_v48 = vpop.f32.mrf.mxu1 }
 0x8dd   :  { %v2209_v20 = vadd.f32 %v2208_v29, %v2156_v25  ;;  %v2222_v55 = vadd.f32 %v2221_v48, %v2169_v39  ;;  %v5881_v25 = vld [vmem:[#allocation8 + $0x94] sm:$0xf0]  ;;  %v5879_v39 = vld [vmem:[#allocation8 + $0x8c] sm:$0xf] }
 0x8de   :  { %v5329_v49 = vor.u32 %v5881_v25, %v5328_v3  ;;  %v5273_v3 = vor.u32 %v5868_v51, %v5272_v57  ;;  %v5274_v25 = vld [vmem:[#allocation8 + $0x30] sm:$0xf0] }
 0x8df   :  { %v2251_v41 = vmul.f32 0.5, %v2209_v20  ;;  %v2252_v22 = vmul.f32 0.5, %v2222_v55  ;;  %v5321_v20 = vor.u32 %v5880_v45, %v5320_v30  ;;  %v5330_v55 = vld [vmem:[#allocation8 + $0x98] sm:$0xf0]  ;;  %v5297_v30 = vor.u32 %v5873_v8, %v5296_v61  ;;  %v5871_v45 = vld [vmem:[#allocation8 + $0x4c] sm:$0xf] }
 0x8e0   :  { %v5333_v40 = vor.u32 %v5879_v39, %v5330_v55  ;;  %2625 = vmatpush.bf16.msra.mxu2 %v5329_v49  ;;  %v5280_v39 = vld [vmem:[#allocation8 + $0x28] sm:$0xf]  ;;  %v5867_v55 = vld [vmem:[#allocation8 + $0x2c] sm:$0xf]  ;;  %v5864_v49 = vld [vmem:[#allocation8 + $0xc] sm:$0xf0] }
 0x8e1   :  { %6142 = vtanh.f32 %v2251_v41  ;;  %2599 = vmatpush.bf16.msra.mxu0 %v5321_v20  ;;  %v5464_v61 = vld [vmem:[#allocation10 + $0xa0] sm:$0xf]  ;;  %v5916_v8 = vld [vmem:[#allocation10 + $0xac] sm:$0xf0] }
 0x8e2   :  { %6144 = vtanh.f32 %v2252_v22  ;;  %2638 = vmatpush.bf16.msra.mxu3 %v5333_v40  ;;  %v5862_v40 = vld [vmem:[#allocation8 + $0x4] sm:$0xf] }
 0x8e3   :  { %v2234_v33 = vpop.f32.mrf.mxu2  ;;  %v2247_v27 = vpop.f32.mrf.mxu3 }
 0x8e4   :  { %v2235_v10 = vadd.f32 %v2234_v33, %v2182_v2  ;;  %v2248_v50 = vadd.f32 %v2247_v27, %v2195_v1  ;;  %v2210_v43 = vpop.f32.mrf.mxu0  ;;  %v2223_v36 = vpop.f32.mrf.mxu1  ;;  %v5305_v33 = vor.u32 %v5876_v28, %v5304_v13  ;;  %v5306_v27 = vld [vmem:[#allocation8 + $0x70] sm:$0xf0]  ;;  %2626 = vmatpush.bf16.msra.mxu2 %v5313_v11  ;;  %v5925_v13 = vld [vmem:[#allocation10 + $0xf4] sm:$0xf0]  ;;  %v5923_v28 = vld [vmem:[#allocation10 + $0xec] sm:$0xf] }
 0x8e5   :  { %v5309_v9 = vor.u32 %v5874_v62, %v5306_v27  ;;  %v5288_v36 = vld [vmem:[#allocation8 + $0x40] sm:$0xf]  ;;  %v5918_v11 = vld [vmem:[#allocation10 + $0xc4] sm:$0xf] }
 0x8e6   :  { %6146 = vtanh.f32 %v2235_v10  ;;  %v2260_v46 = vmul.f32 0.5, %v2248_v50  ;;  %v5875_v10 = vld [vmem:[#allocation8 + $0x6c] sm:$0xf]  ;;  %v5314_v50 = vld [vmem:[#allocation8 + $0x78] sm:$0xf0]  ;;  %2600 = vmatpush.bf16.msra.mxu0 %v5305_v33  ;;  %v5289_v42 = vor.u32 %v5872_v34, %v5288_v36 }
 0x8e7   :  { %v6143_v44 = vpop.eup %6142  ;;  %v5317_v43 = vor.u32 %v5875_v10, %v5314_v50  ;;  %2613 = vmatpush.bf16.msra.mxu1 %v5309_v9  ;;  %v5506_v33 = vld [vmem:[#allocation10 + $0xf8] sm:$0xf0]  ;;  %v5480_v27 = vld [vmem:[#allocation10 + $0xc0] sm:$0xf]  ;;  %v5482_v10 = vld [vmem:[#allocation10 + $0xd0] sm:$0xf0] }
 0x8e8   :  { %v6145_v29 = vpop.eup %6144  ;;  %v2255_v48 = vmul.f32 0.5, %v6143_v44  ;;  %6148 = vtanh.f32 %v2260_v46  ;;  %v5298_v46 = vld [vmem:[#allocation8 + $0x58] sm:$0xf0]  ;;  %2627 = vmatpush.bf16.msra.mxu2 %v5297_v30  ;;  %v5866_v44 = vld [vmem:[#allocation8 + $0x24] sm:$0xf]  ;;  %v7901_v37 = vor.u32 %v5923_v28, %v5506_v33  ;;  %v7903_v9 = vor.u32 %v5920_v7, %v5480_v27 }
 0x8e9   :  { %v2256_v63 = vmul.f32 0.5, %v6145_v29  ;;  %2639 = vmatpush.bf16.msra.mxu3 %v5317_v43  ;;  %v5301_v18 = vor.u32 %v5871_v45, %v5298_v46  ;;  %v5869_v29 = vld [vmem:[#allocation8 + $0x34] sm:$0xf0]  ;;  %v5488_v50 = vld [vmem:[#allocation10 + $0xc8] sm:$0xf]  ;;  %v7906_v43 = vor.u32 %v5918_v11, %v5482_v10  ;;  %v7915_v30 = vor.u32 %v5916_v8, %v5464_v61 }
 0x8ea   :  { %v2257_v26 = vadd.f32 0.5, %v2255_v48  ;;  %2601 = vmatpush.bf16.msra.mxu0 %v5289_v42  ;;  %v5277_v48 = vor.u32 %v5866_v44, %v5274_v25  ;;  %v5281_v20 = vor.u32 %v5869_v29, %v5280_v39  ;;  %v5921_v36 = vld [vmem:[#allocation10 + $0xd4] sm:$0xf0]  ;;  %v5919_v34 = vld [vmem:[#allocation10 + $0xcc] sm:$0xf] }
 0x8eb   :  { %v2258_v16 = vadd.f32 0.5, %v2256_v63  ;;  %v2236_v56 = vpop.f32.mrf.mxu2  ;;  %v2249_v41 = vpop.f32.mrf.mxu3  ;;  %2614 = vmatpush.bf16.msra.mxu1 %v5293_v17  ;;  %v5282_v63 = vld [vmem:[#allocation8 + $0x38] sm:$0xf0]  ;;  %v7909_v42 = vor.u32 %v5921_v36, %v5488_v50  ;;  %v7911_v53 = vor.u32 %v5919_v34, %v5490_v24  ;;  %v5914_v17 = vld [vmem:[#allocation10 + $0xa4] sm:$0xf] }
 0x8ec   :  { %v6147_v22 = vpop.eup %6146  ;;  %v7881_v23 = vpop.f32.mrf.mxu0  ;;  %v5285_v38 = vor.u32 %v5867_v55, %v5282_v63  ;;  %2628 = vmatpush.bf16.msra.mxu2 %v5281_v20  ;;  %v5258_v56 = vld [vmem:[#allocation8 + $0x10] sm:$0xf0]  ;;  %v5264_v41 = vld [vmem:[#allocation8 + $0x8] sm:$0xf]  ;;  %v5915_v44 = vld [vmem:[#allocation10 + $0xac] sm:$0xf] }
 0x8ed   :  { %v7883_v47 = vpop.f32.mrf.mxu1  ;;  %v2264_v19 = vmul.f32 %v2258_v16, %v7834_v60  ;;  %v2265_v58 = vmul.f32 %v6147_v22, %v2257_v26  ;;  %2640 = vmatpush.bf16.msra.mxu3 %v5301_v18  ;;  %v5256_v26 = vld [vmem:[#allocation8] sm:$0xf]  ;;  %v5865_v22 = vld [vmem:[#allocation8 + $0x14] sm:$0xf0]  ;;  %v5466_v45 = vld [vmem:[#allocation10 + $0xb0] sm:$0xf0] }
 0x8ee   :  { %v6149_v31 = vpop.eup %6148  ;;  %2602 = vmatpush.bf16.msra.mxu0 %v5273_v3  ;;  %v5257_v16 = vor.u32 %v5864_v49, %v5256_v26  ;;  %v5472_v46 = vld [vmem:[#allocation10 + $0xa8] sm:$0xf]  ;;  %v5917_v18 = vld [vmem:[#allocation10 + $0xb4] sm:$0xf0]  ;;  %v7918_v57 = vor.u32 %v5914_v17, %v5466_v45  ;;  %v5474_v3 = vld [vmem:[#allocation10 + $0xb8] sm:$0xf0] }
 0x8ef   :  { %v7886_v32 = vadd.f32 %v2265_v58, %v2264_v19  ;;  %v2262_v52 = vmul.f32 0.5, %v6149_v31  ;;  %2615 = vmatpush.bf16.msra.mxu1 %v5277_v48  ;;  %v5261_v19 = vor.u32 %v5862_v40, %v5258_v56  ;;  %v5265_v58 = vor.u32 %v5865_v22, %v5264_v41  ;;  %v5863_v31 = vld [vmem:[#allocation8 + $0xc] sm:$0xf]  ;;  %v5448_v39 = vld [vmem:[#allocation10 + $0x80] sm:$0xf] }
 0x8f0   :  { %v7920_v51 = vor.u32 %v5917_v18, %v5472_v46  ;;  %v7923_v25 = vor.u32 %v5915_v44, %v5474_v3  ;;  %v5912_v29 = vld [vmem:[#allocation10 + $0x8c] sm:$0xf0]  ;;  %v5910_v48 = vld [vmem:[#allocation10 + $0x84] sm:$0xf]  ;;  %v5450_v55 = vld [vmem:[#allocation10 + $0x90] sm:$0xf0]  ;;  %v2280_v41 = vadd.f32 %v7881_v23, %v9635_v6  ;;  %v2293_v22 = vadd.f32 %v7883_v47, %v9636_v54 }
 0x8f1   :  { %6150 = vtanh.f32 %v7886_v32  ;;  %v2263_v5 = vadd.f32 0.5, %v2262_v52  ;;  %2641 = vmatpush.bf16.msra.mxu3 %v5285_v38  ;;  %v5266_v52 = vld [vmem:[#allocation8 + $0x18] sm:$0xf0]  ;;  %2629 = vmatpush.bf16.msra.mxu2 %v5265_v58  ;;  %v7927_v20 = vor.u32 %v5912_v29, %v5448_v39  ;;  %v5456_v63 = vld [vmem:[#allocation10 + $0x88] sm:$0xf]  ;;  %v7930_v26 = vor.u32 %v5910_v48, %v5450_v55 }
 0x8f2   :  { %2603 = vmatpush.bf16.msra.mxu0 %v5257_v16  ;;  %v5913_v38 = vld [vmem:[#allocation10 + $0x94] sm:$0xf0]  ;;  %v5911_v40 = vld [vmem:[#allocation10 + $0x8c] sm:$0xf]  ;;  %v5458_v16 = vld [vmem:[#allocation10 + $0x98] sm:$0xf0] }
 0x8f3   :  { %v7889_v0 = vpop.f32.mrf.mxu2  ;;  %v7891_v2 = vpop.f32.mrf.mxu3  ;;  %2616 = vmatpush.bf16.msra.mxu1 %v5261_v19  ;;  %v7932_v49 = vor.u32 %v5913_v38, %v5456_v63  ;;  %v7935_v56 = vor.u32 %v5911_v40, %v5458_v16  ;;  %v5432_v19 = vld [vmem:[#allocation10 + $0x60] sm:$0xf]  ;;  %v5908_v58 = vld [vmem:[#allocation10 + $0x6c] sm:$0xf0]  ;;  %v5902_v7 = vld [vmem:[#allocation10 + $0x44] sm:$0xf] }
 0x8f4   :  { %v2281_v35 = vpop.f32.mrf.mxu0  ;;  %v5416_v28 = vld [vmem:[#allocation10 + $0x40] sm:$0xf]  ;;  %v5904_v27 = vld [vmem:[#allocation10 + $0x4c] sm:$0xf0]  ;;  %v5418_v11 = vld [vmem:[#allocation10 + $0x50] sm:$0xf0]  ;;  %v2306_v29 = vadd.f32 %v7889_v0, %v9637_v4  ;;  %v2319_v48 = vadd.f32 %v7891_v2, %v9533_v15 }
 0x8f5   :  { %v2294_v21 = vpop.f32.mrf.mxu1  ;;  %v5496_v35 = vld [vmem:[#allocation10 + $0xe0] sm:$0xf]  ;;  %v7955_v36 = vor.u32 %v5904_v27, %v5416_v28  ;;  %v7957_v34 = vor.u32 %v5902_v7, %v5418_v11  ;;  %v5424_v24 = vld [vmem:[#allocation10 + $0x48] sm:$0xf]  ;;  %v5905_v61 = vld [vmem:[#allocation10 + $0x54] sm:$0xf0] }
 0x8f6   :  { %v5269_v21 = vor.u32 %v5863_v31, %v5266_v52  ;;  %v5906_v31 = vld [vmem:[#allocation10 + $0x64] sm:$0xf]  ;;  %v7960_v8 = vor.u32 %v5905_v61, %v5424_v24  ;;  %v5903_v17 = vld [vmem:[#allocation10 + $0x4c] sm:$0xf]  ;;  %v5426_v45 = vld [vmem:[#allocation10 + $0x58] sm:$0xf0] }
 0x8f7   :  { %v6151_v59 = vpop.eup %6150  ;;  %v5400_v46 = vld [vmem:[#allocation10 + $0x20] sm:$0xf]  ;;  %v7963_v18 = vor.u32 %v5903_v17, %v5426_v45  ;;  %v5900_v44 = vld [vmem:[#allocation10 + $0x2c] sm:$0xf0]  ;;  %v5898_v3 = vld [vmem:[#allocation10 + $0x24] sm:$0xf] }
 0x8f8   :  { %v2268_v1 = vmul.f32 %v6151_v59, %v2263_v5  ;;  %v5924_v5 = vld [vmem:[#allocation10 + $0xec] sm:$0xf0]  ;;  %v5922_v59 = vld [vmem:[#allocation10 + $0xe4] sm:$0xf]  ;;  %2642 = vmatpush.bf16.msra.mxu3 %v5269_v21  ;;  %v7944_v21 = vor.u32 %v5908_v58, %v5432_v19  ;;  %v5402_v39 = vld [vmem:[#allocation10 + $0x30] sm:$0xf0] }
 0x8f9   :  { %v5408_v55 = vld [vmem:[#allocation10 + $0x28] sm:$0xf]  ;;  %v5901_v63 = vld [vmem:[#allocation10 + $0x34] sm:$0xf0]  ;;  %v5899_v38 = vld [vmem:[#allocation10 + $0x2c] sm:$0xf] }
 0x8fa   :  { %v2322_v60 = vpack.c.bf16 %v2268_v1, %v2268_v1  ;;  %v5498_v1 = vld [vmem:[#allocation10 + $0xf0] sm:$0xf0]  ;;  %v5410_v19 = vld [vmem:[#allocation10 + $0x38] sm:$0xf0]  ;;  %v5384_v58 = vld [vmem:[#allocation10] sm:$0xf]  ;;  %v7976_v2 = vor.u32 %v5901_v63, %v5408_v55 }
 0x8fb   :  { %v2307_v14 = vpop.f32.mrf.mxu2  ;;  %v2320_v12 = vpop.f32.mrf.mxu3 }
 0x8fc   :  { %2331 = vmatmul.bf16.vlgmr.msrb.gmra.mxu0 %v2322_v60  ;;  %2344 = vmatmul.bf16.vlgmr.msrb.gmra.mxu1 %v2322_v60  ;;  %v7895_v14 = vor.u32 %v5922_v59, %v5498_v1  ;;  %v5504_v12 = vld [vmem:[#allocation10 + $0xe8] sm:$0xf]  ;;  %v5909_v1 = vld [vmem:[#allocation10 + $0x74] sm:$0xf0] }
 0x8fd   :  { %2357 = vmatmul.bf16.vlgmr.msrb.gmra.mxu2 %v2322_v60  ;;  %2370 = vmatmul.bf16.vlgmr.msrb.gmra.mxu3 %v2322_v60  ;;  %v7893_v60 = vor.u32 %v5924_v5, %v5496_v35  ;;  %v7897_v62 = vor.u32 %v5925_v13, %v5504_v12  ;;  %v5434_v5 = vld [vmem:[#allocation10 + $0x70] sm:$0xf0]  ;;  %v5440_v59 = vld [vmem:[#allocation10 + $0x68] sm:$0xf]  ;;  %v5907_v12 = vld [vmem:[#allocation10 + $0x6c] sm:$0xf] }
 0x8fe   :  { %2853 = vmatpush.bf16.msrb.mxu1 %v7895_v14  ;;  %2879 = vmatpush.bf16.msrb.mxu3 %v7901_v37  ;;  %v7947_v54 = vor.u32 %v5906_v31, %v5434_v5  ;;  %v7949_v47 = vor.u32 %v5909_v1, %v5440_v59  ;;  %v5442_v13 = vld [vmem:[#allocation10 + $0x78] sm:$0xf0]  ;;  %v5386_v5 = vld [vmem:[#allocation10 + $0x10] sm:$0xf0]  ;;  %v7979_v59 = vor.u32 %v5899_v38, %v5410_v19  ;;  %v5392_v1 = vld [vmem:[#allocation10 + $0x8] sm:$0xf] }
 0x8ff   :  { %2840 = vmatpush.bf16.msrb.mxu0 %v7893_v60  ;;  %2866 = vmatpush.bf16.msrb.mxu2 %v7897_v62  ;;  %v7951_v33 = vor.u32 %v5907_v12, %v5442_v13  ;;  %v5895_v12 = vld [vmem:[#allocation10 + $0xc] sm:$0xf]  ;;  %v5394_v13 = vld [vmem:[#allocation10 + $0x18] sm:$0xf0] }
 0x900   :  { %v7991_v61 = vor.u32 %v5895_v12, %v5394_v13 }
 0x902   :  { %2854 = vmatpush.bf16.msrb.mxu1 %v7906_v43  ;;  %2880 = vmatpush.bf16.msrb.mxu3 %v7911_v53 }
 0x903   :  { %2841 = vmatpush.bf16.msrb.mxu0 %v7903_v9  ;;  %2867 = vmatpush.bf16.msrb.mxu2 %v7909_v42 }
 0x906   :  { %2855 = vmatpush.bf16.msrb.mxu1 %v7918_v57  ;;  %2881 = vmatpush.bf16.msrb.mxu3 %v7923_v25 }
 0x907   :  { %2842 = vmatpush.bf16.msrb.mxu0 %v7915_v30  ;;  %2868 = vmatpush.bf16.msrb.mxu2 %v7920_v51 }
 0x90a   :  { %2856 = vmatpush.bf16.msrb.mxu1 %v7930_v26  ;;  %2882 = vmatpush.bf16.msrb.mxu3 %v7935_v56 }
 0x90b   :  { %2843 = vmatpush.bf16.msrb.mxu0 %v7927_v20  ;;  %2869 = vmatpush.bf16.msrb.mxu2 %v7932_v49 }
 0x90e   :  { %2857 = vmatpush.bf16.msrb.mxu1 %v7947_v54  ;;  %2883 = vmatpush.bf16.msrb.mxu3 %v7951_v33 }
 0x90f   :  { %2844 = vmatpush.bf16.msrb.mxu0 %v7944_v21  ;;  %2870 = vmatpush.bf16.msrb.mxu2 %v7949_v47 }
 0x912   :  { %2858 = vmatpush.bf16.msrb.mxu1 %v7957_v34  ;;  %2884 = vmatpush.bf16.msrb.mxu3 %v7963_v18 }
 0x913   :  { %2845 = vmatpush.bf16.msrb.mxu0 %v7955_v36  ;;  %2871 = vmatpush.bf16.msrb.mxu2 %v7960_v8 }
 0x916   :  { %2885 = vmatpush.bf16.msrb.mxu3 %v7979_v59 }
 0x917   :  { %2872 = vmatpush.bf16.msrb.mxu2 %v7976_v2 }
 0x91a   :  { %2886 = vmatpush.bf16.msrb.mxu3 %v7991_v61 }
 0x979   :  { %v2332_v52 = vpop.f32.mrf.mxu0  ;;  %v2345_v35 = vpop.f32.mrf.mxu1 }
 0x97a   :  { %v2333_v6 = vadd.f32 %v2332_v52, %v2280_v41  ;;  %v2346_v23 = vadd.f32 %v2345_v35, %v2293_v22  ;;  %v7971_v41 = vor.u32 %v5900_v44, %v5400_v46  ;;  %v7973_v22 = vor.u32 %v5898_v3, %v5402_v39  ;;  %v5896_v52 = vld [vmem:[#allocation10 + $0xc] sm:$0xf0]  ;;  %v5894_v35 = vld [vmem:[#allocation10 + $0x4] sm:$0xf] }
 0x97b   :  { %v7983_v27 = vor.u32 %v5896_v52, %v5384_v58  ;;  %v7985_v7 = vor.u32 %v5894_v35, %v5386_v5 }
 0x97c   :  { %v2375_v10 = vmul.f32 0.5, %v2333_v6  ;;  %v2376_v50 = vmul.f32 0.5, %v2346_v23  ;;  %v5897_v6 = vld [vmem:[#allocation10 + $0x14] sm:$0xf0]  ;;  %2846 = vmatpush.bf16.msrb.mxu0 %v7971_v41  ;;  %2859 = vmatpush.bf16.msrb.mxu1 %v7973_v22 }
 0x97e   :  { %6152 = vtanh.f32 %v2375_v10 }
 0x97f   :  { %6154 = vtanh.f32 %v2376_v50  ;;  %v7988_v50 = vor.u32 %v5897_v6, %v5392_v1 }
 0x980   :  { %v2358_v40 = vpop.f32.mrf.mxu2  ;;  %v2371_v16 = vpop.f32.mrf.mxu3  ;;  %2847 = vmatpush.bf16.msrb.mxu0 %v7983_v27  ;;  %2860 = vmatpush.bf16.msrb.mxu1 %v7985_v7 }
 0x981   :  { %v2359_v4 = vadd.f32 %v2358_v40, %v2306_v29  ;;  %v2372_v0 = vadd.f32 %v2371_v16, %v2319_v48  ;;  %v2334_v31 = vpop.f32.mrf.mxu0  ;;  %v2347_v15 = vpop.f32.mrf.mxu1  ;;  %2873 = vmatpush.bf16.msrb.mxu2 %v7988_v50 }
 0x982   :  { %v2426_v15 = vld [vmem:[%s9237_s9] sm:$0xf] }
 0x983   :  { %6156 = vtanh.f32 %v2359_v4  ;;  %v2384_v23 = vmul.f32 0.5, %v2372_v0  ;;  %v2588_v5 = vperm.slane %v2426_v15, 0  ;;  %v2589_v1 = vperm.slane %v2426_v15, 1 }
 0x984   :  { %v6153_v28 = vpop.eup %6152 }
 0x985   :  { %v6155_v11 = vpop.eup %6154  ;;  %v2379_v10 = vmul.f32 0.5, %v6153_v28  ;;  %6158 = vtanh.f32 %v2384_v23 }
 0x986   :  { %v2380_v24 = vmul.f32 0.5, %v6155_v11 }
 0x987   :  { %v2381_v17 = vadd.f32 0.5, %v2379_v10 }
 0x988   :  { %v2382_v45 = vadd.f32 0.5, %v2380_v24  ;;  %v2360_v46 = vpop.f32.mrf.mxu2  ;;  %v2373_v44 = vpop.f32.mrf.mxu3 }
 0x989   :  { %v6157_v3 = vpop.eup %6156 }
 0x98a   :  { %v2388_v39 = vmul.f32 %v2382_v45, %v7886_v32  ;;  %v2389_v29 = vmul.f32 %v6157_v3, %v2381_v17  ;;  %v9639_v32 = vmov 0   ;;  %v2590_v17 = vperm.slane %v2426_v15, 2 }
 0x98b   :  { %v6159_v48 = vpop.eup %6158  ;;  %v2591_v45 = vperm.slane %v2426_v15, 3 }
 0x98c   :  { %v2390_v55 = vadd.f32 %v2389_v29, %v2388_v39  ;;  %v2386_v63 = vmul.f32 0.5, %v6159_v48 }
 0x98e   :  { %6160 = vtanh.f32 %v2390_v55  ;;  %v2387_v38 = vadd.f32 0.5, %v2386_v63 }
 0x994   :  { %v6161_v40 = vpop.eup %6160 }
 0x995   :  { %v2392_v16 = vmul.f32 %v6161_v40, %v2387_v38 }
 0x997   :  { %v2393_v19 = vpack.c.bf16 %v2392_v16, %v2392_v16 }
 0x999   :  { %2604 = vmatmul.bf16.vlgmr.msra.gmra.mxu0 %v2393_v19  ;;  %2617 = vmatmul.bf16.vlgmr.msra.gmra.mxu1 %v2393_v19 }
 0x99a   :  { %2630 = vmatmul.bf16.vlgmr.msra.gmra.mxu2 %v2393_v19  ;;  %2643 = vmatmul.bf16.vlgmr.msra.gmra.mxu3 %v2393_v19 }
 0x99b   :  { %2911 = vmatpush.bf16.msra.mxu0 %v7893_v60  ;;  %2924 = vmatpush.bf16.msra.mxu1 %v7895_v14 }
 0x99c   :  { %2937 = vmatpush.bf16.msra.mxu2 %v7897_v62  ;;  %2950 = vmatpush.bf16.msra.mxu3 %v7901_v37 }
 0x99f   :  { %2912 = vmatpush.bf16.msra.mxu0 %v7903_v9  ;;  %2925 = vmatpush.bf16.msra.mxu1 %v7906_v43 }
 0x9a0   :  { %2938 = vmatpush.bf16.msra.mxu2 %v7909_v42  ;;  %2951 = vmatpush.bf16.msra.mxu3 %v7911_v53 }
 0x9a3   :  { %2913 = vmatpush.bf16.msra.mxu0 %v7915_v30  ;;  %2926 = vmatpush.bf16.msra.mxu1 %v7918_v57 }
 0x9a4   :  { %2939 = vmatpush.bf16.msra.mxu2 %v7920_v51  ;;  %2952 = vmatpush.bf16.msra.mxu3 %v7923_v25 }
 0x9a7   :  { %2914 = vmatpush.bf16.msra.mxu0 %v7927_v20  ;;  %2927 = vmatpush.bf16.msra.mxu1 %v7930_v26 }
 0x9a8   :  { %2940 = vmatpush.bf16.msra.mxu2 %v7932_v49  ;;  %2953 = vmatpush.bf16.msra.mxu3 %v7935_v56 }
 0x9a9   :  { %2848 = vmatmul.bf16.vlgmr.msrb.gmra.mxu0 %v9639_v32  ;;  %2861 = vmatmul.bf16.vlgmr.msrb.gmra.mxu1 %v9639_v32 }
 0x9aa   :  { %2874 = vmatmul.bf16.vlgmr.msrb.gmra.mxu2 %v9639_v32  ;;  %2887 = vmatmul.bf16.vlgmr.msrb.gmra.mxu3 %v9639_v32 }
 0x9ab   :  { %2915 = vmatpush.bf16.msra.mxu0 %v7944_v21  ;;  %2928 = vmatpush.bf16.msra.mxu1 %v7947_v54 }
 0x9ac   :  { %2941 = vmatpush.bf16.msra.mxu2 %v7949_v47  ;;  %2954 = vmatpush.bf16.msra.mxu3 %v7951_v33 }
 0x9af   :  { %2916 = vmatpush.bf16.msra.mxu0 %v7955_v36  ;;  %2929 = vmatpush.bf16.msra.mxu1 %v7957_v34 }
 0x9b0   :  { %2942 = vmatpush.bf16.msra.mxu2 %v7960_v8  ;;  %2955 = vmatpush.bf16.msra.mxu3 %v7963_v18 }
 0x9b3   :  { %2917 = vmatpush.bf16.msra.mxu0 %v7971_v41  ;;  %2930 = vmatpush.bf16.msra.mxu1 %v7973_v22 }
 0x9b4   :  { %2943 = vmatpush.bf16.msra.mxu2 %v7976_v2  ;;  %2956 = vmatpush.bf16.msra.mxu3 %v7979_v59 }
 0x9b7   :  { %2918 = vmatpush.bf16.msra.mxu0 %v7983_v27  ;;  %2931 = vmatpush.bf16.msra.mxu1 %v7985_v7 }
 0x9b8   :  { %2944 = vmatpush.bf16.msra.mxu2 %v7988_v50  ;;  %2957 = vmatpush.bf16.msra.mxu3 %v7991_v61 }
 0x9bb   :  { %2982 = vmatpush.bf16.msrb.mxu0 %v7893_v60  ;;  %2995 = vmatpush.bf16.msrb.mxu1 %v7895_v14 }
 0x9bc   :  { %3008 = vmatpush.bf16.msrb.mxu2 %v7897_v62  ;;  %3021 = vmatpush.bf16.msrb.mxu3 %v7901_v37 }
 0x9bf   :  { %2983 = vmatpush.bf16.msrb.mxu0 %v7903_v9  ;;  %2996 = vmatpush.bf16.msrb.mxu1 %v7906_v43 }
 0x9c0   :  { %3009 = vmatpush.bf16.msrb.mxu2 %v7909_v42  ;;  %3022 = vmatpush.bf16.msrb.mxu3 %v7911_v53 }
 0x9c3   :  { %2984 = vmatpush.bf16.msrb.mxu0 %v7915_v30  ;;  %2997 = vmatpush.bf16.msrb.mxu1 %v7918_v57 }
 0x9c4   :  { %3010 = vmatpush.bf16.msrb.mxu2 %v7920_v51  ;;  %3023 = vmatpush.bf16.msrb.mxu3 %v7923_v25 }
 0x9c7   :  { %2985 = vmatpush.bf16.msrb.mxu0 %v7927_v20  ;;  %2998 = vmatpush.bf16.msrb.mxu1 %v7930_v26 }
 0x9c8   :  { %3011 = vmatpush.bf16.msrb.mxu2 %v7932_v49  ;;  %3024 = vmatpush.bf16.msrb.mxu3 %v7935_v56 }
 0x9cb   :  { %2986 = vmatpush.bf16.msrb.mxu0 %v7944_v21  ;;  %2999 = vmatpush.bf16.msrb.mxu1 %v7947_v54 }
 0x9cc   :  { %3012 = vmatpush.bf16.msrb.mxu2 %v7949_v47  ;;  %3025 = vmatpush.bf16.msrb.mxu3 %v7951_v33 }
 0x9cf   :  { %2987 = vmatpush.bf16.msrb.mxu0 %v7955_v36  ;;  %3000 = vmatpush.bf16.msrb.mxu1 %v7957_v34 }
 0x9d0   :  { %3013 = vmatpush.bf16.msrb.mxu2 %v7960_v8  ;;  %3026 = vmatpush.bf16.msrb.mxu3 %v7963_v18 }
 0x9d3   :  { %2988 = vmatpush.bf16.msrb.mxu0 %v7971_v41  ;;  %3001 = vmatpush.bf16.msrb.mxu1 %v7973_v22 }
 0x9d4   :  { %3014 = vmatpush.bf16.msrb.mxu2 %v7976_v2  ;;  %3027 = vmatpush.bf16.msrb.mxu3 %v7979_v59 }
 0x9d7   :  { %2989 = vmatpush.bf16.msrb.mxu0 %v7983_v27  ;;  %3002 = vmatpush.bf16.msrb.mxu1 %v7985_v7 }
 0x9d8   :  { %3015 = vmatpush.bf16.msrb.mxu2 %v7988_v50  ;;  %3028 = vmatpush.bf16.msrb.mxu3 %v7991_v61 }
 0xa16   :  { %v2605_v58 = vpop.f32.mrf.mxu0  ;;  %v2618_v4 = vpop.f32.mrf.mxu1 }
 0xa17   :  { %v8069_v6 = vadd.f32 %v2605_v58, %v2588_v5  ;;  %v8071_v23 = vadd.f32 %v2618_v4, %v2589_v1 }
 0xa19   :  { %9640 = vst [vmem:[#allocation55_spill] sm:$0xff] %v8069_v6 }
 0xa1a   :  { %9641 = vst [vmem:[#allocation56_spill] sm:$0xff] %v8071_v23 }
 0xa1d   :  { %v2631_v0 = vpop.f32.mrf.mxu2  ;;  %v2644_v31 = vpop.f32.mrf.mxu3 }
 0xa1e   :  { %v2607_v52 = vpop.f32.mrf.mxu0  ;;  %v2620_v35 = vpop.f32.mrf.mxu1  ;;  %v8075_v3 = vadd.f32 %v2631_v0, %v2590_v17  ;;  %v8077_v39 = vadd.f32 %v2644_v31, %v2591_v45 }
 0xa20   :  { %9642 = vst [vmem:[#allocation57_spill] sm:$0xff] %v8075_v3 }
 0xa21   :  { %9643 = vst [vmem:[#allocation58_spill] sm:$0xff] %v8077_v39 }
 0xa25   :  { %v2633_v12 = vpop.f32.mrf.mxu2  ;;  %v2646_v13 = vpop.f32.mrf.mxu3 }
 0xa26   :  { %v2849_v28 = vpop.f32.mrf.mxu0  ;;  %v2862_v11 = vpop.f32.mrf.mxu1 }
 0xa27   :  { %v2850_v10 = vadd.f32 %v2849_v28, %v8069_v6  ;;  %v2863_v24 = vadd.f32 %v2862_v11, %v8071_v23 }
 0xa29   :  { %v2892_v46 = vmul.f32 0.5, %v2850_v10  ;;  %v2893_v44 = vmul.f32 0.5, %v2863_v24 }
 0xa2b   :  { %6162 = vtanh.f32 %v2892_v46 }
 0xa2c   :  { %6164 = vtanh.f32 %v2893_v44 }
 0xa2d   :  { %v2875_v29 = vpop.f32.mrf.mxu2  ;;  %v2888_v48 = vpop.f32.mrf.mxu3 }
 0xa2e   :  { %v2876_v55 = vadd.f32 %v2875_v29, %v8075_v3  ;;  %v2889_v63 = vadd.f32 %v2888_v48, %v8077_v39  ;;  %v2851_v38 = vpop.f32.mrf.mxu0  ;;  %v2864_v40 = vpop.f32.mrf.mxu1 }
 0xa30   :  { %6166 = vtanh.f32 %v2876_v55  ;;  %v2901_v16 = vmul.f32 0.5, %v2889_v63 }
 0xa31   :  { %v6163_v19 = vpop.eup %6162 }
 0xa32   :  { %v6165_v58 = vpop.eup %6164  ;;  %v2896_v4 = vmul.f32 0.5, %v6163_v19  ;;  %6168 = vtanh.f32 %v2901_v16 }
 0xa33   :  { %v2897_v15 = vmul.f32 0.5, %v6165_v58 }
 0xa34   :  { %v2898_v0 = vadd.f32 0.5, %v2896_v4 }
 0xa35   :  { %v2899_v52 = vadd.f32 0.5, %v2897_v15  ;;  %v2877_v31 = vpop.f32.mrf.mxu2  ;;  %v2890_v35 = vpop.f32.mrf.mxu3 }
 0xa36   :  { %v6167_v5 = vpop.eup %6166 }
 0xa37   :  { %v2905_v1 = vmul.f32 0.0, %v2899_v52  ;;  %v2906_v12 = vmul.f32 %v6167_v5, %v2898_v0 }
 0xa38   :  { %v6169_v13 = vpop.eup %6168 }
 0xa39   :  { %v8081_v28 = vadd.f32 %v2906_v12, %v2905_v1  ;;  %v2903_v11 = vmul.f32 0.5, %v6169_v13 }
 0xa3b   :  { %6170 = vtanh.f32 %v8081_v28  ;;  %v2904_v10 = vadd.f32 0.5, %v2903_v11 }
 0xa41   :  { %v6171_v24 = vpop.eup %6170 }
 0xa42   :  { %v2909_v17 = vmul.f32 %v6171_v24, %v2904_v10 }
 0xa44   :  { %v8084_v45 = vpack.c.bf16 %v2909_v17, %v2909_v17 }
 0xa46   :  { %2919 = vmatmul.bf16.vlgmr.msra.gmra.mxu0 %v8084_v45  ;;  %2932 = vmatmul.bf16.vlgmr.msra.gmra.mxu1 %v8084_v45 }
 0xa47   :  { %2945 = vmatmul.bf16.vlgmr.msra.gmra.mxu2 %v8084_v45  ;;  %2958 = vmatmul.bf16.vlgmr.msra.gmra.mxu3 %v8084_v45 }
 0xa48   :  { %3053 = vmatpush.bf16.msra.mxu0 %v7893_v60  ;;  %3066 = vmatpush.bf16.msra.mxu1 %v7895_v14 }
 0xa49   :  { %3079 = vmatpush.bf16.msra.mxu2 %v7897_v62  ;;  %3092 = vmatpush.bf16.msra.mxu3 %v7901_v37 }
 0xa4c   :  { %3054 = vmatpush.bf16.msra.mxu0 %v7903_v9  ;;  %3067 = vmatpush.bf16.msra.mxu1 %v7906_v43 }
 0xa4d   :  { %3080 = vmatpush.bf16.msra.mxu2 %v7909_v42  ;;  %3093 = vmatpush.bf16.msra.mxu3 %v7911_v53 }
 0xa50   :  { %3055 = vmatpush.bf16.msra.mxu0 %v7915_v30  ;;  %3068 = vmatpush.bf16.msra.mxu1 %v7918_v57 }
 0xa51   :  { %3081 = vmatpush.bf16.msra.mxu2 %v7920_v51  ;;  %3094 = vmatpush.bf16.msra.mxu3 %v7923_v25 }
 0xa54   :  { %3056 = vmatpush.bf16.msra.mxu0 %v7927_v20  ;;  %3069 = vmatpush.bf16.msra.mxu1 %v7930_v26 }
 0xa55   :  { %3082 = vmatpush.bf16.msra.mxu2 %v7932_v49  ;;  %3095 = vmatpush.bf16.msra.mxu3 %v7935_v56 }
 0xa58   :  { %3057 = vmatpush.bf16.msra.mxu0 %v7944_v21  ;;  %3070 = vmatpush.bf16.msra.mxu1 %v7947_v54 }
 0xa59   :  { %3083 = vmatpush.bf16.msra.mxu2 %v7949_v47  ;;  %3096 = vmatpush.bf16.msra.mxu3 %v7951_v33 }
 0xa5c   :  { %3058 = vmatpush.bf16.msra.mxu0 %v7955_v36  ;;  %3071 = vmatpush.bf16.msra.mxu1 %v7957_v34 }
 0xa5d   :  { %3084 = vmatpush.bf16.msra.mxu2 %v7960_v8  ;;  %3097 = vmatpush.bf16.msra.mxu3 %v7963_v18 }
 0xa60   :  { %3059 = vmatpush.bf16.msra.mxu0 %v7971_v41  ;;  %3072 = vmatpush.bf16.msra.mxu1 %v7973_v22 }
 0xa61   :  { %3085 = vmatpush.bf16.msra.mxu2 %v7976_v2  ;;  %3098 = vmatpush.bf16.msra.mxu3 %v7979_v59 }
 0xa64   :  { %3060 = vmatpush.bf16.msra.mxu0 %v7983_v27  ;;  %3073 = vmatpush.bf16.msra.mxu1 %v7985_v7 }
 0xa65   :  { %3086 = vmatpush.bf16.msra.mxu2 %v7988_v50  ;;  %3099 = vmatpush.bf16.msra.mxu3 %v7991_v61 }
 0xac3   :  { %v2920_v46 = vpop.f32.mrf.mxu0  ;;  %v2933_v44 = vpop.f32.mrf.mxu1 }
 0xac4   :  { %v2921_v29 = vadd.f32 %v2920_v46, %v8069_v6  ;;  %v2934_v48 = vadd.f32 %v2933_v44, %v8071_v23 }
 0xac6   :  { %v2963_v55 = vmul.f32 0.5, %v2921_v29  ;;  %v2964_v63 = vmul.f32 0.5, %v2934_v48 }
 0xac8   :  { %6172 = vtanh.f32 %v2963_v55 }
 0xac9   :  { %6174 = vtanh.f32 %v2964_v63 }
 0xaca   :  { %v2946_v38 = vpop.f32.mrf.mxu2  ;;  %v2959_v40 = vpop.f32.mrf.mxu3 }
 0xacb   :  { %v2947_v16 = vadd.f32 %v2946_v38, %v8075_v3  ;;  %v2960_v19 = vadd.f32 %v2959_v40, %v8077_v39  ;;  %v2922_v58 = vpop.f32.mrf.mxu0  ;;  %v2935_v4 = vpop.f32.mrf.mxu1 }
 0xacd   :  { %6176 = vtanh.f32 %v2947_v16  ;;  %v2972_v15 = vmul.f32 0.5, %v2960_v19 }
 0xace   :  { %v6173_v0 = vpop.eup %6172 }
 0xacf   :  { %v6175_v52 = vpop.eup %6174  ;;  %v2967_v31 = vmul.f32 0.5, %v6173_v0  ;;  %6178 = vtanh.f32 %v2972_v15 }
 0xad0   :  { %v2968_v35 = vmul.f32 0.5, %v6175_v52 }
 0xad1   :  { %v2969_v5 = vadd.f32 0.5, %v2967_v31 }
 0xad2   :  { %v2970_v1 = vadd.f32 0.5, %v2968_v35  ;;  %v2948_v12 = vpop.f32.mrf.mxu2  ;;  %v2961_v13 = vpop.f32.mrf.mxu3 }
 0xad3   :  { %v6177_v11 = vpop.eup %6176 }
 0xad4   :  { %v2976_v10 = vmul.f32 %v2970_v1, %v8081_v28  ;;  %v2977_v24 = vmul.f32 %v6177_v11, %v2969_v5 }
 0xad5   :  { %v6179_v17 = vpop.eup %6178 }
 0xad6   :  { %v8127_v46 = vadd.f32 %v2977_v24, %v2976_v10  ;;  %v2974_v44 = vmul.f32 0.5, %v6179_v17 }
 0xad8   :  { %6180 = vtanh.f32 %v8127_v46  ;;  %v2975_v29 = vadd.f32 0.5, %v2974_v44 }
 0xade   :  { %v6181_v48 = vpop.eup %6180 }
 0xadf   :  { %v2980_v55 = vmul.f32 %v6181_v48, %v2975_v29 }
 0xae1   :  { %v8130_v63 = vpack.c.bf16 %v2980_v55, %v2980_v55 }
 0xae3   :  { %2990 = vmatmul.bf16.vlgmr.msrb.gmra.mxu0 %v8130_v63  ;;  %3003 = vmatmul.bf16.vlgmr.msrb.gmra.mxu1 %v8130_v63 }
 0xae4   :  { %3016 = vmatmul.bf16.vlgmr.msrb.gmra.mxu2 %v8130_v63  ;;  %3029 = vmatmul.bf16.vlgmr.msrb.gmra.mxu3 %v8130_v63 }
 0xae5   :  { %3124 = vmatpush.bf16.msrb.mxu0 %v7893_v60  ;;  %3137 = vmatpush.bf16.msrb.mxu1 %v7895_v14 }
 0xae6   :  { %3150 = vmatpush.bf16.msrb.mxu2 %v7897_v62  ;;  %3163 = vmatpush.bf16.msrb.mxu3 %v7901_v37 }
 0xae9   :  { %3125 = vmatpush.bf16.msrb.mxu0 %v7903_v9  ;;  %3138 = vmatpush.bf16.msrb.mxu1 %v7906_v43 }
 0xaea   :  { %3151 = vmatpush.bf16.msrb.mxu2 %v7909_v42  ;;  %3164 = vmatpush.bf16.msrb.mxu3 %v7911_v53 }
 0xaed   :  { %3126 = vmatpush.bf16.msrb.mxu0 %v7915_v30  ;;  %3139 = vmatpush.bf16.msrb.mxu1 %v7918_v57 }
 0xaee   :  { %3152 = vmatpush.bf16.msrb.mxu2 %v7920_v51  ;;  %3165 = vmatpush.bf16.msrb.mxu3 %v7923_v25 }
 0xaf1   :  { %3127 = vmatpush.bf16.msrb.mxu0 %v7927_v20  ;;  %3140 = vmatpush.bf16.msrb.mxu1 %v7930_v26 }
 0xaf2   :  { %3153 = vmatpush.bf16.msrb.mxu2 %v7932_v49  ;;  %3166 = vmatpush.bf16.msrb.mxu3 %v7935_v56 }
 0xaf5   :  { %3128 = vmatpush.bf16.msrb.mxu0 %v7944_v21  ;;  %3141 = vmatpush.bf16.msrb.mxu1 %v7947_v54 }
 0xaf6   :  { %3154 = vmatpush.bf16.msrb.mxu2 %v7949_v47  ;;  %3167 = vmatpush.bf16.msrb.mxu3 %v7951_v33 }
 0xaf9   :  { %3129 = vmatpush.bf16.msrb.mxu0 %v7955_v36  ;;  %3142 = vmatpush.bf16.msrb.mxu1 %v7957_v34 }
 0xafa   :  { %3155 = vmatpush.bf16.msrb.mxu2 %v7960_v8  ;;  %3168 = vmatpush.bf16.msrb.mxu3 %v7963_v18 }
 0xafd   :  { %3130 = vmatpush.bf16.msrb.mxu0 %v7971_v41  ;;  %3143 = vmatpush.bf16.msrb.mxu1 %v7973_v22 }
 0xafe   :  { %3156 = vmatpush.bf16.msrb.mxu2 %v7976_v2  ;;  %3169 = vmatpush.bf16.msrb.mxu3 %v7979_v59 }
 0xb01   :  { %3131 = vmatpush.bf16.msrb.mxu0 %v7983_v27  ;;  %3144 = vmatpush.bf16.msrb.mxu1 %v7985_v7 }
 0xb02   :  { %3157 = vmatpush.bf16.msrb.mxu2 %v7988_v50  ;;  %3170 = vmatpush.bf16.msrb.mxu3 %v7991_v61 }
 0xb60   :  { %v2991_v28 = vpop.f32.mrf.mxu0  ;;  %v3004_v38 = vpop.f32.mrf.mxu1 }
 0xb61   :  { %v2992_v40 = vadd.f32 %v2991_v28, %v8069_v6  ;;  %v3005_v16 = vadd.f32 %v3004_v38, %v8071_v23 }
 0xb63   :  { %v3034_v19 = vmul.f32 0.5, %v2992_v40  ;;  %v3035_v58 = vmul.f32 0.5, %v3005_v16 }
 0xb65   :  { %6182 = vtanh.f32 %v3034_v19 }
 0xb66   :  { %6184 = vtanh.f32 %v3035_v58 }
 0xb67   :  { %v3017_v4 = vpop.f32.mrf.mxu2  ;;  %v3030_v15 = vpop.f32.mrf.mxu3 }
 0xb68   :  { %v3018_v0 = vadd.f32 %v3017_v4, %v8075_v3  ;;  %v3031_v52 = vadd.f32 %v3030_v15, %v8077_v39  ;;  %v2993_v31 = vpop.f32.mrf.mxu0  ;;  %v3006_v35 = vpop.f32.mrf.mxu1 }
 0xb6a   :  { %6186 = vtanh.f32 %v3018_v0  ;;  %v3043_v5 = vmul.f32 0.5, %v3031_v52 }
 0xb6b   :  { %v6183_v1 = vpop.eup %6182 }
 0xb6c   :  { %v6185_v12 = vpop.eup %6184  ;;  %v3038_v13 = vmul.f32 0.5, %v6183_v1  ;;  %6188 = vtanh.f32 %v3043_v5 }
 0xb6d   :  { %v3039_v11 = vmul.f32 0.5, %v6185_v12 }
 0xb6e   :  { %v3040_v10 = vadd.f32 0.5, %v3038_v13 }
 0xb6f   :  { %v3041_v24 = vadd.f32 0.5, %v3039_v11  ;;  %v3019_v17 = vpop.f32.mrf.mxu2  ;;  %v3032_v44 = vpop.f32.mrf.mxu3 }
 0xb70   :  { %v6187_v29 = vpop.eup %6186 }
 0xb71   :  { %v3047_v48 = vmul.f32 %v3041_v24, %v8127_v46  ;;  %v3048_v55 = vmul.f32 %v6187_v29, %v3040_v10 }
 0xb72   :  { %v6189_v28 = vpop.eup %6188 }
 0xb73   :  { %v8173_v38 = vadd.f32 %v3048_v55, %v3047_v48  ;;  %v3045_v40 = vmul.f32 0.5, %v6189_v28 }
 0xb75   :  { %6190 = vtanh.f32 %v8173_v38  ;;  %v3046_v16 = vadd.f32 0.5, %v3045_v40 }
 0xb7b   :  { %v6191_v19 = vpop.eup %6190 }
 0xb7c   :  { %v3051_v58 = vmul.f32 %v6191_v19, %v3046_v16 }
 0xb7e   :  { %v8176_v4 = vpack.c.bf16 %v3051_v58, %v3051_v58 }
 0xb80   :  { %9644 = vst [vmem:[#allocation59_spill] sm:$0xff] %v8176_v4  ;;  %3061 = vmatmul.bf16.vlgmr.msra.gmra.mxu0 %v8176_v4  ;;  %3074 = vmatmul.bf16.vlgmr.msra.gmra.mxu1 %v8176_v4 }
 0xb81   :  { %3087 = vmatmul.bf16.vlgmr.msra.gmra.mxu2 %v8176_v4  ;;  %3100 = vmatmul.bf16.vlgmr.msra.gmra.mxu3 %v8176_v4  ;;  %v5730_v4 = vld [vmem:[#allocation13 + $0xb8] sm:$0xf0] }
 0xb82   :  { %3195 = vmatpush.bf16.msra.mxu0 %v7893_v60  ;;  %3208 = vmatpush.bf16.msra.mxu1 %v7895_v14 }
 0xb83   :  { %3221 = vmatpush.bf16.msra.mxu2 %v7897_v62  ;;  %3234 = vmatpush.bf16.msra.mxu3 %v7901_v37 }
 0xb86   :  { %3196 = vmatpush.bf16.msra.mxu0 %v7903_v9  ;;  %3209 = vmatpush.bf16.msra.mxu1 %v7906_v43 }
 0xb87   :  { %3222 = vmatpush.bf16.msra.mxu2 %v7909_v42  ;;  %3235 = vmatpush.bf16.msra.mxu3 %v7911_v53 }
 0xb8a   :  { %3197 = vmatpush.bf16.msra.mxu0 %v7915_v30  ;;  %3210 = vmatpush.bf16.msra.mxu1 %v7918_v57 }
 0xb8b   :  { %3223 = vmatpush.bf16.msra.mxu2 %v7920_v51  ;;  %3236 = vmatpush.bf16.msra.mxu3 %v7923_v25 }
 0xb8e   :  { %3198 = vmatpush.bf16.msra.mxu0 %v7927_v20  ;;  %3211 = vmatpush.bf16.msra.mxu1 %v7930_v26 }
 0xb8f   :  { %3224 = vmatpush.bf16.msra.mxu2 %v7932_v49  ;;  %3237 = vmatpush.bf16.msra.mxu3 %v7935_v56 }
 0xb92   :  { %3199 = vmatpush.bf16.msra.mxu0 %v7944_v21  ;;  %3212 = vmatpush.bf16.msra.mxu1 %v7947_v54 }
 0xb93   :  { %3225 = vmatpush.bf16.msra.mxu2 %v7949_v47  ;;  %3238 = vmatpush.bf16.msra.mxu3 %v7951_v33 }
 0xb96   :  { %3200 = vmatpush.bf16.msra.mxu0 %v7955_v36  ;;  %3213 = vmatpush.bf16.msra.mxu1 %v7957_v34 }
 0xb97   :  { %3226 = vmatpush.bf16.msra.mxu2 %v7960_v8  ;;  %3239 = vmatpush.bf16.msra.mxu3 %v7963_v18 }
 0xb9a   :  { %3201 = vmatpush.bf16.msra.mxu0 %v7971_v41  ;;  %3214 = vmatpush.bf16.msra.mxu1 %v7973_v22 }
 0xb9b   :  { %3227 = vmatpush.bf16.msra.mxu2 %v7976_v2  ;;  %3240 = vmatpush.bf16.msra.mxu3 %v7979_v59 }
 0xb9e   :  { %3202 = vmatpush.bf16.msra.mxu0 %v7983_v27  ;;  %3215 = vmatpush.bf16.msra.mxu1 %v7985_v7 }
 0xb9f   :  { %3228 = vmatpush.bf16.msra.mxu2 %v7988_v50  ;;  %3241 = vmatpush.bf16.msra.mxu3 %v7991_v61 }
 0xbfd   :  { %v3062_v46 = vpop.f32.mrf.mxu0  ;;  %v3075_v15 = vpop.f32.mrf.mxu1 }
 0xbfe   :  { %v3063_v0 = vadd.f32 %v3062_v46, %v8069_v6  ;;  %v3076_v52 = vadd.f32 %v3075_v15, %v8071_v23 }
 0xc00   :  { %v3105_v31 = vmul.f32 0.5, %v3063_v0  ;;  %v3106_v35 = vmul.f32 0.5, %v3076_v52 }
 0xc02   :  { %6192 = vtanh.f32 %v3105_v31 }
 0xc03   :  { %6194 = vtanh.f32 %v3106_v35 }
 0xc04   :  { %v3088_v5 = vpop.f32.mrf.mxu2  ;;  %v3101_v1 = vpop.f32.mrf.mxu3 }
 0xc05   :  { %v3089_v12 = vadd.f32 %v3088_v5, %v8075_v3  ;;  %v3102_v13 = vadd.f32 %v3101_v1, %v8077_v39  ;;  %v3064_v11 = vpop.f32.mrf.mxu0  ;;  %v3077_v10 = vpop.f32.mrf.mxu1 }
 0xc07   :  { %6196 = vtanh.f32 %v3089_v12  ;;  %v3114_v24 = vmul.f32 0.5, %v3102_v13 }
 0xc08   :  { %v6193_v17 = vpop.eup %6192 }
 0xc09   :  { %v6195_v44 = vpop.eup %6194  ;;  %v3109_v29 = vmul.f32 0.5, %v6193_v17  ;;  %6198 = vtanh.f32 %v3114_v24 }
 0xc0a   :  { %v3110_v48 = vmul.f32 0.5, %v6195_v44 }
 0xc0b   :  { %v3111_v55 = vadd.f32 0.5, %v3109_v29 }
 0xc0c   :  { %v3112_v28 = vadd.f32 0.5, %v3110_v48  ;;  %v3090_v40 = vpop.f32.mrf.mxu2  ;;  %v3103_v16 = vpop.f32.mrf.mxu3 }
 0xc0d   :  { %v6197_v19 = vpop.eup %6196 }
 0xc0e   :  { %v3118_v58 = vmul.f32 %v3112_v28, %v8173_v38  ;;  %v3119_v46 = vmul.f32 %v6197_v19, %v3111_v55 }
 0xc0f   :  { %v6199_v15 = vpop.eup %6198 }
 0xc10   :  { %v8219_v0 = vadd.f32 %v3119_v46, %v3118_v58  ;;  %v3116_v52 = vmul.f32 0.5, %v6199_v15 }
 0xc12   :  { %6200 = vtanh.f32 %v8219_v0  ;;  %v3117_v31 = vadd.f32 0.5, %v3116_v52 }
 0xc18   :  { %v6201_v35 = vpop.eup %6200 }
 0xc19   :  { %v3122_v5 = vmul.f32 %v6201_v35, %v3117_v31 }
 0xc1b   :  { %v8222_v1 = vpack.c.bf16 %v3122_v5, %v3122_v5 }
 0xc1d   :  { %9645 = vst [vmem:[#allocation60_spill] sm:$0xff] %v8222_v1  ;;  %3132 = vmatmul.bf16.vlgmr.msrb.gmra.mxu0 %v8222_v1  ;;  %3145 = vmatmul.bf16.vlgmr.msrb.gmra.mxu1 %v8222_v1 }
 0xc1e   :  { %3158 = vmatmul.bf16.vlgmr.msrb.gmra.mxu2 %v8222_v1  ;;  %3171 = vmatmul.bf16.vlgmr.msrb.gmra.mxu3 %v8222_v1  ;;  %v5979_v1 = vld [vmem:[#allocation13 + $0xac] sm:$0xf] }
 0xc1f   :  { %3266 = vmatpush.bf16.msrb.mxu0 %v7893_v60  ;;  %3279 = vmatpush.bf16.msrb.mxu1 %v7895_v14 }
 0xc20   :  { %3292 = vmatpush.bf16.msrb.mxu2 %v7897_v62  ;;  %3305 = vmatpush.bf16.msrb.mxu3 %v7901_v37 }
 0xc23   :  { %3267 = vmatpush.bf16.msrb.mxu0 %v7903_v9  ;;  %3280 = vmatpush.bf16.msrb.mxu1 %v7906_v43 }
 0xc24   :  { %3293 = vmatpush.bf16.msrb.mxu2 %v7909_v42  ;;  %3306 = vmatpush.bf16.msrb.mxu3 %v7911_v53 }
 0xc27   :  { %3268 = vmatpush.bf16.msrb.mxu0 %v7915_v30  ;;  %3281 = vmatpush.bf16.msrb.mxu1 %v7918_v57 }
 0xc28   :  { %3294 = vmatpush.bf16.msrb.mxu2 %v7920_v51  ;;  %3307 = vmatpush.bf16.msrb.mxu3 %v7923_v25 }
 0xc2b   :  { %3269 = vmatpush.bf16.msrb.mxu0 %v7927_v20  ;;  %3282 = vmatpush.bf16.msrb.mxu1 %v7930_v26 }
 0xc2c   :  { %3295 = vmatpush.bf16.msrb.mxu2 %v7932_v49  ;;  %3308 = vmatpush.bf16.msrb.mxu3 %v7935_v56 }
 0xc2f   :  { %3270 = vmatpush.bf16.msrb.mxu0 %v7944_v21  ;;  %3283 = vmatpush.bf16.msrb.mxu1 %v7947_v54 }
 0xc30   :  { %3296 = vmatpush.bf16.msrb.mxu2 %v7949_v47  ;;  %3309 = vmatpush.bf16.msrb.mxu3 %v7951_v33 }
 0xc33   :  { %3271 = vmatpush.bf16.msrb.mxu0 %v7955_v36  ;;  %3284 = vmatpush.bf16.msrb.mxu1 %v7957_v34 }
 0xc34   :  { %3297 = vmatpush.bf16.msrb.mxu2 %v7960_v8  ;;  %3310 = vmatpush.bf16.msrb.mxu3 %v7963_v18 }
 0xc37   :  { %3272 = vmatpush.bf16.msrb.mxu0 %v7971_v41  ;;  %3285 = vmatpush.bf16.msrb.mxu1 %v7973_v22 }
 0xc38   :  { %3298 = vmatpush.bf16.msrb.mxu2 %v7976_v2  ;;  %3311 = vmatpush.bf16.msrb.mxu3 %v7979_v59 }
 0xc3b   :  { %3273 = vmatpush.bf16.msrb.mxu0 %v7983_v27  ;;  %3286 = vmatpush.bf16.msrb.mxu1 %v7985_v7 }
 0xc3c   :  { %3299 = vmatpush.bf16.msrb.mxu2 %v7988_v50  ;;  %3312 = vmatpush.bf16.msrb.mxu3 %v7991_v61 }
 0xc9a   :  { %v3133_v38 = vpop.f32.mrf.mxu0  ;;  %v3146_v12 = vpop.f32.mrf.mxu1 }
 0xc9b   :  { %v3134_v13 = vadd.f32 %v3133_v38, %v8069_v6  ;;  %v3147_v11 = vadd.f32 %v3146_v12, %v8071_v23 }
 0xc9d   :  { %v3176_v10 = vmul.f32 0.5, %v3134_v13  ;;  %v3177_v24 = vmul.f32 0.5, %v3147_v11 }
 0xc9f   :  { %6202 = vtanh.f32 %v3176_v10 }
 0xca0   :  { %6204 = vtanh.f32 %v3177_v24 }
 0xca1   :  { %v3159_v17 = vpop.f32.mrf.mxu2  ;;  %v3172_v44 = vpop.f32.mrf.mxu3 }
 0xca2   :  { %v3160_v29 = vadd.f32 %v3159_v17, %v8075_v3  ;;  %v3173_v48 = vadd.f32 %v3172_v44, %v8077_v39  ;;  %v3135_v55 = vpop.f32.mrf.mxu0  ;;  %v3148_v28 = vpop.f32.mrf.mxu1 }
 0xca3   :  { %v5626_v28 = vld [vmem:[#allocation11 + $0xf0] sm:$0xf0] }
 0xca4   :  { %6206 = vtanh.f32 %v3160_v29  ;;  %v3185_v40 = vmul.f32 0.5, %v3173_v48  ;;  %v5954_v48 = vld [vmem:[#allocation11 + $0xe4] sm:$0xf] }
 0xca5   :  { %v6203_v16 = vpop.eup %6202 }
 0xca6   :  { %v6205_v19 = vpop.eup %6204  ;;  %v3180_v58 = vmul.f32 0.5, %v6203_v16  ;;  %6208 = vtanh.f32 %v3185_v40  ;;  %v5632_v40 = vld [vmem:[#allocation11 + $0xe8] sm:$0xf]  ;;  %v5957_v16 = vld [vmem:[#allocation11 + $0xf4] sm:$0xf0] }
 0xca7   :  { %v3181_v46 = vmul.f32 0.5, %v6205_v19  ;;  %v8322_v19 = vor.u32 %v5954_v48, %v5626_v28  ;;  %v5941_v48 = vld [vmem:[#allocation11 + $0x74] sm:$0xf0] }
 0xca8   :  { %v3182_v15 = vadd.f32 0.5, %v3180_v58  ;;  %v8324_v58 = vor.u32 %v5957_v16, %v5632_v40  ;;  %v5939_v16 = vld [vmem:[#allocation11 + $0x6c] sm:$0xf] }
 0xca9   :  { %v3183_v52 = vadd.f32 0.5, %v3181_v46  ;;  %v3161_v31 = vpop.f32.mrf.mxu2  ;;  %v3174_v35 = vpop.f32.mrf.mxu3  ;;  %v5955_v46 = vld [vmem:[#allocation11 + $0xec] sm:$0xf] }
 0xcaa   :  { %v6207_v5 = vpop.eup %6206  ;;  %v5608_v31 = vld [vmem:[#allocation11 + $0xc0] sm:$0xf]  ;;  %v5952_v35 = vld [vmem:[#allocation11 + $0xcc] sm:$0xf0] }
 0xcab   :  { %v3189_v38 = vmul.f32 %v3183_v52, %v8219_v0  ;;  %v3190_v12 = vmul.f32 %v6207_v5, %v3182_v15  ;;  %v5956_v0 = vld [vmem:[#allocation11 + $0xec] sm:$0xf0]  ;;  %v5634_v15 = vld [vmem:[#allocation11 + $0xf8] sm:$0xf0]  ;;  %v5950_v5 = vld [vmem:[#allocation11 + $0xc4] sm:$0xf] }
 0xcac   :  { %v6209_v13 = vpop.eup %6208  ;;  %v8327_v52 = vor.u32 %v5955_v46, %v5634_v15  ;;  %v5570_v46 = vld [vmem:[#allocation11 + $0x78] sm:$0xf0] }
 0xcad   :  { %v8265_v11 = vadd.f32 %v3190_v12, %v3189_v38  ;;  %v3187_v10 = vmul.f32 0.5, %v6209_v13  ;;  %v8332_v38 = vor.u32 %v5952_v35, %v5608_v31  ;;  %v5610_v12 = vld [vmem:[#allocation11 + $0xd0] sm:$0xf0]  ;;  %v5616_v13 = vld [vmem:[#allocation11 + $0xc8] sm:$0xf]  ;;  %v8375_v15 = vor.u32 %v5939_v16, %v5570_v46 }
 0xcae   :  { %v5544_v31 = vld [vmem:[#allocation11 + $0x40] sm:$0xf]  ;;  %v5936_v35 = vld [vmem:[#allocation11 + $0x4c] sm:$0xf0]  ;;  %v5929_v16 = vld [vmem:[#allocation11 + $0x14] sm:$0xf0] }
 0xcaf   :  { %6210 = vtanh.f32 %v8265_v11  ;;  %v3188_v24 = vadd.f32 0.5, %v3187_v10  ;;  %v8334_v10 = vor.u32 %v5950_v5, %v5610_v12  ;;  %9658 = vst [vmem:[#allocation49_spill] sm:$0xff] %v8375_v15  ;;  %v5934_v5 = vld [vmem:[#allocation11 + $0x44] sm:$0xf]  ;;  %v8380_v12 = vor.u32 %v5936_v35, %v5544_v31  ;;  %v5927_v35 = vld [vmem:[#allocation11 + $0xc] sm:$0xf] }
 0xcb1   :  { %9659 = vst [vmem:[#allocation26_spill] sm:$0xff] %v8380_v12 }
 0xcb5   :  { %v6211_v17 = vpop.eup %6210 }
 0xcb6   :  { %v3193_v44 = vmul.f32 %v6211_v17, %v3188_v24  ;;  %v5951_v17 = vld [vmem:[#allocation11 + $0xcc] sm:$0xf] }
 0xcb8   :  { %v8268_v29 = vpack.c.bf16 %v3193_v44, %v3193_v44  ;;  %v5618_v44 = vld [vmem:[#allocation11 + $0xd8] sm:$0xf0] }
 0xcba   :  { %9646 = vst [vmem:[#allocation61_spill] sm:$0xff] %v8268_v29  ;;  %3203 = vmatmul.bf16.vlgmr.msra.gmra.mxu0 %v8268_v29  ;;  %3216 = vmatmul.bf16.vlgmr.msra.gmra.mxu1 %v8268_v29 }
 0xcbb   :  { %3229 = vmatmul.bf16.vlgmr.msra.gmra.mxu2 %v8268_v29  ;;  %3242 = vmatmul.bf16.vlgmr.msra.gmra.mxu3 %v8268_v29  ;;  %v5981_v29 = vld [vmem:[#allocation13 + $0xb4] sm:$0xf0] }
 0xcbc   :  { %3337 = vmatpush.bf16.msra.mxu0 %v7893_v60  ;;  %3350 = vmatpush.bf16.msra.mxu1 %v7895_v14 }
 0xcbd   :  { %3363 = vmatpush.bf16.msra.mxu2 %v7897_v62  ;;  %3376 = vmatpush.bf16.msra.mxu3 %v7901_v37 }
 0xcc0   :  { %3338 = vmatpush.bf16.msra.mxu0 %v7903_v9  ;;  %3351 = vmatpush.bf16.msra.mxu1 %v7906_v43 }
 0xcc1   :  { %3364 = vmatpush.bf16.msra.mxu2 %v7909_v42  ;;  %3377 = vmatpush.bf16.msra.mxu3 %v7911_v53 }
 0xcc4   :  { %3339 = vmatpush.bf16.msra.mxu0 %v7915_v30  ;;  %3352 = vmatpush.bf16.msra.mxu1 %v7918_v57 }
 0xcc5   :  { %3365 = vmatpush.bf16.msra.mxu2 %v7920_v51  ;;  %3378 = vmatpush.bf16.msra.mxu3 %v7923_v25 }
 0xcc8   :  { %3340 = vmatpush.bf16.msra.mxu0 %v7927_v20  ;;  %3353 = vmatpush.bf16.msra.mxu1 %v7930_v26 }
 0xcc9   :  { %3366 = vmatpush.bf16.msra.mxu2 %v7932_v49  ;;  %3379 = vmatpush.bf16.msra.mxu3 %v7935_v56 }
 0xccc   :  { %3341 = vmatpush.bf16.msra.mxu0 %v7944_v21  ;;  %3354 = vmatpush.bf16.msra.mxu1 %v7947_v54 }
 0xccd   :  { %3367 = vmatpush.bf16.msra.mxu2 %v7949_v47  ;;  %3380 = vmatpush.bf16.msra.mxu3 %v7951_v33 }
 0xcd0   :  { %3342 = vmatpush.bf16.msra.mxu0 %v7955_v36  ;;  %3355 = vmatpush.bf16.msra.mxu1 %v7957_v34 }
 0xcd1   :  { %3368 = vmatpush.bf16.msra.mxu2 %v7960_v8  ;;  %3381 = vmatpush.bf16.msra.mxu3 %v7963_v18 }
 0xcd4   :  { %3343 = vmatpush.bf16.msra.mxu0 %v7971_v41  ;;  %3356 = vmatpush.bf16.msra.mxu1 %v7973_v22 }
 0xcd5   :  { %3369 = vmatpush.bf16.msra.mxu2 %v7976_v2  ;;  %3382 = vmatpush.bf16.msra.mxu3 %v7979_v59 }
 0xcd8   :  { %3344 = vmatpush.bf16.msra.mxu0 %v7983_v27  ;;  %3357 = vmatpush.bf16.msra.mxu1 %v7985_v7 }
 0xcd9   :  { %3370 = vmatpush.bf16.msra.mxu2 %v7988_v50  ;;  %3383 = vmatpush.bf16.msra.mxu3 %v7991_v61  ;;  %v5624_v61 = vld [vmem:[#allocation11 + $0xe0] sm:$0xf] }
 0xcda   :  { %v8320_v55 = vor.u32 %v5956_v0, %v5624_v61  ;;  %v5562_v61 = vld [vmem:[#allocation11 + $0x70] sm:$0xf0]  ;;  %v5568_v0 = vld [vmem:[#allocation11 + $0x68] sm:$0xf] }
 0xcdb   :  { %v8372_v40 = vor.u32 %v5941_v48, %v5568_v0  ;;  %v5514_v0 = vld [vmem:[#allocation11 + $0x10] sm:$0xf0]  ;;  %v5520_v48 = vld [vmem:[#allocation11 + $0x8] sm:$0xf] }
 0xcdc   :  { %v8408_v31 = vor.u32 %v5929_v16, %v5520_v48 }
 0xcdd   :  { %9657 = vst [vmem:[#allocation25_spill] sm:$0xff] %v8372_v40 }
 0xcde   :  { %9669 = vst [vmem:[#allocation36_spill] sm:$0xff] %v8408_v31 }
 0xd37   :  { %v3204_v60 = vpop.f32.mrf.mxu0  ;;  %v3217_v14 = vpop.f32.mrf.mxu1 }
 0xd38   :  { %v3205_v62 = vadd.f32 %v3204_v60, %v8069_v6  ;;  %v3218_v37 = vadd.f32 %v3217_v14, %v8071_v23  ;;  %v8339_v60 = vor.u32 %v5951_v17, %v5618_v44  ;;  %v5592_v14 = vld [vmem:[#allocation11 + $0xa0] sm:$0xf]  ;;  %v5937_v17 = vld [vmem:[#allocation11 + $0x54] sm:$0xf0] }
 0xd3a   :  { %v3247_v9 = vmul.f32 0.5, %v3205_v62  ;;  %v3248_v43 = vmul.f32 0.5, %v3218_v37  ;;  %v5948_v62 = vld [vmem:[#allocation11 + $0xac] sm:$0xf0]  ;;  %v5946_v37 = vld [vmem:[#allocation11 + $0xa4] sm:$0xf] }
 0xd3c   :  { %6212 = vtanh.f32 %v3247_v9  ;;  %v8344_v9 = vor.u32 %v5948_v62, %v5592_v14  ;;  %v5935_v62 = vld [vmem:[#allocation11 + $0x4c] sm:$0xf] }
 0xd3d   :  { %6214 = vtanh.f32 %v3248_v43  ;;  %v5594_v43 = vld [vmem:[#allocation11 + $0xb0] sm:$0xf0] }
 0xd3e   :  { %v3230_v42 = vpop.f32.mrf.mxu2  ;;  %v3243_v53 = vpop.f32.mrf.mxu3 }
 0xd3f   :  { %v3231_v30 = vadd.f32 %v3230_v42, %v8075_v3  ;;  %v3244_v57 = vadd.f32 %v3243_v53, %v8077_v39  ;;  %v3206_v51 = vpop.f32.mrf.mxu0  ;;  %v3219_v25 = vpop.f32.mrf.mxu1  ;;  %v5600_v42 = vld [vmem:[#allocation11 + $0xa8] sm:$0xf]  ;;  %v5949_v53 = vld [vmem:[#allocation11 + $0xb4] sm:$0xf0] }
 0xd40   :  { %v5947_v51 = vld [vmem:[#allocation11 + $0xac] sm:$0xf]  ;;  %v5602_v25 = vld [vmem:[#allocation11 + $0xb8] sm:$0xf0] }
 0xd41   :  { %6216 = vtanh.f32 %v3231_v30  ;;  %v3256_v20 = vmul.f32 0.5, %v3244_v57  ;;  %v8346_v30 = vor.u32 %v5946_v37, %v5594_v43  ;;  %v8348_v57 = vor.u32 %v5949_v53, %v5600_v42  ;;  %v5554_v37 = vld [vmem:[#allocation11 + $0x58] sm:$0xf0]  ;;  %v5528_v42 = vld [vmem:[#allocation11 + $0x20] sm:$0xf] }
 0xd42   :  { %v6213_v26 = vpop.eup %6212  ;;  %v8387_v43 = vor.u32 %v5935_v62, %v5554_v37  ;;  %v5932_v53 = vld [vmem:[#allocation11 + $0x2c] sm:$0xf0] }
 0xd43   :  { %v6215_v49 = vpop.eup %6214  ;;  %v3251_v56 = vmul.f32 0.5, %v6213_v26  ;;  %6218 = vtanh.f32 %v3256_v20  ;;  %9648 = vst [vmem:[#allocation18_spill] sm:$0xff] %v8346_v30  ;;  %v8351_v20 = vor.u32 %v5947_v51, %v5602_v25  ;;  %v5576_v26 = vld [vmem:[#allocation11 + $0x80] sm:$0xf]  ;;  %v5930_v51 = vld [vmem:[#allocation11 + $0x24] sm:$0xf]  ;;  %v8392_v25 = vor.u32 %v5932_v53, %v5528_v42 }
 0xd44   :  { %v3252_v21 = vmul.f32 0.5, %v6215_v49  ;;  %9649 = vst [vmem:[#allocation19_spill] sm:$0xff] %v8348_v57  ;;  %v5944_v49 = vld [vmem:[#allocation11 + $0x8c] sm:$0xf0] }
 0xd45   :  { %v3253_v54 = vadd.f32 0.5, %v3251_v56  ;;  %9650 = vst [vmem:[#allocation20_spill] sm:$0xff] %v8351_v20  ;;  %v5942_v56 = vld [vmem:[#allocation11 + $0x84] sm:$0xf] }
 0xd46   :  { %v3254_v47 = vadd.f32 0.5, %v3252_v21  ;;  %v3232_v33 = vpop.f32.mrf.mxu2  ;;  %v3245_v36 = vpop.f32.mrf.mxu3  ;;  %v8356_v21 = vor.u32 %v5944_v49, %v5576_v26  ;;  %9662 = vst [vmem:[#allocation29_spill] sm:$0xff] %v8387_v43  ;;  %v5530_v26 = vld [vmem:[#allocation11 + $0x30] sm:$0xf0]  ;;  %v5536_v49 = vld [vmem:[#allocation11 + $0x28] sm:$0xf] }
 0xd47   :  { %v6217_v34 = vpop.eup %6216  ;;  %v5945_v33 = vld [vmem:[#allocation11 + $0x94] sm:$0xf0]  ;;  %9663 = vst [vmem:[#allocation30_spill] sm:$0xff] %v8392_v25 }
 0xd48   :  { %v3260_v8 = vmul.f32 %v3254_v47, %v8265_v11  ;;  %v3261_v18 = vmul.f32 %v6217_v34, %v3253_v54  ;;  %v5953_v11 = vld [vmem:[#allocation11 + $0xd4] sm:$0xf0]  ;;  %9651 = vst [vmem:[#allocation21_spill] sm:$0xff] %v8356_v21  ;;  %v5578_v54 = vld [vmem:[#allocation11 + $0x90] sm:$0xf0] }
 0xd49   :  { %v6219_v41 = vpop.eup %6218  ;;  %v8336_v24 = vor.u32 %v5953_v11, %v5616_v13  ;;  %v5584_v47 = vld [vmem:[#allocation11 + $0x88] sm:$0xf]  ;;  %v8358_v36 = vor.u32 %v5942_v56, %v5578_v54  ;;  %v5546_v13 = vld [vmem:[#allocation11 + $0x50] sm:$0xf0]  ;;  %v5933_v56 = vld [vmem:[#allocation11 + $0x34] sm:$0xf0]  ;;  %v8394_v54 = vor.u32 %v5930_v51, %v5530_v26 }
 0xd4a   :  { %v8311_v22 = vadd.f32 %v3261_v18, %v3260_v8  ;;  %v3258_v2 = vmul.f32 0.5, %v6219_v41  ;;  %v8360_v34 = vor.u32 %v5945_v33, %v5584_v47  ;;  %v5943_v8 = vld [vmem:[#allocation11 + $0x8c] sm:$0xf]  ;;  %v5586_v18 = vld [vmem:[#allocation11 + $0x98] sm:$0xf0]  ;;  %v8382_v44 = vor.u32 %v5934_v5, %v5546_v13 }
 0xd4b   :  { %9652 = vst [vmem:[#allocation48_spill] sm:$0xff] %v8358_v36  ;;  %v8363_v41 = vor.u32 %v5943_v8, %v5586_v18  ;;  %v5552_v11 = vld [vmem:[#allocation11 + $0x48] sm:$0xf]  ;;  %v8396_v47 = vor.u32 %v5933_v56, %v5536_v49  ;;  %v5931_v33 = vld [vmem:[#allocation11 + $0x2c] sm:$0xf] }
 0xd4c   :  { %6220 = vtanh.f32 %v8311_v22  ;;  %v3259_v59 = vadd.f32 0.5, %v3258_v2  ;;  %9653 = vst [vmem:[#allocation22_spill] sm:$0xff] %v8360_v34  ;;  %v5560_v2 = vld [vmem:[#allocation11 + $0x60] sm:$0xf]  ;;  %v8384_v14 = vor.u32 %v5937_v17, %v5552_v11  ;;  %v5538_v8 = vld [vmem:[#allocation11 + $0x38] sm:$0xf0] }
 0xd4d   :  { %9654 = vst [vmem:[#allocation54_spill] sm:$0xff] %v8363_v41  ;;  %v8399_v18 = vor.u32 %v5931_v33, %v5538_v8  ;;  %v5522_v5 = vld [vmem:[#allocation11 + $0x18] sm:$0xf0] }
 0xd4e   :  { %9660 = vst [vmem:[#allocation27_spill] sm:$0xff] %v8382_v44  ;;  %v8411_v13 = vor.u32 %v5927_v35, %v5522_v5 }
 0xd4f   :  { %9661 = vst [vmem:[#allocation28_spill] sm:$0xff] %v8384_v14 }
 0xd50   :  { %9664 = vst [vmem:[#allocation31_spill] sm:$0xff] %v8394_v54 }
 0xd51   :  { %9665 = vst [vmem:[#allocation32_spill] sm:$0xff] %v8396_v47 }
 0xd52   :  { %v6221_v27 = vpop.eup %6220  ;;  %9666 = vst [vmem:[#allocation33_spill] sm:$0xff] %v8399_v18 }
 0xd53   :  { %v3264_v7 = vmul.f32 %v6221_v27, %v3259_v59  ;;  %v5940_v59 = vld [vmem:[#allocation11 + $0x6c] sm:$0xf0]  ;;  %v5938_v27 = vld [vmem:[#allocation11 + $0x64] sm:$0xf]  ;;  %9670 = vst [vmem:[#allocation37_spill] sm:$0xff] %v8411_v13 }
 0xd54   :  { %v8370_v28 = vor.u32 %v5938_v27, %v5562_v61  ;;  %v5926_v27 = vld [vmem:[#allocation11 + $0x4] sm:$0xf] }
 0xd55   :  { %v8314_v50 = vpack.c.bf16 %v3264_v7, %v3264_v7  ;;  %v8368_v7 = vor.u32 %v5940_v59, %v5560_v2  ;;  %v5512_v2 = vld [vmem:[#allocation11] sm:$0xf]  ;;  %v5928_v59 = vld [vmem:[#allocation11 + $0xc] sm:$0xf0]  ;;  %v8406_v46 = vor.u32 %v5926_v27, %v5514_v0 }
 0xd56   :  { %9656 = vst [vmem:[#allocation24_spill] sm:$0xff] %v8370_v28  ;;  %v8404_v61 = vor.u32 %v5928_v59, %v5512_v2 }
 0xd57   :  { %9647 = vst [vmem:[#allocation62_spill] sm:$0xff] %v8314_v50  ;;  %3274 = vmatmul.bf16.vlgmr.msrb.gmra.mxu0 %v8314_v50  ;;  %3287 = vmatmul.bf16.vlgmr.msrb.gmra.mxu1 %v8314_v50 }
 0xd58   :  { %3300 = vmatmul.bf16.vlgmr.msrb.gmra.mxu2 %v8314_v50  ;;  %3313 = vmatmul.bf16.vlgmr.msrb.gmra.mxu3 %v8314_v50  ;;  %9655 = vst [vmem:[#allocation23_spill] sm:$0xff] %v8368_v7  ;;  %v5744_v50 = vld [vmem:[#allocation13 + $0xc8] sm:$0xf] }
 0xd59   :  { %3641 = vmatpush.bf16.msrb.mxu0 %v8320_v55  ;;  %3654 = vmatpush.bf16.msrb.mxu1 %v8322_v19  ;;  %9667 = vst [vmem:[#allocation34_spill] sm:$0xff] %v8404_v61 }
 0xd5a   :  { %3667 = vmatpush.bf16.msrb.mxu2 %v8324_v58  ;;  %3680 = vmatpush.bf16.msrb.mxu3 %v8327_v52  ;;  %9668 = vst [vmem:[#allocation35_spill] sm:$0xff] %v8406_v46 }
 0xd5d   :  { %3642 = vmatpush.bf16.msrb.mxu0 %v8332_v38  ;;  %3655 = vmatpush.bf16.msrb.mxu1 %v8334_v10 }
 0xd5e   :  { %3668 = vmatpush.bf16.msrb.mxu2 %v8336_v24  ;;  %3681 = vmatpush.bf16.msrb.mxu3 %v8339_v60 }
 0xd61   :  { %3643 = vmatpush.bf16.msrb.mxu0 %v8344_v9  ;;  %3656 = vmatpush.bf16.msrb.mxu1 %v8346_v30 }
 0xd62   :  { %3669 = vmatpush.bf16.msrb.mxu2 %v8348_v57  ;;  %3682 = vmatpush.bf16.msrb.mxu3 %v8351_v20 }
 0xd65   :  { %3644 = vmatpush.bf16.msrb.mxu0 %v8356_v21  ;;  %3657 = vmatpush.bf16.msrb.mxu1 %v8358_v36 }
 0xd66   :  { %3670 = vmatpush.bf16.msrb.mxu2 %v8360_v34  ;;  %3683 = vmatpush.bf16.msrb.mxu3 %v8363_v41 }
 0xd69   :  { %3645 = vmatpush.bf16.msrb.mxu0 %v8368_v7  ;;  %3658 = vmatpush.bf16.msrb.mxu1 %v8370_v28 }
 0xd6a   :  { %3671 = vmatpush.bf16.msrb.mxu2 %v8372_v40  ;;  %3684 = vmatpush.bf16.msrb.mxu3 %v8375_v15 }
 0xd6d   :  { %3646 = vmatpush.bf16.msrb.mxu0 %v8380_v12  ;;  %3659 = vmatpush.bf16.msrb.mxu1 %v8382_v44 }
 0xd6e   :  { %3672 = vmatpush.bf16.msrb.mxu2 %v8384_v14  ;;  %3685 = vmatpush.bf16.msrb.mxu3 %v8387_v43 }
 0xd71   :  { %3647 = vmatpush.bf16.msrb.mxu0 %v8392_v25  ;;  %3660 = vmatpush.bf16.msrb.mxu1 %v8394_v54 }
 0xd72   :  { %3673 = vmatpush.bf16.msrb.mxu2 %v8396_v47  ;;  %3686 = vmatpush.bf16.msrb.mxu3 %v8399_v18 }
 0xd75   :  { %3648 = vmatpush.bf16.msrb.mxu0 %v8404_v61  ;;  %3661 = vmatpush.bf16.msrb.mxu1 %v8406_v46 }
 0xd76   :  { %3674 = vmatpush.bf16.msrb.mxu2 %v8408_v31  ;;  %3687 = vmatpush.bf16.msrb.mxu3 %v8411_v13 }
 0xdd4   :  { %v3275_v11 = vpop.f32.mrf.mxu0  ;;  %v3288_v17 = vpop.f32.mrf.mxu1 }
 0xdd5   :  { %v3276_v62 = vadd.f32 %v3275_v11, %v8069_v6  ;;  %v3289_v37 = vadd.f32 %v3288_v17, %v8071_v23  ;;  %v5714_v23 = vld [vmem:[#allocation13 + $0x98] sm:$0xf0]  ;;  %v5696_v6 = vld [vmem:[#allocation13 + $0x68] sm:$0xf] }
 0xdd7   :  { %v3318_v42 = vmul.f32 0.5, %v3276_v62  ;;  %v3319_v53 = vmul.f32 0.5, %v3289_v37 }
 0xdd9   :  { %6222 = vtanh.f32 %v3318_v42 }
 0xdda   :  { %6224 = vtanh.f32 %v3319_v53 }
 0xddb   :  { %v3301_v51 = vpop.f32.mrf.mxu2  ;;  %v3314_v26 = vpop.f32.mrf.mxu3 }
 0xddc   :  { %v3302_v49 = vadd.f32 %v3301_v51, %v8075_v3  ;;  %v3315_v56 = vadd.f32 %v3314_v26, %v8077_v39  ;;  %v3277_v33 = vpop.f32.mrf.mxu0  ;;  %v3290_v8 = vpop.f32.mrf.mxu1  ;;  %v5977_v39 = vld [vmem:[#allocation13 + $0x94] sm:$0xf0]  ;;  %v5975_v3 = vld [vmem:[#allocation13 + $0x8c] sm:$0xf] }
 0xddd   :  { %v5986_v8 = vld [vmem:[#allocation13 + $0xe4] sm:$0xf] }
 0xdde   :  { %6226 = vtanh.f32 %v3302_v49  ;;  %v3327_v2 = vmul.f32 0.5, %v3315_v56  ;;  %v5752_v49 = vld [vmem:[#allocation13 + $0xe0] sm:$0xf]  ;;  %v5988_v56 = vld [vmem:[#allocation13 + $0xec] sm:$0xf0] }
 0xddf   :  { %v6223_v59 = vpop.eup %6222 }
 0xde0   :  { %v6225_v27 = vpop.eup %6224  ;;  %v3322_v0 = vmul.f32 0.5, %v6223_v59  ;;  %6228 = vtanh.f32 %v3327_v2  ;;  %v5754_v2 = vld [vmem:[#allocation13 + $0xf0] sm:$0xf0]  ;;  %v5760_v59 = vld [vmem:[#allocation13 + $0xe8] sm:$0xf] }
 0xde1   :  { %v3323_v48 = vmul.f32 0.5, %v6225_v27 }
 0xde2   :  { %v3324_v16 = vadd.f32 0.5, %v3322_v0  ;;  %v5989_v0 = vld [vmem:[#allocation13 + $0xf4] sm:$0xf0] }
 0xde3   :  { %v3325_v35 = vadd.f32 0.5, %v3323_v48  ;;  %v3303_v5 = vpop.f32.mrf.mxu2  ;;  %v3316_v11 = vpop.f32.mrf.mxu3  ;;  %v5987_v48 = vld [vmem:[#allocation13 + $0xec] sm:$0xf] }
 0xde4   :  { %v6227_v17 = vpop.eup %6226  ;;  %v5762_v5 = vld [vmem:[#allocation13 + $0xf8] sm:$0xf0] }
 0xde5   :  { %v3331_v62 = vmul.f32 %v3325_v35, %v8311_v22  ;;  %v3332_v37 = vmul.f32 %v6227_v17, %v3324_v16  ;;  %v8426_v22 = vor.u32 %v5988_v56, %v5752_v49  ;;  %v8428_v16 = vor.u32 %v5986_v8, %v5754_v2  ;;  %v5736_v35 = vld [vmem:[#allocation13 + $0xc0] sm:$0xf]  ;;  %v5984_v17 = vld [vmem:[#allocation13 + $0xcc] sm:$0xf0] }
 0xde6   :  { %v6229_v42 = vpop.eup %6228  ;;  %v8440_v49 = vor.u32 %v5984_v17, %v5736_v35  ;;  %v5720_v8 = vld [vmem:[#allocation13 + $0xa0] sm:$0xf]  ;;  %v5980_v2 = vld [vmem:[#allocation13 + $0xac] sm:$0xf0] }
 0xde7   :  { %v8421_v53 = vadd.f32 %v3332_v37, %v3331_v62  ;;  %v3329_v51 = vmul.f32 0.5, %v6229_v42  ;;  %v8430_v62 = vor.u32 %v5989_v0, %v5760_v59  ;;  %v8432_v37 = vor.u32 %v5987_v48, %v5762_v5  ;;  %v5982_v42 = vld [vmem:[#allocation13 + $0xc4] sm:$0xf]  ;;  %v5722_v5 = vld [vmem:[#allocation13 + $0xb0] sm:$0xf0] }
 0xde8   :  { %v5978_v48 = vld [vmem:[#allocation13 + $0xa4] sm:$0xf]  ;;  %v8452_v35 = vor.u32 %v5980_v2, %v5720_v8 }
 0xde9   :  { %9671 = vst [vmem:[#allocation38_spill] sm:$0xff] %v8421_v53  ;;  %6230 = vtanh.f32 %v8421_v53  ;;  %v3330_v26 = vadd.f32 0.5, %v3329_v51  ;;  %v5738_v51 = vld [vmem:[#allocation13 + $0xd0] sm:$0xf0]  ;;  %v8454_v17 = vor.u32 %v5978_v48, %v5722_v5  ;;  %v5712_v53 = vld [vmem:[#allocation13 + $0x88] sm:$0xf] }
 0xdea   :  { %v8442_v56 = vor.u32 %v5982_v42, %v5738_v51  ;;  %9674 = vst [vmem:[#allocation41_spill] sm:$0xff] %v8452_v35  ;;  %v5704_v42 = vld [vmem:[#allocation13 + $0x80] sm:$0xf]  ;;  %v5976_v51 = vld [vmem:[#allocation13 + $0x8c] sm:$0xf0] }
 0xdeb   :  { %9675 = vst [vmem:[#allocation42_spill] sm:$0xff] %v8454_v17  ;;  %v8464_v8 = vor.u32 %v5976_v51, %v5704_v42  ;;  %v5688_v48 = vld [vmem:[#allocation13 + $0x60] sm:$0xf]  ;;  %v5972_v5 = vld [vmem:[#allocation13 + $0x6c] sm:$0xf0] }
 0xdec   :  { %v8476_v42 = vor.u32 %v5972_v5, %v5688_v48  ;;  %v5969_v48 = vld [vmem:[#allocation13 + $0x54] sm:$0xf0]  ;;  %v5967_v5 = vld [vmem:[#allocation13 + $0x4c] sm:$0xf] }
 0xded   :  { %9677 = vst [vmem:[#allocation44_spill] sm:$0xff] %v8464_v8 }
 0xdee   :  { %9681 = vst [vmem:[#allocation51_spill] sm:$0xff] %v8476_v42 }
 0xdef   :  { %v6231_v33 = vpop.eup %6230 }
 0xdf0   :  { %v3335_v27 = vmul.f32 %v6231_v33, %v3330_v26  ;;  %v5985_v26 = vld [vmem:[#allocation13 + $0xd4] sm:$0xf0]  ;;  %v5983_v33 = vld [vmem:[#allocation13 + $0xcc] sm:$0xf] }
 0xdf1   :  { %v8446_v59 = vor.u32 %v5985_v26, %v5744_v50  ;;  %v8460_v26 = vor.u32 %v5979_v1, %v5730_v4  ;;  %v8470_v4 = vor.u32 %v5977_v39, %v5712_v53  ;;  %v8472_v1 = vor.u32 %v5975_v3, %v5714_v23  ;;  %v5966_v39 = vld [vmem:[#allocation13 + $0x44] sm:$0xf]  ;;  %v5674_v53 = vld [vmem:[#allocation13 + $0x50] sm:$0xf0] }
 0xdf2   :  { %v8424_v11 = vpack.c.bf16 %v3335_v27, %v3335_v27  ;;  %v5746_v27 = vld [vmem:[#allocation13 + $0xd8] sm:$0xf0] }
 0xdf3   :  { %v8448_v0 = vor.u32 %v5983_v33, %v5746_v27  ;;  %9676 = vst [vmem:[#allocation43_spill] sm:$0xff] %v8460_v26  ;;  %v5974_v33 = vld [vmem:[#allocation13 + $0x84] sm:$0xf]  ;;  %v5706_v27 = vld [vmem:[#allocation13 + $0x90] sm:$0xf0] }
 0xdf4   :  { %9672 = vst [vmem:[#allocation39_spill] sm:$0xff] %v8424_v11  ;;  %3345 = vmatmul.bf16.vlgmr.msra.gmra.mxu0 %v8424_v11  ;;  %3358 = vmatmul.bf16.vlgmr.msra.gmra.mxu1 %v8424_v11  ;;  %v8466_v2 = vor.u32 %v5974_v33, %v5706_v27  ;;  %v5672_v33 = vld [vmem:[#allocation13 + $0x40] sm:$0xf]  ;;  %v5968_v27 = vld [vmem:[#allocation13 + $0x4c] sm:$0xf0] }
 0xdf5   :  { %3371 = vmatmul.bf16.vlgmr.msra.gmra.mxu2 %v8424_v11  ;;  %3384 = vmatmul.bf16.vlgmr.msra.gmra.mxu3 %v8424_v11  ;;  %9673 = vst [vmem:[#allocation40_spill] sm:$0xff] %v8448_v0  ;;  %v5728_v11 = vld [vmem:[#allocation13 + $0xa8] sm:$0xf] }
 0xdf6   :  { %3853 = vmatpush.bf16.msra.mxu0 %v8426_v22  ;;  %3866 = vmatpush.bf16.msra.mxu1 %v8428_v16  ;;  %v8458_v50 = vor.u32 %v5981_v29, %v5728_v11  ;;  %9678 = vst [vmem:[#allocation45_spill] sm:$0xff] %v8466_v2  ;;  %v5970_v29 = vld [vmem:[#allocation13 + $0x64] sm:$0xf]  ;;  %v5690_v11 = vld [vmem:[#allocation13 + $0x70] sm:$0xf0] }
 0xdf7   :  { %3879 = vmatpush.bf16.msra.mxu2 %v8430_v62  ;;  %3892 = vmatpush.bf16.msra.mxu3 %v8432_v37  ;;  %9679 = vst [vmem:[#allocation46_spill] sm:$0xff] %v8470_v4  ;;  %v8478_v51 = vor.u32 %v5970_v29, %v5690_v11  ;;  %v5682_v29 = vld [vmem:[#allocation13 + $0x58] sm:$0xf0] }
 0xdf8   :  { %9680 = vst [vmem:[#allocation47_spill] sm:$0xff] %v8472_v1 }
 0xdf9   :  { %9682 = vst [vmem:[#allocation52_spill] sm:$0xff] %v8478_v51 }
 0xdfa   :  { %3854 = vmatpush.bf16.msra.mxu0 %v8440_v49  ;;  %3867 = vmatpush.bf16.msra.mxu1 %v8442_v56 }
 0xdfb   :  { %3880 = vmatpush.bf16.msra.mxu2 %v8446_v59  ;;  %3893 = vmatpush.bf16.msra.mxu3 %v8448_v0  ;;  %v5971_v0 = vld [vmem:[#allocation13 + $0x6c] sm:$0xf] }
 0xdfe   :  { %3855 = vmatpush.bf16.msra.mxu0 %v8452_v35  ;;  %3868 = vmatpush.bf16.msra.mxu1 %v8454_v17  ;;  %v5973_v35 = vld [vmem:[#allocation13 + $0x74] sm:$0xf0]  ;;  %v5698_v17 = vld [vmem:[#allocation13 + $0x78] sm:$0xf0] }
 0xdff   :  { %3881 = vmatpush.bf16.msra.mxu2 %v8458_v50  ;;  %3894 = vmatpush.bf16.msra.mxu3 %v8460_v26  ;;  %v8482_v23 = vor.u32 %v5973_v35, %v5696_v6  ;;  %v8484_v3 = vor.u32 %v5971_v0, %v5698_v17  ;;  %v5680_v26 = vld [vmem:[#allocation13 + $0x48] sm:$0xf]  ;;  %v8492_v6 = vor.u32 %v5968_v27, %v5672_v33  ;;  %v5656_v35 = vld [vmem:[#allocation13 + $0x20] sm:$0xf]  ;;  %v5964_v17 = vld [vmem:[#allocation13 + $0x2c] sm:$0xf0] }
 0xe00   :  { %v8494_v0 = vor.u32 %v5966_v39, %v5674_v53  ;;  %v8498_v11 = vor.u32 %v5969_v48, %v5680_v26  ;;  %v8504_v33 = vor.u32 %v5964_v17, %v5656_v35  ;;  %v5640_v39 = vld [vmem:[#allocation13] sm:$0xf]  ;;  %v5960_v53 = vld [vmem:[#allocation13 + $0xc] sm:$0xf0]  ;;  %v9695_v17 = vld [vmem:[#allocation51_spill] sm:$0xff] }
 0xe01   :  { %9683 = vst [vmem:[#allocation53_spill] sm:$0xff] %v8482_v23 }
 0xe02   :  { %3856 = vmatpush.bf16.msra.mxu0 %v8464_v8  ;;  %3869 = vmatpush.bf16.msra.mxu1 %v8466_v2  ;;  %9684 = vst [vmem:[#allocation50_spill] sm:$0xff] %v8484_v3  ;;  %v5664_v2 = vld [vmem:[#allocation13 + $0x28] sm:$0xf]  ;;  %v5963_v8 = vld [vmem:[#allocation13 + $0x2c] sm:$0xf] }
 0xe03   :  { %3882 = vmatpush.bf16.msra.mxu2 %v8470_v4  ;;  %3895 = vmatpush.bf16.msra.mxu3 %v8472_v1  ;;  %9685 = vst [vmem:[#allocation63_spill] sm:$0xff] %v8492_v6  ;;  %v8500_v1 = vor.u32 %v5967_v5, %v5682_v29  ;;  %v5962_v4 = vld [vmem:[#allocation13 + $0x24] sm:$0xf]  ;;  %v5642_v29 = vld [vmem:[#allocation13 + $0x10] sm:$0xf0] }
 0xe04   :  { %3649 = vmatmul.bf16.vlgmr.msrb.gmra.mxu0 %v8084_v45  ;;  %3662 = vmatmul.bf16.vlgmr.msrb.gmra.mxu1 %v8084_v45  ;;  %9686 = vst [vmem:[#allocation64_spill] sm:$0xff] %v8494_v0  ;;  %v5958_v5 = vld [vmem:[#allocation13 + $0x4] sm:$0xf] }
 0xe05   :  { %3675 = vmatmul.bf16.vlgmr.msrb.gmra.mxu2 %v8084_v45  ;;  %3688 = vmatmul.bf16.vlgmr.msrb.gmra.mxu3 %v8084_v45  ;;  %v5658_v45 = vld [vmem:[#allocation13 + $0x30] sm:$0xf0]  ;;  %v8518_v35 = vor.u32 %v5958_v5, %v5642_v29 }
 0xe06   :  { %3857 = vmatpush.bf16.msra.mxu0 %v8476_v42  ;;  %3870 = vmatpush.bf16.msra.mxu1 %v8478_v51  ;;  %v5965_v42 = vld [vmem:[#allocation13 + $0x34] sm:$0xf0]  ;;  %v5666_v51 = vld [vmem:[#allocation13 + $0x38] sm:$0xf0]  ;;  %v8506_v27 = vor.u32 %v5962_v4, %v5658_v45  ;;  %v8516_v4 = vor.u32 %v5960_v53, %v5640_v39  ;;  %v9696_v45 = vld [vmem:[#allocation52_spill] sm:$0xff] }
 0xe07   :  { %3883 = vmatpush.bf16.msra.mxu2 %v8482_v23  ;;  %3896 = vmatpush.bf16.msra.mxu3 %v8484_v3  ;;  %v8510_v26 = vor.u32 %v5965_v42, %v5664_v2  ;;  %v8512_v48 = vor.u32 %v5963_v8, %v5666_v51  ;;  %v5648_v3 = vld [vmem:[#allocation13 + $0x8] sm:$0xf]  ;;  %v5959_v23 = vld [vmem:[#allocation13 + $0xc] sm:$0xf]  ;;  %v9688_v42 = vld [vmem:[#allocation41_spill] sm:$0xff] }
 0xe08   :  { %v9689_v51 = vld [vmem:[#allocation42_spill] sm:$0xff]  ;;  %v9697_v39 = vld [vmem:[#allocation53_spill] sm:$0xff] }
 0xe09   :  { %v9698_v53 = vld [vmem:[#allocation50_spill] sm:$0xff] }
 0xe0a   :  { %3858 = vmatpush.bf16.msra.mxu0 %v8492_v6  ;;  %3871 = vmatpush.bf16.msra.mxu1 %v8494_v0  ;;  %v5961_v6 = vld [vmem:[#allocation13 + $0x14] sm:$0xf0]  ;;  %v5650_v0 = vld [vmem:[#allocation13 + $0x18] sm:$0xf0]  ;;  %v9699_v5 = vld [vmem:[#allocation63_spill] sm:$0xff] }
 0xe0b   :  { %3884 = vmatpush.bf16.msra.mxu2 %v8498_v11  ;;  %3897 = vmatpush.bf16.msra.mxu3 %v8500_v1  ;;  %v8522_v8 = vor.u32 %v5961_v6, %v5648_v3  ;;  %v8524_v2 = vor.u32 %v5959_v23, %v5650_v0  ;;  %v9690_v23 = vld [vmem:[#allocation43_spill] sm:$0xff]  ;;  %v9692_v3 = vld [vmem:[#allocation45_spill] sm:$0xff]  ;;  %v9693_v6 = vld [vmem:[#allocation46_spill] sm:$0xff] }
 0xe0c   :  { %v9694_v0 = vld [vmem:[#allocation47_spill] sm:$0xff]  ;;  %v9700_v29 = vld [vmem:[#allocation64_spill] sm:$0xff] }
 0xe0e   :  { %3859 = vmatpush.bf16.msra.mxu0 %v8504_v33  ;;  %3872 = vmatpush.bf16.msra.mxu1 %v8506_v27 }
 0xe0f   :  { %3885 = vmatpush.bf16.msra.mxu2 %v8510_v26  ;;  %3898 = vmatpush.bf16.msra.mxu3 %v8512_v48 }
 0xe12   :  { %3860 = vmatpush.bf16.msra.mxu0 %v8516_v4  ;;  %3873 = vmatpush.bf16.msra.mxu1 %v8518_v35 }
 0xe13   :  { %3886 = vmatpush.bf16.msra.mxu2 %v8522_v8  ;;  %3899 = vmatpush.bf16.msra.mxu3 %v8524_v2 }
 0xe15   :  { %3861 = vmatmul.bf16.vlgmr.msra.gmra.mxu0 %v9639_v32  ;;  %3874 = vmatmul.bf16.vlgmr.msra.gmra.mxu1 %v9639_v32 }
 0xe16   :  { %3923 = vmatpush.bf16.msrb.mxu0 %v8320_v55  ;;  %3936 = vmatpush.bf16.msrb.mxu1 %v8322_v19 }
 0xe17   :  { %3949 = vmatpush.bf16.msrb.mxu2 %v8324_v58  ;;  %3962 = vmatpush.bf16.msrb.mxu3 %v8327_v52 }
 0xe18   :  { %3887 = vmatmul.bf16.vlgmr.msra.gmra.mxu2 %v9639_v32  ;;  %3900 = vmatmul.bf16.vlgmr.msra.gmra.mxu3 %v9639_v32  ;;  %v9687_v32 = vld [vmem:[#allocation40_spill] sm:$0xff] }
 0xe1a   :  { %3924 = vmatpush.bf16.msrb.mxu0 %v8332_v38  ;;  %3937 = vmatpush.bf16.msrb.mxu1 %v8334_v10 }
 0xe1b   :  { %3950 = vmatpush.bf16.msrb.mxu2 %v8336_v24  ;;  %3963 = vmatpush.bf16.msrb.mxu3 %v8339_v60 }
 0xe1e   :  { %3925 = vmatpush.bf16.msrb.mxu0 %v8344_v9  ;;  %3938 = vmatpush.bf16.msrb.mxu1 %v8346_v30 }
 0xe1f   :  { %3951 = vmatpush.bf16.msrb.mxu2 %v8348_v57  ;;  %3964 = vmatpush.bf16.msrb.mxu3 %v8351_v20 }
 0xe22   :  { %3926 = vmatpush.bf16.msrb.mxu0 %v8356_v21  ;;  %3939 = vmatpush.bf16.msrb.mxu1 %v8358_v36 }
 0xe23   :  { %3952 = vmatpush.bf16.msrb.mxu2 %v8360_v34  ;;  %3965 = vmatpush.bf16.msrb.mxu3 %v8363_v41 }
 0xe26   :  { %3927 = vmatpush.bf16.msrb.mxu0 %v8368_v7  ;;  %3940 = vmatpush.bf16.msrb.mxu1 %v8370_v28 }
 0xe27   :  { %3953 = vmatpush.bf16.msrb.mxu2 %v8372_v40  ;;  %3966 = vmatpush.bf16.msrb.mxu3 %v8375_v15 }
 0xe2a   :  { %3928 = vmatpush.bf16.msrb.mxu0 %v8380_v12  ;;  %3941 = vmatpush.bf16.msrb.mxu1 %v8382_v44 }
 0xe2b   :  { %3954 = vmatpush.bf16.msrb.mxu2 %v8384_v14  ;;  %3967 = vmatpush.bf16.msrb.mxu3 %v8387_v43 }
 0xe2e   :  { %3929 = vmatpush.bf16.msrb.mxu0 %v8392_v25  ;;  %3942 = vmatpush.bf16.msrb.mxu1 %v8394_v54 }
 0xe2f   :  { %3955 = vmatpush.bf16.msrb.mxu2 %v8396_v47  ;;  %3968 = vmatpush.bf16.msrb.mxu3 %v8399_v18 }
 0xe32   :  { %3930 = vmatpush.bf16.msrb.mxu0 %v8404_v61  ;;  %3943 = vmatpush.bf16.msrb.mxu1 %v8406_v46 }
 0xe33   :  { %3956 = vmatpush.bf16.msrb.mxu2 %v8408_v31  ;;  %3969 = vmatpush.bf16.msrb.mxu3 %v8411_v13 }
 0xe35   :  { %3931 = vmatmul.bf16.vlgmr.msrb.gmra.mxu0 %v8130_v63  ;;  %3944 = vmatmul.bf16.vlgmr.msrb.gmra.mxu1 %v8130_v63 }
 0xe36   :  { %3976 = vmatpush.bf16.msra.mxu0 %v8426_v22  ;;  %3989 = vmatpush.bf16.msra.mxu1 %v8428_v16 }
 0xe37   :  { %3957 = vmatmul.bf16.vlgmr.msrb.gmra.mxu2 %v8130_v63  ;;  %3970 = vmatmul.bf16.vlgmr.msrb.gmra.mxu3 %v8130_v63  ;;  %v9691_v63 = vld [vmem:[#allocation44_spill] sm:$0xff] }
 0xe38   :  { %4002 = vmatpush.bf16.msra.mxu2 %v8430_v62  ;;  %4015 = vmatpush.bf16.msra.mxu3 %v8432_v37 }
 0xe3a   :  { %3977 = vmatpush.bf16.msra.mxu0 %v8440_v49  ;;  %3990 = vmatpush.bf16.msra.mxu1 %v8442_v56 }
 0xe3c   :  { %4003 = vmatpush.bf16.msra.mxu2 %v8446_v59  ;;  %4016 = vmatpush.bf16.msra.mxu3 %v9687_v32 }
 0xe3e   :  { %3978 = vmatpush.bf16.msra.mxu0 %v9688_v42  ;;  %3991 = vmatpush.bf16.msra.mxu1 %v9689_v51 }
 0xe40   :  { %4004 = vmatpush.bf16.msra.mxu2 %v8458_v50  ;;  %4017 = vmatpush.bf16.msra.mxu3 %v9690_v23 }
 0xe42   :  { %3979 = vmatpush.bf16.msra.mxu0 %v9691_v63  ;;  %3992 = vmatpush.bf16.msra.mxu1 %v9692_v3 }
 0xe44   :  { %4005 = vmatpush.bf16.msra.mxu2 %v9693_v6  ;;  %4018 = vmatpush.bf16.msra.mxu3 %v9694_v0 }
 0xe46   :  { %3980 = vmatpush.bf16.msra.mxu0 %v9695_v17  ;;  %3993 = vmatpush.bf16.msra.mxu1 %v9696_v45 }
 0xe48   :  { %4006 = vmatpush.bf16.msra.mxu2 %v9697_v39  ;;  %4019 = vmatpush.bf16.msra.mxu3 %v9698_v53 }
 0xe4a   :  { %3981 = vmatpush.bf16.msra.mxu0 %v9699_v5  ;;  %3994 = vmatpush.bf16.msra.mxu1 %v9700_v29 }
 0xe4c   :  { %4007 = vmatpush.bf16.msra.mxu2 %v8498_v11  ;;  %4020 = vmatpush.bf16.msra.mxu3 %v8500_v1 }
 0xe4e   :  { %3982 = vmatpush.bf16.msra.mxu0 %v8504_v33  ;;  %3995 = vmatpush.bf16.msra.mxu1 %v8506_v27 }
 0xe50   :  { %4008 = vmatpush.bf16.msra.mxu2 %v8510_v26  ;;  %4021 = vmatpush.bf16.msra.mxu3 %v8512_v48 }
 0xe52   :  { %3983 = vmatpush.bf16.msra.mxu0 %v8516_v4  ;;  %3996 = vmatpush.bf16.msra.mxu1 %v8518_v35 }
 0xe54   :  { %4009 = vmatpush.bf16.msra.mxu2 %v8522_v8  ;;  %4022 = vmatpush.bf16.msra.mxu3 %v8524_v2 }
 0xe56   :  { %4046 = vmatpush.bf16.msrb.mxu0 %v8320_v55  ;;  %4059 = vmatpush.bf16.msrb.mxu1 %v8322_v19 }
 0xe58   :  { %4072 = vmatpush.bf16.msrb.mxu2 %v8324_v58  ;;  %4085 = vmatpush.bf16.msrb.mxu3 %v8327_v52 }
 0xe5a   :  { %4047 = vmatpush.bf16.msrb.mxu0 %v8332_v38  ;;  %4060 = vmatpush.bf16.msrb.mxu1 %v8334_v10 }
 0xe5c   :  { %4073 = vmatpush.bf16.msrb.mxu2 %v8336_v24  ;;  %4086 = vmatpush.bf16.msrb.mxu3 %v8339_v60 }
 0xe5e   :  { %4048 = vmatpush.bf16.msrb.mxu0 %v8344_v9  ;;  %4061 = vmatpush.bf16.msrb.mxu1 %v8346_v30 }
 0xe60   :  { %4074 = vmatpush.bf16.msrb.mxu2 %v8348_v57  ;;  %4087 = vmatpush.bf16.msrb.mxu3 %v8351_v20  ;;  %v9705_v20 = vld [vmem:[#allocation38_spill] sm:$0xff] }
 0xe62   :  { %4049 = vmatpush.bf16.msrb.mxu0 %v8356_v21  ;;  %4062 = vmatpush.bf16.msrb.mxu1 %v8358_v36 }
 0xe64   :  { %4075 = vmatpush.bf16.msrb.mxu2 %v8360_v34  ;;  %4088 = vmatpush.bf16.msrb.mxu3 %v8363_v41 }
 0xe66   :  { %4050 = vmatpush.bf16.msrb.mxu0 %v8368_v7  ;;  %4063 = vmatpush.bf16.msrb.mxu1 %v8370_v28  ;;  %v9703_v28 = vld [vmem:[#allocation57_spill] sm:$0xff]  ;;  %v9704_v7 = vld [vmem:[#allocation58_spill] sm:$0xff] }
 0xe68   :  { %4076 = vmatpush.bf16.msrb.mxu2 %v8372_v40  ;;  %4089 = vmatpush.bf16.msrb.mxu3 %v8375_v15  ;;  %v9702_v15 = vld [vmem:[#allocation56_spill] sm:$0xff] }
 0xe6a   :  { %4051 = vmatpush.bf16.msrb.mxu0 %v8380_v12  ;;  %4064 = vmatpush.bf16.msrb.mxu1 %v8382_v44  ;;  %v9701_v12 = vld [vmem:[#allocation55_spill] sm:$0xff] }
 0xe6c   :  { %4077 = vmatpush.bf16.msrb.mxu2 %v8384_v14  ;;  %4090 = vmatpush.bf16.msrb.mxu3 %v8387_v43 }
 0xe6e   :  { %4052 = vmatpush.bf16.msrb.mxu0 %v8392_v25  ;;  %4065 = vmatpush.bf16.msrb.mxu1 %v8394_v54 }
 0xe70   :  { %4078 = vmatpush.bf16.msrb.mxu2 %v8396_v47  ;;  %4091 = vmatpush.bf16.msrb.mxu3 %v8399_v18 }
 0xe71   :  { %v3346_v44 = vpop.f32.mrf.mxu0  ;;  %v3359_v14 = vpop.f32.mrf.mxu1 }
 0xe72   :  { %4053 = vmatpush.bf16.msrb.mxu0 %v8404_v61  ;;  %4066 = vmatpush.bf16.msrb.mxu1 %v8406_v46  ;;  %v3347_v43 = vadd.f32 %v3346_v44, %v9701_v12  ;;  %v3360_v25 = vadd.f32 %v3359_v14, %v9702_v15 }
 0xe74   :  { %4079 = vmatpush.bf16.msrb.mxu2 %v8408_v31  ;;  %4092 = vmatpush.bf16.msrb.mxu3 %v8411_v13  ;;  %v3389_v40 = vmul.f32 0.5, %v3347_v43  ;;  %v3390_v54 = vmul.f32 0.5, %v3360_v25 }
 0xe76   :  { %6232 = vtanh.f32 %v3389_v40 }
 0xe77   :  { %6234 = vtanh.f32 %v3390_v54 }
 0xe78   :  { %v3372_v47 = vpop.f32.mrf.mxu2  ;;  %v3385_v18 = vpop.f32.mrf.mxu3 }
 0xe79   :  { %v3373_v61 = vadd.f32 %v3372_v47, %v9703_v28  ;;  %v3386_v46 = vadd.f32 %v3385_v18, %v9704_v7  ;;  %v3348_v41 = vpop.f32.mrf.mxu0  ;;  %v3361_v31 = vpop.f32.mrf.mxu1 }
 0xe7b   :  { %6236 = vtanh.f32 %v3373_v61  ;;  %v3398_v13 = vmul.f32 0.5, %v3386_v46 }
 0xe7c   :  { %v6233_v34 = vpop.eup %6232 }
 0xe7d   :  { %v6235_v36 = vpop.eup %6234  ;;  %v3393_v21 = vmul.f32 0.5, %v6233_v34  ;;  %6238 = vtanh.f32 %v3398_v13 }
 0xe7e   :  { %v3394_v12 = vmul.f32 0.5, %v6235_v36 }
 0xe7f   :  { %v3395_v15 = vadd.f32 0.5, %v3393_v21  ;;  %v3471_v21 = vld [vmem:[%s9240_s12] sm:$0xf] }
 0xe80   :  { %v3396_v44 = vadd.f32 0.5, %v3394_v12  ;;  %v3374_v14 = vpop.f32.mrf.mxu2  ;;  %v3387_v40 = vpop.f32.mrf.mxu3 }
 0xe81   :  { %v6237_v43 = vpop.eup %6236  ;;  %v3650_v25 = vpop.f32.mrf.mxu0  ;;  %v8644_v14 = vperm.slane %v3471_v21, 0 }
 0xe82   :  { %v3663_v54 = vpop.f32.mrf.mxu1  ;;  %v3402_v28 = vmul.f32 %v3396_v44, %v9705_v20  ;;  %v3403_v47 = vmul.f32 %v6237_v43, %v3395_v15  ;;  %v8646_v20 = vperm.slane %v3471_v21, 1 }
 0xe83   :  { %v6239_v7 = vpop.eup %6238  ;;  %9707 = vst [vmem:[#allocation41_spill] sm:$0xff] %v8644_v14  ;;  %v3651_v40 = vadd.f32 %v3650_v25, %v8644_v14 }
 0xe84   :  { %v3404_v41 = vadd.f32 %v3403_v47, %v3402_v28  ;;  %v3400_v18 = vmul.f32 0.5, %v6239_v7  ;;  %9708 = vst [vmem:[#allocation42_spill] sm:$0xff] %v8646_v20  ;;  %v3664_v43 = vadd.f32 %v3663_v54, %v8646_v20 }
 0xe86   :  { %6240 = vtanh.f32 %v3404_v41  ;;  %v3401_v36 = vadd.f32 0.5, %v3400_v18  ;;  %v8650_v18 = vperm.slane %v3471_v21, 2 }
 0xe88   :  { %v3676_v61 = vpop.f32.mrf.mxu2  ;;  %v3689_v46 = vpop.f32.mrf.mxu3  ;;  %9709 = vst [vmem:[#allocation43_spill] sm:$0xff] %v8650_v18 }
 0xe89   :  { %v3652_v31 = vpop.f32.mrf.mxu0 }
 0xe8a   :  { %v3665_v34 = vpop.f32.mrf.mxu1  ;;  %v8652_v31 = vperm.slane %v3471_v21, 3 }
 0xe8c   :  { %v6241_v13 = vpop.eup %6240  ;;  %9710 = vst [vmem:[#allocation44_spill] sm:$0xff] %v8652_v31 }
 0xe8d   :  { %v8642_v12 = vmul.f32 %v6241_v13, %v3401_v36  ;;  %v3677_v13 = vadd.f32 %v3676_v61, %v8650_v18 }
 0xe8f   :  { %9706 = vst [vmem:[#allocation40_spill] sm:$0xff] %v8642_v12 }
 0xe90   :  { %v3678_v15 = vpop.f32.mrf.mxu2  ;;  %v3691_v44 = vpop.f32.mrf.mxu3 }
 0xe91   :  { %v3690_v15 = vadd.f32 %v3689_v46, %v8652_v31 }
 0xe92   :  { %v3862_v28 = vpop.f32.mrf.mxu0  ;;  %v3875_v47 = vpop.f32.mrf.mxu1 }
 0xe93   :  { %v3863_v7 = vadd.f32 %v3862_v28, %v3651_v40  ;;  %v3876_v41 = vadd.f32 %v3875_v47, %v3664_v43 }
 0xe95   :  { %v3905_v34 = vmul.f32 0.5, %v3863_v7  ;;  %v3906_v36 = vmul.f32 0.5, %v3876_v41 }
 0xe97   :  { %6242 = vtanh.f32 %v3905_v34 }
 0xe98   :  { %6244 = vtanh.f32 %v3906_v36 }
 0xe9a   :  { %v3864_v20 = vpop.f32.mrf.mxu0  ;;  %v3877_v14 = vpop.f32.mrf.mxu1 }
 0xe9b   :  { %v3888_v44 = vpop.f32.mrf.mxu2  ;;  %v3901_v25 = vpop.f32.mrf.mxu3 }
 0xe9c   :  { %v3889_v12 = vadd.f32 %v3888_v44, %v3677_v13  ;;  %v3902_v54 = vadd.f32 %v3901_v25, %v3690_v15 }
 0xe9d   :  { %v6243_v43 = vpop.eup %6242 }
 0xe9e   :  { %6246 = vtanh.f32 %v3889_v12  ;;  %v3914_v40 = vmul.f32 0.5, %v3902_v54  ;;  %v6245_v28 = vpop.eup %6244  ;;  %v3909_v21 = vmul.f32 0.5, %v6243_v43 }
 0xe9f   :  { %v3910_v47 = vmul.f32 0.5, %v6245_v28 }
 0xea0   :  { %6248 = vtanh.f32 %v3914_v40  ;;  %v3911_v7 = vadd.f32 0.5, %v3909_v21  ;;  %v9712_v21 = vld [vmem:[#allocation59_spill] sm:$0xff] }
 0xea1   :  { %v3912_v41 = vadd.f32 0.5, %v3910_v47  ;;  %v9713_v47 = vld [vmem:[#allocation19_spill] sm:$0xff] }
 0xea3   :  { %v3890_v34 = vpop.f32.mrf.mxu2  ;;  %v3903_v61 = vpop.f32.mrf.mxu3  ;;  %v3918_v46 = vmul.f32 0.0, %v3912_v41  ;;  %v9715_v41 = vld [vmem:[#allocation21_spill] sm:$0xff] }
 0xea4   :  { %v6247_v18 = vpop.eup %6246  ;;  %v9716_v34 = vld [vmem:[#allocation48_spill] sm:$0xff]  ;;  %v9717_v61 = vld [vmem:[#allocation22_spill] sm:$0xff] }
 0xea5   :  { %v3919_v36 = vmul.f32 %v6247_v18, %v3911_v7  ;;  %v9714_v7 = vld [vmem:[#allocation20_spill] sm:$0xff] }
 0xea6   :  { %v6249_v31 = vpop.eup %6248 }
 0xea7   :  { %v8656_v57 = vadd.f32 %v3919_v36, %v3918_v46  ;;  %v3916_v14 = vmul.f32 0.5, %v6249_v31  ;;  %v9718_v46 = vld [vmem:[#allocation54_spill] sm:$0xff]  ;;  %v9719_v36 = vld [vmem:[#allocation23_spill] sm:$0xff] }
 0xea9   :  { %6250 = vtanh.f32 %v8656_v57  ;;  %v3917_v12 = vadd.f32 0.5, %v3916_v14  ;;  %v9720_v14 = vld [vmem:[#allocation24_spill] sm:$0xff] }
 0xeaf   :  { %v6251_v20 = vpop.eup %6250 }
 0xeb0   :  { %v8659_v13 = vmul.f32 %v6251_v20, %v3917_v12  ;;  %v9721_v12 = vld [vmem:[#allocation25_spill] sm:$0xff] }
 0xeb1   :  { %v9722_v20 = vld [vmem:[#allocation49_spill] sm:$0xff] }
 0xeb2   :  { %9711 = vst [vmem:[#allocation45_spill] sm:$0xff] %v8659_v13  ;;  %v8661_v15 = vpop.f32.mrf.mxu0  ;;  %v8663_v44 = vpop.f32.mrf.mxu1  ;;  %v3975_v25 = vpack.c.bf16 %v8659_v13, %v8659_v13  ;;  %v9729_v13 = vld [vmem:[#allocation32_spill] sm:$0xff] }
 0xeb4   :  { %3984 = vmatmul.bf16.vlgmr.msra.gmra.mxu0 %v3975_v25  ;;  %3997 = vmatmul.bf16.vlgmr.msra.gmra.mxu1 %v3975_v25 }
 0xeb5   :  { %4010 = vmatmul.bf16.vlgmr.msra.gmra.mxu2 %v3975_v25  ;;  %4023 = vmatmul.bf16.vlgmr.msra.gmra.mxu3 %v3975_v25  ;;  %v9723_v25 = vld [vmem:[#allocation26_spill] sm:$0xff] }
 0xeb6   :  { %4099 = vmatpush.bf16.msra.mxu0 %v8426_v22  ;;  %4112 = vmatpush.bf16.msra.mxu1 %v8428_v16 }
 0xeb7   :  { %4125 = vmatpush.bf16.msra.mxu2 %v8430_v62  ;;  %4138 = vmatpush.bf16.msra.mxu3 %v8432_v37 }
 0xeba   :  { %v8671_v18 = vpop.f32.mrf.mxu2  ;;  %v8673_v31 = vpop.f32.mrf.mxu3  ;;  %4100 = vmatpush.bf16.msra.mxu0 %v8440_v49  ;;  %4113 = vmatpush.bf16.msra.mxu1 %v8442_v56 }
 0xebb   :  { %v3934_v54 = vpop.f32.mrf.mxu0  ;;  %v3947_v40 = vpop.f32.mrf.mxu1  ;;  %4126 = vmatpush.bf16.msra.mxu2 %v8446_v59  ;;  %4139 = vmatpush.bf16.msra.mxu3 %v9687_v32 }
 0xebc   :  { %v9724_v54 = vld [vmem:[#allocation27_spill] sm:$0xff]  ;;  %v9725_v40 = vld [vmem:[#allocation28_spill] sm:$0xff] }
 0xebe   :  { %4101 = vmatpush.bf16.msra.mxu0 %v9688_v42  ;;  %4114 = vmatpush.bf16.msra.mxu1 %v9689_v51 }
 0xebf   :  { %4127 = vmatpush.bf16.msra.mxu2 %v8458_v50  ;;  %4140 = vmatpush.bf16.msra.mxu3 %v9690_v23 }
 0xec2   :  { %v3960_v43 = vpop.f32.mrf.mxu2  ;;  %v3973_v28 = vpop.f32.mrf.mxu3  ;;  %4102 = vmatpush.bf16.msra.mxu0 %v9691_v63  ;;  %4115 = vmatpush.bf16.msra.mxu1 %v9692_v3 }
 0xec3   :  { %4128 = vmatpush.bf16.msra.mxu2 %v9693_v6  ;;  %4141 = vmatpush.bf16.msra.mxu3 %v9694_v0  ;;  %v9726_v43 = vld [vmem:[#allocation29_spill] sm:$0xff]  ;;  %v9727_v28 = vld [vmem:[#allocation30_spill] sm:$0xff] }
 0xec4   :  { %4054 = vmatmul.bf16.vlgmr.msrb.gmra.mxu0 %v9712_v21  ;;  %4067 = vmatmul.bf16.vlgmr.msrb.gmra.mxu1 %v9712_v21 }
 0xec5   :  { %4080 = vmatmul.bf16.vlgmr.msrb.gmra.mxu2 %v9712_v21  ;;  %4093 = vmatmul.bf16.vlgmr.msrb.gmra.mxu3 %v9712_v21  ;;  %v9728_v21 = vld [vmem:[#allocation31_spill] sm:$0xff] }
 0xec6   :  { %4103 = vmatpush.bf16.msra.mxu0 %v9695_v17  ;;  %4116 = vmatpush.bf16.msra.mxu1 %v9696_v45 }
 0xec7   :  { %4129 = vmatpush.bf16.msra.mxu2 %v9697_v39  ;;  %4142 = vmatpush.bf16.msra.mxu3 %v9698_v53 }
 0xeca   :  { %4104 = vmatpush.bf16.msra.mxu0 %v9699_v5  ;;  %4117 = vmatpush.bf16.msra.mxu1 %v9700_v29 }
 0xecb   :  { %4130 = vmatpush.bf16.msra.mxu2 %v8498_v11  ;;  %4143 = vmatpush.bf16.msra.mxu3 %v8500_v1 }
 0xece   :  { %4105 = vmatpush.bf16.msra.mxu0 %v8504_v33  ;;  %4118 = vmatpush.bf16.msra.mxu1 %v8506_v27 }
 0xecf   :  { %4131 = vmatpush.bf16.msra.mxu2 %v8510_v26  ;;  %4144 = vmatpush.bf16.msra.mxu3 %v8512_v48 }
 0xed2   :  { %4106 = vmatpush.bf16.msra.mxu0 %v8516_v4  ;;  %4119 = vmatpush.bf16.msra.mxu1 %v8518_v35 }
 0xed3   :  { %4132 = vmatpush.bf16.msra.mxu2 %v8522_v8  ;;  %4145 = vmatpush.bf16.msra.mxu3 %v8524_v2 }
 0xed6   :  { %4169 = vmatpush.bf16.msrb.mxu0 %v8320_v55  ;;  %4182 = vmatpush.bf16.msrb.mxu1 %v8322_v19 }
 0xed7   :  { %4195 = vmatpush.bf16.msrb.mxu2 %v8324_v58  ;;  %4208 = vmatpush.bf16.msrb.mxu3 %v8327_v52 }
 0xeda   :  { %4170 = vmatpush.bf16.msrb.mxu0 %v8332_v38  ;;  %4183 = vmatpush.bf16.msrb.mxu1 %v8334_v10 }
 0xedb   :  { %4196 = vmatpush.bf16.msrb.mxu2 %v8336_v24  ;;  %4209 = vmatpush.bf16.msrb.mxu3 %v8339_v60 }
 0xede   :  { %4171 = vmatpush.bf16.msrb.mxu0 %v8344_v9  ;;  %4184 = vmatpush.bf16.msrb.mxu1 %v8346_v30 }
 0xedf   :  { %4197 = vmatpush.bf16.msrb.mxu2 %v9713_v47  ;;  %4210 = vmatpush.bf16.msrb.mxu3 %v9714_v7 }
 0xee2   :  { %4172 = vmatpush.bf16.msrb.mxu0 %v9715_v41  ;;  %4185 = vmatpush.bf16.msrb.mxu1 %v9716_v34  ;;  %v9738_v41 = vld [vmem:[#allocation44_spill] sm:$0xff] }
 0xee3   :  { %4198 = vmatpush.bf16.msrb.mxu2 %v9717_v61  ;;  %4211 = vmatpush.bf16.msrb.mxu3 %v9718_v46 }
 0xee6   :  { %4173 = vmatpush.bf16.msrb.mxu0 %v9719_v36  ;;  %4186 = vmatpush.bf16.msrb.mxu1 %v9720_v14  ;;  %v9730_v36 = vld [vmem:[#allocation33_spill] sm:$0xff]  ;;  %v9731_v14 = vld [vmem:[#allocation34_spill] sm:$0xff] }
 0xee7   :  { %4199 = vmatpush.bf16.msrb.mxu2 %v9721_v12  ;;  %4212 = vmatpush.bf16.msrb.mxu3 %v9722_v20  ;;  %v9732_v12 = vld [vmem:[#allocation35_spill] sm:$0xff]  ;;  %v9733_v20 = vld [vmem:[#allocation36_spill] sm:$0xff] }
 0xeea   :  { %4174 = vmatpush.bf16.msrb.mxu0 %v9723_v25  ;;  %4187 = vmatpush.bf16.msrb.mxu1 %v9724_v54  ;;  %v9734_v25 = vld [vmem:[#allocation37_spill] sm:$0xff] }
 0xeeb   :  { %4200 = vmatpush.bf16.msrb.mxu2 %v9725_v40  ;;  %4213 = vmatpush.bf16.msrb.mxu3 %v9726_v43  ;;  %v9735_v54 = vld [vmem:[#allocation41_spill] sm:$0xff]  ;;  %v9736_v43 = vld [vmem:[#allocation42_spill] sm:$0xff] }
 0xeec   :  { %v3933_v40 = vadd.f32 %v8661_v15, %v9735_v54 }
 0xeee   :  { %4175 = vmatpush.bf16.msrb.mxu0 %v9727_v28  ;;  %4188 = vmatpush.bf16.msrb.mxu1 %v9728_v21  ;;  %v3946_v28 = vadd.f32 %v8663_v44, %v9736_v43 }
 0xeef   :  { %4201 = vmatpush.bf16.msrb.mxu2 %v9729_v13  ;;  %4214 = vmatpush.bf16.msrb.mxu3 %v9730_v36 }
 0xef2   :  { %4176 = vmatpush.bf16.msrb.mxu0 %v9731_v14  ;;  %4189 = vmatpush.bf16.msrb.mxu1 %v9732_v12  ;;  %v9737_v14 = vld [vmem:[#allocation43_spill] sm:$0xff] }
 0xef3   :  { %4202 = vmatpush.bf16.msrb.mxu2 %v9733_v20  ;;  %4215 = vmatpush.bf16.msrb.mxu3 %v9734_v25  ;;  %v3959_v12 = vadd.f32 %v8671_v18, %v9737_v14  ;;  %v3972_v20 = vadd.f32 %v8673_v31, %v9738_v41 }
 0xf31   :  { %v3985_v46 = vpop.f32.mrf.mxu0  ;;  %v3998_v21 = vpop.f32.mrf.mxu1 }
 0xf32   :  { %v3986_v61 = vadd.f32 %v3985_v46, %v3933_v40  ;;  %v3999_v13 = vadd.f32 %v3998_v21, %v3946_v28 }
 0xf34   :  { %v4028_v34 = vmul.f32 0.5, %v3986_v61  ;;  %v4029_v36 = vmul.f32 0.5, %v3999_v13 }
 0xf36   :  { %6252 = vtanh.f32 %v4028_v34 }
 0xf37   :  { %6254 = vtanh.f32 %v4029_v36 }
 0xf38   :  { %v4011_v25 = vpop.f32.mrf.mxu2  ;;  %v4024_v7 = vpop.f32.mrf.mxu3 }
 0xf39   :  { %v4012_v15 = vadd.f32 %v4011_v25, %v3959_v12  ;;  %v4025_v54 = vadd.f32 %v4024_v7, %v3972_v20  ;;  %v3987_v47 = vpop.f32.mrf.mxu0  ;;  %v4000_v44 = vpop.f32.mrf.mxu1 }
 0xf3b   :  { %6256 = vtanh.f32 %v4012_v15  ;;  %v4037_v43 = vmul.f32 0.5, %v4025_v54 }
 0xf3c   :  { %v6253_v46 = vpop.eup %6252 }
 0xf3d   :  { %v6255_v40 = vpop.eup %6254  ;;  %v4032_v61 = vmul.f32 0.5, %v6253_v46  ;;  %6258 = vtanh.f32 %v4037_v43 }
 0xf3e   :  { %v4033_v13 = vmul.f32 0.5, %v6255_v40 }
 0xf3f   :  { %v4034_v34 = vadd.f32 0.5, %v4032_v61 }
 0xf40   :  { %v4035_v28 = vadd.f32 0.5, %v4033_v13  ;;  %v4013_v18 = vpop.f32.mrf.mxu2  ;;  %v4026_v21 = vpop.f32.mrf.mxu3 }
 0xf41   :  { %v6257_v14 = vpop.eup %6256  ;;  %v8747_v31 = vpop.f32.mrf.mxu0  ;;  %v9741_v18 = vld [vmem:[#allocation20_spill] sm:$0xff]  ;;  %v9742_v21 = vld [vmem:[#allocation21_spill] sm:$0xff] }
 0xf42   :  { %v8749_v36 = vpop.f32.mrf.mxu1  ;;  %v4041_v7 = vmul.f32 %v4035_v28, %v8656_v57  ;;  %v4042_v47 = vmul.f32 %v6257_v14, %v4034_v34  ;;  %v9739_v34 = vld [vmem:[#allocation60_spill] sm:$0xff]  ;;  %v9740_v28 = vld [vmem:[#allocation19_spill] sm:$0xff] }
 0xf43   :  { %v6259_v12 = vpop.eup %6258 }
 0xf44   :  { %v8752_v20 = vadd.f32 %v4042_v47, %v4041_v7  ;;  %v4039_v25 = vmul.f32 0.5, %v6259_v12  ;;  %v9743_v7 = vld [vmem:[#allocation48_spill] sm:$0xff]  ;;  %v9744_v47 = vld [vmem:[#allocation22_spill] sm:$0xff] }
 0xf45   :  { %v9745_v12 = vld [vmem:[#allocation54_spill] sm:$0xff] }
 0xf46   :  { %6260 = vtanh.f32 %v8752_v20  ;;  %v4040_v46 = vadd.f32 0.5, %v4039_v25  ;;  %v9746_v25 = vld [vmem:[#allocation23_spill] sm:$0xff] }
 0xf48   :  { %v8755_v54 = vpop.f32.mrf.mxu2  ;;  %v8757_v43 = vpop.f32.mrf.mxu3 }
 0xf49   :  { %v4057_v15 = vpop.f32.mrf.mxu0 }
 0xf4a   :  { %v4070_v44 = vpop.f32.mrf.mxu1  ;;  %v9747_v15 = vld [vmem:[#allocation24_spill] sm:$0xff] }
 0xf4b   :  { %v9748_v44 = vld [vmem:[#allocation25_spill] sm:$0xff] }
 0xf4c   :  { %v6261_v40 = vpop.eup %6260 }
 0xf4d   :  { %v8759_v61 = vmul.f32 %v6261_v40, %v4040_v46  ;;  %v9749_v46 = vld [vmem:[#allocation49_spill] sm:$0xff]  ;;  %v9750_v40 = vld [vmem:[#allocation26_spill] sm:$0xff] }
 0xf4f   :  { %v4098_v57 = vpack.c.bf16 %v8759_v61, %v8759_v61 }
 0xf50   :  { %v4083_v14 = vpop.f32.mrf.mxu2  ;;  %v4096_v13 = vpop.f32.mrf.mxu3 }
 0xf51   :  { %4107 = vmatmul.bf16.vlgmr.msra.gmra.mxu0 %v4098_v57  ;;  %4120 = vmatmul.bf16.vlgmr.msra.gmra.mxu1 %v4098_v57  ;;  %v9752_v14 = vld [vmem:[#allocation28_spill] sm:$0xff]  ;;  %v9753_v13 = vld [vmem:[#allocation29_spill] sm:$0xff] }
 0xf52   :  { %4133 = vmatmul.bf16.vlgmr.msra.gmra.mxu2 %v4098_v57  ;;  %4146 = vmatmul.bf16.vlgmr.msra.gmra.mxu3 %v4098_v57  ;;  %v9751_v57 = vld [vmem:[#allocation27_spill] sm:$0xff] }
 0xf53   :  { %4222 = vmatpush.bf16.msra.mxu0 %v8426_v22  ;;  %4235 = vmatpush.bf16.msra.mxu1 %v8428_v16 }
 0xf54   :  { %4248 = vmatpush.bf16.msra.mxu2 %v8430_v62  ;;  %4261 = vmatpush.bf16.msra.mxu3 %v8432_v37 }
 0xf57   :  { %4223 = vmatpush.bf16.msra.mxu0 %v8440_v49  ;;  %4236 = vmatpush.bf16.msra.mxu1 %v8442_v56 }
 0xf58   :  { %4249 = vmatpush.bf16.msra.mxu2 %v8446_v59  ;;  %4262 = vmatpush.bf16.msra.mxu3 %v9687_v32 }
 0xf5b   :  { %4224 = vmatpush.bf16.msra.mxu0 %v9688_v42  ;;  %4237 = vmatpush.bf16.msra.mxu1 %v9689_v51 }
 0xf5c   :  { %4250 = vmatpush.bf16.msra.mxu2 %v8458_v50  ;;  %4263 = vmatpush.bf16.msra.mxu3 %v9690_v23 }
 0xf5f   :  { %4225 = vmatpush.bf16.msra.mxu0 %v9691_v63  ;;  %4238 = vmatpush.bf16.msra.mxu1 %v9692_v3 }
 0xf60   :  { %4251 = vmatpush.bf16.msra.mxu2 %v9693_v6  ;;  %4264 = vmatpush.bf16.msra.mxu3 %v9694_v0 }
 0xf61   :  { %4177 = vmatmul.bf16.vlgmr.msrb.gmra.mxu0 %v9739_v34  ;;  %4190 = vmatmul.bf16.vlgmr.msrb.gmra.mxu1 %v9739_v34 }
 0xf62   :  { %4203 = vmatmul.bf16.vlgmr.msrb.gmra.mxu2 %v9739_v34  ;;  %4216 = vmatmul.bf16.vlgmr.msrb.gmra.mxu3 %v9739_v34  ;;  %v9754_v34 = vld [vmem:[#allocation30_spill] sm:$0xff] }
 0xf63   :  { %4226 = vmatpush.bf16.msra.mxu0 %v9695_v17  ;;  %4239 = vmatpush.bf16.msra.mxu1 %v9696_v45 }
 0xf64   :  { %4252 = vmatpush.bf16.msra.mxu2 %v9697_v39  ;;  %4265 = vmatpush.bf16.msra.mxu3 %v9698_v53 }
 0xf67   :  { %4227 = vmatpush.bf16.msra.mxu0 %v9699_v5  ;;  %4240 = vmatpush.bf16.msra.mxu1 %v9700_v29 }
 0xf68   :  { %4253 = vmatpush.bf16.msra.mxu2 %v8498_v11  ;;  %4266 = vmatpush.bf16.msra.mxu3 %v8500_v1 }
 0xf6b   :  { %4228 = vmatpush.bf16.msra.mxu0 %v8504_v33  ;;  %4241 = vmatpush.bf16.msra.mxu1 %v8506_v27 }
 0xf6c   :  { %4254 = vmatpush.bf16.msra.mxu2 %v8510_v26  ;;  %4267 = vmatpush.bf16.msra.mxu3 %v8512_v48 }
 0xf6f   :  { %4229 = vmatpush.bf16.msra.mxu0 %v8516_v4  ;;  %4242 = vmatpush.bf16.msra.mxu1 %v8518_v35 }
 0xf70   :  { %4255 = vmatpush.bf16.msra.mxu2 %v8522_v8  ;;  %4268 = vmatpush.bf16.msra.mxu3 %v8524_v2 }
 0xf73   :  { %4292 = vmatpush.bf16.msrb.mxu0 %v8320_v55  ;;  %4305 = vmatpush.bf16.msrb.mxu1 %v8322_v19 }
 0xf74   :  { %4318 = vmatpush.bf16.msrb.mxu2 %v8324_v58  ;;  %4331 = vmatpush.bf16.msrb.mxu3 %v8327_v52 }
 0xf77   :  { %4293 = vmatpush.bf16.msrb.mxu0 %v8332_v38  ;;  %4306 = vmatpush.bf16.msrb.mxu1 %v8334_v10 }
 0xf78   :  { %4319 = vmatpush.bf16.msrb.mxu2 %v8336_v24  ;;  %4332 = vmatpush.bf16.msrb.mxu3 %v8339_v60 }
 0xf7b   :  { %4294 = vmatpush.bf16.msrb.mxu0 %v8344_v9  ;;  %4307 = vmatpush.bf16.msrb.mxu1 %v8346_v30 }
 0xf7c   :  { %4320 = vmatpush.bf16.msrb.mxu2 %v9740_v28  ;;  %4333 = vmatpush.bf16.msrb.mxu3 %v9741_v18 }
 0xf7f   :  { %4295 = vmatpush.bf16.msrb.mxu0 %v9742_v21  ;;  %4308 = vmatpush.bf16.msrb.mxu1 %v9743_v7 }
 0xf80   :  { %4321 = vmatpush.bf16.msrb.mxu2 %v9744_v47  ;;  %4334 = vmatpush.bf16.msrb.mxu3 %v9745_v12  ;;  %v9755_v47 = vld [vmem:[#allocation31_spill] sm:$0xff]  ;;  %v9756_v12 = vld [vmem:[#allocation32_spill] sm:$0xff] }
 0xf83   :  { %4296 = vmatpush.bf16.msrb.mxu0 %v9746_v25  ;;  %4309 = vmatpush.bf16.msrb.mxu1 %v9747_v15  ;;  %v9757_v25 = vld [vmem:[#allocation33_spill] sm:$0xff]  ;;  %v9758_v15 = vld [vmem:[#allocation34_spill] sm:$0xff] }
 0xf84   :  { %4322 = vmatpush.bf16.msrb.mxu2 %v9748_v44  ;;  %4335 = vmatpush.bf16.msrb.mxu3 %v9749_v46  ;;  %v9759_v44 = vld [vmem:[#allocation35_spill] sm:$0xff]  ;;  %v9760_v46 = vld [vmem:[#allocation36_spill] sm:$0xff] }
 0xf87   :  { %4297 = vmatpush.bf16.msrb.mxu0 %v9750_v40  ;;  %4310 = vmatpush.bf16.msrb.mxu1 %v9751_v57  ;;  %v9761_v40 = vld [vmem:[#allocation37_spill] sm:$0xff] }
 0xf88   :  { %4323 = vmatpush.bf16.msrb.mxu2 %v9752_v14  ;;  %4336 = vmatpush.bf16.msrb.mxu3 %v9753_v13  ;;  %v9762_v57 = vld [vmem:[#allocation41_spill] sm:$0xff]  ;;  %v9763_v13 = vld [vmem:[#allocation42_spill] sm:$0xff] }
 0xf89   :  { %v4056_v14 = vadd.f32 %v8747_v31, %v9762_v57 }
 0xf8b   :  { %4298 = vmatpush.bf16.msrb.mxu0 %v9754_v34  ;;  %4311 = vmatpush.bf16.msrb.mxu1 %v9755_v47  ;;  %v4069_v34 = vadd.f32 %v8749_v36, %v9763_v13 }
 0xf8c   :  { %4324 = vmatpush.bf16.msrb.mxu2 %v9756_v12  ;;  %4337 = vmatpush.bf16.msrb.mxu3 %v9757_v25 }
 0xf8f   :  { %4299 = vmatpush.bf16.msrb.mxu0 %v9758_v15  ;;  %4312 = vmatpush.bf16.msrb.mxu1 %v9759_v44  ;;  %v9764_v15 = vld [vmem:[#allocation43_spill] sm:$0xff] }
 0xf90   :  { %4325 = vmatpush.bf16.msrb.mxu2 %v9760_v46  ;;  %4338 = vmatpush.bf16.msrb.mxu3 %v9761_v40  ;;  %v4082_v44 = vadd.f32 %v8755_v54, %v9764_v15  ;;  %v4095_v46 = vadd.f32 %v8757_v43, %v9738_v41 }
 0xfce   :  { %v4108_v7 = vpop.f32.mrf.mxu0  ;;  %v4121_v47 = vpop.f32.mrf.mxu1 }
 0xfcf   :  { %v4109_v21 = vadd.f32 %v4108_v7, %v4056_v14  ;;  %v4122_v12 = vadd.f32 %v4121_v47, %v4069_v34 }
 0xfd1   :  { %v4151_v18 = vmul.f32 0.5, %v4109_v21  ;;  %v4152_v25 = vmul.f32 0.5, %v4122_v12 }
 0xfd3   :  { %6262 = vtanh.f32 %v4151_v18 }
 0xfd4   :  { %6264 = vtanh.f32 %v4152_v25 }
 0xfd5   :  { %v4134_v40 = vpop.f32.mrf.mxu2  ;;  %v4147_v28 = vpop.f32.mrf.mxu3 }
 0xfd6   :  { %v4135_v31 = vadd.f32 %v4134_v40, %v4082_v44  ;;  %v4148_v57 = vadd.f32 %v4147_v28, %v4095_v46  ;;  %v4110_v30 = vpop.f32.mrf.mxu0  ;;  %v4123_v36 = vpop.f32.mrf.mxu1 }
 0xfd8   :  { %6266 = vtanh.f32 %v4135_v31  ;;  %v4160_v13 = vmul.f32 0.5, %v4148_v57 }
 0xfd9   :  { %v6263_v7 = vpop.eup %6262 }
 0xfda   :  { %v6265_v47 = vpop.eup %6264  ;;  %v4155_v21 = vmul.f32 0.5, %v6263_v7  ;;  %6268 = vtanh.f32 %v4160_v13 }
 0xfdb   :  { %v4156_v12 = vmul.f32 0.5, %v6265_v47 }
 0xfdc   :  { %v4157_v18 = vadd.f32 0.5, %v4155_v21  ;;  %v4786_v21 = vrot.slane %v8759_v61, 7  ;;  %v9766_v61 = vld [vmem:[#allocation61_spill] sm:$0xff] }
 0xfdd   :  { %v4158_v14 = vadd.f32 0.5, %v4156_v12  ;;  %v4136_v54 = vpop.f32.mrf.mxu2  ;;  %v4149_v34 = vpop.f32.mrf.mxu3 }
 0xfde   :  { %v6267_v15 = vpop.eup %6266  ;;  %v8839_v43 = vpop.f32.mrf.mxu0 }
 0xfdf   :  { %v8841_v25 = vpop.f32.mrf.mxu1  ;;  %v4164_v28 = vmul.f32 %v4158_v14, %v8752_v20  ;;  %v4165_v30 = vmul.f32 %v6267_v15, %v4157_v18  ;;  %v9765_v18 = vld [vmem:[#allocation45_spill] sm:$0xff] }
 0xfe0   :  { %v6269_v44 = vpop.eup %6268  ;;  %v4807_v14 = vsel %vm4806_vm0, %v9765_v18, %v4786_v21  ;;  %v9774_v21 = vld [vmem:[#allocation23_spill] sm:$0xff]  ;;  %v9778_v18 = vld [vmem:[#allocation26_spill] sm:$0xff] }
 0xfe1   :  { %v8844_v46 = vadd.f32 %v4165_v30, %v4164_v28  ;;  %v4162_v40 = vmul.f32 0.5, %v6269_v44  ;;  %v9767_v30 = vld [vmem:[#allocation18_spill] sm:$0xff]  ;;  %v9768_v44 = vld [vmem:[#allocation19_spill] sm:$0xff] }
 0xfe3   :  { %6270 = vtanh.f32 %v8844_v46  ;;  %v4163_v7 = vadd.f32 0.5, %v4162_v40  ;;  %v9769_v40 = vld [vmem:[#allocation20_spill] sm:$0xff] }
 0xfe5   :  { %v8847_v57 = vpop.f32.mrf.mxu2  ;;  %v8849_v13 = vpop.f32.mrf.mxu3 }
 0xfe6   :  { %v4180_v31 = vpop.f32.mrf.mxu0 }
 0xfe7   :  { %v4193_v36 = vpop.f32.mrf.mxu1  ;;  %v9770_v31 = vld [vmem:[#allocation21_spill] sm:$0xff] }
 0xfe8   :  { %v9771_v36 = vld [vmem:[#allocation48_spill] sm:$0xff] }
 0xfe9   :  { %v6271_v47 = vpop.eup %6270 }
 0xfea   :  { %v4168_v12 = vmul.f32 %v6271_v47, %v4163_v7  ;;  %v9772_v7 = vld [vmem:[#allocation22_spill] sm:$0xff] }
 0xfeb   :  { %v9773_v47 = vld [vmem:[#allocation54_spill] sm:$0xff] }
 0xfec   :  { %v4221_v20 = vpack.c.bf16 %v4168_v12, %v4168_v12  ;;  %v4789_v15 = vrot.slane %v4168_v12, 6  ;;  %v9775_v12 = vld [vmem:[#allocation24_spill] sm:$0xff] }
 0xfed   :  { %v4206_v54 = vpop.f32.mrf.mxu2  ;;  %v4219_v34 = vpop.f32.mrf.mxu3 }
 0xfee   :  { %v8853_v28 = vsel %vm4808_vm1, %v4807_v14, %v4789_v15  ;;  %4230 = vmatmul.bf16.vlgmr.msra.gmra.mxu0 %v4221_v20  ;;  %4243 = vmatmul.bf16.vlgmr.msra.gmra.mxu1 %v4221_v20  ;;  %v9777_v15 = vld [vmem:[#allocation49_spill] sm:$0xff]  ;;  %v9779_v14 = vld [vmem:[#allocation27_spill] sm:$0xff]  ;;  %v9780_v54 = vld [vmem:[#allocation28_spill] sm:$0xff] }
 0xfef   :  { %4256 = vmatmul.bf16.vlgmr.msra.gmra.mxu2 %v4221_v20  ;;  %4269 = vmatmul.bf16.vlgmr.msra.gmra.mxu3 %v4221_v20  ;;  %v9776_v20 = vld [vmem:[#allocation25_spill] sm:$0xff] }
 0xff0   :  { %4345 = vmatpush.bf16.msra.mxu0 %v8426_v22  ;;  %4358 = vmatpush.bf16.msra.mxu1 %v8428_v16  ;;  %v9781_v34 = vld [vmem:[#allocation29_spill] sm:$0xff] }
 0xff1   :  { %4371 = vmatpush.bf16.msra.mxu2 %v8430_v62  ;;  %4384 = vmatpush.bf16.msra.mxu3 %v8432_v37 }
 0xff4   :  { %4346 = vmatpush.bf16.msra.mxu0 %v8440_v49  ;;  %4359 = vmatpush.bf16.msra.mxu1 %v8442_v56 }
 0xff5   :  { %4372 = vmatpush.bf16.msra.mxu2 %v8446_v59  ;;  %4385 = vmatpush.bf16.msra.mxu3 %v9687_v32 }
 0xff8   :  { %4347 = vmatpush.bf16.msra.mxu0 %v9688_v42  ;;  %4360 = vmatpush.bf16.msra.mxu1 %v9689_v51 }
 0xff9   :  { %4373 = vmatpush.bf16.msra.mxu2 %v8458_v50  ;;  %4386 = vmatpush.bf16.msra.mxu3 %v9690_v23 }
 0xffc   :  { %4348 = vmatpush.bf16.msra.mxu0 %v9691_v63  ;;  %4361 = vmatpush.bf16.msra.mxu1 %v9692_v3 }
 0xffd   :  { %4374 = vmatpush.bf16.msra.mxu2 %v9693_v6  ;;  %4387 = vmatpush.bf16.msra.mxu3 %v9694_v0 }
 0xffe   :  { %4300 = vmatmul.bf16.vlgmr.msrb.gmra.mxu0 %v9766_v61  ;;  %4313 = vmatmul.bf16.vlgmr.msrb.gmra.mxu1 %v9766_v61 }
 0xfff   :  { %4326 = vmatmul.bf16.vlgmr.msrb.gmra.mxu2 %v9766_v61  ;;  %4339 = vmatmul.bf16.vlgmr.msrb.gmra.mxu3 %v9766_v61  ;;  %v9782_v61 = vld [vmem:[#allocation30_spill] sm:$0xff] }
0x1000   :  { %4349 = vmatpush.bf16.msra.mxu0 %v9695_v17  ;;  %4362 = vmatpush.bf16.msra.mxu1 %v9696_v45 }
0x1001   :  { %4375 = vmatpush.bf16.msra.mxu2 %v9697_v39  ;;  %4388 = vmatpush.bf16.msra.mxu3 %v9698_v53 }
0x1004   :  { %4350 = vmatpush.bf16.msra.mxu0 %v9699_v5  ;;  %4363 = vmatpush.bf16.msra.mxu1 %v9700_v29 }
0x1005   :  { %4376 = vmatpush.bf16.msra.mxu2 %v8498_v11  ;;  %4389 = vmatpush.bf16.msra.mxu3 %v8500_v1 }
0x1008   :  { %4351 = vmatpush.bf16.msra.mxu0 %v8504_v33  ;;  %4364 = vmatpush.bf16.msra.mxu1 %v8506_v27 }
0x1009   :  { %4377 = vmatpush.bf16.msra.mxu2 %v8510_v26  ;;  %4390 = vmatpush.bf16.msra.mxu3 %v8512_v48 }
0x100c   :  { %4352 = vmatpush.bf16.msra.mxu0 %v8516_v4  ;;  %4365 = vmatpush.bf16.msra.mxu1 %v8518_v35 }
0x100d   :  { %4378 = vmatpush.bf16.msra.mxu2 %v8522_v8  ;;  %4391 = vmatpush.bf16.msra.mxu3 %v8524_v2 }
0x1010   :  { %4415 = vmatpush.bf16.msrb.mxu0 %v8320_v55  ;;  %4428 = vmatpush.bf16.msrb.mxu1 %v8322_v19 }
0x1011   :  { %4441 = vmatpush.bf16.msrb.mxu2 %v8324_v58  ;;  %4454 = vmatpush.bf16.msrb.mxu3 %v8327_v52 }
0x1014   :  { %4416 = vmatpush.bf16.msrb.mxu0 %v8332_v38  ;;  %4429 = vmatpush.bf16.msrb.mxu1 %v8334_v10 }
0x1015   :  { %4442 = vmatpush.bf16.msrb.mxu2 %v8336_v24  ;;  %4455 = vmatpush.bf16.msrb.mxu3 %v8339_v60 }
0x1018   :  { %4417 = vmatpush.bf16.msrb.mxu0 %v8344_v9  ;;  %4430 = vmatpush.bf16.msrb.mxu1 %v9767_v30 }
0x1019   :  { %4443 = vmatpush.bf16.msrb.mxu2 %v9768_v44  ;;  %4456 = vmatpush.bf16.msrb.mxu3 %v9769_v40 }
0x101c   :  { %4418 = vmatpush.bf16.msrb.mxu0 %v9770_v31  ;;  %4431 = vmatpush.bf16.msrb.mxu1 %v9771_v36 }
0x101d   :  { %4444 = vmatpush.bf16.msrb.mxu2 %v9772_v7  ;;  %4457 = vmatpush.bf16.msrb.mxu3 %v9773_v47  ;;  %v9783_v7 = vld [vmem:[#allocation31_spill] sm:$0xff]  ;;  %v9784_v47 = vld [vmem:[#allocation32_spill] sm:$0xff] }
0x1020   :  { %4419 = vmatpush.bf16.msrb.mxu0 %v9774_v21  ;;  %4432 = vmatpush.bf16.msrb.mxu1 %v9775_v12  ;;  %v9785_v21 = vld [vmem:[#allocation33_spill] sm:$0xff]  ;;  %v9786_v12 = vld [vmem:[#allocation34_spill] sm:$0xff] }
0x1021   :  { %4445 = vmatpush.bf16.msrb.mxu2 %v9776_v20  ;;  %4458 = vmatpush.bf16.msrb.mxu3 %v9777_v15  ;;  %v9787_v20 = vld [vmem:[#allocation35_spill] sm:$0xff]  ;;  %v9788_v15 = vld [vmem:[#allocation36_spill] sm:$0xff] }
0x1024   :  { %4420 = vmatpush.bf16.msrb.mxu0 %v9778_v18  ;;  %4433 = vmatpush.bf16.msrb.mxu1 %v9779_v14  ;;  %v9789_v18 = vld [vmem:[#allocation37_spill] sm:$0xff] }
0x1025   :  { %4446 = vmatpush.bf16.msrb.mxu2 %v9780_v54  ;;  %4459 = vmatpush.bf16.msrb.mxu3 %v9781_v34  ;;  %v9790_v14 = vld [vmem:[#allocation41_spill] sm:$0xff]  ;;  %v9791_v34 = vld [vmem:[#allocation42_spill] sm:$0xff] }
0x1026   :  { %v4179_v54 = vadd.f32 %v8839_v43, %v9790_v14 }
0x1028   :  { %4421 = vmatpush.bf16.msrb.mxu0 %v9782_v61  ;;  %4434 = vmatpush.bf16.msrb.mxu1 %v9783_v7  ;;  %v4192_v61 = vadd.f32 %v8841_v25, %v9791_v34 }
0x1029   :  { %4447 = vmatpush.bf16.msrb.mxu2 %v9784_v47  ;;  %4460 = vmatpush.bf16.msrb.mxu3 %v9785_v21 }
0x102c   :  { %4422 = vmatpush.bf16.msrb.mxu0 %v9786_v12  ;;  %4435 = vmatpush.bf16.msrb.mxu1 %v9787_v20  ;;  %v9792_v12 = vld [vmem:[#allocation43_spill] sm:$0xff] }
0x102d   :  { %4448 = vmatpush.bf16.msrb.mxu2 %v9788_v15  ;;  %4461 = vmatpush.bf16.msrb.mxu3 %v9789_v18  ;;  %v4205_v20 = vadd.f32 %v8847_v57, %v9792_v12  ;;  %v4218_v15 = vadd.f32 %v8849_v13, %v9738_v41 }
0x106b   :  { %v4231_v36 = vpop.f32.mrf.mxu0  ;;  %v4244_v7 = vpop.f32.mrf.mxu1 }
0x106c   :  { %v4232_v31 = vadd.f32 %v4231_v36, %v4179_v54  ;;  %v4245_v47 = vadd.f32 %v4244_v7, %v4192_v61 }
0x106e   :  { %v4274_v40 = vmul.f32 0.5, %v4232_v31  ;;  %v4275_v21 = vmul.f32 0.5, %v4245_v47 }
0x1070   :  { %6272 = vtanh.f32 %v4274_v40 }
0x1071   :  { %6274 = vtanh.f32 %v4275_v21 }
0x1072   :  { %v4257_v18 = vpop.f32.mrf.mxu2  ;;  %v4270_v44 = vpop.f32.mrf.mxu3 }
0x1073   :  { %v4258_v43 = vadd.f32 %v4257_v18, %v4205_v20  ;;  %v4271_v14 = vadd.f32 %v4270_v44, %v4218_v15  ;;  %v4233_v30 = vpop.f32.mrf.mxu0  ;;  %v4246_v25 = vpop.f32.mrf.mxu1 }
0x1075   :  { %6276 = vtanh.f32 %v4258_v43  ;;  %v4283_v34 = vmul.f32 0.5, %v4271_v14 }
0x1076   :  { %v6273_v36 = vpop.eup %6272 }
0x1077   :  { %v6275_v7 = vpop.eup %6274  ;;  %v4278_v31 = vmul.f32 0.5, %v6273_v36  ;;  %6278 = vtanh.f32 %v4283_v34 }
0x1078   :  { %v4279_v47 = vmul.f32 0.5, %v6275_v7 }
0x1079   :  { %v4280_v40 = vadd.f32 0.5, %v4278_v31 }
0x107a   :  { %v4281_v54 = vadd.f32 0.5, %v4279_v47  ;;  %v4259_v57 = vpop.f32.mrf.mxu2  ;;  %v4272_v61 = vpop.f32.mrf.mxu3 }
0x107b   :  { %v6277_v12 = vpop.eup %6276  ;;  %v8931_v13 = vpop.f32.mrf.mxu0  ;;  %v9795_v61 = vld [vmem:[#allocation19_spill] sm:$0xff] }
0x107c   :  { %v8933_v21 = vpop.f32.mrf.mxu1  ;;  %v4287_v44 = vmul.f32 %v4281_v54, %v8844_v46  ;;  %v4288_v30 = vmul.f32 %v6277_v12, %v4280_v40  ;;  %v9794_v54 = vld [vmem:[#allocation18_spill] sm:$0xff] }
0x107d   :  { %v6279_v20 = vpop.eup %6278 }
0x107e   :  { %v8936_v15 = vadd.f32 %v4288_v30, %v4287_v44  ;;  %v4285_v18 = vmul.f32 0.5, %v6279_v20  ;;  %v9796_v44 = vld [vmem:[#allocation20_spill] sm:$0xff]  ;;  %v9797_v30 = vld [vmem:[#allocation21_spill] sm:$0xff] }
0x107f   :  { %v9798_v20 = vld [vmem:[#allocation48_spill] sm:$0xff] }
0x1080   :  { %6280 = vtanh.f32 %v8936_v15  ;;  %v4286_v36 = vadd.f32 0.5, %v4285_v18  ;;  %v9799_v18 = vld [vmem:[#allocation22_spill] sm:$0xff] }
0x1082   :  { %v8939_v14 = vpop.f32.mrf.mxu2  ;;  %v8941_v34 = vpop.f32.mrf.mxu3 }
0x1083   :  { %v4303_v43 = vpop.f32.mrf.mxu0 }
0x1084   :  { %v4316_v25 = vpop.f32.mrf.mxu1  ;;  %v9800_v43 = vld [vmem:[#allocation54_spill] sm:$0xff] }
0x1085   :  { %v9801_v25 = vld [vmem:[#allocation23_spill] sm:$0xff] }
0x1086   :  { %v6281_v7 = vpop.eup %6280 }
0x1087   :  { %v4291_v31 = vmul.f32 %v6281_v7, %v4286_v36  ;;  %v9802_v36 = vld [vmem:[#allocation24_spill] sm:$0xff]  ;;  %v9803_v7 = vld [vmem:[#allocation25_spill] sm:$0xff] }
0x1089   :  { %v4344_v47 = vpack.c.bf16 %v4291_v31, %v4291_v31  ;;  %v4792_v57 = vrot.slane %v4291_v31, 5  ;;  %v9804_v31 = vld [vmem:[#allocation49_spill] sm:$0xff] }
0x108a   :  { %v4329_v46 = vpop.f32.mrf.mxu2  ;;  %v4342_v12 = vpop.f32.mrf.mxu3 }
0x108b   :  { %v8944_v40 = vsel %vm4810_vm2, %v8853_v28, %v4792_v57  ;;  %4353 = vmatmul.bf16.vlgmr.msra.gmra.mxu0 %v4344_v47  ;;  %4366 = vmatmul.bf16.vlgmr.msra.gmra.mxu1 %v4344_v47  ;;  %v9793_v28 = vld [vmem:[#allocation62_spill] sm:$0xff]  ;;  %v9806_v57 = vld [vmem:[#allocation27_spill] sm:$0xff]  ;;  %v9807_v46 = vld [vmem:[#allocation28_spill] sm:$0xff] }
0x108c   :  { %4379 = vmatmul.bf16.vlgmr.msra.gmra.mxu2 %v4344_v47  ;;  %4392 = vmatmul.bf16.vlgmr.msra.gmra.mxu3 %v4344_v47  ;;  %v9805_v47 = vld [vmem:[#allocation26_spill] sm:$0xff]  ;;  %v9808_v12 = vld [vmem:[#allocation29_spill] sm:$0xff] }
0x108d   :  { %4468 = vmatpush.bf16.msra.mxu0 %v8426_v22  ;;  %4481 = vmatpush.bf16.msra.mxu1 %v8428_v16 }
0x108e   :  { %4494 = vmatpush.bf16.msra.mxu2 %v8430_v62  ;;  %4507 = vmatpush.bf16.msra.mxu3 %v8432_v37 }
0x1091   :  { %4469 = vmatpush.bf16.msra.mxu0 %v8440_v49  ;;  %4482 = vmatpush.bf16.msra.mxu1 %v8442_v56 }
0x1092   :  { %4495 = vmatpush.bf16.msra.mxu2 %v8446_v59  ;;  %4508 = vmatpush.bf16.msra.mxu3 %v9687_v32 }
0x1095   :  { %4470 = vmatpush.bf16.msra.mxu0 %v9688_v42  ;;  %4483 = vmatpush.bf16.msra.mxu1 %v9689_v51 }
0x1096   :  { %4496 = vmatpush.bf16.msra.mxu2 %v8458_v50  ;;  %4509 = vmatpush.bf16.msra.mxu3 %v9690_v23 }
0x1099   :  { %4471 = vmatpush.bf16.msra.mxu0 %v9691_v63  ;;  %4484 = vmatpush.bf16.msra.mxu1 %v9692_v3 }
0x109a   :  { %4497 = vmatpush.bf16.msra.mxu2 %v9693_v6  ;;  %4510 = vmatpush.bf16.msra.mxu3 %v9694_v0 }
0x109b   :  { %4423 = vmatmul.bf16.vlgmr.msrb.gmra.mxu0 %v9793_v28  ;;  %4436 = vmatmul.bf16.vlgmr.msrb.gmra.mxu1 %v9793_v28 }
0x109c   :  { %4449 = vmatmul.bf16.vlgmr.msrb.gmra.mxu2 %v9793_v28  ;;  %4462 = vmatmul.bf16.vlgmr.msrb.gmra.mxu3 %v9793_v28  ;;  %v9809_v28 = vld [vmem:[#allocation30_spill] sm:$0xff] }
0x109d   :  { %4472 = vmatpush.bf16.msra.mxu0 %v9695_v17  ;;  %4485 = vmatpush.bf16.msra.mxu1 %v9696_v45 }
0x109e   :  { %4498 = vmatpush.bf16.msra.mxu2 %v9697_v39  ;;  %4511 = vmatpush.bf16.msra.mxu3 %v9698_v53 }
0x10a1   :  { %4473 = vmatpush.bf16.msra.mxu0 %v9699_v5  ;;  %4486 = vmatpush.bf16.msra.mxu1 %v9700_v29 }
0x10a2   :  { %4499 = vmatpush.bf16.msra.mxu2 %v8498_v11  ;;  %4512 = vmatpush.bf16.msra.mxu3 %v8500_v1 }
0x10a5   :  { %4474 = vmatpush.bf16.msra.mxu0 %v8504_v33  ;;  %4487 = vmatpush.bf16.msra.mxu1 %v8506_v27 }
0x10a6   :  { %4500 = vmatpush.bf16.msra.mxu2 %v8510_v26  ;;  %4513 = vmatpush.bf16.msra.mxu3 %v8512_v48 }
0x10a9   :  { %4475 = vmatpush.bf16.msra.mxu0 %v8516_v4  ;;  %4488 = vmatpush.bf16.msra.mxu1 %v8518_v35 }
0x10aa   :  { %4501 = vmatpush.bf16.msra.mxu2 %v8522_v8  ;;  %4514 = vmatpush.bf16.msra.mxu3 %v8524_v2 }
0x10ad   :  { %4538 = vmatpush.bf16.msrb.mxu0 %v8320_v55  ;;  %4551 = vmatpush.bf16.msrb.mxu1 %v8322_v19 }
0x10ae   :  { %4564 = vmatpush.bf16.msrb.mxu2 %v8324_v58  ;;  %4577 = vmatpush.bf16.msrb.mxu3 %v8327_v52 }
0x10b1   :  { %4539 = vmatpush.bf16.msrb.mxu0 %v8332_v38  ;;  %4552 = vmatpush.bf16.msrb.mxu1 %v8334_v10 }
0x10b2   :  { %4565 = vmatpush.bf16.msrb.mxu2 %v8336_v24  ;;  %4578 = vmatpush.bf16.msrb.mxu3 %v8339_v60 }
0x10b5   :  { %4540 = vmatpush.bf16.msrb.mxu0 %v8344_v9  ;;  %4553 = vmatpush.bf16.msrb.mxu1 %v9794_v54 }
0x10b6   :  { %4566 = vmatpush.bf16.msrb.mxu2 %v9795_v61  ;;  %4579 = vmatpush.bf16.msrb.mxu3 %v9796_v44 }
0x10b9   :  { %4541 = vmatpush.bf16.msrb.mxu0 %v9797_v30  ;;  %4554 = vmatpush.bf16.msrb.mxu1 %v9798_v20 }
0x10ba   :  { %4567 = vmatpush.bf16.msrb.mxu2 %v9799_v18  ;;  %4580 = vmatpush.bf16.msrb.mxu3 %v9800_v43  ;;  %v9810_v18 = vld [vmem:[#allocation31_spill] sm:$0xff]  ;;  %v9811_v43 = vld [vmem:[#allocation32_spill] sm:$0xff] }
0x10bd   :  { %4542 = vmatpush.bf16.msrb.mxu0 %v9801_v25  ;;  %4555 = vmatpush.bf16.msrb.mxu1 %v9802_v36  ;;  %v9812_v25 = vld [vmem:[#allocation33_spill] sm:$0xff]  ;;  %v9813_v36 = vld [vmem:[#allocation34_spill] sm:$0xff] }
0x10be   :  { %4568 = vmatpush.bf16.msrb.mxu2 %v9803_v7  ;;  %4581 = vmatpush.bf16.msrb.mxu3 %v9804_v31  ;;  %v9814_v7 = vld [vmem:[#allocation35_spill] sm:$0xff]  ;;  %v9815_v31 = vld [vmem:[#allocation36_spill] sm:$0xff] }
0x10c1   :  { %4543 = vmatpush.bf16.msrb.mxu0 %v9805_v47  ;;  %4556 = vmatpush.bf16.msrb.mxu1 %v9806_v57  ;;  %v9816_v47 = vld [vmem:[#allocation37_spill] sm:$0xff] }
0x10c2   :  { %4569 = vmatpush.bf16.msrb.mxu2 %v9807_v46  ;;  %4582 = vmatpush.bf16.msrb.mxu3 %v9808_v12  ;;  %v9817_v57 = vld [vmem:[#allocation41_spill] sm:$0xff]  ;;  %v9818_v12 = vld [vmem:[#allocation42_spill] sm:$0xff] }
0x10c3   :  { %v4302_v46 = vadd.f32 %v8931_v13, %v9817_v57 }
0x10c5   :  { %4544 = vmatpush.bf16.msrb.mxu0 %v9809_v28  ;;  %4557 = vmatpush.bf16.msrb.mxu1 %v9810_v18  ;;  %v4315_v28 = vadd.f32 %v8933_v21, %v9818_v12 }
0x10c6   :  { %4570 = vmatpush.bf16.msrb.mxu2 %v9811_v43  ;;  %4583 = vmatpush.bf16.msrb.mxu3 %v9812_v25 }
0x10c9   :  { %4545 = vmatpush.bf16.msrb.mxu0 %v9813_v36  ;;  %4558 = vmatpush.bf16.msrb.mxu1 %v9814_v7  ;;  %v9819_v36 = vld [vmem:[#allocation43_spill] sm:$0xff] }
0x10ca   :  { %4571 = vmatpush.bf16.msrb.mxu2 %v9815_v31  ;;  %4584 = vmatpush.bf16.msrb.mxu3 %v9816_v47  ;;  %v4328_v7 = vadd.f32 %v8939_v14, %v9819_v36  ;;  %v4341_v31 = vadd.f32 %v8941_v34, %v9738_v41 }
0x1108   :  { %v4354_v20 = vpop.f32.mrf.mxu0  ;;  %v4367_v18 = vpop.f32.mrf.mxu1 }
0x1109   :  { %v4355_v30 = vadd.f32 %v4354_v20, %v4302_v46  ;;  %v4368_v43 = vadd.f32 %v4367_v18, %v4315_v28 }
0x110b   :  { %v4397_v44 = vmul.f32 0.5, %v4355_v30  ;;  %v4398_v25 = vmul.f32 0.5, %v4368_v43 }
0x110d   :  { %6282 = vtanh.f32 %v4397_v44 }
0x110e   :  { %6284 = vtanh.f32 %v4398_v25 }
0x110f   :  { %v4380_v47 = vpop.f32.mrf.mxu2  ;;  %v4393_v61 = vpop.f32.mrf.mxu3 }
0x1110   :  { %v4381_v13 = vadd.f32 %v4380_v47, %v4328_v7  ;;  %v4394_v57 = vadd.f32 %v4393_v61, %v4341_v31  ;;  %v4356_v54 = vpop.f32.mrf.mxu0  ;;  %v4369_v21 = vpop.f32.mrf.mxu1 }
0x1112   :  { %6286 = vtanh.f32 %v4381_v13  ;;  %v4406_v12 = vmul.f32 0.5, %v4394_v57 }
0x1113   :  { %v6283_v20 = vpop.eup %6282 }
0x1114   :  { %v6285_v18 = vpop.eup %6284  ;;  %v4401_v30 = vmul.f32 0.5, %v6283_v20  ;;  %6288 = vtanh.f32 %v4406_v12 }
0x1115   :  { %v4402_v43 = vmul.f32 0.5, %v6285_v18 }
0x1116   :  { %v4403_v44 = vadd.f32 0.5, %v4401_v30 }
0x1117   :  { %v4404_v46 = vadd.f32 0.5, %v4402_v43  ;;  %v4382_v14 = vpop.f32.mrf.mxu2  ;;  %v4395_v28 = vpop.f32.mrf.mxu3 }
0x1118   :  { %v6287_v36 = vpop.eup %6286  ;;  %v9022_v34 = vpop.f32.mrf.mxu0  ;;  %v9822_v28 = vld [vmem:[#allocation19_spill] sm:$0xff] }
0x1119   :  { %v9024_v25 = vpop.f32.mrf.mxu1  ;;  %v4410_v61 = vmul.f32 %v4404_v46, %v8936_v15  ;;  %v4411_v54 = vmul.f32 %v6287_v36, %v4403_v44  ;;  %v9821_v46 = vld [vmem:[#allocation18_spill] sm:$0xff] }
0x111a   :  { %v6289_v7 = vpop.eup %6288 }
0x111b   :  { %v9027_v31 = vadd.f32 %v4411_v54, %v4410_v61  ;;  %v4408_v47 = vmul.f32 0.5, %v6289_v7  ;;  %v9832_v61 = vld [vmem:[#allocation26_spill] sm:$0xff]  ;;  %v9833_v54 = vld [vmem:[#allocation27_spill] sm:$0xff]  ;;  %v9834_v7 = vld [vmem:[#allocation28_spill] sm:$0xff] }
0x111d   :  { %6290 = vtanh.f32 %v9027_v31  ;;  %v4409_v20 = vadd.f32 0.5, %v4408_v47  ;;  %v9835_v47 = vld [vmem:[#allocation29_spill] sm:$0xff] }
0x111f   :  { %v9030_v57 = vpop.f32.mrf.mxu2  ;;  %v9032_v12 = vpop.f32.mrf.mxu3 }
0x1120   :  { %v4426_v13 = vpop.f32.mrf.mxu0 }
0x1121   :  { %v4439_v21 = vpop.f32.mrf.mxu1  ;;  %v9836_v13 = vld [vmem:[#allocation30_spill] sm:$0xff] }
0x1122   :  { %v9837_v21 = vld [vmem:[#allocation31_spill] sm:$0xff] }
0x1123   :  { %v6291_v18 = vpop.eup %6290 }
0x1124   :  { %v4414_v30 = vmul.f32 %v6291_v18, %v4409_v20  ;;  %v9838_v20 = vld [vmem:[#allocation32_spill] sm:$0xff]  ;;  %v9839_v18 = vld [vmem:[#allocation33_spill] sm:$0xff] }
0x1126   :  { %v4467_v43 = vpack.c.bf16 %v4414_v30, %v4414_v30  ;;  %v4795_v14 = vrot.slane %v4414_v30, 4  ;;  %v9840_v30 = vld [vmem:[#allocation34_spill] sm:$0xff] }
0x1127   :  { %v4452_v15 = vpop.f32.mrf.mxu2  ;;  %v4465_v36 = vpop.f32.mrf.mxu3 }
0x1128   :  { %v9035_v44 = vsel %vm4812_vm3, %v8944_v40, %v4795_v14  ;;  %4476 = vmatmul.bf16.vlgmr.msra.gmra.mxu0 %v4467_v43  ;;  %4489 = vmatmul.bf16.vlgmr.msra.gmra.mxu1 %v4467_v43  ;;  %v9820_v40 = vld [vmem:[#allocation39_spill] sm:$0xff]  ;;  %v9842_v14 = vld [vmem:[#allocation36_spill] sm:$0xff]  ;;  %v9843_v15 = vld [vmem:[#allocation37_spill] sm:$0xff] }
0x1129   :  { %4502 = vmatmul.bf16.vlgmr.msra.gmra.mxu2 %v4467_v43  ;;  %4515 = vmatmul.bf16.vlgmr.msra.gmra.mxu3 %v4467_v43  ;;  %v9841_v43 = vld [vmem:[#allocation35_spill] sm:$0xff]  ;;  %v9844_v36 = vld [vmem:[#allocation41_spill] sm:$0xff] }
0x112a   :  { %4591 = vmatpush.bf16.msra.mxu0 %v8426_v22  ;;  %4604 = vmatpush.bf16.msra.mxu1 %v8428_v16 }
0x112b   :  { %4617 = vmatpush.bf16.msra.mxu2 %v8430_v62  ;;  %4630 = vmatpush.bf16.msra.mxu3 %v8432_v37 }
0x112e   :  { %4592 = vmatpush.bf16.msra.mxu0 %v8440_v49  ;;  %4605 = vmatpush.bf16.msra.mxu1 %v8442_v56 }
0x112f   :  { %4618 = vmatpush.bf16.msra.mxu2 %v8446_v59  ;;  %4631 = vmatpush.bf16.msra.mxu3 %v9687_v32 }
0x1132   :  { %4593 = vmatpush.bf16.msra.mxu0 %v9688_v42  ;;  %4606 = vmatpush.bf16.msra.mxu1 %v9689_v51 }
0x1133   :  { %4619 = vmatpush.bf16.msra.mxu2 %v8458_v50  ;;  %4632 = vmatpush.bf16.msra.mxu3 %v9690_v23 }
0x1136   :  { %4594 = vmatpush.bf16.msra.mxu0 %v9691_v63  ;;  %4607 = vmatpush.bf16.msra.mxu1 %v9692_v3 }
0x1137   :  { %4620 = vmatpush.bf16.msra.mxu2 %v9693_v6  ;;  %4633 = vmatpush.bf16.msra.mxu3 %v9694_v0 }
0x1138   :  { %4546 = vmatmul.bf16.vlgmr.msrb.gmra.mxu0 %v9820_v40  ;;  %4559 = vmatmul.bf16.vlgmr.msrb.gmra.mxu1 %v9820_v40 }
0x1139   :  { %4572 = vmatmul.bf16.vlgmr.msrb.gmra.mxu2 %v9820_v40  ;;  %4585 = vmatmul.bf16.vlgmr.msrb.gmra.mxu3 %v9820_v40  ;;  %v4425_v40 = vadd.f32 %v9022_v34, %v9844_v36 }
0x113a   :  { %4595 = vmatpush.bf16.msra.mxu0 %v9695_v17  ;;  %4608 = vmatpush.bf16.msra.mxu1 %v9696_v45 }
0x113b   :  { %4621 = vmatpush.bf16.msra.mxu2 %v9697_v39  ;;  %4634 = vmatpush.bf16.msra.mxu3 %v9698_v53 }
0x113e   :  { %4596 = vmatpush.bf16.msra.mxu0 %v9699_v5  ;;  %4609 = vmatpush.bf16.msra.mxu1 %v9700_v29 }
0x113f   :  { %4622 = vmatpush.bf16.msra.mxu2 %v8498_v11  ;;  %4635 = vmatpush.bf16.msra.mxu3 %v8500_v1 }
0x1142   :  { %4597 = vmatpush.bf16.msra.mxu0 %v8504_v33  ;;  %4610 = vmatpush.bf16.msra.mxu1 %v8506_v27 }
0x1143   :  { %4623 = vmatpush.bf16.msra.mxu2 %v8510_v26  ;;  %4636 = vmatpush.bf16.msra.mxu3 %v8512_v48 }
0x1146   :  { %4598 = vmatpush.bf16.msra.mxu0 %v8516_v4  ;;  %4611 = vmatpush.bf16.msra.mxu1 %v8518_v35 }
0x1147   :  { %4624 = vmatpush.bf16.msra.mxu2 %v8522_v8  ;;  %4637 = vmatpush.bf16.msra.mxu3 %v8524_v2 }
0x114a   :  { %4662 = vmatpush.bf16.msrb.mxu0 %v8320_v55  ;;  %4675 = vmatpush.bf16.msrb.mxu1 %v8322_v19  ;;  %v9823_v55 = vld [vmem:[#allocation20_spill] sm:$0xff]  ;;  %v9824_v19 = vld [vmem:[#allocation21_spill] sm:$0xff] }
0x114b   :  { %4688 = vmatpush.bf16.msrb.mxu2 %v8324_v58  ;;  %4701 = vmatpush.bf16.msrb.mxu3 %v8327_v52  ;;  %v9825_v58 = vld [vmem:[#allocation48_spill] sm:$0xff]  ;;  %v9826_v52 = vld [vmem:[#allocation22_spill] sm:$0xff] }
0x114e   :  { %4663 = vmatpush.bf16.msrb.mxu0 %v8332_v38  ;;  %4676 = vmatpush.bf16.msrb.mxu1 %v8334_v10  ;;  %v9827_v38 = vld [vmem:[#allocation54_spill] sm:$0xff]  ;;  %v9828_v10 = vld [vmem:[#allocation23_spill] sm:$0xff] }
0x114f   :  { %4689 = vmatpush.bf16.msrb.mxu2 %v8336_v24  ;;  %4702 = vmatpush.bf16.msrb.mxu3 %v8339_v60  ;;  %v9829_v24 = vld [vmem:[#allocation24_spill] sm:$0xff]  ;;  %v9830_v60 = vld [vmem:[#allocation25_spill] sm:$0xff] }
0x1152   :  { %4664 = vmatpush.bf16.msrb.mxu0 %v8344_v9  ;;  %4677 = vmatpush.bf16.msrb.mxu1 %v9821_v46  ;;  %v9831_v9 = vld [vmem:[#allocation49_spill] sm:$0xff]  ;;  %v9845_v46 = vld [vmem:[#allocation42_spill] sm:$0xff] }
0x1153   :  { %4690 = vmatpush.bf16.msrb.mxu2 %v9822_v28  ;;  %4703 = vmatpush.bf16.msrb.mxu3 %v9823_v55  ;;  %v4438_v28 = vadd.f32 %v9024_v25, %v9845_v46 }
0x1156   :  { %4665 = vmatpush.bf16.msrb.mxu0 %v9824_v19  ;;  %4678 = vmatpush.bf16.msrb.mxu1 %v9825_v58 }
0x1157   :  { %4691 = vmatpush.bf16.msrb.mxu2 %v9826_v52  ;;  %4704 = vmatpush.bf16.msrb.mxu3 %v9827_v38 }
0x115a   :  { %4666 = vmatpush.bf16.msrb.mxu0 %v9828_v10  ;;  %4679 = vmatpush.bf16.msrb.mxu1 %v9829_v24  ;;  %v9846_v24 = vld [vmem:[#allocation43_spill] sm:$0xff] }
0x115b   :  { %4692 = vmatpush.bf16.msrb.mxu2 %v9830_v60  ;;  %4705 = vmatpush.bf16.msrb.mxu3 %v9831_v9  ;;  %v4451_v60 = vadd.f32 %v9030_v57, %v9846_v24  ;;  %v4464_v9 = vadd.f32 %v9032_v12, %v9738_v41 }
0x115e   :  { %4667 = vmatpush.bf16.msrb.mxu0 %v9832_v61  ;;  %4680 = vmatpush.bf16.msrb.mxu1 %v9833_v54 }
0x115f   :  { %4693 = vmatpush.bf16.msrb.mxu2 %v9834_v7  ;;  %4706 = vmatpush.bf16.msrb.mxu3 %v9835_v47 }
0x1162   :  { %4668 = vmatpush.bf16.msrb.mxu0 %v9836_v13  ;;  %4681 = vmatpush.bf16.msrb.mxu1 %v9837_v21 }
0x1163   :  { %4694 = vmatpush.bf16.msrb.mxu2 %v9838_v20  ;;  %4707 = vmatpush.bf16.msrb.mxu3 %v9839_v18 }
0x1166   :  { %4669 = vmatpush.bf16.msrb.mxu0 %v9840_v30  ;;  %4682 = vmatpush.bf16.msrb.mxu1 %v9841_v43 }
0x1167   :  { %4695 = vmatpush.bf16.msrb.mxu2 %v9842_v14  ;;  %4708 = vmatpush.bf16.msrb.mxu3 %v9843_v15 }
0x11a5   :  { %v4477_v55 = vpop.f32.mrf.mxu0  ;;  %v4490_v19 = vpop.f32.mrf.mxu1 }
0x11a6   :  { %v4478_v58 = vadd.f32 %v4477_v55, %v4425_v40  ;;  %v4491_v52 = vadd.f32 %v4490_v19, %v4438_v28 }
0x11a8   :  { %v4520_v38 = vmul.f32 0.5, %v4478_v58  ;;  %v4521_v10 = vmul.f32 0.5, %v4491_v52 }
0x11aa   :  { %6292 = vtanh.f32 %v4520_v38 }
0x11ab   :  { %6294 = vtanh.f32 %v4521_v10 }
0x11ac   :  { %v4503_v61 = vpop.f32.mrf.mxu2  ;;  %v4516_v54 = vpop.f32.mrf.mxu3 }
0x11ad   :  { %v4504_v34 = vadd.f32 %v4503_v61, %v4451_v60  ;;  %v4517_v7 = vadd.f32 %v4516_v54, %v4464_v9  ;;  %v4479_v47 = vpop.f32.mrf.mxu0  ;;  %v4492_v25 = vpop.f32.mrf.mxu1 }
0x11af   :  { %6296 = vtanh.f32 %v4504_v34  ;;  %v4529_v13 = vmul.f32 0.5, %v4517_v7 }
0x11b0   :  { %v6293_v21 = vpop.eup %6292 }
0x11b1   :  { %v6295_v20 = vpop.eup %6294  ;;  %v4524_v18 = vmul.f32 0.5, %v6293_v21  ;;  %6298 = vtanh.f32 %v4529_v13 }
0x11b2   :  { %v4525_v30 = vmul.f32 0.5, %v6295_v20 }
0x11b3   :  { %v4526_v43 = vadd.f32 0.5, %v4524_v18 }
0x11b4   :  { %v4527_v14 = vadd.f32 0.5, %v4525_v30  ;;  %v4505_v57 = vpop.f32.mrf.mxu2  ;;  %v4518_v15 = vpop.f32.mrf.mxu3 }
0x11b5   :  { %v6297_v40 = vpop.eup %6296  ;;  %v4547_v12 = vpop.f32.mrf.mxu0 }
0x11b6   :  { %v4560_v28 = vpop.f32.mrf.mxu1  ;;  %v4533_v55 = vmul.f32 %v4527_v14, %v9027_v31  ;;  %v4534_v19 = vmul.f32 %v6297_v40, %v4526_v43 }
0x11b7   :  { %v6299_v58 = vpop.eup %6298 }
0x11b8   :  { %v9114_v52 = vadd.f32 %v4534_v19, %v4533_v55  ;;  %v4531_v38 = vmul.f32 0.5, %v6299_v58 }
0x11ba   :  { %6300 = vtanh.f32 %v9114_v52  ;;  %v4532_v54 = vadd.f32 0.5, %v4531_v38  ;;  %v4835_v38 = vld [vmem:[%s9241_s13 + $0x78] sm:$0xff] }
0x11bc   :  { %v9117_v10 = vpop.f32.mrf.mxu2  ;;  %v9119_v60 = vpop.f32.mrf.mxu3 }
0x11bd   :  { %v4549_v9 = vpop.f32.mrf.mxu0 }
0x11be   :  { %v4562_v61 = vpop.f32.mrf.mxu1  ;;  %v4832_v9 = vld [vmem:[%s9241_s13 + $0x60] sm:$0xff] }
0x11bf   :  { %v4831_v61 = vld [vmem:[%s9241_s13 + $0x58] sm:$0xff] }
0x11c0   :  { %v6301_v34 = vpop.eup %6300 }
0x11c1   :  { %v4537_v7 = vmul.f32 %v6301_v34, %v4532_v54  ;;  %v4830_v54 = vld [vmem:[%s9241_s13 + $0x50] sm:$0xff]  ;;  %v4829_v34 = vld [vmem:[%s9241_s13 + $0x48] sm:$0xff] }
0x11c3   :  { %v4590_v47 = vpack.c.bf16 %v4537_v7, %v4537_v7  ;;  %v4798_v25 = vrot.slane %v4537_v7, 3  ;;  %v4828_v7 = vld [vmem:[%s9241_s13 + $0x40] sm:$0xff] }
0x11c4   :  { %v4575_v31 = vpop.f32.mrf.mxu2  ;;  %v4588_v13 = vpop.f32.mrf.mxu3 }
0x11c5   :  { %4599 = vmatmul.bf16.vlgmr.msra.gmra.mxu0 %v4590_v47  ;;  %4612 = vmatmul.bf16.vlgmr.msra.gmra.mxu1 %v4590_v47  ;;  %v9122_v21 = vsel %vm4814_vm4, %v9035_v44, %v4798_v25  ;;  %v4826_v25 = vld [vmem:[%s9241_s13 + $0x30] sm:$0xff]  ;;  %v4825_v31 = vld [vmem:[%s9241_s13 + $0x28] sm:$0xff]  ;;  %v4824_v13 = vld [vmem:[%s9241_s13 + $0x20] sm:$0xff] }
0x11c6   :  { %4625 = vmatmul.bf16.vlgmr.msra.gmra.mxu2 %v4590_v47  ;;  %4638 = vmatmul.bf16.vlgmr.msra.gmra.mxu3 %v4590_v47  ;;  %v4827_v47 = vld [vmem:[%s9241_s13 + $0x38] sm:$0xff] }
0x11c7   :  { %4715 = vmatpush.bf16.msra.mxu0 %v8426_v22  ;;  %4728 = vmatpush.bf16.msra.mxu1 %v8428_v16  ;;  %v9847_v22 = vld [vmem:[#allocation40_spill] sm:$0xff] }
0x11c8   :  { %4741 = vmatpush.bf16.msra.mxu2 %v8430_v62  ;;  %4754 = vmatpush.bf16.msra.mxu3 %v8432_v37  ;;  %v4661_v16 = vpack.c.bf16 %v9847_v22, %v9847_v22  ;;  %v4548_v62 = vadd.f32 %v4547_v12, %v9844_v36  ;;  %v4561_v37 = vadd.f32 %v4560_v28, %v9845_v46  ;;  %v4822_v22 = vld [vmem:[%s9241_s13 + $0x10] sm:$0xff] }
0x11cb   :  { %4716 = vmatpush.bf16.msra.mxu0 %v8440_v49  ;;  %4729 = vmatpush.bf16.msra.mxu1 %v8442_v56 }
0x11cc   :  { %4742 = vmatpush.bf16.msra.mxu2 %v8446_v59  ;;  %4755 = vmatpush.bf16.msra.mxu3 %v9687_v32 }
0x11cf   :  { %4717 = vmatpush.bf16.msra.mxu0 %v9688_v42  ;;  %4730 = vmatpush.bf16.msra.mxu1 %v9689_v51 }
0x11d0   :  { %4743 = vmatpush.bf16.msra.mxu2 %v8458_v50  ;;  %4756 = vmatpush.bf16.msra.mxu3 %v9690_v23 }
0x11d3   :  { %4718 = vmatpush.bf16.msra.mxu0 %v9691_v63  ;;  %4731 = vmatpush.bf16.msra.mxu1 %v9692_v3 }
0x11d4   :  { %4744 = vmatpush.bf16.msra.mxu2 %v9693_v6  ;;  %4757 = vmatpush.bf16.msra.mxu3 %v9694_v0 }
0x11d5   :  { %4670 = vmatmul.bf16.vlgmr.msrb.gmra.mxu0 %v4661_v16  ;;  %4683 = vmatmul.bf16.vlgmr.msrb.gmra.mxu1 %v4661_v16 }
0x11d6   :  { %4696 = vmatmul.bf16.vlgmr.msrb.gmra.mxu2 %v4661_v16  ;;  %4709 = vmatmul.bf16.vlgmr.msrb.gmra.mxu3 %v4661_v16  ;;  %v4821_v16 = vld [vmem:[%s9241_s13 + $0x8] sm:$0xff] }
0x11d7   :  { %4719 = vmatpush.bf16.msra.mxu0 %v9695_v17  ;;  %4732 = vmatpush.bf16.msra.mxu1 %v9696_v45 }
0x11d8   :  { %4745 = vmatpush.bf16.msra.mxu2 %v9697_v39  ;;  %4758 = vmatpush.bf16.msra.mxu3 %v9698_v53 }
0x11db   :  { %4720 = vmatpush.bf16.msra.mxu0 %v9699_v5  ;;  %4733 = vmatpush.bf16.msra.mxu1 %v9700_v29 }
0x11dc   :  { %4746 = vmatpush.bf16.msra.mxu2 %v8498_v11  ;;  %4759 = vmatpush.bf16.msra.mxu3 %v8500_v1 }
0x11df   :  { %4721 = vmatpush.bf16.msra.mxu0 %v8504_v33  ;;  %4734 = vmatpush.bf16.msra.mxu1 %v8506_v27  ;;  %v4574_v33 = vadd.f32 %v9117_v10, %v9846_v24  ;;  %v4587_v27 = vadd.f32 %v9119_v60, %v9738_v41  ;;  %v4834_v10 = vld [vmem:[%s9241_s13 + $0x70] sm:$0xff]  ;;  %v4833_v60 = vld [vmem:[%s9241_s13 + $0x68] sm:$0xff] }
0x11e0   :  { %4747 = vmatpush.bf16.msra.mxu2 %v8510_v26  ;;  %4760 = vmatpush.bf16.msra.mxu3 %v8512_v48 }
0x11e3   :  { %4722 = vmatpush.bf16.msra.mxu0 %v8516_v4  ;;  %4735 = vmatpush.bf16.msra.mxu1 %v8518_v35 }
0x11e4   :  { %4748 = vmatpush.bf16.msra.mxu2 %v8522_v8  ;;  %4761 = vmatpush.bf16.msra.mxu3 %v8524_v2 }
0x11e7   :  { %4840 = vmatpush.msrb.mxu0 %v4835_v38 }
0x11e9   :  { %4841 = vmatpush.msrb.mxu0 %v4834_v10 }
0x11eb   :  { %4842 = vmatpush.msrb.mxu0 %v4833_v60 }
0x11ed   :  { %4843 = vmatpush.msrb.mxu0 %v4832_v9 }
0x11ef   :  { %4844 = vmatpush.msrb.mxu0 %v4831_v61 }
0x11f1   :  { %4845 = vmatpush.msrb.mxu0 %v4830_v54 }
0x11f3   :  { %4846 = vmatpush.msrb.mxu0 %v4829_v34 }
0x11f5   :  { %4847 = vmatpush.msrb.mxu0 %v4828_v7 }
0x11f7   :  { %4848 = vmatpush.msrb.mxu0 %v4827_v47 }
0x11f9   :  { %4849 = vmatpush.msrb.mxu0 %v4826_v25 }
0x11fb   :  { %4850 = vmatpush.msrb.mxu0 %v4825_v31 }
0x11fd   :  { %4851 = vmatpush.msrb.mxu0 %v4824_v13 }
0x1242   :  { %v4600_v49 = vpop.f32.mrf.mxu0  ;;  %v4613_v56 = vpop.f32.mrf.mxu1 }
0x1243   :  { %v4601_v59 = vadd.f32 %v4600_v49, %v4548_v62  ;;  %v4614_v50 = vadd.f32 %v4613_v56, %v4561_v37  ;;  %v4820_v62 = vld [vmem:[%s9241_s13] sm:$0xff] }
0x1245   :  { %v4643_v1 = vmul.f32 0.5, %v4601_v59  ;;  %v4644_v11 = vmul.f32 0.5, %v4614_v50 }
0x1247   :  { %6302 = vtanh.f32 %v4643_v1 }
0x1248   :  { %6304 = vtanh.f32 %v4644_v11 }
0x1249   :  { %v4626_v26 = vpop.f32.mrf.mxu2  ;;  %v4639_v48 = vpop.f32.mrf.mxu3 }
0x124a   :  { %v4627_v4 = vadd.f32 %v4626_v26, %v4574_v33  ;;  %v4640_v35 = vadd.f32 %v4639_v48, %v4587_v27  ;;  %v4602_v8 = vpop.f32.mrf.mxu0  ;;  %v4615_v2 = vpop.f32.mrf.mxu1 }
0x124c   :  { %6306 = vtanh.f32 %v4627_v4  ;;  %v4652_v32 = vmul.f32 0.5, %v4640_v35 }
0x124d   :  { %v6303_v42 = vpop.eup %6302 }
0x124e   :  { %v6305_v51 = vpop.eup %6304  ;;  %v4647_v23 = vmul.f32 0.5, %v6303_v42  ;;  %6308 = vtanh.f32 %v4652_v32 }
0x124f   :  { %v4648_v63 = vmul.f32 0.5, %v6305_v51 }
0x1250   :  { %v4649_v3 = vadd.f32 0.5, %v4647_v23 }
0x1251   :  { %v4650_v6 = vadd.f32 0.5, %v4648_v63  ;;  %v4628_v0 = vpop.f32.mrf.mxu2  ;;  %v4641_v17 = vpop.f32.mrf.mxu3 }
0x1252   :  { %v6307_v45 = vpop.eup %6306  ;;  %v4671_v39 = vpop.f32.mrf.mxu0 }
0x1253   :  { %v4684_v53 = vpop.f32.mrf.mxu1  ;;  %v4656_v5 = vmul.f32 %v4650_v6, %v9114_v52  ;;  %v4657_v29 = vmul.f32 %v6307_v45, %v4649_v3  ;;  %v4672_v37 = vadd.f32 %v4671_v39, %v9844_v36 }
0x1254   :  { %v6309_v44 = vpop.eup %6308  ;;  %v4685_v49 = vadd.f32 %v4684_v53, %v9845_v46 }
0x1255   :  { %v9165_v20 = vadd.f32 %v4657_v29, %v4656_v5  ;;  %v4654_v18 = vmul.f32 0.5, %v6309_v44 }
0x1257   :  { %6310 = vtanh.f32 %v9165_v20  ;;  %v4655_v15 = vadd.f32 0.5, %v4654_v18 }
0x1259   :  { %v4697_v30 = vpop.f32.mrf.mxu2  ;;  %v4710_v43 = vpop.f32.mrf.mxu3 }
0x125a   :  { %v4673_v14 = vpop.f32.mrf.mxu0  ;;  %v4698_v27 = vadd.f32 %v4697_v30, %v9846_v24  ;;  %v4711_v26 = vadd.f32 %v4710_v43, %v9738_v41  ;;  %v6001_v43 = vld [vmem:[#allocation2] ss:$0 sm:$0xff] }
0x125b   :  { %v4686_v57 = vpop.f32.mrf.mxu1 }
0x125d   :  { %v6311_v40 = vpop.eup %6310 }
0x125e   :  { %v4660_v12 = vmul.f32 %v6311_v40, %v4655_v15 }
0x1260   :  { %v4714_v28 = vpack.c.bf16 %v4660_v12, %v4660_v12  ;;  %v4801_v55 = vrot.slane %v4660_v12, 2 }
0x1261   :  { %v4699_v19 = vpop.f32.mrf.mxu2  ;;  %v4712_v58 = vpop.f32.mrf.mxu3 }
0x1262   :  { %4723 = vmatmul.bf16.vlgmr.msra.gmra.mxu0 %v4714_v28  ;;  %4736 = vmatmul.bf16.vlgmr.msra.gmra.mxu1 %v4714_v28  ;;  %v9169_v52 = vsel %vm4816_vm5, %v9122_v21, %v4801_v55  ;;  %v4823_v21 = vld [vmem:[%s9241_s13 + $0x18] sm:$0xff] }
0x1263   :  { %4749 = vmatmul.bf16.vlgmr.msra.gmra.mxu2 %v4714_v28  ;;  %4762 = vmatmul.bf16.vlgmr.msra.gmra.mxu3 %v4714_v28 }
0x1264   :  { %4852 = vmatpush.msrb.mxu0 %v4823_v21 }
0x1266   :  { %4853 = vmatpush.msrb.mxu0 %v4822_v22 }
0x1268   :  { %4854 = vmatpush.msrb.mxu0 %v4821_v16 }
0x126a   :  { %4855 = vmatpush.msrb.mxu0 %v4820_v62 }
0x12df   :  { %v4724_v56 = vpop.f32.mrf.mxu0  ;;  %v4737_v59 = vpop.f32.mrf.mxu1 }
0x12e0   :  { %v4725_v50 = vadd.f32 %v4724_v56, %v4672_v37  ;;  %v4738_v1 = vadd.f32 %v4737_v59, %v4685_v49 }
0x12e2   :  { %v4767_v11 = vmul.f32 0.5, %v4725_v50  ;;  %v4768_v33 = vmul.f32 0.5, %v4738_v1 }
0x12e4   :  { %6312 = vtanh.f32 %v4767_v11 }
0x12e5   :  { %6314 = vtanh.f32 %v4768_v33 }
0x12e6   :  { %v4750_v48 = vpop.f32.mrf.mxu2  ;;  %v4763_v4 = vpop.f32.mrf.mxu3 }
0x12e7   :  { %v4751_v35 = vadd.f32 %v4750_v48, %v4698_v27  ;;  %v4764_v8 = vadd.f32 %v4763_v4, %v4711_v26  ;;  %v4726_v36 = vpop.f32.mrf.mxu0  ;;  %v4739_v2 = vpop.f32.mrf.mxu1 }
0x12e9   :  { %6316 = vtanh.f32 %v4751_v35  ;;  %v4776_v46 = vmul.f32 0.5, %v4764_v8 }
0x12ea   :  { %v6313_v32 = vpop.eup %6312 }
0x12eb   :  { %v6315_v42 = vpop.eup %6314  ;;  %v4771_v51 = vmul.f32 0.5, %v6313_v32  ;;  %6318 = vtanh.f32 %v4776_v46 }
0x12ec   :  { %v4772_v23 = vmul.f32 0.5, %v6315_v42 }
0x12ed   :  { %v4773_v63 = vadd.f32 0.5, %v4771_v51 }
0x12ee   :  { %v4774_v3 = vadd.f32 0.5, %v4772_v23  ;;  %v4752_v6 = vpop.f32.mrf.mxu2  ;;  %v4765_v24 = vpop.f32.mrf.mxu3 }
0x12ef   :  { %v6317_v0 = vpop.eup %6316 }
0x12f0   :  { %v4780_v41 = vmul.f32 %v4774_v3, %v9165_v20  ;;  %v4781_v17 = vmul.f32 %v6317_v0, %v4773_v63 }
0x12f1   :  { %v6319_v45 = vpop.eup %6318 }
0x12f2   :  { %v4782_v39 = vadd.f32 %v4781_v17, %v4780_v41  ;;  %v4778_v53 = vmul.f32 0.5, %v6319_v45 }
0x12f4   :  { %6320 = vtanh.f32 %v4782_v39  ;;  %v4779_v5 = vadd.f32 0.5, %v4778_v53 }
0x12fa   :  { %v6321_v29 = vpop.eup %6320 }
0x12fb   :  { %v4784_v44 = vmul.f32 %v6321_v29, %v4779_v5 }
0x12fd   :  { %v4804_v18 = vrot.slane %v4784_v44, 1 }
0x12ff   :  { %v4819_v30 = vsel %vm4818_vm6, %v9169_v52, %v4804_v18 }
0x1300   :  { %4856 = vmatmul.f32.vlgmr.msrb.gmra.mxu0 %v4819_v30 }
0x137d   :  { %v4857_v14 = vpop.f32.mrf.mxu0 }
0x137e   :  { %v4858_v57 = vadd.f32 %v6001_v43, %v4857_v14 }
0x1380   :  { %4861 = vst.msk [vmem:[%s9243_s15] sm:$0xff] %vm4860_vm7, %v4858_v57 }
0x1381   :  { %4866 = vsyncpa [#allocation4], 1 }
0x1382   :  { %4867 = vsyncpa [#allocation6], 1 }
0x1383   :  { %4868 = vsyncpa [#allocation9], 1 }
0x1384   :  { %4869 = vsyncpa [#allocation12], 1 }

</bundles_post_ra>
